<compile_context>
chip_gen: v5e
topology: v5e:2x2
jax: 0.10.0
libtpu: 0.0.40
codegen_flags: <defaults>
</compile_context>

<pallas_src>
import functools

import jax
import jax.numpy as jnp
from jax.experimental import pallas as pl
from jax.experimental.pallas import tpu as pltpu

LANES = 128                  # pad every matmul N dim to one full lane width
MXU_DTYPE = jnp.bfloat16     # MXU operand dtype (accumulate + epilogue stay f32)
BN_EPS = 1e-5

# Scaled-down AlexNet features: (cout, kernel, stride, pad, maxpool(3,2) after).
# TODO(synk): torchvision's pretrained AlexNet weights / 224x224 geometry cannot be
# loaded here; this is a structurally identical scaled-down stack with synthetic
# deterministic weights.
CONV_CFG = (
    (16, 11, 4, 2, True),
    (32, 5, 1, 2, True),
    (48, 3, 1, 1, False),
    (32, 3, 1, 1, False),
    (32, 3, 1, 1, True),
)
HIDDEN_DIM = 64       # stands in for 4096
EMBEDDING_DIM = 32    # embedding_dim
FLAT_DIM = 32         # stands in for 9216 (= C5 * 1 * 1 at this input size)


# ------------------------------- Pallas kernels ------------------------------- #
def _conv_relu_pool_kernel(x_ref, w_ref, b_ref, o_ref, acc_ref, *,
                           taps, r_conv, r_out, pool_offs):
    """Fused conv (+bias +ReLU) (+3x3 stride-1 maxpool) for one image.

    x_ref:   [1, HW_in, Cin]  flattened, padded NHWC input rows (f32)
    w_ref:   [T, Cin, 128]    one (Cin x 128) weight tile per conv tap (bf16)
    b_ref:   [1, 128]         bias, zero-padded past Cout (f32)
    o_ref:   [1, r_out, 128]  lane-dense output rows (f32)
    acc_ref: [r_conv, 128]    f32 accumulator scratch (VMEM)
    """
    for t, off in enumerate(taps):
        xs = x_ref[0, off:off + r_conv, :].astype(w_ref.dtype)
        contrib = jnp.dot(xs, w_ref[t], preferred_element_type=jnp.float32)
        if t == 0:
            acc_ref[...] = contrib
        else:
            acc_ref[...] += contrib
    # bias + ReLU epilogue in f32
    acc_ref[...] = jnp.maximum(acc_ref[...] + b_ref[...], 0.0)
    if pool_offs is None:
        o_ref[0, :, :] = acc_ref[0:r_out, :]
    else:
        # fused MaxPool2d(3, 2) as a 3x3 *stride-1* max over the in-VMEM conv rows;
        # the stride-2 subsample is a free slice in the wrapper.
        res = acc_ref[0:r_out, :]
        for d in pool_offs:
            if d:
                res = jnp.maximum(res, acc_ref[d:d + r_out, :])
        o_ref[0, :, :] = res


def _head_kernel(x_ref, w1_ref, b1_ref, g_ref, be_ref, w2_ref, b2_ref, o_ref, *,
                 eps, batch):
    """feature_proj fused: fc1 -> ReLU -> BatchNorm1d (training batch stats) -> fc2."""
    x = x_ref[...].astype(w1_ref.dtype)
    h = jnp.dot(x, w1_ref[...], preferred_element_type=jnp.float32) + b1_ref[...]
    h = jnp.maximum(h, 0.0)
    inv_b = 1.0 / batch
    mean = jnp.sum(h, axis=0, keepdims=True) * inv_b
    var = jnp.sum(h * h, axis=0, keepdims=True) * inv_b - mean * mean  # biased var
    var = jnp.maximum(var, 0.0)                                        # one-pass guard
    hn = (h - mean) * jax.lax.rsqrt(var + eps) * g_ref[...] + be_ref[...]
    y = jnp.dot(hn.astype(w2_ref.dtype), w2_ref[...],
                preferred_element_type=jnp.float32) + b2_ref[...]
    o_ref[...] = y


# ------------------------------ kernel wrappers -------------------------------- #
def conv_block(x, w_taps, b, *, k, stride, pad, pooled, cout):
    """One features layer: Conv2d(k, stride, pad) + ReLU (+ MaxPool2d(3, 2))."""
    n, h, w_dim, c = x.shape
    hp, wp = h + 2 * pad, w_dim + 2 * pad
    oh, ow = (hp - k) // stride + 1, (wp - k) // stride + 1
    ks = -(-k // stride)                        # super-kernel size after s2d
    ws = ow + ks - 1                            # padded (super-)width
    hs = oh + ks + (1 if pooled else 0)         # padded (super-)height (+ slack)

    # conv padding + extra bottom/right zero padding for in-kernel slack
    x = jnp.pad(x, ((0, 0),
                    (pad, stride * hs - h - pad),
                    (pad, stride * ws - w_dim - pad),
                    (0, 0)))
    if stride > 1:  # fold the stride into the channel dim (space-to-depth)
        x = x.reshape(n, hs, stride, ws, stride, c)
        x = x.transpose(0, 1, 3, 2, 4, 5).reshape(n, hs, ws, stride * stride * c)
    cin = x.shape[-1]
    x = x.reshape(n, hs * ws, cin)              # flat rows: tap reads are contiguous

    r_conv = (oh + (1 if pooled else 0)) * ws
    r_out = ((oh - 2) if pooled else oh) * ws
    taps = tuple(a * ws + bb for a in range(ks) for bb in range(ks))
    pool_offs = (tuple(di * ws + dj for di in range(3) for dj in range(3))
                 if pooled else None)

    flops = 2 * n * len(taps) * r_conv * cin * LANES
    bytes_accessed = x.size * 4 + w_taps.size * 2 + n * r_out * LANES * 4

    out = pl.pallas_call(
        functools.partial(_conv_relu_pool_kernel, taps=taps, r_conv=r_conv,
                          r_out=r_out, pool_offs=pool_offs),
        grid=(n,),
        in_specs=[
            pl.BlockSpec((1, hs * ws, cin), lambda i: (i, 0, 0)),
            pl.BlockSpec((len(taps), cin, LANES), lambda i: (0, 0, 0)),
            pl.BlockSpec((1, LANES), lambda i: (0, 0)),
        ],
        out_specs=pl.BlockSpec((1, r_out, LANES), lambda i: (i, 0, 0)),
        out_shape=jax.ShapeDtypeStruct((n, r_out, LANES), jnp.float32),
        scratch_shapes=[pltpu.VMEM((r_conv, LANES), jnp.float32)],
        compiler_params=pltpu.CompilerParams(dimension_semantics=("parallel",)),
        cost_estimate=pl.CostEstimate(flops=flops, transcendentals=0,
                                      bytes_accessed=bytes_accessed),
    )(x, w_taps, b)

    if pooled:  # stride-2 subsample of the stride-1 pooled rows + drop pad lanes
        out = out.reshape(n, oh - 2, ws, LANES)[:, ::2, 0:ow - 2:2, :cout]
    else:
        out = out.reshape(n, oh, ws, LANES)[:, :, :ow, :cout]
    return out


def feature_proj_pallas(x, params):
    bsz, _ = x.shape
    vspec = pl.BlockSpec(memory_space=pltpu.MemorySpace.VMEM)
    out = pl.pallas_call(
        functools.partial(_head_kernel, eps=BN_EPS, batch=bsz),
        out_shape=jax.ShapeDtypeStruct((bsz, LANES), jnp.float32),
        in_specs=[vspec] * 7,
        out_specs=vspec,
    )(x, params["fc1_w"], params["fc1_b"], params["bn_g"], params["bn_b"],
      params["fc2_w"], params["fc2_b"])
    return out[:, :EMBEDDING_DIM]


# --------------------------------- parameters ---------------------------------- #
def _fold_conv_weight(w, k, stride, cout):
    """[k, k, cin, cout] -> kernel-ready taps [T, cin_eff, 128] (bf16, stride folded)."""
    ks = -(-k // stride)
    if stride > 1:
        cin = w.shape[2]
        w = jnp.pad(w, ((0, ks * stride - k), (0, ks * stride - k), (0, 0), (0, 0)))
        w = w.reshape(ks, stride, ks, stride, cin, cout)
        w = w.transpose(0, 2, 1, 3, 4, 5).reshape(ks, ks, stride * stride * cin, cout)
    w = w.reshape(ks * ks, w.shape[2], cout)
    w = jnp.pad(w, ((0, 0), (0, 0), (0, LANES - cout)))
    return w.astype(MXU_DTYPE)


def _pad_vec(v):
    return jnp.pad(v, (0, LANES - v.shape[0])).reshape(1, LANES).astype(jnp.float32)


def init_params(key, in_channels=3):
    # TODO(synk): pretrained AlexNet conv weights cannot be loaded; synthesize
    # deterministic weights.  Linear init mirrors init_weights: N(0, 0.02), bias 0.
    params = {"convs": []}
    cin = in_channels
    for cout, k, stride, _p, _pooled in CONV_CFG:
        key, kw_ = jax.random.split(key)
        w = 0.02 * jax.random.normal(kw_, (k, k, cin, cout), jnp.float32)
        b = jnp.zeros((cout,), jnp.float32)
        params["convs"].append((_fold_conv_weight(w, k, stride, cout), _pad_vec(b)))
        cin = cout
    key, k1, k2 = jax.random.split(key, 3)
    fc1_w = 0.02 * jax.random.normal(k1, (FLAT_DIM, HIDDEN_DIM), jnp.float32)
    fc2_w = 0.02 * jax.random.normal(k2, (HIDDEN_DIM, EMBEDDING_DIM), jnp.float32)
    params["fc1_w"] = jnp.pad(fc1_w, ((0, 0), (0, LANES - HIDDEN_DIM))).astype(MXU_DTYPE)
    params["fc1_b"] = _pad_vec(jnp.zeros((HIDDEN_DIM,), jnp.float32))
    params["bn_g"] = _pad_vec(jnp.ones((HIDDEN_DIM,), jnp.float32))
    params["bn_b"] = _pad_vec(jnp.zeros((HIDDEN_DIM,), jnp.float32))
    params["fc2_w"] = jnp.pad(fc2_w, ((0, LANES - HIDDEN_DIM),
                                      (0, LANES - EMBEDDING_DIM))).astype(MXU_DTYPE)
    params["fc2_b"] = _pad_vec(jnp.zeros((EMBEDDING_DIM,), jnp.float32))
    return params


# ----------------------------------- forward ----------------------------------- #
def image_features_forward(params, x_nchw):
    # PyTorch NCHW input -> NHWC for the kernels.
    x = jnp.transpose(x_nchw, (0, 2, 3, 1)).astype(jnp.float32)
    # self.features: conv+ReLU (+ MaxPool2d(3, 2) at AlexNet positions), all fused.
    for (cout, k, stride, pad, pooled), (w_taps, b) in zip(CONV_CFG, params["convs"]):
        x = conv_block(x, w_taps, b, k=k, stride=stride, pad=pad,
                       pooled=pooled, cout=cout)
    n = x.shape[0]
    # x.view(x.size(0), -1): the final spatial extent is 1x1 so NCHW / NHWC flatten
    # orders coincide; at full AlexNet scale the NCHW permutation would be folded
    # into fc1_w's rows at init instead of transposing the activation.
    x = x.reshape(n, -1)
    # self.feature_proj: Linear -> ReLU -> BatchNorm1d (training-mode stats) -> Linear
    return feature_proj_pallas(x, params)


if __name__ == "__main__":
    key = jax.random.PRNGKey(0)
    key, kx = jax.random.split(key)
    # NCHW input consistent with the scaled-down conv stack: (2, 3, 63, 63)
    x = jax.random.normal(kx, (2, 3, 63, 63), jnp.float32)
    params = init_params(key)

    out = jax.jit(image_features_forward)(params, x)
    out = jax.block_until_ready(out)
    assert out.shape == (2, EMBEDDING_DIM), out.shape
    assert bool(jnp.all(jnp.isfinite(out)))
    print("KERNEL_OK")
</pallas_src>

<mosaic_0001>
module attributes {stable_mosaic.version = 11 : i64} {
  func.func @_conv_relu_pool_kernel(%arg0: i32, %arg1: memref<1x323x48xf32, #tpu.memory_space<vmem>>, %arg2: memref<9x48x128xbf16, #tpu.memory_space<vmem>>, %arg3: memref<1x128xf32, #tpu.memory_space<vmem>>, %arg4: memref<1x221x128xf32, #tpu.memory_space<vmem>>, %arg5: memref<272x128xf32, #tpu.memory_space<vmem>>) attributes {dimension_semantics = [#tpu.dimension_semantics<parallel>], iteration_bounds = array<i64: 2>, scalar_prefetch = 0 : i64, scratch_operands = 1 : i64, tpu.core_type = #tpu.core_type<tc>, window_params = [{transform_indices = @transform_0, window_bounds = array<i64: 1, 323, 48>}, {pipeline_mode = #tpu.pipeline_mode<synchronous>, transform_indices = @transform_1, window_bounds = array<i64: 9, 48, 128>}, {pipeline_mode = #tpu.pipeline_mode<synchronous>, transform_indices = @transform_2, window_bounds = array<i64: 1, 128>}, {transform_indices = @transform_3, window_bounds = array<i64: 1, 221, 128>}]} {
    %c0 = arith.constant 0 : index
    %c0_0 = arith.constant 0 : index
    %c0_1 = arith.constant 0 : index
    %0 = vector.load %arg1[%c0, %c0_0, %c0_1] : memref<1x323x48xf32, #tpu.memory_space<vmem>>, vector<1x272x48xf32>
    %1 = vector.shape_cast %0 : vector<1x272x48xf32> to vector<272x48xf32>
    %2 = arith.truncf %1 : vector<272x48xf32> to vector<272x48xbf16>
    %c0_2 = arith.constant 0 : index
    %c0_3 = arith.constant 0 : index
    %c0_4 = arith.constant 0 : index
    %3 = vector.load %arg2[%c0_2, %c0_3, %c0_4] : memref<9x48x128xbf16, #tpu.memory_space<vmem>>, vector<1x48x128xbf16>
    %4 = vector.shape_cast %3 : vector<1x48x128xbf16> to vector<48x128xbf16>
    %cst = arith.constant dense<0.000000e+00> : vector<272x128xf32>
    %5 = tpu.matmul %2, %4, %cst {dimension_numbers = #tpu.dot_dimension_numbers<[1], [0], [0], [1], [0, 0, 1, 1], [], []>} : vector<272x48xbf16>, vector<48x128xbf16>, vector<272x128xf32> -> vector<272x128xf32>
    %c0_5 = arith.constant 0 : index
    %c0_6 = arith.constant 0 : index
    %6 = vector.load %arg5[%c0_5, %c0_6] : memref<272x128xf32, #tpu.memory_space<vmem>>, vector<272x128xf32>
    tpu.vector_store %arg5[%c0_5, %c0_6], %5 {strides = array<i32>} : memref<272x128xf32, #tpu.memory_space<vmem>>, vector<272x128xf32>,
    %c0_7 = arith.constant 0 : index
    %c1 = arith.constant 1 : index
    %c0_8 = arith.constant 0 : index
    %7 = vector.load %arg1[%c0_7, %c1, %c0_8] : memref<1x323x48xf32, #tpu.memory_space<vmem>>, vector<1x272x48xf32>
    %8 = vector.shape_cast %7 : vector<1x272x48xf32> to vector<272x48xf32>
    %9 = arith.truncf %8 : vector<272x48xf32> to vector<272x48xbf16>
    %c1_9 = arith.constant 1 : index
    %c0_10 = arith.constant 0 : index
    %c0_11 = arith.constant 0 : index
    %10 = vector.load %arg2[%c1_9, %c0_10, %c0_11] : memref<9x48x128xbf16, #tpu.memory_space<vmem>>, vector<1x48x128xbf16>
    %11 = vector.shape_cast %10 : vector<1x48x128xbf16> to vector<48x128xbf16>
    %cst_12 = arith.constant dense<0.000000e+00> : vector<272x128xf32>
    %12 = tpu.matmul %9, %11, %cst_12 {dimension_numbers = #tpu.dot_dimension_numbers<[1], [0], [0], [1], [0, 0, 1, 1], [], []>} : vector<272x48xbf16>, vector<48x128xbf16>, vector<272x128xf32> -> vector<272x128xf32>
    %c0_13 = arith.constant 0 : index
    %c0_14 = arith.constant 0 : index
    %13 = vector.load %arg5[%c0_13, %c0_14] : memref<272x128xf32, #tpu.memory_space<vmem>>, vector<272x128xf32>
    %14 = arith.addf %13, %12 : vector<272x128xf32>
    %c0_15 = arith.constant 0 : index
    %c0_16 = arith.constant 0 : index
    %15 = vector.load %arg5[%c0_15, %c0_16] : memref<272x128xf32, #tpu.memory_space<vmem>>, vector<272x128xf32>
    tpu.vector_store %arg5[%c0_15, %c0_16], %14 {strides = array<i32>} : memref<272x128xf32, #tpu.memory_space<vmem>>, vector<272x128xf32>,
    %c0_17 = arith.constant 0 : index
    %c2 = arith.constant 2 : index
    %c0_18 = arith.constant 0 : index
    %16 = vector.load %arg1[%c0_17, %c2, %c0_18] : memref<1x323x48xf32, #tpu.memory_space<vmem>>, vector<1x272x48xf32>
    %17 = vector.shape_cast %16 : vector<1x272x48xf32> to vector<272x48xf32>
    %18 = arith.truncf %17 : vector<272x48xf32> to vector<272x48xbf16>
    %c2_19 = arith.constant 2 : index
    %c0_20 = arith.constant 0 : index
    %c0_21 = arith.constant 0 : index
    %19 = vector.load %arg2[%c2_19, %c0_20, %c0_21] : memref<9x48x128xbf16, #tpu.memory_space<vmem>>, vector<1x48x128xbf16>
    %20 = vector.shape_cast %19 : vector<1x48x128xbf16> to vector<48x128xbf16>
    %cst_22 = arith.constant dense<0.000000e+00> : vector<272x128xf32>
    %21 = tpu.matmul %18, %20, %cst_22 {dimension_numbers = #tpu.dot_dimension_numbers<[1], [0], [0], [1], [0, 0, 1, 1], [], []>} : vector<272x48xbf16>, vector<48x128xbf16>, vector<272x128xf32> -> vector<272x128xf32>
    %c0_23 = arith.constant 0 : index
    %c0_24 = arith.constant 0 : index
    %22 = vector.load %arg5[%c0_23, %c0_24] : memref<272x128xf32, #tpu.memory_space<vmem>>, vector<272x128xf32>
    %23 = arith.addf %22, %21 : vector<272x128xf32>
    %c0_25 = arith.constant 0 : index
    %c0_26 = arith.constant 0 : index
    %24 = vector.load %arg5[%c0_25, %c0_26] : memref<272x128xf32, #tpu.memory_space<vmem>>, vector<272x128xf32>
    tpu.vector_store %arg5[%c0_25, %c0_26], %23 {strides = array<i32>} : memref<272x128xf32, #tpu.memory_space<vmem>>, vector<272x128xf32>,
    %c0_27 = arith.constant 0 : index
    %c17 = arith.constant 17 : index
    %c0_28 = arith.constant 0 : index
    %25 = vector.load %arg1[%c0_27, %c17, %c0_28] : memref<1x323x48xf32, #tpu.memory_space<vmem>>, vector<1x272x48xf32>
    %26 = vector.shape_cast %25 : vector<1x272x48xf32> to vector<272x48xf32>
    %27 = arith.truncf %26 : vector<272x48xf32> to vector<272x48xbf16>
    %c3 = arith.constant 3 : index
    %c0_29 = arith.constant 0 : index
    %c0_30 = arith.constant 0 : index
    %28 = vector.load %arg2[%c3, %c0_29, %c0_30] : memref<9x48x128xbf16, #tpu.memory_space<vmem>>, vector<1x48x128xbf16>
    %29 = vector.shape_cast %28 : vector<1x48x128xbf16> to vector<48x128xbf16>
    %cst_31 = arith.constant dense<0.000000e+00> : vector<272x128xf32>
    %30 = tpu.matmul %27, %29, %cst_31 {dimension_numbers = #tpu.dot_dimension_numbers<[1], [0], [0], [1], [0, 0, 1, 1], [], []>} : vector<272x48xbf16>, vector<48x128xbf16>, vector<272x128xf32> -> vector<272x128xf32>
    %c0_32 = arith.constant 0 : index
    %c0_33 = arith.constant 0 : index
    %31 = vector.load %arg5[%c0_32, %c0_33] : memref<272x128xf32, #tpu.memory_space<vmem>>, vector<272x128xf32>
    %32 = arith.addf %31, %30 : vector<272x128xf32>
    %c0_34 = arith.constant 0 : index
    %c0_35 = arith.constant 0 : index
    %33 = vector.load %arg5[%c0_34, %c0_35] : memref<272x128xf32, #tpu.memory_space<vmem>>, vector<272x128xf32>
    tpu.vector_store %arg5[%c0_34, %c0_35], %32 {strides = array<i32>} : memref<272x128xf32, #tpu.memory_space<vmem>>, vector<272x128xf32>,
    %c0_36 = arith.constant 0 : index
    %c18 = arith.constant 18 : index
    %c0_37 = arith.constant 0 : index
    %34 = vector.load %arg1[%c0_36, %c18, %c0_37] : memref<1x323x48xf32, #tpu.memory_space<vmem>>, vector<1x272x48xf32>
    %35 = vector.shape_cast %34 : vector<1x272x48xf32> to vector<272x48xf32>
    %36 = arith.truncf %35 : vector<272x48xf32> to vector<272x48xbf16>
    %c4 = arith.constant 4 : index
    %c0_38 = arith.constant 0 : index
    %c0_39 = arith.constant 0 : index
    %37 = vector.load %arg2[%c4, %c0_38, %c0_39] : memref<9x48x128xbf16, #tpu.memory_space<vmem>>, vector<1x48x128xbf16>
    %38 = vector.shape_cast %37 : vector<1x48x128xbf16> to vector<48x128xbf16>
    %cst_40 = arith.constant dense<0.000000e+00> : vector<272x128xf32>
    %39 = tpu.matmul %36, %38, %cst_40 {dimension_numbers = #tpu.dot_dimension_numbers<[1], [0], [0], [1], [0, 0, 1, 1], [], []>} : vector<272x48xbf16>, vector<48x128xbf16>, vector<272x128xf32> -> vector<272x128xf32>
    %c0_41 = arith.constant 0 : index
    %c0_42 = arith.constant 0 : index
    %40 = vector.load %arg5[%c0_41, %c0_42] : memref<272x128xf32, #tpu.memory_space<vmem>>, vector<272x128xf32>
    %41 = arith.addf %40, %39 : vector<272x128xf32>
    %c0_43 = arith.constant 0 : index
    %c0_44 = arith.constant 0 : index
    %42 = vector.load %arg5[%c0_43, %c0_44] : memref<272x128xf32, #tpu.memory_space<vmem>>, vector<272x128xf32>
    tpu.vector_store %arg5[%c0_43, %c0_44], %41 {strides = array<i32>} : memref<272x128xf32, #tpu.memory_space<vmem>>, vector<272x128xf32>,
    %c0_45 = arith.constant 0 : index
    %c19 = arith.constant 19 : index
    %c0_46 = arith.constant 0 : index
    %43 = vector.load %arg1[%c0_45, %c19, %c0_46] : memref<1x323x48xf32, #tpu.memory_space<vmem>>, vector<1x272x48xf32>
    %44 = vector.shape_cast %43 : vector<1x272x48xf32> to vector<272x48xf32>
    %45 = arith.truncf %44 : vector<272x48xf32> to vector<272x48xbf16>
    %c5 = arith.constant 5 : index
    %c0_47 = arith.constant 0 : index
    %c0_48 = arith.constant 0 : index
    %46 = vector.load %arg2[%c5, %c0_47, %c0_48] : memref<9x48x128xbf16, #tpu.memory_space<vmem>>, vector<1x48x128xbf16>
    %47 = vector.shape_cast %46 : vector<1x48x128xbf16> to vector<48x128xbf16>
    %cst_49 = arith.constant dense<0.000000e+00> : vector<272x128xf32>
    %48 = tpu.matmul %45, %47, %cst_49 {dimension_numbers = #tpu.dot_dimension_numbers<[1], [0], [0], [1], [0, 0, 1, 1], [], []>} : vector<272x48xbf16>, vector<48x128xbf16>, vector<272x128xf32> -> vector<272x128xf32>
    %c0_50 = arith.constant 0 : index
    %c0_51 = arith.constant 0 : index
    %49 = vector.load %arg5[%c0_50, %c0_51] : memref<272x128xf32, #tpu.memory_space<vmem>>, vector<272x128xf32>
    %50 = arith.addf %49, %48 : vector<272x128xf32>
    %c0_52 = arith.constant 0 : index
    %c0_53 = arith.constant 0 : index
    %51 = vector.load %arg5[%c0_52, %c0_53] : memref<272x128xf32, #tpu.memory_space<vmem>>, vector<272x128xf32>
    tpu.vector_store %arg5[%c0_52, %c0_53], %50 {strides = array<i32>} : memref<272x128xf32, #tpu.memory_space<vmem>>, vector<272x128xf32>,
    %c0_54 = arith.constant 0 : index
    %c34 = arith.constant 34 : index
    %c0_55 = arith.constant 0 : index
    %52 = vector.load %arg1[%c0_54, %c34, %c0_55] : memref<1x323x48xf32, #tpu.memory_space<vmem>>, vector<1x272x48xf32>
    %53 = vector.shape_cast %52 : vector<1x272x48xf32> to vector<272x48xf32>
    %54 = arith.truncf %53 : vector<272x48xf32> to vector<272x48xbf16>
    %c6 = arith.constant 6 : index
    %c0_56 = arith.constant 0 : index
    %c0_57 = arith.constant 0 : index
    %55 = vector.load %arg2[%c6, %c0_56, %c0_57] : memref<9x48x128xbf16, #tpu.memory_space<vmem>>, vector<1x48x128xbf16>
    %56 = vector.shape_cast %55 : vector<1x48x128xbf16> to vector<48x128xbf16>
    %cst_58 = arith.constant dense<0.000000e+00> : vector<272x128xf32>
    %57 = tpu.matmul %54, %56, %cst_58 {dimension_numbers = #tpu.dot_dimension_numbers<[1], [0], [0], [1], [0, 0, 1, 1], [], []>} : vector<272x48xbf16>, vector<48x128xbf16>, vector<272x128xf32> -> vector<272x128xf32>
    %c0_59 = arith.constant 0 : index
    %c0_60 = arith.constant 0 : index
    %58 = vector.load %arg5[%c0_59, %c0_60] : memref<272x128xf32, #tpu.memory_space<vmem>>, vector<272x128xf32>
    %59 = arith.addf %58, %57 : vector<272x128xf32>
    %c0_61 = arith.constant 0 : index
    %c0_62 = arith.constant 0 : index
    %60 = vector.load %arg5[%c0_61, %c0_62] : memref<272x128xf32, #tpu.memory_space<vmem>>, vector<272x128xf32>
    tpu.vector_store %arg5[%c0_61, %c0_62], %59 {strides = array<i32>} : memref<272x128xf32, #tpu.memory_space<vmem>>, vector<272x128xf32>,
    %c0_63 = arith.constant 0 : index
    %c35 = arith.constant 35 : index
    %c0_64 = arith.constant 0 : index
    %61 = vector.load %arg1[%c0_63, %c35, %c0_64] : memref<1x323x48xf32, #tpu.memory_space<vmem>>, vector<1x272x48xf32>
    %62 = vector.shape_cast %61 : vector<1x272x48xf32> to vector<272x48xf32>
    %63 = arith.truncf %62 : vector<272x48xf32> to vector<272x48xbf16>
    %c7 = arith.constant 7 : index
    %c0_65 = arith.constant 0 : index
    %c0_66 = arith.constant 0 : index
    %64 = vector.load %arg2[%c7, %c0_65, %c0_66] : memref<9x48x128xbf16, #tpu.memory_space<vmem>>, vector<1x48x128xbf16>
    %65 = vector.shape_cast %64 : vector<1x48x128xbf16> to vector<48x128xbf16>
    %cst_67 = arith.constant dense<0.000000e+00> : vector<272x128xf32>
    %66 = tpu.matmul %63, %65, %cst_67 {dimension_numbers = #tpu.dot_dimension_numbers<[1], [0], [0], [1], [0, 0, 1, 1], [], []>} : vector<272x48xbf16>, vector<48x128xbf16>, vector<272x128xf32> -> vector<272x128xf32>
    %c0_68 = arith.constant 0 : index
    %c0_69 = arith.constant 0 : index
    %67 = vector.load %arg5[%c0_68, %c0_69] : memref<272x128xf32, #tpu.memory_space<vmem>>, vector<272x128xf32>
    %68 = arith.addf %67, %66 : vector<272x128xf32>
    %c0_70 = arith.constant 0 : index
    %c0_71 = arith.constant 0 : index
    %69 = vector.load %arg5[%c0_70, %c0_71] : memref<272x128xf32, #tpu.memory_space<vmem>>, vector<272x128xf32>
    tpu.vector_store %arg5[%c0_70, %c0_71], %68 {strides = array<i32>} : memref<272x128xf32, #tpu.memory_space<vmem>>, vector<272x128xf32>,
    %c0_72 = arith.constant 0 : index
    %c36 = arith.constant 36 : index
    %c0_73 = arith.constant 0 : index
    %70 = vector.load %arg1[%c0_72, %c36, %c0_73] : memref<1x323x48xf32, #tpu.memory_space<vmem>>, vector<1x272x48xf32>
    %71 = vector.shape_cast %70 : vector<1x272x48xf32> to vector<272x48xf32>
    %72 = arith.truncf %71 : vector<272x48xf32> to vector<272x48xbf16>
    %c8 = arith.constant 8 : index
    %c0_74 = arith.constant 0 : index
    %c0_75 = arith.constant 0 : index
    %73 = vector.load %arg2[%c8, %c0_74, %c0_75] : memref<9x48x128xbf16, #tpu.memory_space<vmem>>, vector<1x48x128xbf16>
    %74 = vector.shape_cast %73 : vector<1x48x128xbf16> to vector<48x128xbf16>
    %cst_76 = arith.constant dense<0.000000e+00> : vector<272x128xf32>
    %75 = tpu.matmul %72, %74, %cst_76 {dimension_numbers = #tpu.dot_dimension_numbers<[1], [0], [0], [1], [0, 0, 1, 1], [], []>} : vector<272x48xbf16>, vector<48x128xbf16>, vector<272x128xf32> -> vector<272x128xf32>
    %c0_77 = arith.constant 0 : index
    %c0_78 = arith.constant 0 : index
    %76 = vector.load %arg5[%c0_77, %c0_78] : memref<272x128xf32, #tpu.memory_space<vmem>>, vector<272x128xf32>
    %77 = arith.addf %76, %75 : vector<272x128xf32>
    %c0_79 = arith.constant 0 : index
    %c0_80 = arith.constant 0 : index
    %78 = vector.load %arg5[%c0_79, %c0_80] : memref<272x128xf32, #tpu.memory_space<vmem>>, vector<272x128xf32>
    tpu.vector_store %arg5[%c0_79, %c0_80], %77 {strides = array<i32>} : memref<272x128xf32, #tpu.memory_space<vmem>>, vector<272x128xf32>,
    %c0_81 = arith.constant 0 : index
    %c0_82 = arith.constant 0 : index
    %79 = vector.load %arg5[%c0_81, %c0_82] : memref<272x128xf32, #tpu.memory_space<vmem>>, vector<272x128xf32>
    %c0_83 = arith.constant 0 : index
    %c0_84 = arith.constant 0 : index
    %80 = vector.load %arg3[%c0_83, %c0_84] : memref<1x128xf32, #tpu.memory_space<vmem>>, vector<1x128xf32>
    %81 = vector.broadcast %80 : vector<1x128xf32> to vector<272x128xf32>
    %82 = arith.addf %79, %81 : vector<272x128xf32>
    %cst_85 = arith.constant 0.000000e+00 : f32
    %83 = vector.broadcast %cst_85 : f32 to vector<272x128xf32>
    %84 = arith.maximumf %82, %83 : vector<272x128xf32>
    %c0_86 = arith.constant 0 : index
    %c0_87 = arith.constant 0 : index
    %85 = vector.load %arg5[%c0_86, %c0_87] : memref<272x128xf32, #tpu.memory_space<vmem>>, vector<272x128xf32>
    tpu.vector_store %arg5[%c0_86, %c0_87], %84 {strides = array<i32>} : memref<272x128xf32, #tpu.memory_space<vmem>>, vector<272x128xf32>,
    %c0_88 = arith.constant 0 : index
    %c0_89 = arith.constant 0 : index
    %86 = vector.load %arg5[%c0_88, %c0_89] : memref<272x128xf32, #tpu.memory_space<vmem>>, vector<221x128xf32>
    %c1_90 = arith.constant 1 : index
    %c0_91 = arith.constant 0 : index
    %87 = vector.load %arg5[%c1_90, %c0_91] : memref<272x128xf32, #tpu.memory_space<vmem>>, vector<221x128xf32>
    %88 = arith.maximumf %86, %87 : vector<221x128xf32>
    %c2_92 = arith.constant 2 : index
    %c0_93 = arith.constant 0 : index
    %89 = vector.load %arg5[%c2_92, %c0_93] : memref<272x128xf32, #tpu.memory_space<vmem>>, vector<221x128xf32>
    %90 = arith.maximumf %88, %89 : vector<221x128xf32>
    %c17_94 = arith.constant 17 : index
    %c0_95 = arith.constant 0 : index
    %91 = vector.load %arg5[%c17_94, %c0_95] : memref<272x128xf32, #tpu.memory_space<vmem>>, vector<221x128xf32>
    %92 = arith.maximumf %90, %91 : vector<221x128xf32>
    %c18_96 = arith.constant 18 : index
    %c0_97 = arith.constant 0 : index
    %93 = vector.load %arg5[%c18_96, %c0_97] : memref<272x128xf32, #tpu.memory_space<vmem>>, vector<221x128xf32>
    %94 = arith.maximumf %92, %93 : vector<221x128xf32>
    %c19_98 = arith.constant 19 : index
    %c0_99 = arith.constant 0 : index
    %95 = vector.load %arg5[%c19_98, %c0_99] : memref<272x128xf32, #tpu.memory_space<vmem>>, vector<221x128xf32>
    %96 = arith.maximumf %94, %95 : vector<221x128xf32>
    %c34_100 = arith.constant 34 : index
    %c0_101 = arith.constant 0 : index
    %97 = vector.load %arg5[%c34_100, %c0_101] : memref<272x128xf32, #tpu.memory_space<vmem>>, vector<221x128xf32>
    %98 = arith.maximumf %96, %97 : vector<221x128xf32>
    %c35_102 = arith.constant 35 : index
    %c0_103 = arith.constant 0 : index
    %99 = vector.load %arg5[%c35_102, %c0_103] : memref<272x128xf32, #tpu.memory_space<vmem>>, vector<221x128xf32>
    %100 = arith.maximumf %98, %99 : vector<221x128xf32>
    %c36_104 = arith.constant 36 : index
    %c0_105 = arith.constant 0 : index
    %101 = vector.load %arg5[%c36_104, %c0_105] : memref<272x128xf32, #tpu.memory_space<vmem>>, vector<221x128xf32>
    %102 = arith.maximumf %100, %101 : vector<221x128xf32>
    %c0_106 = arith.constant 0 : index
    %c0_107 = arith.constant 0 : index
    %c0_108 = arith.constant 0 : index
    %103 = vector.load %arg4[%c0_106, %c0_107, %c0_108] : memref<1x221x128xf32, #tpu.memory_space<vmem>>, vector<1x221x128xf32>
    %104 = vector.shape_cast %103 : vector<1x221x128xf32> to vector<221x128xf32>
    %105 = vector.shape_cast %102 : vector<221x128xf32> to vector<1x221x128xf32>
    tpu.vector_store %arg4[%c0_106, %c0_107, %c0_108], %105 {strides = array<i32>} : memref<1x221x128xf32, #tpu.memory_space<vmem>>, vector<1x221x128xf32>,
    return
  }
  func.func @transform_0(%arg0: i32) -> (i32, i32, i32) {
    %c0_i32 = arith.constant 0 : i32
    %c0_i32_0 = arith.constant 0 : i32
    %c0_i32_1 = arith.constant 0 : i32
    return %arg0, %c0_i32, %c0_i32_0 : i32, i32, i32
  }
  func.func @transform_1(%arg0: i32) -> (i32, i32, i32) {
    %c0_i32 = arith.constant 0 : i32
    %c0_i32_0 = arith.constant 0 : i32
    %c0_i32_1 = arith.constant 0 : i32
    %c0_i32_2 = arith.constant 0 : i32
    return %c0_i32, %c0_i32_0, %c0_i32_1 : i32, i32, i32
  }
  func.func @transform_2(%arg0: i32) -> (i32, i32) {
    %c0_i32 = arith.constant 0 : i32
    %c0_i32_0 = arith.constant 0 : i32
    %c0_i32_1 = arith.constant 0 : i32
    return %c0_i32, %c0_i32_0 : i32, i32
  }
  func.func @transform_3(%arg0: i32) -> (i32, i32, i32) {
    %c0_i32 = arith.constant 0 : i32
    %c0_i32_0 = arith.constant 0 : i32
    %c0_i32_1 = arith.constant 0 : i32
    return %arg0, %c0_i32, %c0_i32_0 : i32, i32, i32
  }
}

module attributes {stable_mosaic.version = 11 : i64} {
  func.func @_conv_relu_pool_kernel(%arg0: i32, %arg1: memref<1x143x16xf32, #tpu.memory_space<vmem>>, %arg2: memref<25x16x128xbf16, #tpu.memory_space<vmem>>, %arg3: memref<1x128xf32, #tpu.memory_space<vmem>>, %arg4: memref<1x55x128xf32, #tpu.memory_space<vmem>>, %arg5: memref<88x128xf32, #tpu.memory_space<vmem>>) attributes {dimension_semantics = [#tpu.dimension_semantics<parallel>], iteration_bounds = array<i64: 2>, scalar_prefetch = 0 : i64, scratch_operands = 1 : i64, tpu.core_type = #tpu.core_type<tc>, window_params = [{transform_indices = @transform_0, window_bounds = array<i64: 1, 143, 16>}, {pipeline_mode = #tpu.pipeline_mode<synchronous>, transform_indices = @transform_1, window_bounds = array<i64: 25, 16, 128>}, {pipeline_mode = #tpu.pipeline_mode<synchronous>, transform_indices = @transform_2, window_bounds = array<i64: 1, 128>}, {transform_indices = @transform_3, window_bounds = array<i64: 1, 55, 128>}]} {
    %c0 = arith.constant 0 : index
    %c0_0 = arith.constant 0 : index
    %c0_1 = arith.constant 0 : index
    %0 = vector.load %arg1[%c0, %c0_0, %c0_1] : memref<1x143x16xf32, #tpu.memory_space<vmem>>, vector<1x88x16xf32>
    %1 = vector.shape_cast %0 : vector<1x88x16xf32> to vector<88x16xf32>
    %2 = arith.truncf %1 : vector<88x16xf32> to vector<88x16xbf16>
    %c0_2 = arith.constant 0 : index
    %c0_3 = arith.constant 0 : index
    %c0_4 = arith.constant 0 : index
    %3 = vector.load %arg2[%c0_2, %c0_3, %c0_4] : memref<25x16x128xbf16, #tpu.memory_space<vmem>>, vector<1x16x128xbf16>
    %4 = vector.shape_cast %3 : vector<1x16x128xbf16> to vector<16x128xbf16>
    %cst = arith.constant dense<0.000000e+00> : vector<88x128xf32>
    %5 = tpu.matmul %2, %4, %cst {dimension_numbers = #tpu.dot_dimension_numbers<[1], [0], [0], [1], [0, 0, 1, 1], [], []>} : vector<88x16xbf16>, vector<16x128xbf16>, vector<88x128xf32> -> vector<88x128xf32>
    %c0_5 = arith.constant 0 : index
    %c0_6 = arith.constant 0 : index
    %6 = vector.load %arg5[%c0_5, %c0_6] : memref<88x128xf32, #tpu.memory_space<vmem>>, vector<88x128xf32>
    tpu.vector_store %arg5[%c0_5, %c0_6], %5 {strides = array<i32>} : memref<88x128xf32, #tpu.memory_space<vmem>>, vector<88x128xf32>,
    %c0_7 = arith.constant 0 : index
    %c1 = arith.constant 1 : index
    %c0_8 = arith.constant 0 : index
    %7 = vector.load %arg1[%c0_7, %c1, %c0_8] : memref<1x143x16xf32, #tpu.memory_space<vmem>>, vector<1x88x16xf32>
    %8 = vector.shape_cast %7 : vector<1x88x16xf32> to vector<88x16xf32>
    %9 = arith.truncf %8 : vector<88x16xf32> to vector<88x16xbf16>
    %c1_9 = arith.constant 1 : index
    %c0_10 = arith.constant 0 : index
    %c0_11 = arith.constant 0 : index
    %10 = vector.load %arg2[%c1_9, %c0_10, %c0_11] : memref<25x16x128xbf16, #tpu.memory_space<vmem>>, vector<1x16x128xbf16>
    %11 = vector.shape_cast %10 : vector<1x16x128xbf16> to vector<16x128xbf16>
    %cst_12 = arith.constant dense<0.000000e+00> : vector<88x128xf32>
    %12 = tpu.matmul %9, %11, %cst_12 {dimension_numbers = #tpu.dot_dimension_numbers<[1], [0], [0], [1], [0, 0, 1, 1], [], []>} : vector<88x16xbf16>, vector<16x128xbf16>, vector<88x128xf32> -> vector<88x128xf32>
    %c0_13 = arith.constant 0 : index
    %c0_14 = arith.constant 0 : index
    %13 = vector.load %arg5[%c0_13, %c0_14] : memref<88x128xf32, #tpu.memory_space<vmem>>, vector<88x128xf32>
    %14 = arith.addf %13, %12 : vector<88x128xf32>
    %c0_15 = arith.constant 0 : index
    %c0_16 = arith.constant 0 : index
    %15 = vector.load %arg5[%c0_15, %c0_16] : memref<88x128xf32, #tpu.memory_space<vmem>>, vector<88x128xf32>
    tpu.vector_store %arg5[%c0_15, %c0_16], %14 {strides = array<i32>} : memref<88x128xf32, #tpu.memory_space<vmem>>, vector<88x128xf32>,
    %c0_17 = arith.constant 0 : index
    %c2 = arith.constant 2 : index
    %c0_18 = arith.constant 0 : index
    %16 = vector.load %arg1[%c0_17, %c2, %c0_18] : memref<1x143x16xf32, #tpu.memory_space<vmem>>, vector<1x88x16xf32>
    %17 = vector.shape_cast %16 : vector<1x88x16xf32> to vector<88x16xf32>
    %18 = arith.truncf %17 : vector<88x16xf32> to vector<88x16xbf16>
    %c2_19 = arith.constant 2 : index
    %c0_20 = arith.constant 0 : index
    %c0_21 = arith.constant 0 : index
    %19 = vector.load %arg2[%c2_19, %c0_20, %c0_21] : memref<25x16x128xbf16, #tpu.memory_space<vmem>>, vector<1x16x128xbf16>
    %20 = vector.shape_cast %19 : vector<1x16x128xbf16> to vector<16x128xbf16>
    %cst_22 = arith.constant dense<0.000000e+00> : vector<88x128xf32>
    %21 = tpu.matmul %18, %20, %cst_22 {dimension_numbers = #tpu.dot_dimension_numbers<[1], [0], [0], [1], [0, 0, 1, 1], [], []>} : vector<88x16xbf16>, vector<16x128xbf16>, vector<88x128xf32> -> vector<88x128xf32>
    %c0_23 = arith.constant 0 : index
    %c0_24 = arith.constant 0 : index
    %22 = vector.load %arg5[%c0_23, %c0_24] : memref<88x128xf32, #tpu.memory_space<vmem>>, vector<88x128xf32>
    %23 = arith.addf %22, %21 : vector<88x128xf32>
    %c0_25 = arith.constant 0 : index
    %c0_26 = arith.constant 0 : index
    %24 = vector.load %arg5[%c0_25, %c0_26] : memref<88x128xf32, #tpu.memory_space<vmem>>, vector<88x128xf32>
    tpu.vector_store %arg5[%c0_25, %c0_26], %23 {strides = array<i32>} : memref<88x128xf32, #tpu.memory_space<vmem>>, vector<88x128xf32>,
    %c0_27 = arith.constant 0 : index
    %c3 = arith.constant 3 : index
    %c0_28 = arith.constant 0 : index
    %25 = vector.load %arg1[%c0_27, %c3, %c0_28] : memref<1x143x16xf32, #tpu.memory_space<vmem>>, vector<1x88x16xf32>
    %26 = vector.shape_cast %25 : vector<1x88x16xf32> to vector<88x16xf32>
    %27 = arith.truncf %26 : vector<88x16xf32> to vector<88x16xbf16>
    %c3_29 = arith.constant 3 : index
    %c0_30 = arith.constant 0 : index
    %c0_31 = arith.constant 0 : index
    %28 = vector.load %arg2[%c3_29, %c0_30, %c0_31] : memref<25x16x128xbf16, #tpu.memory_space<vmem>>, vector<1x16x128xbf16>
    %29 = vector.shape_cast %28 : vector<1x16x128xbf16> to vector<16x128xbf16>
    %cst_32 = arith.constant dense<0.000000e+00> : vector<88x128xf32>
    %30 = tpu.matmul %27, %29, %cst_32 {dimension_numbers = #tpu.dot_dimension_numbers<[1], [0], [0], [1], [0, 0, 1, 1], [], []>} : vector<88x16xbf16>, vector<16x128xbf16>, vector<88x128xf32> -> vector<88x128xf32>
    %c0_33 = arith.constant 0 : index
    %c0_34 = arith.constant 0 : index
    %31 = vector.load %arg5[%c0_33, %c0_34] : memref<88x128xf32, #tpu.memory_space<vmem>>, vector<88x128xf32>
    %32 = arith.addf %31, %30 : vector<88x128xf32>
    %c0_35 = arith.constant 0 : index
    %c0_36 = arith.constant 0 : index
    %33 = vector.load %arg5[%c0_35, %c0_36] : memref<88x128xf32, #tpu.memory_space<vmem>>, vector<88x128xf32>
    tpu.vector_store %arg5[%c0_35, %c0_36], %32 {strides = array<i32>} : memref<88x128xf32, #tpu.memory_space<vmem>>, vector<88x128xf32>,
    %c0_37 = arith.constant 0 : index
    %c4 = arith.constant 4 : index
    %c0_38 = arith.constant 0 : index
    %34 = vector.load %arg1[%c0_37, %c4, %c0_38] : memref<1x143x16xf32, #tpu.memory_space<vmem>>, vector<1x88x16xf32>
    %35 = vector.shape_cast %34 : vector<1x88x16xf32> to vector<88x16xf32>
    %36 = arith.truncf %35 : vector<88x16xf32> to vector<88x16xbf16>
    %c4_39 = arith.constant 4 : index
    %c0_40 = arith.constant 0 : index
    %c0_41 = arith.constant 0 : index
    %37 = vector.load %arg2[%c4_39, %c0_40, %c0_41] : memref<25x16x128xbf16, #tpu.memory_space<vmem>>, vector<1x16x128xbf16>
    %38 = vector.shape_cast %37 : vector<1x16x128xbf16> to vector<16x128xbf16>
    %cst_42 = arith.constant dense<0.000000e+00> : vector<88x128xf32>
    %39 = tpu.matmul %36, %38, %cst_42 {dimension_numbers = #tpu.dot_dimension_numbers<[1], [0], [0], [1], [0, 0, 1, 1], [], []>} : vector<88x16xbf16>, vector<16x128xbf16>, vector<88x128xf32> -> vector<88x128xf32>
    %c0_43 = arith.constant 0 : index
    %c0_44 = arith.constant 0 : index
    %40 = vector.load %arg5[%c0_43, %c0_44] : memref<88x128xf32, #tpu.memory_space<vmem>>, vector<88x128xf32>
    %41 = arith.addf %40, %39 : vector<88x128xf32>
    %c0_45 = arith.constant 0 : index
    %c0_46 = arith.constant 0 : index
    %42 = vector.load %arg5[%c0_45, %c0_46] : memref<88x128xf32, #tpu.memory_space<vmem>>, vector<88x128xf32>
    tpu.vector_store %arg5[%c0_45, %c0_46], %41 {strides = array<i32>} : memref<88x128xf32, #tpu.memory_space<vmem>>, vector<88x128xf32>,
    %c0_47 = arith.constant 0 : index
    %c11 = arith.constant 11 : index
    %c0_48 = arith.constant 0 : index
    %43 = vector.load %arg1[%c0_47, %c11, %c0_48] : memref<1x143x16xf32, #tpu.memory_space<vmem>>, vector<1x88x16xf32>
    %44 = vector.shape_cast %43 : vector<1x88x16xf32> to vector<88x16xf32>
    %45 = arith.truncf %44 : vector<88x16xf32> to vector<88x16xbf16>
    %c5 = arith.constant 5 : index
    %c0_49 = arith.constant 0 : index
    %c0_50 = arith.constant 0 : index
    %46 = vector.load %arg2[%c5, %c0_49, %c0_50] : memref<25x16x128xbf16, #tpu.memory_space<vmem>>, vector<1x16x128xbf16>
    %47 = vector.shape_cast %46 : vector<1x16x128xbf16> to vector<16x128xbf16>
    %cst_51 = arith.constant dense<0.000000e+00> : vector<88x128xf32>
    %48 = tpu.matmul %45, %47, %cst_51 {dimension_numbers = #tpu.dot_dimension_numbers<[1], [0], [0], [1], [0, 0, 1, 1], [], []>} : vector<88x16xbf16>, vector<16x128xbf16>, vector<88x128xf32> -> vector<88x128xf32>
    %c0_52 = arith.constant 0 : index
    %c0_53 = arith.constant 0 : index
    %49 = vector.load %arg5[%c0_52, %c0_53] : memref<88x128xf32, #tpu.memory_space<vmem>>, vector<88x128xf32>
    %50 = arith.addf %49, %48 : vector<88x128xf32>
    %c0_54 = arith.constant 0 : index
    %c0_55 = arith.constant 0 : index
    %51 = vector.load %arg5[%c0_54, %c0_55] : memref<88x128xf32, #tpu.memory_space<vmem>>, vector<88x128xf32>
    tpu.vector_store %arg5[%c0_54, %c0_55], %50 {strides = array<i32>} : memref<88x128xf32, #tpu.memory_space<vmem>>, vector<88x128xf32>,
    %c0_56 = arith.constant 0 : index
    %c12 = arith.constant 12 : index
    %c0_57 = arith.constant 0 : index
    %52 = vector.load %arg1[%c0_56, %c12, %c0_57] : memref<1x143x16xf32, #tpu.memory_space<vmem>>, vector<1x88x16xf32>
    %53 = vector.shape_cast %52 : vector<1x88x16xf32> to vector<88x16xf32>
    %54 = arith.truncf %53 : vector<88x16xf32> to vector<88x16xbf16>
    %c6 = arith.constant 6 : index
    %c0_58 = arith.constant 0 : index
    %c0_59 = arith.constant 0 : index
    %55 = vector.load %arg2[%c6, %c0_58, %c0_59] : memref<25x16x128xbf16, #tpu.memory_space<vmem>>, vector<1x16x128xbf16>
    %56 = vector.shape_cast %55 : vector<1x16x128xbf16> to vector<16x128xbf16>
    %cst_60 = arith.constant dense<0.000000e+00> : vector<88x128xf32>
    %57 = tpu.matmul %54, %56, %cst_60 {dimension_numbers = #tpu.dot_dimension_numbers<[1], [0], [0], [1], [0, 0, 1, 1], [], []>} : vector<88x16xbf16>, vector<16x128xbf16>, vector<88x128xf32> -> vector<88x128xf32>
    %c0_61 = arith.constant 0 : index
    %c0_62 = arith.constant 0 : index
    %58 = vector.load %arg5[%c0_61, %c0_62] : memref<88x128xf32, #tpu.memory_space<vmem>>, vector<88x128xf32>
    %59 = arith.addf %58, %57 : vector<88x128xf32>
    %c0_63 = arith.constant 0 : index
    %c0_64 = arith.constant 0 : index
    %60 = vector.load %arg5[%c0_63, %c0_64] : memref<88x128xf32, #tpu.memory_space<vmem>>, vector<88x128xf32>
    tpu.vector_store %arg5[%c0_63, %c0_64], %59 {strides = array<i32>} : memref<88x128xf32, #tpu.memory_space<vmem>>, vector<88x128xf32>,
    %c0_65 = arith.constant 0 : index
    %c13 = arith.constant 13 : index
    %c0_66 = arith.constant 0 : index
    %61 = vector.load %arg1[%c0_65, %c13, %c0_66] : memref<1x143x16xf32, #tpu.memory_space<vmem>>, vector<1x88x16xf32>
    %62 = vector.shape_cast %61 : vector<1x88x16xf32> to vector<88x16xf32>
    %63 = arith.truncf %62 : vector<88x16xf32> to vector<88x16xbf16>
    %c7 = arith.constant 7 : index
    %c0_67 = arith.constant 0 : index
    %c0_68 = arith.constant 0 : index
    %64 = vector.load %arg2[%c7, %c0_67, %c0_68] : memref<25x16x128xbf16, #tpu.memory_space<vmem>>, vector<1x16x128xbf16>
    %65 = vector.shape_cast %64 : vector<1x16x128xbf16> to vector<16x128xbf16>
    %cst_69 = arith.constant dense<0.000000e+00> : vector<88x128xf32>
    %66 = tpu.matmul %63, %65, %cst_69 {dimension_numbers = #tpu.dot_dimension_numbers<[1], [0], [0], [1], [0, 0, 1, 1], [], []>} : vector<88x16xbf16>, vector<16x128xbf16>, vector<88x128xf32> -> vector<88x128xf32>
    %c0_70 = arith.constant 0 : index
    %c0_71 = arith.constant 0 : index
    %67 = vector.load %arg5[%c0_70, %c0_71] : memref<88x128xf32, #tpu.memory_space<vmem>>, vector<88x128xf32>
    %68 = arith.addf %67, %66 : vector<88x128xf32>
    %c0_72 = arith.constant 0 : index
    %c0_73 = arith.constant 0 : index
    %69 = vector.load %arg5[%c0_72, %c0_73] : memref<88x128xf32, #tpu.memory_space<vmem>>, vector<88x128xf32>
    tpu.vector_store %arg5[%c0_72, %c0_73], %68 {strides = array<i32>} : memref<88x128xf32, #tpu.memory_space<vmem>>, vector<88x128xf32>,
    %c0_74 = arith.constant 0 : index
    %c14 = arith.constant 14 : index
    %c0_75 = arith.constant 0 : index
    %70 = vector.load %arg1[%c0_74, %c14, %c0_75] : memref<1x143x16xf32, #tpu.memory_space<vmem>>, vector<1x88x16xf32>
    %71 = vector.shape_cast %70 : vector<1x88x16xf32> to vector<88x16xf32>
    %72 = arith.truncf %71 : vector<88x16xf32> to vector<88x16xbf16>
    %c8 = arith.constant 8 : index
    %c0_76 = arith.constant 0 : index
    %c0_77 = arith.constant 0 : index
    %73 = vector.load %arg2[%c8, %c0_76, %c0_77] : memref<25x16x128xbf16, #tpu.memory_space<vmem>>, vector<1x16x128xbf16>
    %74 = vector.shape_cast %73 : vector<1x16x128xbf16> to vector<16x128xbf16>
    %cst_78 = arith.constant dense<0.000000e+00> : vector<88x128xf32>
    %75 = tpu.matmul %72, %74, %cst_78 {dimension_numbers = #tpu.dot_dimension_numbers<[1], [0], [0], [1], [0, 0, 1, 1], [], []>} : vector<88x16xbf16>, vector<16x128xbf16>, vector<88x128xf32> -> vector<88x128xf32>
    %c0_79 = arith.constant 0 : index
    %c0_80 = arith.constant 0 : index
    %76 = vector.load %arg5[%c0_79, %c0_80] : memref<88x128xf32, #tpu.memory_space<vmem>>, vector<88x128xf32>
    %77 = arith.addf %76, %75 : vector<88x128xf32>
    %c0_81 = arith.constant 0 : index
    %c0_82 = arith.constant 0 : index
    %78 = vector.load %arg5[%c0_81, %c0_82] : memref<88x128xf32, #tpu.memory_space<vmem>>, vector<88x128xf32>
    tpu.vector_store %arg5[%c0_81, %c0_82], %77 {strides = array<i32>} : memref<88x128xf32, #tpu.memory_space<vmem>>, vector<88x128xf32>,
    %c0_83 = arith.constant 0 : index
    %c15 = arith.constant 15 : index
    %c0_84 = arith.constant 0 : index
    %79 = vector.load %arg1[%c0_83, %c15, %c0_84] : memref<1x143x16xf32, #tpu.memory_space<vmem>>, vector<1x88x16xf32>
    %80 = vector.shape_cast %79 : vector<1x88x16xf32> to vector<88x16xf32>
    %81 = arith.truncf %80 : vector<88x16xf32> to vector<88x16xbf16>
    %c9 = arith.constant 9 : index
    %c0_85 = arith.constant 0 : index
    %c0_86 = arith.constant 0 : index
    %82 = vector.load %arg2[%c9, %c0_85, %c0_86] : memref<25x16x128xbf16, #tpu.memory_space<vmem>>, vector<1x16x128xbf16>
    %83 = vector.shape_cast %82 : vector<1x16x128xbf16> to vector<16x128xbf16>
    %cst_87 = arith.constant dense<0.000000e+00> : vector<88x128xf32>
    %84 = tpu.matmul %81, %83, %cst_87 {dimension_numbers = #tpu.dot_dimension_numbers<[1], [0], [0], [1], [0, 0, 1, 1], [], []>} : vector<88x16xbf16>, vector<16x128xbf16>, vector<88x128xf32> -> vector<88x128xf32>
    %c0_88 = arith.constant 0 : index
    %c0_89 = arith.constant 0 : index
    %85 = vector.load %arg5[%c0_88, %c0_89] : memref<88x128xf32, #tpu.memory_space<vmem>>, vector<88x128xf32>
    %86 = arith.addf %85, %84 : vector<88x128xf32>
    %c0_90 = arith.constant 0 : index
    %c0_91 = arith.constant 0 : index
    %87 = vector.load %arg5[%c0_90, %c0_91] : memref<88x128xf32, #tpu.memory_space<vmem>>, vector<88x128xf32>
    tpu.vector_store %arg5[%c0_90, %c0_91], %86 {strides = array<i32>} : memref<88x128xf32, #tpu.memory_space<vmem>>, vector<88x128xf32>,
    %c0_92 = arith.constant 0 : index
    %c22 = arith.constant 22 : index
    %c0_93 = arith.constant 0 : index
    %88 = vector.load %arg1[%c0_92, %c22, %c0_93] : memref<1x143x16xf32, #tpu.memory_space<vmem>>, vector<1x88x16xf32>
    %89 = vector.shape_cast %88 : vector<1x88x16xf32> to vector<88x16xf32>
    %90 = arith.truncf %89 : vector<88x16xf32> to vector<88x16xbf16>
    %c10 = arith.constant 10 : index
    %c0_94 = arith.constant 0 : index
    %c0_95 = arith.constant 0 : index
    %91 = vector.load %arg2[%c10, %c0_94, %c0_95] : memref<25x16x128xbf16, #tpu.memory_space<vmem>>, vector<1x16x128xbf16>
    %92 = vector.shape_cast %91 : vector<1x16x128xbf16> to vector<16x128xbf16>
    %cst_96 = arith.constant dense<0.000000e+00> : vector<88x128xf32>
    %93 = tpu.matmul %90, %92, %cst_96 {dimension_numbers = #tpu.dot_dimension_numbers<[1], [0], [0], [1], [0, 0, 1, 1], [], []>} : vector<88x16xbf16>, vector<16x128xbf16>, vector<88x128xf32> -> vector<88x128xf32>
    %c0_97 = arith.constant 0 : index
    %c0_98 = arith.constant 0 : index
    %94 = vector.load %arg5[%c0_97, %c0_98] : memref<88x128xf32, #tpu.memory_space<vmem>>, vector<88x128xf32>
    %95 = arith.addf %94, %93 : vector<88x128xf32>
    %c0_99 = arith.constant 0 : index
    %c0_100 = arith.constant 0 : index
    %96 = vector.load %arg5[%c0_99, %c0_100] : memref<88x128xf32, #tpu.memory_space<vmem>>, vector<88x128xf32>
    tpu.vector_store %arg5[%c0_99, %c0_100], %95 {strides = array<i32>} : memref<88x128xf32, #tpu.memory_space<vmem>>, vector<88x128xf32>,
    %c0_101 = arith.constant 0 : index
    %c23 = arith.constant 23 : index
    %c0_102 = arith.constant 0 : index
    %97 = vector.load %arg1[%c0_101, %c23, %c0_102] : memref<1x143x16xf32, #tpu.memory_space<vmem>>, vector<1x88x16xf32>
    %98 = vector.shape_cast %97 : vector<1x88x16xf32> to vector<88x16xf32>
    %99 = arith.truncf %98 : vector<88x16xf32> to vector<88x16xbf16>
    %c11_103 = arith.constant 11 : index
    %c0_104 = arith.constant 0 : index
    %c0_105 = arith.constant 0 : index
    %100 = vector.load %arg2[%c11_103, %c0_104, %c0_105] : memref<25x16x128xbf16, #tpu.memory_space<vmem>>, vector<1x16x128xbf16>
    %101 = vector.shape_cast %100 : vector<1x16x128xbf16> to vector<16x128xbf16>
    %cst_106 = arith.constant dense<0.000000e+00> : vector<88x128xf32>
    %102 = tpu.matmul %99, %101, %cst_106 {dimension_numbers = #tpu.dot_dimension_numbers<[1], [0], [0], [1], [0, 0, 1, 1], [], []>} : vector<88x16xbf16>, vector<16x128xbf16>, vector<88x128xf32> -> vector<88x128xf32>
    %c0_107 = arith.constant 0 : index
    %c0_108 = arith.constant 0 : index
    %103 = vector.load %arg5[%c0_107, %c0_108] : memref<88x128xf32, #tpu.memory_space<vmem>>, vector<88x128xf32>
    %104 = arith.addf %103, %102 : vector<88x128xf32>
    %c0_109 = arith.constant 0 : index
    %c0_110 = arith.constant 0 : index
    %105 = vector.load %arg5[%c0_109, %c0_110] : memref<88x128xf32, #tpu.memory_space<vmem>>, vector<88x128xf32>
    tpu.vector_store %arg5[%c0_109, %c0_110], %104 {strides = array<i32>} : memref<88x128xf32, #tpu.memory_space<vmem>>, vector<88x128xf32>,
    %c0_111 = arith.constant 0 : index
    %c24 = arith.constant 24 : index
    %c0_112 = arith.constant 0 : index
    %106 = vector.load %arg1[%c0_111, %c24, %c0_112] : memref<1x143x16xf32, #tpu.memory_space<vmem>>, vector<1x88x16xf32>
    %107 = vector.shape_cast %106 : vector<1x88x16xf32> to vector<88x16xf32>
    %108 = arith.truncf %107 : vector<88x16xf32> to vector<88x16xbf16>
    %c12_113 = arith.constant 12 : index
    %c0_114 = arith.constant 0 : index
    %c0_115 = arith.constant 0 : index
    %109 = vector.load %arg2[%c12_113, %c0_114, %c0_115] : memref<25x16x128xbf16, #tpu.memory_space<vmem>>, vector<1x16x128xbf16>
    %110 = vector.shape_cast %109 : vector<1x16x128xbf16> to vector<16x128xbf16>
    %cst_116 = arith.constant dense<0.000000e+00> : vector<88x128xf32>
    %111 = tpu.matmul %108, %110, %cst_116 {dimension_numbers = #tpu.dot_dimension_numbers<[1], [0], [0], [1], [0, 0, 1, 1], [], []>} : vector<88x16xbf16>, vector<16x128xbf16>, vector<88x128xf32> -> vector<88x128xf32>
    %c0_117 = arith.constant 0 : index
    %c0_118 = arith.constant 0 : index
    %112 = vector.load %arg5[%c0_117, %c0_118] : memref<88x128xf32, #tpu.memory_space<vmem>>, vector<88x128xf32>
    %113 = arith.addf %112, %111 : vector<88x128xf32>
    %c0_119 = arith.constant 0 : index
    %c0_120 = arith.constant 0 : index
    %114 = vector.load %arg5[%c0_119, %c0_120] : memref<88x128xf32, #tpu.memory_space<vmem>>, vector<88x128xf32>
    tpu.vector_store %arg5[%c0_119, %c0_120], %113 {strides = array<i32>} : memref<88x128xf32, #tpu.memory_space<vmem>>, vector<88x128xf32>,
    %c0_121 = arith.constant 0 : index
    %c25 = arith.constant 25 : index
    %c0_122 = arith.constant 0 : index
    %115 = vector.load %arg1[%c0_121, %c25, %c0_122] : memref<1x143x16xf32, #tpu.memory_space<vmem>>, vector<1x88x16xf32>
    %116 = vector.shape_cast %115 : vector<1x88x16xf32> to vector<88x16xf32>
    %117 = arith.truncf %116 : vector<88x16xf32> to vector<88x16xbf16>
    %c13_123 = arith.constant 13 : index
    %c0_124 = arith.constant 0 : index
    %c0_125 = arith.constant 0 : index
    %118 = vector.load %arg2[%c13_123, %c0_124, %c0_125] : memref<25x16x128xbf16, #tpu.memory_space<vmem>>, vector<1x16x128xbf16>
    %119 = vector.shape_cast %118 : vector<1x16x128xbf16> to vector<16x128xbf16>
    %cst_126 = arith.constant dense<0.000000e+00> : vector<88x128xf32>
    %120 = tpu.matmul %117, %119, %cst_126 {dimension_numbers = #tpu.dot_dimension_numbers<[1], [0], [0], [1], [0, 0, 1, 1], [], []>} : vector<88x16xbf16>, vector<16x128xbf16>, vector<88x128xf32> -> vector<88x128xf32>
    %c0_127 = arith.constant 0 : index
    %c0_128 = arith.constant 0 : index
    %121 = vector.load %arg5[%c0_127, %c0_128] : memref<88x128xf32, #tpu.memory_space<vmem>>, vector<88x128xf32>
    %122 = arith.addf %121, %120 : vector<88x128xf32>
    %c0_129 = arith.constant 0 : index
    %c0_130 = arith.constant 0 : index
    %123 = vector.load %arg5[%c0_129, %c0_130] : memref<88x128xf32, #tpu.memory_space<vmem>>, vector<88x128xf32>
    tpu.vector_store %arg5[%c0_129, %c0_130], %122 {strides = array<i32>} : memref<88x128xf32, #tpu.memory_space<vmem>>, vector<88x128xf32>,
    %c0_131 = arith.constant 0 : index
    %c26 = arith.constant 26 : index
    %c0_132 = arith.constant 0 : index
    %124 = vector.load %arg1[%c0_131, %c26, %c0_132] : memref<1x143x16xf32, #tpu.memory_space<vmem>>, vector<1x88x16xf32>
    %125 = vector.shape_cast %124 : vector<1x88x16xf32> to vector<88x16xf32>
    %126 = arith.truncf %125 : vector<88x16xf32> to vector<88x16xbf16>
    %c14_133 = arith.constant 14 : index
    %c0_134 = arith.constant 0 : index
    %c0_135 = arith.constant 0 : index
    %127 = vector.load %arg2[%c14_133, %c0_134, %c0_135] : memref<25x16x128xbf16, #tpu.memory_space<vmem>>, vector<1x16x128xbf16>
    %128 = vector.shape_cast %127 : vector<1x16x128xbf16> to vector<16x128xbf16>
    %cst_136 = arith.constant dense<0.000000e+00> : vector<88x128xf32>
    %129 = tpu.matmul %126, %128, %cst_136 {dimension_numbers = #tpu.dot_dimension_numbers<[1], [0], [0], [1], [0, 0, 1, 1], [], []>} : vector<88x16xbf16>, vector<16x128xbf16>, vector<88x128xf32> -> vector<88x128xf32>
    %c0_137 = arith.constant 0 : index
    %c0_138 = arith.constant 0 : index
    %130 = vector.load %arg5[%c0_137, %c0_138] : memref<88x128xf32, #tpu.memory_space<vmem>>, vector<88x128xf32>
    %131 = arith.addf %130, %129 : vector<88x128xf32>
    %c0_139 = arith.constant 0 : index
    %c0_140 = arith.constant 0 : index
    %132 = vector.load %arg5[%c0_139, %c0_140] : memref<88x128xf32, #tpu.memory_space<vmem>>, vector<88x128xf32>
    tpu.vector_store %arg5[%c0_139, %c0_140], %131 {strides = array<i32>} : memref<88x128xf32, #tpu.memory_space<vmem>>, vector<88x128xf32>,
    %c0_141 = arith.constant 0 : index
    %c33 = arith.constant 33 : index
    %c0_142 = arith.constant 0 : index
    %133 = vector.load %arg1[%c0_141, %c33, %c0_142] : memref<1x143x16xf32, #tpu.memory_space<vmem>>, vector<1x88x16xf32>
    %134 = vector.shape_cast %133 : vector<1x88x16xf32> to vector<88x16xf32>
    %135 = arith.truncf %134 : vector<88x16xf32> to vector<88x16xbf16>
    %c15_143 = arith.constant 15 : index
    %c0_144 = arith.constant 0 : index
    %c0_145 = arith.constant 0 : index
    %136 = vector.load %arg2[%c15_143, %c0_144, %c0_145] : memref<25x16x128xbf16, #tpu.memory_space<vmem>>, vector<1x16x128xbf16>
    %137 = vector.shape_cast %136 : vector<1x16x128xbf16> to vector<16x128xbf16>
    %cst_146 = arith.constant dense<0.000000e+00> : vector<88x128xf32>
    %138 = tpu.matmul %135, %137, %cst_146 {dimension_numbers = #tpu.dot_dimension_numbers<[1], [0], [0], [1], [0, 0, 1, 1], [], []>} : vector<88x16xbf16>, vector<16x128xbf16>, vector<88x128xf32> -> vector<88x128xf32>
    %c0_147 = arith.constant 0 : index
    %c0_148 = arith.constant 0 : index
    %139 = vector.load %arg5[%c0_147, %c0_148] : memref<88x128xf32, #tpu.memory_space<vmem>>, vector<88x128xf32>
    %140 = arith.addf %139, %138 : vector<88x128xf32>
    %c0_149 = arith.constant 0 : index
    %c0_150 = arith.constant 0 : index
    %141 = vector.load %arg5[%c0_149, %c0_150] : memref<88x128xf32, #tpu.memory_space<vmem>>, vector<88x128xf32>
    tpu.vector_store %arg5[%c0_149, %c0_150], %140 {strides = array<i32>} : memref<88x128xf32, #tpu.memory_space<vmem>>, vector<88x128xf32>,
    %c0_151 = arith.constant 0 : index
    %c34 = arith.constant 34 : index
    %c0_152 = arith.constant 0 : index
    %142 = vector.load %arg1[%c0_151, %c34, %c0_152] : memref<1x143x16xf32, #tpu.memory_space<vmem>>, vector<1x88x16xf32>
    %143 = vector.shape_cast %142 : vector<1x88x16xf32> to vector<88x16xf32>
    %144 = arith.truncf %143 : vector<88x16xf32> to vector<88x16xbf16>
    %c16 = arith.constant 16 : index
    %c0_153 = arith.constant 0 : index
    %c0_154 = arith.constant 0 : index
    %145 = vector.load %arg2[%c16, %c0_153, %c0_154] : memref<25x16x128xbf16, #tpu.memory_space<vmem>>, vector<1x16x128xbf16>
    %146 = vector.shape_cast %145 : vector<1x16x128xbf16> to vector<16x128xbf16>
    %cst_155 = arith.constant dense<0.000000e+00> : vector<88x128xf32>
    %147 = tpu.matmul %144, %146, %cst_155 {dimension_numbers = #tpu.dot_dimension_numbers<[1], [0], [0], [1], [0, 0, 1, 1], [], []>} : vector<88x16xbf16>, vector<16x128xbf16>, vector<88x128xf32> -> vector<88x128xf32>
    %c0_156 = arith.constant 0 : index
    %c0_157 = arith.constant 0 : index
    %148 = vector.load %arg5[%c0_156, %c0_157] : memref<88x128xf32, #tpu.memory_space<vmem>>, vector<88x128xf32>
    %149 = arith.addf %148, %147 : vector<88x128xf32>
    %c0_158 = arith.constant 0 : index
    %c0_159 = arith.constant 0 : index
    %150 = vector.load %arg5[%c0_158, %c0_159] : memref<88x128xf32, #tpu.memory_space<vmem>>, vector<88x128xf32>
    tpu.vector_store %arg5[%c0_158, %c0_159], %149 {strides = array<i32>} : memref<88x128xf32, #tpu.memory_space<vmem>>, vector<88x128xf32>,
    %c0_160 = arith.constant 0 : index
    %c35 = arith.constant 35 : index
    %c0_161 = arith.constant 0 : index
    %151 = vector.load %arg1[%c0_160, %c35, %c0_161] : memref<1x143x16xf32, #tpu.memory_space<vmem>>, vector<1x88x16xf32>
    %152 = vector.shape_cast %151 : vector<1x88x16xf32> to vector<88x16xf32>
    %153 = arith.truncf %152 : vector<88x16xf32> to vector<88x16xbf16>
    %c17 = arith.constant 17 : index
    %c0_162 = arith.constant 0 : index
    %c0_163 = arith.constant 0 : index
    %154 = vector.load %arg2[%c17, %c0_162, %c0_163] : memref<25x16x128xbf16, #tpu.memory_space<vmem>>, vector<1x16x128xbf16>
    %155 = vector.shape_cast %154 : vector<1x16x128xbf16> to vector<16x128xbf16>
    %cst_164 = arith.constant dense<0.000000e+00> : vector<88x128xf32>
    %156 = tpu.matmul %153, %155, %cst_164 {dimension_numbers = #tpu.dot_dimension_numbers<[1], [0], [0], [1], [0, 0, 1, 1], [], []>} : vector<88x16xbf16>, vector<16x128xbf16>, vector<88x128xf32> -> vector<88x128xf32>
    %c0_165 = arith.constant 0 : index
    %c0_166 = arith.constant 0 : index
    %157 = vector.load %arg5[%c0_165, %c0_166] : memref<88x128xf32, #tpu.memory_space<vmem>>, vector<88x128xf32>
    %158 = arith.addf %157, %156 : vector<88x128xf32>
    %c0_167 = arith.constant 0 : index
    %c0_168 = arith.constant 0 : index
    %159 = vector.load %arg5[%c0_167, %c0_168] : memref<88x128xf32, #tpu.memory_space<vmem>>, vector<88x128xf32>
    tpu.vector_store %arg5[%c0_167, %c0_168], %158 {strides = array<i32>} : memref<88x128xf32, #tpu.memory_space<vmem>>, vector<88x128xf32>,
    %c0_169 = arith.constant 0 : index
    %c36 = arith.constant 36 : index
    %c0_170 = arith.constant 0 : index
    %160 = vector.load %arg1[%c0_169, %c36, %c0_170] : memref<1x143x16xf32, #tpu.memory_space<vmem>>, vector<1x88x16xf32>
    %161 = vector.shape_cast %160 : vector<1x88x16xf32> to vector<88x16xf32>
    %162 = arith.truncf %161 : vector<88x16xf32> to vector<88x16xbf16>
    %c18 = arith.constant 18 : index
    %c0_171 = arith.constant 0 : index
    %c0_172 = arith.constant 0 : index
    %163 = vector.load %arg2[%c18, %c0_171, %c0_172] : memref<25x16x128xbf16, #tpu.memory_space<vmem>>, vector<1x16x128xbf16>
    %164 = vector.shape_cast %163 : vector<1x16x128xbf16> to vector<16x128xbf16>
    %cst_173 = arith.constant dense<0.000000e+00> : vector<88x128xf32>
    %165 = tpu.matmul %162, %164, %cst_173 {dimension_numbers = #tpu.dot_dimension_numbers<[1], [0], [0], [1], [0, 0, 1, 1], [], []>} : vector<88x16xbf16>, vector<16x128xbf16>, vector<88x128xf32> -> vector<88x128xf32>
    %c0_174 = arith.constant 0 : index
    %c0_175 = arith.constant 0 : index
    %166 = vector.load %arg5[%c0_174, %c0_175] : memref<88x128xf32, #tpu.memory_space<vmem>>, vector<88x128xf32>
    %167 = arith.addf %166, %165 : vector<88x128xf32>
    %c0_176 = arith.constant 0 : index
    %c0_177 = arith.constant 0 : index
    %168 = vector.load %arg5[%c0_176, %c0_177] : memref<88x128xf32, #tpu.memory_space<vmem>>, vector<88x128xf32>
    tpu.vector_store %arg5[%c0_176, %c0_177], %167 {strides = array<i32>} : memref<88x128xf32, #tpu.memory_space<vmem>>, vector<88x128xf32>,
    %c0_178 = arith.constant 0 : index
    %c37 = arith.constant 37 : index
    %c0_179 = arith.constant 0 : index
    %169 = vector.load %arg1[%c0_178, %c37, %c0_179] : memref<1x143x16xf32, #tpu.memory_space<vmem>>, vector<1x88x16xf32>
    %170 = vector.shape_cast %169 : vector<1x88x16xf32> to vector<88x16xf32>
    %171 = arith.truncf %170 : vector<88x16xf32> to vector<88x16xbf16>
    %c19 = arith.constant 19 : index
    %c0_180 = arith.constant 0 : index
    %c0_181 = arith.constant 0 : index
    %172 = vector.load %arg2[%c19, %c0_180, %c0_181] : memref<25x16x128xbf16, #tpu.memory_space<vmem>>, vector<1x16x128xbf16>
    %173 = vector.shape_cast %172 : vector<1x16x128xbf16> to vector<16x128xbf16>
    %cst_182 = arith.constant dense<0.000000e+00> : vector<88x128xf32>
    %174 = tpu.matmul %171, %173, %cst_182 {dimension_numbers = #tpu.dot_dimension_numbers<[1], [0], [0], [1], [0, 0, 1, 1], [], []>} : vector<88x16xbf16>, vector<16x128xbf16>, vector<88x128xf32> -> vector<88x128xf32>
    %c0_183 = arith.constant 0 : index
    %c0_184 = arith.constant 0 : index
    %175 = vector.load %arg5[%c0_183, %c0_184] : memref<88x128xf32, #tpu.memory_space<vmem>>, vector<88x128xf32>
    %176 = arith.addf %175, %174 : vector<88x128xf32>
    %c0_185 = arith.constant 0 : index
    %c0_186 = arith.constant 0 : index
    %177 = vector.load %arg5[%c0_185, %c0_186] : memref<88x128xf32, #tpu.memory_space<vmem>>, vector<88x128xf32>
    tpu.vector_store %arg5[%c0_185, %c0_186], %176 {strides = array<i32>} : memref<88x128xf32, #tpu.memory_space<vmem>>, vector<88x128xf32>,
    %c0_187 = arith.constant 0 : index
    %c44 = arith.constant 44 : index
    %c0_188 = arith.constant 0 : index
    %178 = vector.load %arg1[%c0_187, %c44, %c0_188] : memref<1x143x16xf32, #tpu.memory_space<vmem>>, vector<1x88x16xf32>
    %179 = vector.shape_cast %178 : vector<1x88x16xf32> to vector<88x16xf32>
    %180 = arith.truncf %179 : vector<88x16xf32> to vector<88x16xbf16>
    %c20 = arith.constant 20 : index
    %c0_189 = arith.constant 0 : index
    %c0_190 = arith.constant 0 : index
    %181 = vector.load %arg2[%c20, %c0_189, %c0_190] : memref<25x16x128xbf16, #tpu.memory_space<vmem>>, vector<1x16x128xbf16>
    %182 = vector.shape_cast %181 : vector<1x16x128xbf16> to vector<16x128xbf16>
    %cst_191 = arith.constant dense<0.000000e+00> : vector<88x128xf32>
    %183 = tpu.matmul %180, %182, %cst_191 {dimension_numbers = #tpu.dot_dimension_numbers<[1], [0], [0], [1], [0, 0, 1, 1], [], []>} : vector<88x16xbf16>, vector<16x128xbf16>, vector<88x128xf32> -> vector<88x128xf32>
    %c0_192 = arith.constant 0 : index
    %c0_193 = arith.constant 0 : index
    %184 = vector.load %arg5[%c0_192, %c0_193] : memref<88x128xf32, #tpu.memory_space<vmem>>, vector<88x128xf32>
    %185 = arith.addf %184, %183 : vector<88x128xf32>
    %c0_194 = arith.constant 0 : index
    %c0_195 = arith.constant 0 : index
    %186 = vector.load %arg5[%c0_194, %c0_195] : memref<88x128xf32, #tpu.memory_space<vmem>>, vector<88x128xf32>
    tpu.vector_store %arg5[%c0_194, %c0_195], %185 {strides = array<i32>} : memref<88x128xf32, #tpu.memory_space<vmem>>, vector<88x128xf32>,
    %c0_196 = arith.constant 0 : index
    %c45 = arith.constant 45 : index
    %c0_197 = arith.constant 0 : index
    %187 = vector.load %arg1[%c0_196, %c45, %c0_197] : memref<1x143x16xf32, #tpu.memory_space<vmem>>, vector<1x88x16xf32>
    %188 = vector.shape_cast %187 : vector<1x88x16xf32> to vector<88x16xf32>
    %189 = arith.truncf %188 : vector<88x16xf32> to vector<88x16xbf16>
    %c21 = arith.constant 21 : index
    %c0_198 = arith.constant 0 : index
    %c0_199 = arith.constant 0 : index
    %190 = vector.load %arg2[%c21, %c0_198, %c0_199] : memref<25x16x128xbf16, #tpu.memory_space<vmem>>, vector<1x16x128xbf16>
    %191 = vector.shape_cast %190 : vector<1x16x128xbf16> to vector<16x128xbf16>
    %cst_200 = arith.constant dense<0.000000e+00> : vector<88x128xf32>
    %192 = tpu.matmul %189, %191, %cst_200 {dimension_numbers = #tpu.dot_dimension_numbers<[1], [0], [0], [1], [0, 0, 1, 1], [], []>} : vector<88x16xbf16>, vector<16x128xbf16>, vector<88x128xf32> -> vector<88x128xf32>
    %c0_201 = arith.constant 0 : index
    %c0_202 = arith.constant 0 : index
    %193 = vector.load %arg5[%c0_201, %c0_202] : memref<88x128xf32, #tpu.memory_space<vmem>>, vector<88x128xf32>
    %194 = arith.addf %193, %192 : vector<88x128xf32>
    %c0_203 = arith.constant 0 : index
    %c0_204 = arith.constant 0 : index
    %195 = vector.load %arg5[%c0_203, %c0_204] : memref<88x128xf32, #tpu.memory_space<vmem>>, vector<88x128xf32>
    tpu.vector_store %arg5[%c0_203, %c0_204], %194 {strides = array<i32>} : memref<88x128xf32, #tpu.memory_space<vmem>>, vector<88x128xf32>,
    %c0_205 = arith.constant 0 : index
    %c46 = arith.constant 46 : index
    %c0_206 = arith.constant 0 : index
    %196 = vector.load %arg1[%c0_205, %c46, %c0_206] : memref<1x143x16xf32, #tpu.memory_space<vmem>>, vector<1x88x16xf32>
    %197 = vector.shape_cast %196 : vector<1x88x16xf32> to vector<88x16xf32>
    %198 = arith.truncf %197 : vector<88x16xf32> to vector<88x16xbf16>
    %c22_207 = arith.constant 22 : index
    %c0_208 = arith.constant 0 : index
    %c0_209 = arith.constant 0 : index
    %199 = vector.load %arg2[%c22_207, %c0_208, %c0_209] : memref<25x16x128xbf16, #tpu.memory_space<vmem>>, vector<1x16x128xbf16>
    %200 = vector.shape_cast %199 : vector<1x16x128xbf16> to vector<16x128xbf16>
    %cst_210 = arith.constant dense<0.000000e+00> : vector<88x128xf32>
    %201 = tpu.matmul %198, %200, %cst_210 {dimension_numbers = #tpu.dot_dimension_numbers<[1], [0], [0], [1], [0, 0, 1, 1], [], []>} : vector<88x16xbf16>, vector<16x128xbf16>, vector<88x128xf32> -> vector<88x128xf32>
    %c0_211 = arith.constant 0 : index
    %c0_212 = arith.constant 0 : index
    %202 = vector.load %arg5[%c0_211, %c0_212] : memref<88x128xf32, #tpu.memory_space<vmem>>, vector<88x128xf32>
    %203 = arith.addf %202, %201 : vector<88x128xf32>
    %c0_213 = arith.constant 0 : index
    %c0_214 = arith.constant 0 : index
    %204 = vector.load %arg5[%c0_213, %c0_214] : memref<88x128xf32, #tpu.memory_space<vmem>>, vector<88x128xf32>
    tpu.vector_store %arg5[%c0_213, %c0_214], %203 {strides = array<i32>} : memref<88x128xf32, #tpu.memory_space<vmem>>, vector<88x128xf32>,
    %c0_215 = arith.constant 0 : index
    %c47 = arith.constant 47 : index
    %c0_216 = arith.constant 0 : index
    %205 = vector.load %arg1[%c0_215, %c47, %c0_216] : memref<1x143x16xf32, #tpu.memory_space<vmem>>, vector<1x88x16xf32>
    %206 = vector.shape_cast %205 : vector<1x88x16xf32> to vector<88x16xf32>
    %207 = arith.truncf %206 : vector<88x16xf32> to vector<88x16xbf16>
    %c23_217 = arith.constant 23 : index
    %c0_218 = arith.constant 0 : index
    %c0_219 = arith.constant 0 : index
    %208 = vector.load %arg2[%c23_217, %c0_218, %c0_219] : memref<25x16x128xbf16, #tpu.memory_space<vmem>>, vector<1x16x128xbf16>
    %209 = vector.shape_cast %208 : vector<1x16x128xbf16> to vector<16x128xbf16>
    %cst_220 = arith.constant dense<0.000000e+00> : vector<88x128xf32>
    %210 = tpu.matmul %207, %209, %cst_220 {dimension_numbers = #tpu.dot_dimension_numbers<[1], [0], [0], [1], [0, 0, 1, 1], [], []>} : vector<88x16xbf16>, vector<16x128xbf16>, vector<88x128xf32> -> vector<88x128xf32>
    %c0_221 = arith.constant 0 : index
    %c0_222 = arith.constant 0 : index
    %211 = vector.load %arg5[%c0_221, %c0_222] : memref<88x128xf32, #tpu.memory_space<vmem>>, vector<88x128xf32>
    %212 = arith.addf %211, %210 : vector<88x128xf32>
    %c0_223 = arith.constant 0 : index
    %c0_224 = arith.constant 0 : index
    %213 = vector.load %arg5[%c0_223, %c0_224] : memref<88x128xf32, #tpu.memory_space<vmem>>, vector<88x128xf32>
    tpu.vector_store %arg5[%c0_223, %c0_224], %212 {strides = array<i32>} : memref<88x128xf32, #tpu.memory_space<vmem>>, vector<88x128xf32>,
    %c0_225 = arith.constant 0 : index
    %c48 = arith.constant 48 : index
    %c0_226 = arith.constant 0 : index
    %214 = vector.load %arg1[%c0_225, %c48, %c0_226] : memref<1x143x16xf32, #tpu.memory_space<vmem>>, vector<1x88x16xf32>
    %215 = vector.shape_cast %214 : vector<1x88x16xf32> to vector<88x16xf32>
    %216 = arith.truncf %215 : vector<88x16xf32> to vector<88x16xbf16>
    %c24_227 = arith.constant 24 : index
    %c0_228 = arith.constant 0 : index
    %c0_229 = arith.constant 0 : index
    %217 = vector.load %arg2[%c24_227, %c0_228, %c0_229] : memref<25x16x128xbf16, #tpu.memory_space<vmem>>, vector<1x16x128xbf16>
    %218 = vector.shape_cast %217 : vector<1x16x128xbf16> to vector<16x128xbf16>
    %cst_230 = arith.constant dense<0.000000e+00> : vector<88x128xf32>
    %219 = tpu.matmul %216, %218, %cst_230 {dimension_numbers = #tpu.dot_dimension_numbers<[1], [0], [0], [1], [0, 0, 1, 1], [], []>} : vector<88x16xbf16>, vector<16x128xbf16>, vector<88x128xf32> -> vector<88x128xf32>
    %c0_231 = arith.constant 0 : index
    %c0_232 = arith.constant 0 : index
    %220 = vector.load %arg5[%c0_231, %c0_232] : memref<88x128xf32, #tpu.memory_space<vmem>>, vector<88x128xf32>
    %221 = arith.addf %220, %219 : vector<88x128xf32>
    %c0_233 = arith.constant 0 : index
    %c0_234 = arith.constant 0 : index
    %222 = vector.load %arg5[%c0_233, %c0_234] : memref<88x128xf32, #tpu.memory_space<vmem>>, vector<88x128xf32>
    tpu.vector_store %arg5[%c0_233, %c0_234], %221 {strides = array<i32>} : memref<88x128xf32, #tpu.memory_space<vmem>>, vector<88x128xf32>,
    %c0_235 = arith.constant 0 : index
    %c0_236 = arith.constant 0 : index
    %223 = vector.load %arg5[%c0_235, %c0_236] : memref<88x128xf32, #tpu.memory_space<vmem>>, vector<88x128xf32>
    %c0_237 = arith.constant 0 : index
    %c0_238 = arith.constant 0 : index
    %224 = vector.load %arg3[%c0_237, %c0_238] : memref<1x128xf32, #tpu.memory_space<vmem>>, vector<1x128xf32>
    %225 = vector.broadcast %224 : vector<1x128xf32> to vector<88x128xf32>
    %226 = arith.addf %223, %225 : vector<88x128xf32>
    %cst_239 = arith.constant 0.000000e+00 : f32
    %227 = vector.broadcast %cst_239 : f32 to vector<88x128xf32>
    %228 = arith.maximumf %226, %227 : vector<88x128xf32>
    %c0_240 = arith.constant 0 : index
    %c0_241 = arith.constant 0 : index
    %229 = vector.load %arg5[%c0_240, %c0_241] : memref<88x128xf32, #tpu.memory_space<vmem>>, vector<88x128xf32>
    tpu.vector_store %arg5[%c0_240, %c0_241], %228 {strides = array<i32>} : memref<88x128xf32, #tpu.memory_space<vmem>>, vector<88x128xf32>,
    %c0_242 = arith.constant 0 : index
    %c0_243 = arith.constant 0 : index
    %230 = vector.load %arg5[%c0_242, %c0_243] : memref<88x128xf32, #tpu.memory_space<vmem>>, vector<55x128xf32>
    %c1_244 = arith.constant 1 : index
    %c0_245 = arith.constant 0 : index
    %231 = vector.load %arg5[%c1_244, %c0_245] : memref<88x128xf32, #tpu.memory_space<vmem>>, vector<55x128xf32>
    %232 = arith.maximumf %230, %231 : vector<55x128xf32>
    %c2_246 = arith.constant 2 : index
    %c0_247 = arith.constant 0 : index
    %233 = vector.load %arg5[%c2_246, %c0_247] : memref<88x128xf32, #tpu.memory_space<vmem>>, vector<55x128xf32>
    %234 = arith.maximumf %232, %233 : vector<55x128xf32>
    %c11_248 = arith.constant 11 : index
    %c0_249 = arith.constant 0 : index
    %235 = vector.load %arg5[%c11_248, %c0_249] : memref<88x128xf32, #tpu.memory_space<vmem>>, vector<55x128xf32>
    %236 = arith.maximumf %234, %235 : vector<55x128xf32>
    %c12_250 = arith.constant 12 : index
    %c0_251 = arith.constant 0 : index
    %237 = vector.load %arg5[%c12_250, %c0_251] : memref<88x128xf32, #tpu.memory_space<vmem>>, vector<55x128xf32>
    %238 = arith.maximumf %236, %237 : vector<55x128xf32>
    %c13_252 = arith.constant 13 : index
    %c0_253 = arith.constant 0 : index
    %239 = vector.load %arg5[%c13_252, %c0_253] : memref<88x128xf32, #tpu.memory_space<vmem>>, vector<55x128xf32>
    %240 = arith.maximumf %238, %239 : vector<55x128xf32>
    %c22_254 = arith.constant 22 : index
    %c0_255 = arith.constant 0 : index
    %241 = vector.load %arg5[%c22_254, %c0_255] : memref<88x128xf32, #tpu.memory_space<vmem>>, vector<55x128xf32>
    %242 = arith.maximumf %240, %241 : vector<55x128xf32>
    %c23_256 = arith.constant 23 : index
    %c0_257 = arith.constant 0 : index
    %243 = vector.load %arg5[%c23_256, %c0_257] : memref<88x128xf32, #tpu.memory_space<vmem>>, vector<55x128xf32>
    %244 = arith.maximumf %242, %243 : vector<55x128xf32>
    %c24_258 = arith.constant 24 : index
    %c0_259 = arith.constant 0 : index
    %245 = vector.load %arg5[%c24_258, %c0_259] : memref<88x128xf32, #tpu.memory_space<vmem>>, vector<55x128xf32>
    %246 = arith.maximumf %244, %245 : vector<55x128xf32>
    %c0_260 = arith.constant 0 : index
    %c0_261 = arith.constant 0 : index
    %c0_262 = arith.constant 0 : index
    %247 = vector.load %arg4[%c0_260, %c0_261, %c0_262] : memref<1x55x128xf32, #tpu.memory_space<vmem>>, vector<1x55x128xf32>
    %248 = vector.shape_cast %247 : vector<1x55x128xf32> to vector<55x128xf32>
    %249 = vector.shape_cast %246 : vector<55x128xf32> to vector<1x55x128xf32>
    tpu.vector_store %arg4[%c0_260, %c0_261, %c0_262], %249 {strides = array<i32>} : memref<1x55x128xf32, #tpu.memory_space<vmem>>, vector<1x55x128xf32>,
    return
  }
  func.func @transform_0(%arg0: i32) -> (i32, i32, i32) {
    %c0_i32 = arith.constant 0 : i32
    %c0_i32_0 = arith.constant 0 : i32
    %c0_i32_1 = arith.constant 0 : i32
    return %arg0, %c0_i32, %c0_i32_0 : i32, i32, i32
  }
  func.func @transform_1(%arg0: i32) -> (i32, i32, i32) {
    %c0_i32 = arith.constant 0 : i32
    %c0_i32_0 = arith.constant 0 : i32
    %c0_i32_1 = arith.constant 0 : i32
    %c0_i32_2 = arith.constant 0 : i32
    return %c0_i32, %c0_i32_0, %c0_i32_1 : i32, i32, i32
  }
  func.func @transform_2(%arg0: i32) -> (i32, i32) {
    %c0_i32 = arith.constant 0 : i32
    %c0_i32_0 = arith.constant 0 : i32
    %c0_i32_1 = arith.constant 0 : i32
    return %c0_i32, %c0_i32_0 : i32, i32
  }
  func.func @transform_3(%arg0: i32) -> (i32, i32, i32) {
    %c0_i32 = arith.constant 0 : i32
    %c0_i32_0 = arith.constant 0 : i32
    %c0_i32_1 = arith.constant 0 : i32
    return %arg0, %c0_i32, %c0_i32_0 : i32, i32, i32
  }
}

module attributes {stable_mosaic.version = 11 : i64} {
  func.func @_conv_relu_pool_kernel(%arg0: i32, %arg1: memref<1x30x32xf32, #tpu.memory_space<vmem>>, %arg2: memref<9x32x128xbf16, #tpu.memory_space<vmem>>, %arg3: memref<1x128xf32, #tpu.memory_space<vmem>>, %arg4: memref<1x15x128xf32, #tpu.memory_space<vmem>>, %arg5: memref<15x128xf32, #tpu.memory_space<vmem>>) attributes {dimension_semantics = [#tpu.dimension_semantics<parallel>], iteration_bounds = array<i64: 2>, scalar_prefetch = 0 : i64, scratch_operands = 1 : i64, tpu.core_type = #tpu.core_type<tc>, window_params = [{transform_indices = @transform_0, window_bounds = array<i64: 1, 30, 32>}, {pipeline_mode = #tpu.pipeline_mode<synchronous>, transform_indices = @transform_1, window_bounds = array<i64: 9, 32, 128>}, {pipeline_mode = #tpu.pipeline_mode<synchronous>, transform_indices = @transform_2, window_bounds = array<i64: 1, 128>}, {transform_indices = @transform_3, window_bounds = array<i64: 1, 15, 128>}]} {
    %c0 = arith.constant 0 : index
    %c0_0 = arith.constant 0 : index
    %c0_1 = arith.constant 0 : index
    %0 = vector.load %arg1[%c0, %c0_0, %c0_1] : memref<1x30x32xf32, #tpu.memory_space<vmem>>, vector<1x15x32xf32>
    %1 = vector.shape_cast %0 : vector<1x15x32xf32> to vector<15x32xf32>
    %2 = arith.truncf %1 : vector<15x32xf32> to vector<15x32xbf16>
    %c0_2 = arith.constant 0 : index
    %c0_3 = arith.constant 0 : index
    %c0_4 = arith.constant 0 : index
    %3 = vector.load %arg2[%c0_2, %c0_3, %c0_4] : memref<9x32x128xbf16, #tpu.memory_space<vmem>>, vector<1x32x128xbf16>
    %4 = vector.shape_cast %3 : vector<1x32x128xbf16> to vector<32x128xbf16>
    %cst = arith.constant dense<0.000000e+00> : vector<15x128xf32>
    %5 = tpu.matmul %2, %4, %cst {dimension_numbers = #tpu.dot_dimension_numbers<[1], [0], [0], [1], [0, 0, 1, 1], [], []>} : vector<15x32xbf16>, vector<32x128xbf16>, vector<15x128xf32> -> vector<15x128xf32>
    %c0_5 = arith.constant 0 : index
    %c0_6 = arith.constant 0 : index
    %6 = vector.load %arg5[%c0_5, %c0_6] : memref<15x128xf32, #tpu.memory_space<vmem>>, vector<15x128xf32>
    tpu.vector_store %arg5[%c0_5, %c0_6], %5 {strides = array<i32>} : memref<15x128xf32, #tpu.memory_space<vmem>>, vector<15x128xf32>,
    %c0_7 = arith.constant 0 : index
    %c1 = arith.constant 1 : index
    %c0_8 = arith.constant 0 : index
    %7 = vector.load %arg1[%c0_7, %c1, %c0_8] : memref<1x30x32xf32, #tpu.memory_space<vmem>>, vector<1x15x32xf32>
    %8 = vector.shape_cast %7 : vector<1x15x32xf32> to vector<15x32xf32>
    %9 = arith.truncf %8 : vector<15x32xf32> to vector<15x32xbf16>
    %c1_9 = arith.constant 1 : index
    %c0_10 = arith.constant 0 : index
    %c0_11 = arith.constant 0 : index
    %10 = vector.load %arg2[%c1_9, %c0_10, %c0_11] : memref<9x32x128xbf16, #tpu.memory_space<vmem>>, vector<1x32x128xbf16>
    %11 = vector.shape_cast %10 : vector<1x32x128xbf16> to vector<32x128xbf16>
    %cst_12 = arith.constant dense<0.000000e+00> : vector<15x128xf32>
    %12 = tpu.matmul %9, %11, %cst_12 {dimension_numbers = #tpu.dot_dimension_numbers<[1], [0], [0], [1], [0, 0, 1, 1], [], []>} : vector<15x32xbf16>, vector<32x128xbf16>, vector<15x128xf32> -> vector<15x128xf32>
    %c0_13 = arith.constant 0 : index
    %c0_14 = arith.constant 0 : index
    %13 = vector.load %arg5[%c0_13, %c0_14] : memref<15x128xf32, #tpu.memory_space<vmem>>, vector<15x128xf32>
    %14 = arith.addf %13, %12 : vector<15x128xf32>
    %c0_15 = arith.constant 0 : index
    %c0_16 = arith.constant 0 : index
    %15 = vector.load %arg5[%c0_15, %c0_16] : memref<15x128xf32, #tpu.memory_space<vmem>>, vector<15x128xf32>
    tpu.vector_store %arg5[%c0_15, %c0_16], %14 {strides = array<i32>} : memref<15x128xf32, #tpu.memory_space<vmem>>, vector<15x128xf32>,
    %c0_17 = arith.constant 0 : index
    %c2 = arith.constant 2 : index
    %c0_18 = arith.constant 0 : index
    %16 = vector.load %arg1[%c0_17, %c2, %c0_18] : memref<1x30x32xf32, #tpu.memory_space<vmem>>, vector<1x15x32xf32>
    %17 = vector.shape_cast %16 : vector<1x15x32xf32> to vector<15x32xf32>
    %18 = arith.truncf %17 : vector<15x32xf32> to vector<15x32xbf16>
    %c2_19 = arith.constant 2 : index
    %c0_20 = arith.constant 0 : index
    %c0_21 = arith.constant 0 : index
    %19 = vector.load %arg2[%c2_19, %c0_20, %c0_21] : memref<9x32x128xbf16, #tpu.memory_space<vmem>>, vector<1x32x128xbf16>
    %20 = vector.shape_cast %19 : vector<1x32x128xbf16> to vector<32x128xbf16>
    %cst_22 = arith.constant dense<0.000000e+00> : vector<15x128xf32>
    %21 = tpu.matmul %18, %20, %cst_22 {dimension_numbers = #tpu.dot_dimension_numbers<[1], [0], [0], [1], [0, 0, 1, 1], [], []>} : vector<15x32xbf16>, vector<32x128xbf16>, vector<15x128xf32> -> vector<15x128xf32>
    %c0_23 = arith.constant 0 : index
    %c0_24 = arith.constant 0 : index
    %22 = vector.load %arg5[%c0_23, %c0_24] : memref<15x128xf32, #tpu.memory_space<vmem>>, vector<15x128xf32>
    %23 = arith.addf %22, %21 : vector<15x128xf32>
    %c0_25 = arith.constant 0 : index
    %c0_26 = arith.constant 0 : index
    %24 = vector.load %arg5[%c0_25, %c0_26] : memref<15x128xf32, #tpu.memory_space<vmem>>, vector<15x128xf32>
    tpu.vector_store %arg5[%c0_25, %c0_26], %23 {strides = array<i32>} : memref<15x128xf32, #tpu.memory_space<vmem>>, vector<15x128xf32>,
    %c0_27 = arith.constant 0 : index
    %c5 = arith.constant 5 : index
    %c0_28 = arith.constant 0 : index
    %25 = vector.load %arg1[%c0_27, %c5, %c0_28] : memref<1x30x32xf32, #tpu.memory_space<vmem>>, vector<1x15x32xf32>
    %26 = vector.shape_cast %25 : vector<1x15x32xf32> to vector<15x32xf32>
    %27 = arith.truncf %26 : vector<15x32xf32> to vector<15x32xbf16>
    %c3 = arith.constant 3 : index
    %c0_29 = arith.constant 0 : index
    %c0_30 = arith.constant 0 : index
    %28 = vector.load %arg2[%c3, %c0_29, %c0_30] : memref<9x32x128xbf16, #tpu.memory_space<vmem>>, vector<1x32x128xbf16>
    %29 = vector.shape_cast %28 : vector<1x32x128xbf16> to vector<32x128xbf16>
    %cst_31 = arith.constant dense<0.000000e+00> : vector<15x128xf32>
    %30 = tpu.matmul %27, %29, %cst_31 {dimension_numbers = #tpu.dot_dimension_numbers<[1], [0], [0], [1], [0, 0, 1, 1], [], []>} : vector<15x32xbf16>, vector<32x128xbf16>, vector<15x128xf32> -> vector<15x128xf32>
    %c0_32 = arith.constant 0 : index
    %c0_33 = arith.constant 0 : index
    %31 = vector.load %arg5[%c0_32, %c0_33] : memref<15x128xf32, #tpu.memory_space<vmem>>, vector<15x128xf32>
    %32 = arith.addf %31, %30 : vector<15x128xf32>
    %c0_34 = arith.constant 0 : index
    %c0_35 = arith.constant 0 : index
    %33 = vector.load %arg5[%c0_34, %c0_35] : memref<15x128xf32, #tpu.memory_space<vmem>>, vector<15x128xf32>
    tpu.vector_store %arg5[%c0_34, %c0_35], %32 {strides = array<i32>} : memref<15x128xf32, #tpu.memory_space<vmem>>, vector<15x128xf32>,
    %c0_36 = arith.constant 0 : index
    %c6 = arith.constant 6 : index
    %c0_37 = arith.constant 0 : index
    %34 = vector.load %arg1[%c0_36, %c6, %c0_37] : memref<1x30x32xf32, #tpu.memory_space<vmem>>, vector<1x15x32xf32>
    %35 = vector.shape_cast %34 : vector<1x15x32xf32> to vector<15x32xf32>
    %36 = arith.truncf %35 : vector<15x32xf32> to vector<15x32xbf16>
    %c4 = arith.constant 4 : index
    %c0_38 = arith.constant 0 : index
    %c0_39 = arith.constant 0 : index
    %37 = vector.load %arg2[%c4, %c0_38, %c0_39] : memref<9x32x128xbf16, #tpu.memory_space<vmem>>, vector<1x32x128xbf16>
    %38 = vector.shape_cast %37 : vector<1x32x128xbf16> to vector<32x128xbf16>
    %cst_40 = arith.constant dense<0.000000e+00> : vector<15x128xf32>
    %39 = tpu.matmul %36, %38, %cst_40 {dimension_numbers = #tpu.dot_dimension_numbers<[1], [0], [0], [1], [0, 0, 1, 1], [], []>} : vector<15x32xbf16>, vector<32x128xbf16>, vector<15x128xf32> -> vector<15x128xf32>
    %c0_41 = arith.constant 0 : index
    %c0_42 = arith.constant 0 : index
    %40 = vector.load %arg5[%c0_41, %c0_42] : memref<15x128xf32, #tpu.memory_space<vmem>>, vector<15x128xf32>
    %41 = arith.addf %40, %39 : vector<15x128xf32>
    %c0_43 = arith.constant 0 : index
    %c0_44 = arith.constant 0 : index
    %42 = vector.load %arg5[%c0_43, %c0_44] : memref<15x128xf32, #tpu.memory_space<vmem>>, vector<15x128xf32>
    tpu.vector_store %arg5[%c0_43, %c0_44], %41 {strides = array<i32>} : memref<15x128xf32, #tpu.memory_space<vmem>>, vector<15x128xf32>,
    %c0_45 = arith.constant 0 : index
    %c7 = arith.constant 7 : index
    %c0_46 = arith.constant 0 : index
    %43 = vector.load %arg1[%c0_45, %c7, %c0_46] : memref<1x30x32xf32, #tpu.memory_space<vmem>>, vector<1x15x32xf32>
    %44 = vector.shape_cast %43 : vector<1x15x32xf32> to vector<15x32xf32>
    %45 = arith.truncf %44 : vector<15x32xf32> to vector<15x32xbf16>
    %c5_47 = arith.constant 5 : index
    %c0_48 = arith.constant 0 : index
    %c0_49 = arith.constant 0 : index
    %46 = vector.load %arg2[%c5_47, %c0_48, %c0_49] : memref<9x32x128xbf16, #tpu.memory_space<vmem>>, vector<1x32x128xbf16>
    %47 = vector.shape_cast %46 : vector<1x32x128xbf16> to vector<32x128xbf16>
    %cst_50 = arith.constant dense<0.000000e+00> : vector<15x128xf32>
    %48 = tpu.matmul %45, %47, %cst_50 {dimension_numbers = #tpu.dot_dimension_numbers<[1], [0], [0], [1], [0, 0, 1, 1], [], []>} : vector<15x32xbf16>, vector<32x128xbf16>, vector<15x128xf32> -> vector<15x128xf32>
    %c0_51 = arith.constant 0 : index
    %c0_52 = arith.constant 0 : index
    %49 = vector.load %arg5[%c0_51, %c0_52] : memref<15x128xf32, #tpu.memory_space<vmem>>, vector<15x128xf32>
    %50 = arith.addf %49, %48 : vector<15x128xf32>
    %c0_53 = arith.constant 0 : index
    %c0_54 = arith.constant 0 : index
    %51 = vector.load %arg5[%c0_53, %c0_54] : memref<15x128xf32, #tpu.memory_space<vmem>>, vector<15x128xf32>
    tpu.vector_store %arg5[%c0_53, %c0_54], %50 {strides = array<i32>} : memref<15x128xf32, #tpu.memory_space<vmem>>, vector<15x128xf32>,
    %c0_55 = arith.constant 0 : index
    %c10 = arith.constant 10 : index
    %c0_56 = arith.constant 0 : index
    %52 = vector.load %arg1[%c0_55, %c10, %c0_56] : memref<1x30x32xf32, #tpu.memory_space<vmem>>, vector<1x15x32xf32>
    %53 = vector.shape_cast %52 : vector<1x15x32xf32> to vector<15x32xf32>
    %54 = arith.truncf %53 : vector<15x32xf32> to vector<15x32xbf16>
    %c6_57 = arith.constant 6 : index
    %c0_58 = arith.constant 0 : index
    %c0_59 = arith.constant 0 : index
    %55 = vector.load %arg2[%c6_57, %c0_58, %c0_59] : memref<9x32x128xbf16, #tpu.memory_space<vmem>>, vector<1x32x128xbf16>
    %56 = vector.shape_cast %55 : vector<1x32x128xbf16> to vector<32x128xbf16>
    %cst_60 = arith.constant dense<0.000000e+00> : vector<15x128xf32>
    %57 = tpu.matmul %54, %56, %cst_60 {dimension_numbers = #tpu.dot_dimension_numbers<[1], [0], [0], [1], [0, 0, 1, 1], [], []>} : vector<15x32xbf16>, vector<32x128xbf16>, vector<15x128xf32> -> vector<15x128xf32>
    %c0_61 = arith.constant 0 : index
    %c0_62 = arith.constant 0 : index
    %58 = vector.load %arg5[%c0_61, %c0_62] : memref<15x128xf32, #tpu.memory_space<vmem>>, vector<15x128xf32>
    %59 = arith.addf %58, %57 : vector<15x128xf32>
    %c0_63 = arith.constant 0 : index
    %c0_64 = arith.constant 0 : index
    %60 = vector.load %arg5[%c0_63, %c0_64] : memref<15x128xf32, #tpu.memory_space<vmem>>, vector<15x128xf32>
    tpu.vector_store %arg5[%c0_63, %c0_64], %59 {strides = array<i32>} : memref<15x128xf32, #tpu.memory_space<vmem>>, vector<15x128xf32>,
    %c0_65 = arith.constant 0 : index
    %c11 = arith.constant 11 : index
    %c0_66 = arith.constant 0 : index
    %61 = vector.load %arg1[%c0_65, %c11, %c0_66] : memref<1x30x32xf32, #tpu.memory_space<vmem>>, vector<1x15x32xf32>
    %62 = vector.shape_cast %61 : vector<1x15x32xf32> to vector<15x32xf32>
    %63 = arith.truncf %62 : vector<15x32xf32> to vector<15x32xbf16>
    %c7_67 = arith.constant 7 : index
    %c0_68 = arith.constant 0 : index
    %c0_69 = arith.constant 0 : index
    %64 = vector.load %arg2[%c7_67, %c0_68, %c0_69] : memref<9x32x128xbf16, #tpu.memory_space<vmem>>, vector<1x32x128xbf16>
    %65 = vector.shape_cast %64 : vector<1x32x128xbf16> to vector<32x128xbf16>
    %cst_70 = arith.constant dense<0.000000e+00> : vector<15x128xf32>
    %66 = tpu.matmul %63, %65, %cst_70 {dimension_numbers = #tpu.dot_dimension_numbers<[1], [0], [0], [1], [0, 0, 1, 1], [], []>} : vector<15x32xbf16>, vector<32x128xbf16>, vector<15x128xf32> -> vector<15x128xf32>
    %c0_71 = arith.constant 0 : index
    %c0_72 = arith.constant 0 : index
    %67 = vector.load %arg5[%c0_71, %c0_72] : memref<15x128xf32, #tpu.memory_space<vmem>>, vector<15x128xf32>
    %68 = arith.addf %67, %66 : vector<15x128xf32>
    %c0_73 = arith.constant 0 : index
    %c0_74 = arith.constant 0 : index
    %69 = vector.load %arg5[%c0_73, %c0_74] : memref<15x128xf32, #tpu.memory_space<vmem>>, vector<15x128xf32>
    tpu.vector_store %arg5[%c0_73, %c0_74], %68 {strides = array<i32>} : memref<15x128xf32, #tpu.memory_space<vmem>>, vector<15x128xf32>,
    %c0_75 = arith.constant 0 : index
    %c12 = arith.constant 12 : index
    %c0_76 = arith.constant 0 : index
    %70 = vector.load %arg1[%c0_75, %c12, %c0_76] : memref<1x30x32xf32, #tpu.memory_space<vmem>>, vector<1x15x32xf32>
    %71 = vector.shape_cast %70 : vector<1x15x32xf32> to vector<15x32xf32>
    %72 = arith.truncf %71 : vector<15x32xf32> to vector<15x32xbf16>
    %c8 = arith.constant 8 : index
    %c0_77 = arith.constant 0 : index
    %c0_78 = arith.constant 0 : index
    %73 = vector.load %arg2[%c8, %c0_77, %c0_78] : memref<9x32x128xbf16, #tpu.memory_space<vmem>>, vector<1x32x128xbf16>
    %74 = vector.shape_cast %73 : vector<1x32x128xbf16> to vector<32x128xbf16>
    %cst_79 = arith.constant dense<0.000000e+00> : vector<15x128xf32>
    %75 = tpu.matmul %72, %74, %cst_79 {dimension_numbers = #tpu.dot_dimension_numbers<[1], [0], [0], [1], [0, 0, 1, 1], [], []>} : vector<15x32xbf16>, vector<32x128xbf16>, vector<15x128xf32> -> vector<15x128xf32>
    %c0_80 = arith.constant 0 : index
    %c0_81 = arith.constant 0 : index
    %76 = vector.load %arg5[%c0_80, %c0_81] : memref<15x128xf32, #tpu.memory_space<vmem>>, vector<15x128xf32>
    %77 = arith.addf %76, %75 : vector<15x128xf32>
    %c0_82 = arith.constant 0 : index
    %c0_83 = arith.constant 0 : index
    %78 = vector.load %arg5[%c0_82, %c0_83] : memref<15x128xf32, #tpu.memory_space<vmem>>, vector<15x128xf32>
    tpu.vector_store %arg5[%c0_82, %c0_83], %77 {strides = array<i32>} : memref<15x128xf32, #tpu.memory_space<vmem>>, vector<15x128xf32>,
    %c0_84 = arith.constant 0 : index
    %c0_85 = arith.constant 0 : index
    %79 = vector.load %arg5[%c0_84, %c0_85] : memref<15x128xf32, #tpu.memory_space<vmem>>, vector<15x128xf32>
    %c0_86 = arith.constant 0 : index
    %c0_87 = arith.constant 0 : index
    %80 = vector.load %arg3[%c0_86, %c0_87] : memref<1x128xf32, #tpu.memory_space<vmem>>, vector<1x128xf32>
    %81 = vector.broadcast %80 : vector<1x128xf32> to vector<15x128xf32>
    %82 = arith.addf %79, %81 : vector<15x128xf32>
    %cst_88 = arith.constant 0.000000e+00 : f32
    %83 = vector.broadcast %cst_88 : f32 to vector<15x128xf32>
    %84 = arith.maximumf %82, %83 : vector<15x128xf32>
    %c0_89 = arith.constant 0 : index
    %c0_90 = arith.constant 0 : index
    %85 = vector.load %arg5[%c0_89, %c0_90] : memref<15x128xf32, #tpu.memory_space<vmem>>, vector<15x128xf32>
    tpu.vector_store %arg5[%c0_89, %c0_90], %84 {strides = array<i32>} : memref<15x128xf32, #tpu.memory_space<vmem>>, vector<15x128xf32>,
    %c0_91 = arith.constant 0 : index
    %c0_92 = arith.constant 0 : index
    %86 = vector.load %arg5[%c0_91, %c0_92] : memref<15x128xf32, #tpu.memory_space<vmem>>, vector<15x128xf32>
    %c0_93 = arith.constant 0 : index
    %c0_94 = arith.constant 0 : index
    %c0_95 = arith.constant 0 : index
    %87 = vector.load %arg4[%c0_93, %c0_94, %c0_95] : memref<1x15x128xf32, #tpu.memory_space<vmem>>, vector<1x15x128xf32>
    %88 = vector.shape_cast %87 : vector<1x15x128xf32> to vector<15x128xf32>
    %89 = vector.shape_cast %86 : vector<15x128xf32> to vector<1x15x128xf32>
    tpu.vector_store %arg4[%c0_93, %c0_94, %c0_95], %89 {strides = array<i32>} : memref<1x15x128xf32, #tpu.memory_space<vmem>>, vector<1x15x128xf32>,
    return
  }
  func.func @transform_0(%arg0: i32) -> (i32, i32, i32) {
    %c0_i32 = arith.constant 0 : i32
    %c0_i32_0 = arith.constant 0 : i32
    %c0_i32_1 = arith.constant 0 : i32
    return %arg0, %c0_i32, %c0_i32_0 : i32, i32, i32
  }
  func.func @transform_1(%arg0: i32) -> (i32, i32, i32) {
    %c0_i32 = arith.constant 0 : i32
    %c0_i32_0 = arith.constant 0 : i32
    %c0_i32_1 = arith.constant 0 : i32
    %c0_i32_2 = arith.constant 0 : i32
    return %c0_i32, %c0_i32_0, %c0_i32_1 : i32, i32, i32
  }
  func.func @transform_2(%arg0: i32) -> (i32, i32) {
    %c0_i32 = arith.constant 0 : i32
    %c0_i32_0 = arith.constant 0 : i32
    %c0_i32_1 = arith.constant 0 : i32
    return %c0_i32, %c0_i32_0 : i32, i32
  }
  func.func @transform_3(%arg0: i32) -> (i32, i32, i32) {
    %c0_i32 = arith.constant 0 : i32
    %c0_i32_0 = arith.constant 0 : i32
    %c0_i32_1 = arith.constant 0 : i32
    return %arg0, %c0_i32, %c0_i32_0 : i32, i32, i32
  }
}

module attributes {stable_mosaic.version = 11 : i64} {
  func.func @_conv_relu_pool_kernel(%arg0: i32, %arg1: memref<1x30x48xf32, #tpu.memory_space<vmem>>, %arg2: memref<9x48x128xbf16, #tpu.memory_space<vmem>>, %arg3: memref<1x128xf32, #tpu.memory_space<vmem>>, %arg4: memref<1x15x128xf32, #tpu.memory_space<vmem>>, %arg5: memref<15x128xf32, #tpu.memory_space<vmem>>) attributes {dimension_semantics = [#tpu.dimension_semantics<parallel>], iteration_bounds = array<i64: 2>, scalar_prefetch = 0 : i64, scratch_operands = 1 : i64, tpu.core_type = #tpu.core_type<tc>, window_params = [{transform_indices = @transform_0, window_bounds = array<i64: 1, 30, 48>}, {pipeline_mode = #tpu.pipeline_mode<synchronous>, transform_indices = @transform_1, window_bounds = array<i64: 9, 48, 128>}, {pipeline_mode = #tpu.pipeline_mode<synchronous>, transform_indices = @transform_2, window_bounds = array<i64: 1, 128>}, {transform_indices = @transform_3, window_bounds = array<i64: 1, 15, 128>}]} {
    %c0 = arith.constant 0 : index
    %c0_0 = arith.constant 0 : index
    %c0_1 = arith.constant 0 : index
    %0 = vector.load %arg1[%c0, %c0_0, %c0_1] : memref<1x30x48xf32, #tpu.memory_space<vmem>>, vector<1x15x48xf32>
    %1 = vector.shape_cast %0 : vector<1x15x48xf32> to vector<15x48xf32>
    %2 = arith.truncf %1 : vector<15x48xf32> to vector<15x48xbf16>
    %c0_2 = arith.constant 0 : index
    %c0_3 = arith.constant 0 : index
    %c0_4 = arith.constant 0 : index
    %3 = vector.load %arg2[%c0_2, %c0_3, %c0_4] : memref<9x48x128xbf16, #tpu.memory_space<vmem>>, vector<1x48x128xbf16>
    %4 = vector.shape_cast %3 : vector<1x48x128xbf16> to vector<48x128xbf16>
    %cst = arith.constant dense<0.000000e+00> : vector<15x128xf32>
    %5 = tpu.matmul %2, %4, %cst {dimension_numbers = #tpu.dot_dimension_numbers<[1], [0], [0], [1], [0, 0, 1, 1], [], []>} : vector<15x48xbf16>, vector<48x128xbf16>, vector<15x128xf32> -> vector<15x128xf32>
    %c0_5 = arith.constant 0 : index
    %c0_6 = arith.constant 0 : index
    %6 = vector.load %arg5[%c0_5, %c0_6] : memref<15x128xf32, #tpu.memory_space<vmem>>, vector<15x128xf32>
    tpu.vector_store %arg5[%c0_5, %c0_6], %5 {strides = array<i32>} : memref<15x128xf32, #tpu.memory_space<vmem>>, vector<15x128xf32>,
    %c0_7 = arith.constant 0 : index
    %c1 = arith.constant 1 : index
    %c0_8 = arith.constant 0 : index
    %7 = vector.load %arg1[%c0_7, %c1, %c0_8] : memref<1x30x48xf32, #tpu.memory_space<vmem>>, vector<1x15x48xf32>
    %8 = vector.shape_cast %7 : vector<1x15x48xf32> to vector<15x48xf32>
    %9 = arith.truncf %8 : vector<15x48xf32> to vector<15x48xbf16>
    %c1_9 = arith.constant 1 : index
    %c0_10 = arith.constant 0 : index
    %c0_11 = arith.constant 0 : index
    %10 = vector.load %arg2[%c1_9, %c0_10, %c0_11] : memref<9x48x128xbf16, #tpu.memory_space<vmem>>, vector<1x48x128xbf16>
    %11 = vector.shape_cast %10 : vector<1x48x128xbf16> to vector<48x128xbf16>
    %cst_12 = arith.constant dense<0.000000e+00> : vector<15x128xf32>
    %12 = tpu.matmul %9, %11, %cst_12 {dimension_numbers = #tpu.dot_dimension_numbers<[1], [0], [0], [1], [0, 0, 1, 1], [], []>} : vector<15x48xbf16>, vector<48x128xbf16>, vector<15x128xf32> -> vector<15x128xf32>
    %c0_13 = arith.constant 0 : index
    %c0_14 = arith.constant 0 : index
    %13 = vector.load %arg5[%c0_13, %c0_14] : memref<15x128xf32, #tpu.memory_space<vmem>>, vector<15x128xf32>
    %14 = arith.addf %13, %12 : vector<15x128xf32>
    %c0_15 = arith.constant 0 : index
    %c0_16 = arith.constant 0 : index
    %15 = vector.load %arg5[%c0_15, %c0_16] : memref<15x128xf32, #tpu.memory_space<vmem>>, vector<15x128xf32>
    tpu.vector_store %arg5[%c0_15, %c0_16], %14 {strides = array<i32>} : memref<15x128xf32, #tpu.memory_space<vmem>>, vector<15x128xf32>,
    %c0_17 = arith.constant 0 : index
    %c2 = arith.constant 2 : index
    %c0_18 = arith.constant 0 : index
    %16 = vector.load %arg1[%c0_17, %c2, %c0_18] : memref<1x30x48xf32, #tpu.memory_space<vmem>>, vector<1x15x48xf32>
    %17 = vector.shape_cast %16 : vector<1x15x48xf32> to vector<15x48xf32>
    %18 = arith.truncf %17 : vector<15x48xf32> to vector<15x48xbf16>
    %c2_19 = arith.constant 2 : index
    %c0_20 = arith.constant 0 : index
    %c0_21 = arith.constant 0 : index
    %19 = vector.load %arg2[%c2_19, %c0_20, %c0_21] : memref<9x48x128xbf16, #tpu.memory_space<vmem>>, vector<1x48x128xbf16>
    %20 = vector.shape_cast %19 : vector<1x48x128xbf16> to vector<48x128xbf16>
    %cst_22 = arith.constant dense<0.000000e+00> : vector<15x128xf32>
    %21 = tpu.matmul %18, %20, %cst_22 {dimension_numbers = #tpu.dot_dimension_numbers<[1], [0], [0], [1], [0, 0, 1, 1], [], []>} : vector<15x48xbf16>, vector<48x128xbf16>, vector<15x128xf32> -> vector<15x128xf32>
    %c0_23 = arith.constant 0 : index
    %c0_24 = arith.constant 0 : index
    %22 = vector.load %arg5[%c0_23, %c0_24] : memref<15x128xf32, #tpu.memory_space<vmem>>, vector<15x128xf32>
    %23 = arith.addf %22, %21 : vector<15x128xf32>
    %c0_25 = arith.constant 0 : index
    %c0_26 = arith.constant 0 : index
    %24 = vector.load %arg5[%c0_25, %c0_26] : memref<15x128xf32, #tpu.memory_space<vmem>>, vector<15x128xf32>
    tpu.vector_store %arg5[%c0_25, %c0_26], %23 {strides = array<i32>} : memref<15x128xf32, #tpu.memory_space<vmem>>, vector<15x128xf32>,
    %c0_27 = arith.constant 0 : index
    %c5 = arith.constant 5 : index
    %c0_28 = arith.constant 0 : index
    %25 = vector.load %arg1[%c0_27, %c5, %c0_28] : memref<1x30x48xf32, #tpu.memory_space<vmem>>, vector<1x15x48xf32>
    %26 = vector.shape_cast %25 : vector<1x15x48xf32> to vector<15x48xf32>
    %27 = arith.truncf %26 : vector<15x48xf32> to vector<15x48xbf16>
    %c3 = arith.constant 3 : index
    %c0_29 = arith.constant 0 : index
    %c0_30 = arith.constant 0 : index
    %28 = vector.load %arg2[%c3, %c0_29, %c0_30] : memref<9x48x128xbf16, #tpu.memory_space<vmem>>, vector<1x48x128xbf16>
    %29 = vector.shape_cast %28 : vector<1x48x128xbf16> to vector<48x128xbf16>
    %cst_31 = arith.constant dense<0.000000e+00> : vector<15x128xf32>
    %30 = tpu.matmul %27, %29, %cst_31 {dimension_numbers = #tpu.dot_dimension_numbers<[1], [0], [0], [1], [0, 0, 1, 1], [], []>} : vector<15x48xbf16>, vector<48x128xbf16>, vector<15x128xf32> -> vector<15x128xf32>
    %c0_32 = arith.constant 0 : index
    %c0_33 = arith.constant 0 : index
    %31 = vector.load %arg5[%c0_32, %c0_33] : memref<15x128xf32, #tpu.memory_space<vmem>>, vector<15x128xf32>
    %32 = arith.addf %31, %30 : vector<15x128xf32>
    %c0_34 = arith.constant 0 : index
    %c0_35 = arith.constant 0 : index
    %33 = vector.load %arg5[%c0_34, %c0_35] : memref<15x128xf32, #tpu.memory_space<vmem>>, vector<15x128xf32>
    tpu.vector_store %arg5[%c0_34, %c0_35], %32 {strides = array<i32>} : memref<15x128xf32, #tpu.memory_space<vmem>>, vector<15x128xf32>,
    %c0_36 = arith.constant 0 : index
    %c6 = arith.constant 6 : index
    %c0_37 = arith.constant 0 : index
    %34 = vector.load %arg1[%c0_36, %c6, %c0_37] : memref<1x30x48xf32, #tpu.memory_space<vmem>>, vector<1x15x48xf32>
    %35 = vector.shape_cast %34 : vector<1x15x48xf32> to vector<15x48xf32>
    %36 = arith.truncf %35 : vector<15x48xf32> to vector<15x48xbf16>
    %c4 = arith.constant 4 : index
    %c0_38 = arith.constant 0 : index
    %c0_39 = arith.constant 0 : index
    %37 = vector.load %arg2[%c4, %c0_38, %c0_39] : memref<9x48x128xbf16, #tpu.memory_space<vmem>>, vector<1x48x128xbf16>
    %38 = vector.shape_cast %37 : vector<1x48x128xbf16> to vector<48x128xbf16>
    %cst_40 = arith.constant dense<0.000000e+00> : vector<15x128xf32>
    %39 = tpu.matmul %36, %38, %cst_40 {dimension_numbers = #tpu.dot_dimension_numbers<[1], [0], [0], [1], [0, 0, 1, 1], [], []>} : vector<15x48xbf16>, vector<48x128xbf16>, vector<15x128xf32> -> vector<15x128xf32>
    %c0_41 = arith.constant 0 : index
    %c0_42 = arith.constant 0 : index
    %40 = vector.load %arg5[%c0_41, %c0_42] : memref<15x128xf32, #tpu.memory_space<vmem>>, vector<15x128xf32>
    %41 = arith.addf %40, %39 : vector<15x128xf32>
    %c0_43 = arith.constant 0 : index
    %c0_44 = arith.constant 0 : index
    %42 = vector.load %arg5[%c0_43, %c0_44] : memref<15x128xf32, #tpu.memory_space<vmem>>, vector<15x128xf32>
    tpu.vector_store %arg5[%c0_43, %c0_44], %41 {strides = array<i32>} : memref<15x128xf32, #tpu.memory_space<vmem>>, vector<15x128xf32>,
    %c0_45 = arith.constant 0 : index
    %c7 = arith.constant 7 : index
    %c0_46 = arith.constant 0 : index
    %43 = vector.load %arg1[%c0_45, %c7, %c0_46] : memref<1x30x48xf32, #tpu.memory_space<vmem>>, vector<1x15x48xf32>
    %44 = vector.shape_cast %43 : vector<1x15x48xf32> to vector<15x48xf32>
    %45 = arith.truncf %44 : vector<15x48xf32> to vector<15x48xbf16>
    %c5_47 = arith.constant 5 : index
    %c0_48 = arith.constant 0 : index
    %c0_49 = arith.constant 0 : index
    %46 = vector.load %arg2[%c5_47, %c0_48, %c0_49] : memref<9x48x128xbf16, #tpu.memory_space<vmem>>, vector<1x48x128xbf16>
    %47 = vector.shape_cast %46 : vector<1x48x128xbf16> to vector<48x128xbf16>
    %cst_50 = arith.constant dense<0.000000e+00> : vector<15x128xf32>
    %48 = tpu.matmul %45, %47, %cst_50 {dimension_numbers = #tpu.dot_dimension_numbers<[1], [0], [0], [1], [0, 0, 1, 1], [], []>} : vector<15x48xbf16>, vector<48x128xbf16>, vector<15x128xf32> -> vector<15x128xf32>
    %c0_51 = arith.constant 0 : index
    %c0_52 = arith.constant 0 : index
    %49 = vector.load %arg5[%c0_51, %c0_52] : memref<15x128xf32, #tpu.memory_space<vmem>>, vector<15x128xf32>
    %50 = arith.addf %49, %48 : vector<15x128xf32>
    %c0_53 = arith.constant 0 : index
    %c0_54 = arith.constant 0 : index
    %51 = vector.load %arg5[%c0_53, %c0_54] : memref<15x128xf32, #tpu.memory_space<vmem>>, vector<15x128xf32>
    tpu.vector_store %arg5[%c0_53, %c0_54], %50 {strides = array<i32>} : memref<15x128xf32, #tpu.memory_space<vmem>>, vector<15x128xf32>,
    %c0_55 = arith.constant 0 : index
    %c10 = arith.constant 10 : index
    %c0_56 = arith.constant 0 : index
    %52 = vector.load %arg1[%c0_55, %c10, %c0_56] : memref<1x30x48xf32, #tpu.memory_space<vmem>>, vector<1x15x48xf32>
    %53 = vector.shape_cast %52 : vector<1x15x48xf32> to vector<15x48xf32>
    %54 = arith.truncf %53 : vector<15x48xf32> to vector<15x48xbf16>
    %c6_57 = arith.constant 6 : index
    %c0_58 = arith.constant 0 : index
    %c0_59 = arith.constant 0 : index
    %55 = vector.load %arg2[%c6_57, %c0_58, %c0_59] : memref<9x48x128xbf16, #tpu.memory_space<vmem>>, vector<1x48x128xbf16>
    %56 = vector.shape_cast %55 : vector<1x48x128xbf16> to vector<48x128xbf16>
    %cst_60 = arith.constant dense<0.000000e+00> : vector<15x128xf32>
    %57 = tpu.matmul %54, %56, %cst_60 {dimension_numbers = #tpu.dot_dimension_numbers<[1], [0], [0], [1], [0, 0, 1, 1], [], []>} : vector<15x48xbf16>, vector<48x128xbf16>, vector<15x128xf32> -> vector<15x128xf32>
    %c0_61 = arith.constant 0 : index
    %c0_62 = arith.constant 0 : index
    %58 = vector.load %arg5[%c0_61, %c0_62] : memref<15x128xf32, #tpu.memory_space<vmem>>, vector<15x128xf32>
    %59 = arith.addf %58, %57 : vector<15x128xf32>
    %c0_63 = arith.constant 0 : index
    %c0_64 = arith.constant 0 : index
    %60 = vector.load %arg5[%c0_63, %c0_64] : memref<15x128xf32, #tpu.memory_space<vmem>>, vector<15x128xf32>
    tpu.vector_store %arg5[%c0_63, %c0_64], %59 {strides = array<i32>} : memref<15x128xf32, #tpu.memory_space<vmem>>, vector<15x128xf32>,
    %c0_65 = arith.constant 0 : index
    %c11 = arith.constant 11 : index
    %c0_66 = arith.constant 0 : index
    %61 = vector.load %arg1[%c0_65, %c11, %c0_66] : memref<1x30x48xf32, #tpu.memory_space<vmem>>, vector<1x15x48xf32>
    %62 = vector.shape_cast %61 : vector<1x15x48xf32> to vector<15x48xf32>
    %63 = arith.truncf %62 : vector<15x48xf32> to vector<15x48xbf16>
    %c7_67 = arith.constant 7 : index
    %c0_68 = arith.constant 0 : index
    %c0_69 = arith.constant 0 : index
    %64 = vector.load %arg2[%c7_67, %c0_68, %c0_69] : memref<9x48x128xbf16, #tpu.memory_space<vmem>>, vector<1x48x128xbf16>
    %65 = vector.shape_cast %64 : vector<1x48x128xbf16> to vector<48x128xbf16>
    %cst_70 = arith.constant dense<0.000000e+00> : vector<15x128xf32>
    %66 = tpu.matmul %63, %65, %cst_70 {dimension_numbers = #tpu.dot_dimension_numbers<[1], [0], [0], [1], [0, 0, 1, 1], [], []>} : vector<15x48xbf16>, vector<48x128xbf16>, vector<15x128xf32> -> vector<15x128xf32>
    %c0_71 = arith.constant 0 : index
    %c0_72 = arith.constant 0 : index
    %67 = vector.load %arg5[%c0_71, %c0_72] : memref<15x128xf32, #tpu.memory_space<vmem>>, vector<15x128xf32>
    %68 = arith.addf %67, %66 : vector<15x128xf32>
    %c0_73 = arith.constant 0 : index
    %c0_74 = arith.constant 0 : index
    %69 = vector.load %arg5[%c0_73, %c0_74] : memref<15x128xf32, #tpu.memory_space<vmem>>, vector<15x128xf32>
    tpu.vector_store %arg5[%c0_73, %c0_74], %68 {strides = array<i32>} : memref<15x128xf32, #tpu.memory_space<vmem>>, vector<15x128xf32>,
    %c0_75 = arith.constant 0 : index
    %c12 = arith.constant 12 : index
    %c0_76 = arith.constant 0 : index
    %70 = vector.load %arg1[%c0_75, %c12, %c0_76] : memref<1x30x48xf32, #tpu.memory_space<vmem>>, vector<1x15x48xf32>
    %71 = vector.shape_cast %70 : vector<1x15x48xf32> to vector<15x48xf32>
    %72 = arith.truncf %71 : vector<15x48xf32> to vector<15x48xbf16>
    %c8 = arith.constant 8 : index
    %c0_77 = arith.constant 0 : index
    %c0_78 = arith.constant 0 : index
    %73 = vector.load %arg2[%c8, %c0_77, %c0_78] : memref<9x48x128xbf16, #tpu.memory_space<vmem>>, vector<1x48x128xbf16>
    %74 = vector.shape_cast %73 : vector<1x48x128xbf16> to vector<48x128xbf16>
    %cst_79 = arith.constant dense<0.000000e+00> : vector<15x128xf32>
    %75 = tpu.matmul %72, %74, %cst_79 {dimension_numbers = #tpu.dot_dimension_numbers<[1], [0], [0], [1], [0, 0, 1, 1], [], []>} : vector<15x48xbf16>, vector<48x128xbf16>, vector<15x128xf32> -> vector<15x128xf32>
    %c0_80 = arith.constant 0 : index
    %c0_81 = arith.constant 0 : index
    %76 = vector.load %arg5[%c0_80, %c0_81] : memref<15x128xf32, #tpu.memory_space<vmem>>, vector<15x128xf32>
    %77 = arith.addf %76, %75 : vector<15x128xf32>
    %c0_82 = arith.constant 0 : index
    %c0_83 = arith.constant 0 : index
    %78 = vector.load %arg5[%c0_82, %c0_83] : memref<15x128xf32, #tpu.memory_space<vmem>>, vector<15x128xf32>
    tpu.vector_store %arg5[%c0_82, %c0_83], %77 {strides = array<i32>} : memref<15x128xf32, #tpu.memory_space<vmem>>, vector<15x128xf32>,
    %c0_84 = arith.constant 0 : index
    %c0_85 = arith.constant 0 : index
    %79 = vector.load %arg5[%c0_84, %c0_85] : memref<15x128xf32, #tpu.memory_space<vmem>>, vector<15x128xf32>
    %c0_86 = arith.constant 0 : index
    %c0_87 = arith.constant 0 : index
    %80 = vector.load %arg3[%c0_86, %c0_87] : memref<1x128xf32, #tpu.memory_space<vmem>>, vector<1x128xf32>
    %81 = vector.broadcast %80 : vector<1x128xf32> to vector<15x128xf32>
    %82 = arith.addf %79, %81 : vector<15x128xf32>
    %cst_88 = arith.constant 0.000000e+00 : f32
    %83 = vector.broadcast %cst_88 : f32 to vector<15x128xf32>
    %84 = arith.maximumf %82, %83 : vector<15x128xf32>
    %c0_89 = arith.constant 0 : index
    %c0_90 = arith.constant 0 : index
    %85 = vector.load %arg5[%c0_89, %c0_90] : memref<15x128xf32, #tpu.memory_space<vmem>>, vector<15x128xf32>
    tpu.vector_store %arg5[%c0_89, %c0_90], %84 {strides = array<i32>} : memref<15x128xf32, #tpu.memory_space<vmem>>, vector<15x128xf32>,
    %c0_91 = arith.constant 0 : index
    %c0_92 = arith.constant 0 : index
    %86 = vector.load %arg5[%c0_91, %c0_92] : memref<15x128xf32, #tpu.memory_space<vmem>>, vector<15x128xf32>
    %c0_93 = arith.constant 0 : index
    %c0_94 = arith.constant 0 : index
    %c0_95 = arith.constant 0 : index
    %87 = vector.load %arg4[%c0_93, %c0_94, %c0_95] : memref<1x15x128xf32, #tpu.memory_space<vmem>>, vector<1x15x128xf32>
    %88 = vector.shape_cast %87 : vector<1x15x128xf32> to vector<15x128xf32>
    %89 = vector.shape_cast %86 : vector<15x128xf32> to vector<1x15x128xf32>
    tpu.vector_store %arg4[%c0_93, %c0_94, %c0_95], %89 {strides = array<i32>} : memref<1x15x128xf32, #tpu.memory_space<vmem>>, vector<1x15x128xf32>,
    return
  }
  func.func @transform_0(%arg0: i32) -> (i32, i32, i32) {
    %c0_i32 = arith.constant 0 : i32
    %c0_i32_0 = arith.constant 0 : i32
    %c0_i32_1 = arith.constant 0 : i32
    return %arg0, %c0_i32, %c0_i32_0 : i32, i32, i32
  }
  func.func @transform_1(%arg0: i32) -> (i32, i32, i32) {
    %c0_i32 = arith.constant 0 : i32
    %c0_i32_0 = arith.constant 0 : i32
    %c0_i32_1 = arith.constant 0 : i32
    %c0_i32_2 = arith.constant 0 : i32
    return %c0_i32, %c0_i32_0, %c0_i32_1 : i32, i32, i32
  }
  func.func @transform_2(%arg0: i32) -> (i32, i32) {
    %c0_i32 = arith.constant 0 : i32
    %c0_i32_0 = arith.constant 0 : i32
    %c0_i32_1 = arith.constant 0 : i32
    return %c0_i32, %c0_i32_0 : i32, i32
  }
  func.func @transform_3(%arg0: i32) -> (i32, i32, i32) {
    %c0_i32 = arith.constant 0 : i32
    %c0_i32_0 = arith.constant 0 : i32
    %c0_i32_1 = arith.constant 0 : i32
    return %arg0, %c0_i32, %c0_i32_0 : i32, i32, i32
  }
}

module attributes {stable_mosaic.version = 11 : i64} {
  func.func @_conv_relu_pool_kernel(%arg0: i32, %arg1: memref<1x35x32xf32, #tpu.memory_space<vmem>>, %arg2: memref<9x32x128xbf16, #tpu.memory_space<vmem>>, %arg3: memref<1x128xf32, #tpu.memory_space<vmem>>, %arg4: memref<1x5x128xf32, #tpu.memory_space<vmem>>, %arg5: memref<20x128xf32, #tpu.memory_space<vmem>>) attributes {dimension_semantics = [#tpu.dimension_semantics<parallel>], iteration_bounds = array<i64: 2>, scalar_prefetch = 0 : i64, scratch_operands = 1 : i64, tpu.core_type = #tpu.core_type<tc>, window_params = [{transform_indices = @transform_0, window_bounds = array<i64: 1, 35, 32>}, {pipeline_mode = #tpu.pipeline_mode<synchronous>, transform_indices = @transform_1, window_bounds = array<i64: 9, 32, 128>}, {pipeline_mode = #tpu.pipeline_mode<synchronous>, transform_indices = @transform_2, window_bounds = array<i64: 1, 128>}, {transform_indices = @transform_3, window_bounds = array<i64: 1, 5, 128>}]} {
    %c0 = arith.constant 0 : index
    %c0_0 = arith.constant 0 : index
    %c0_1 = arith.constant 0 : index
    %0 = vector.load %arg1[%c0, %c0_0, %c0_1] : memref<1x35x32xf32, #tpu.memory_space<vmem>>, vector<1x20x32xf32>
    %1 = vector.shape_cast %0 : vector<1x20x32xf32> to vector<20x32xf32>
    %2 = arith.truncf %1 : vector<20x32xf32> to vector<20x32xbf16>
    %c0_2 = arith.constant 0 : index
    %c0_3 = arith.constant 0 : index
    %c0_4 = arith.constant 0 : index
    %3 = vector.load %arg2[%c0_2, %c0_3, %c0_4] : memref<9x32x128xbf16, #tpu.memory_space<vmem>>, vector<1x32x128xbf16>
    %4 = vector.shape_cast %3 : vector<1x32x128xbf16> to vector<32x128xbf16>
    %cst = arith.constant dense<0.000000e+00> : vector<20x128xf32>
    %5 = tpu.matmul %2, %4, %cst {dimension_numbers = #tpu.dot_dimension_numbers<[1], [0], [0], [1], [0, 0, 1, 1], [], []>} : vector<20x32xbf16>, vector<32x128xbf16>, vector<20x128xf32> -> vector<20x128xf32>
    %c0_5 = arith.constant 0 : index
    %c0_6 = arith.constant 0 : index
    %6 = vector.load %arg5[%c0_5, %c0_6] : memref<20x128xf32, #tpu.memory_space<vmem>>, vector<20x128xf32>
    tpu.vector_store %arg5[%c0_5, %c0_6], %5 {strides = array<i32>} : memref<20x128xf32, #tpu.memory_space<vmem>>, vector<20x128xf32>,
    %c0_7 = arith.constant 0 : index
    %c1 = arith.constant 1 : index
    %c0_8 = arith.constant 0 : index
    %7 = vector.load %arg1[%c0_7, %c1, %c0_8] : memref<1x35x32xf32, #tpu.memory_space<vmem>>, vector<1x20x32xf32>
    %8 = vector.shape_cast %7 : vector<1x20x32xf32> to vector<20x32xf32>
    %9 = arith.truncf %8 : vector<20x32xf32> to vector<20x32xbf16>
    %c1_9 = arith.constant 1 : index
    %c0_10 = arith.constant 0 : index
    %c0_11 = arith.constant 0 : index
    %10 = vector.load %arg2[%c1_9, %c0_10, %c0_11] : memref<9x32x128xbf16, #tpu.memory_space<vmem>>, vector<1x32x128xbf16>
    %11 = vector.shape_cast %10 : vector<1x32x128xbf16> to vector<32x128xbf16>
    %cst_12 = arith.constant dense<0.000000e+00> : vector<20x128xf32>
    %12 = tpu.matmul %9, %11, %cst_12 {dimension_numbers = #tpu.dot_dimension_numbers<[1], [0], [0], [1], [0, 0, 1, 1], [], []>} : vector<20x32xbf16>, vector<32x128xbf16>, vector<20x128xf32> -> vector<20x128xf32>
    %c0_13 = arith.constant 0 : index
    %c0_14 = arith.constant 0 : index
    %13 = vector.load %arg5[%c0_13, %c0_14] : memref<20x128xf32, #tpu.memory_space<vmem>>, vector<20x128xf32>
    %14 = arith.addf %13, %12 : vector<20x128xf32>
    %c0_15 = arith.constant 0 : index
    %c0_16 = arith.constant 0 : index
    %15 = vector.load %arg5[%c0_15, %c0_16] : memref<20x128xf32, #tpu.memory_space<vmem>>, vector<20x128xf32>
    tpu.vector_store %arg5[%c0_15, %c0_16], %14 {strides = array<i32>} : memref<20x128xf32, #tpu.memory_space<vmem>>, vector<20x128xf32>,
    %c0_17 = arith.constant 0 : index
    %c2 = arith.constant 2 : index
    %c0_18 = arith.constant 0 : index
    %16 = vector.load %arg1[%c0_17, %c2, %c0_18] : memref<1x35x32xf32, #tpu.memory_space<vmem>>, vector<1x20x32xf32>
    %17 = vector.shape_cast %16 : vector<1x20x32xf32> to vector<20x32xf32>
    %18 = arith.truncf %17 : vector<20x32xf32> to vector<20x32xbf16>
    %c2_19 = arith.constant 2 : index
    %c0_20 = arith.constant 0 : index
    %c0_21 = arith.constant 0 : index
    %19 = vector.load %arg2[%c2_19, %c0_20, %c0_21] : memref<9x32x128xbf16, #tpu.memory_space<vmem>>, vector<1x32x128xbf16>
    %20 = vector.shape_cast %19 : vector<1x32x128xbf16> to vector<32x128xbf16>
    %cst_22 = arith.constant dense<0.000000e+00> : vector<20x128xf32>
    %21 = tpu.matmul %18, %20, %cst_22 {dimension_numbers = #tpu.dot_dimension_numbers<[1], [0], [0], [1], [0, 0, 1, 1], [], []>} : vector<20x32xbf16>, vector<32x128xbf16>, vector<20x128xf32> -> vector<20x128xf32>
    %c0_23 = arith.constant 0 : index
    %c0_24 = arith.constant 0 : index
    %22 = vector.load %arg5[%c0_23, %c0_24] : memref<20x128xf32, #tpu.memory_space<vmem>>, vector<20x128xf32>
    %23 = arith.addf %22, %21 : vector<20x128xf32>
    %c0_25 = arith.constant 0 : index
    %c0_26 = arith.constant 0 : index
    %24 = vector.load %arg5[%c0_25, %c0_26] : memref<20x128xf32, #tpu.memory_space<vmem>>, vector<20x128xf32>
    tpu.vector_store %arg5[%c0_25, %c0_26], %23 {strides = array<i32>} : memref<20x128xf32, #tpu.memory_space<vmem>>, vector<20x128xf32>,
    %c0_27 = arith.constant 0 : index
    %c5 = arith.constant 5 : index
    %c0_28 = arith.constant 0 : index
    %25 = vector.load %arg1[%c0_27, %c5, %c0_28] : memref<1x35x32xf32, #tpu.memory_space<vmem>>, vector<1x20x32xf32>
    %26 = vector.shape_cast %25 : vector<1x20x32xf32> to vector<20x32xf32>
    %27 = arith.truncf %26 : vector<20x32xf32> to vector<20x32xbf16>
    %c3 = arith.constant 3 : index
    %c0_29 = arith.constant 0 : index
    %c0_30 = arith.constant 0 : index
    %28 = vector.load %arg2[%c3, %c0_29, %c0_30] : memref<9x32x128xbf16, #tpu.memory_space<vmem>>, vector<1x32x128xbf16>
    %29 = vector.shape_cast %28 : vector<1x32x128xbf16> to vector<32x128xbf16>
    %cst_31 = arith.constant dense<0.000000e+00> : vector<20x128xf32>
    %30 = tpu.matmul %27, %29, %cst_31 {dimension_numbers = #tpu.dot_dimension_numbers<[1], [0], [0], [1], [0, 0, 1, 1], [], []>} : vector<20x32xbf16>, vector<32x128xbf16>, vector<20x128xf32> -> vector<20x128xf32>
    %c0_32 = arith.constant 0 : index
    %c0_33 = arith.constant 0 : index
    %31 = vector.load %arg5[%c0_32, %c0_33] : memref<20x128xf32, #tpu.memory_space<vmem>>, vector<20x128xf32>
    %32 = arith.addf %31, %30 : vector<20x128xf32>
    %c0_34 = arith.constant 0 : index
    %c0_35 = arith.constant 0 : index
    %33 = vector.load %arg5[%c0_34, %c0_35] : memref<20x128xf32, #tpu.memory_space<vmem>>, vector<20x128xf32>
    tpu.vector_store %arg5[%c0_34, %c0_35], %32 {strides = array<i32>} : memref<20x128xf32, #tpu.memory_space<vmem>>, vector<20x128xf32>,
    %c0_36 = arith.constant 0 : index
    %c6 = arith.constant 6 : index
    %c0_37 = arith.constant 0 : index
    %34 = vector.load %arg1[%c0_36, %c6, %c0_37] : memref<1x35x32xf32, #tpu.memory_space<vmem>>, vector<1x20x32xf32>
    %35 = vector.shape_cast %34 : vector<1x20x32xf32> to vector<20x32xf32>
    %36 = arith.truncf %35 : vector<20x32xf32> to vector<20x32xbf16>
    %c4 = arith.constant 4 : index
    %c0_38 = arith.constant 0 : index
    %c0_39 = arith.constant 0 : index
    %37 = vector.load %arg2[%c4, %c0_38, %c0_39] : memref<9x32x128xbf16, #tpu.memory_space<vmem>>, vector<1x32x128xbf16>
    %38 = vector.shape_cast %37 : vector<1x32x128xbf16> to vector<32x128xbf16>
    %cst_40 = arith.constant dense<0.000000e+00> : vector<20x128xf32>
    %39 = tpu.matmul %36, %38, %cst_40 {dimension_numbers = #tpu.dot_dimension_numbers<[1], [0], [0], [1], [0, 0, 1, 1], [], []>} : vector<20x32xbf16>, vector<32x128xbf16>, vector<20x128xf32> -> vector<20x128xf32>
    %c0_41 = arith.constant 0 : index
    %c0_42 = arith.constant 0 : index
    %40 = vector.load %arg5[%c0_41, %c0_42] : memref<20x128xf32, #tpu.memory_space<vmem>>, vector<20x128xf32>
    %41 = arith.addf %40, %39 : vector<20x128xf32>
    %c0_43 = arith.constant 0 : index
    %c0_44 = arith.constant 0 : index
    %42 = vector.load %arg5[%c0_43, %c0_44] : memref<20x128xf32, #tpu.memory_space<vmem>>, vector<20x128xf32>
    tpu.vector_store %arg5[%c0_43, %c0_44], %41 {strides = array<i32>} : memref<20x128xf32, #tpu.memory_space<vmem>>, vector<20x128xf32>,
    %c0_45 = arith.constant 0 : index
    %c7 = arith.constant 7 : index
    %c0_46 = arith.constant 0 : index
    %43 = vector.load %arg1[%c0_45, %c7, %c0_46] : memref<1x35x32xf32, #tpu.memory_space<vmem>>, vector<1x20x32xf32>
    %44 = vector.shape_cast %43 : vector<1x20x32xf32> to vector<20x32xf32>
    %45 = arith.truncf %44 : vector<20x32xf32> to vector<20x32xbf16>
    %c5_47 = arith.constant 5 : index
    %c0_48 = arith.constant 0 : index
    %c0_49 = arith.constant 0 : index
    %46 = vector.load %arg2[%c5_47, %c0_48, %c0_49] : memref<9x32x128xbf16, #tpu.memory_space<vmem>>, vector<1x32x128xbf16>
    %47 = vector.shape_cast %46 : vector<1x32x128xbf16> to vector<32x128xbf16>
    %cst_50 = arith.constant dense<0.000000e+00> : vector<20x128xf32>
    %48 = tpu.matmul %45, %47, %cst_50 {dimension_numbers = #tpu.dot_dimension_numbers<[1], [0], [0], [1], [0, 0, 1, 1], [], []>} : vector<20x32xbf16>, vector<32x128xbf16>, vector<20x128xf32> -> vector<20x128xf32>
    %c0_51 = arith.constant 0 : index
    %c0_52 = arith.constant 0 : index
    %49 = vector.load %arg5[%c0_51, %c0_52] : memref<20x128xf32, #tpu.memory_space<vmem>>, vector<20x128xf32>
    %50 = arith.addf %49, %48 : vector<20x128xf32>
    %c0_53 = arith.constant 0 : index
    %c0_54 = arith.constant 0 : index
    %51 = vector.load %arg5[%c0_53, %c0_54] : memref<20x128xf32, #tpu.memory_space<vmem>>, vector<20x128xf32>
    tpu.vector_store %arg5[%c0_53, %c0_54], %50 {strides = array<i32>} : memref<20x128xf32, #tpu.memory_space<vmem>>, vector<20x128xf32>,
    %c0_55 = arith.constant 0 : index
    %c10 = arith.constant 10 : index
    %c0_56 = arith.constant 0 : index
    %52 = vector.load %arg1[%c0_55, %c10, %c0_56] : memref<1x35x32xf32, #tpu.memory_space<vmem>>, vector<1x20x32xf32>
    %53 = vector.shape_cast %52 : vector<1x20x32xf32> to vector<20x32xf32>
    %54 = arith.truncf %53 : vector<20x32xf32> to vector<20x32xbf16>
    %c6_57 = arith.constant 6 : index
    %c0_58 = arith.constant 0 : index
    %c0_59 = arith.constant 0 : index
    %55 = vector.load %arg2[%c6_57, %c0_58, %c0_59] : memref<9x32x128xbf16, #tpu.memory_space<vmem>>, vector<1x32x128xbf16>
    %56 = vector.shape_cast %55 : vector<1x32x128xbf16> to vector<32x128xbf16>
    %cst_60 = arith.constant dense<0.000000e+00> : vector<20x128xf32>
    %57 = tpu.matmul %54, %56, %cst_60 {dimension_numbers = #tpu.dot_dimension_numbers<[1], [0], [0], [1], [0, 0, 1, 1], [], []>} : vector<20x32xbf16>, vector<32x128xbf16>, vector<20x128xf32> -> vector<20x128xf32>
    %c0_61 = arith.constant 0 : index
    %c0_62 = arith.constant 0 : index
    %58 = vector.load %arg5[%c0_61, %c0_62] : memref<20x128xf32, #tpu.memory_space<vmem>>, vector<20x128xf32>
    %59 = arith.addf %58, %57 : vector<20x128xf32>
    %c0_63 = arith.constant 0 : index
    %c0_64 = arith.constant 0 : index
    %60 = vector.load %arg5[%c0_63, %c0_64] : memref<20x128xf32, #tpu.memory_space<vmem>>, vector<20x128xf32>
    tpu.vector_store %arg5[%c0_63, %c0_64], %59 {strides = array<i32>} : memref<20x128xf32, #tpu.memory_space<vmem>>, vector<20x128xf32>,
    %c0_65 = arith.constant 0 : index
    %c11 = arith.constant 11 : index
    %c0_66 = arith.constant 0 : index
    %61 = vector.load %arg1[%c0_65, %c11, %c0_66] : memref<1x35x32xf32, #tpu.memory_space<vmem>>, vector<1x20x32xf32>
    %62 = vector.shape_cast %61 : vector<1x20x32xf32> to vector<20x32xf32>
    %63 = arith.truncf %62 : vector<20x32xf32> to vector<20x32xbf16>
    %c7_67 = arith.constant 7 : index
    %c0_68 = arith.constant 0 : index
    %c0_69 = arith.constant 0 : index
    %64 = vector.load %arg2[%c7_67, %c0_68, %c0_69] : memref<9x32x128xbf16, #tpu.memory_space<vmem>>, vector<1x32x128xbf16>
    %65 = vector.shape_cast %64 : vector<1x32x128xbf16> to vector<32x128xbf16>
    %cst_70 = arith.constant dense<0.000000e+00> : vector<20x128xf32>
    %66 = tpu.matmul %63, %65, %cst_70 {dimension_numbers = #tpu.dot_dimension_numbers<[1], [0], [0], [1], [0, 0, 1, 1], [], []>} : vector<20x32xbf16>, vector<32x128xbf16>, vector<20x128xf32> -> vector<20x128xf32>
    %c0_71 = arith.constant 0 : index
    %c0_72 = arith.constant 0 : index
    %67 = vector.load %arg5[%c0_71, %c0_72] : memref<20x128xf32, #tpu.memory_space<vmem>>, vector<20x128xf32>
    %68 = arith.addf %67, %66 : vector<20x128xf32>
    %c0_73 = arith.constant 0 : index
    %c0_74 = arith.constant 0 : index
    %69 = vector.load %arg5[%c0_73, %c0_74] : memref<20x128xf32, #tpu.memory_space<vmem>>, vector<20x128xf32>
    tpu.vector_store %arg5[%c0_73, %c0_74], %68 {strides = array<i32>} : memref<20x128xf32, #tpu.memory_space<vmem>>, vector<20x128xf32>,
    %c0_75 = arith.constant 0 : index
    %c12 = arith.constant 12 : index
    %c0_76 = arith.constant 0 : index
    %70 = vector.load %arg1[%c0_75, %c12, %c0_76] : memref<1x35x32xf32, #tpu.memory_space<vmem>>, vector<1x20x32xf32>
    %71 = vector.shape_cast %70 : vector<1x20x32xf32> to vector<20x32xf32>
    %72 = arith.truncf %71 : vector<20x32xf32> to vector<20x32xbf16>
    %c8 = arith.constant 8 : index
    %c0_77 = arith.constant 0 : index
    %c0_78 = arith.constant 0 : index
    %73 = vector.load %arg2[%c8, %c0_77, %c0_78] : memref<9x32x128xbf16, #tpu.memory_space<vmem>>, vector<1x32x128xbf16>
    %74 = vector.shape_cast %73 : vector<1x32x128xbf16> to vector<32x128xbf16>
    %cst_79 = arith.constant dense<0.000000e+00> : vector<20x128xf32>
    %75 = tpu.matmul %72, %74, %cst_79 {dimension_numbers = #tpu.dot_dimension_numbers<[1], [0], [0], [1], [0, 0, 1, 1], [], []>} : vector<20x32xbf16>, vector<32x128xbf16>, vector<20x128xf32> -> vector<20x128xf32>
    %c0_80 = arith.constant 0 : index
    %c0_81 = arith.constant 0 : index
    %76 = vector.load %arg5[%c0_80, %c0_81] : memref<20x128xf32, #tpu.memory_space<vmem>>, vector<20x128xf32>
    %77 = arith.addf %76, %75 : vector<20x128xf32>
    %c0_82 = arith.constant 0 : index
    %c0_83 = arith.constant 0 : index
    %78 = vector.load %arg5[%c0_82, %c0_83] : memref<20x128xf32, #tpu.memory_space<vmem>>, vector<20x128xf32>
    tpu.vector_store %arg5[%c0_82, %c0_83], %77 {strides = array<i32>} : memref<20x128xf32, #tpu.memory_space<vmem>>, vector<20x128xf32>,
    %c0_84 = arith.constant 0 : index
    %c0_85 = arith.constant 0 : index
    %79 = vector.load %arg5[%c0_84, %c0_85] : memref<20x128xf32, #tpu.memory_space<vmem>>, vector<20x128xf32>
    %c0_86 = arith.constant 0 : index
    %c0_87 = arith.constant 0 : index
    %80 = vector.load %arg3[%c0_86, %c0_87] : memref<1x128xf32, #tpu.memory_space<vmem>>, vector<1x128xf32>
    %81 = vector.broadcast %80 : vector<1x128xf32> to vector<20x128xf32>
    %82 = arith.addf %79, %81 : vector<20x128xf32>
    %cst_88 = arith.constant 0.000000e+00 : f32
    %83 = vector.broadcast %cst_88 : f32 to vector<20x128xf32>
    %84 = arith.maximumf %82, %83 : vector<20x128xf32>
    %c0_89 = arith.constant 0 : index
    %c0_90 = arith.constant 0 : index
    %85 = vector.load %arg5[%c0_89, %c0_90] : memref<20x128xf32, #tpu.memory_space<vmem>>, vector<20x128xf32>
    tpu.vector_store %arg5[%c0_89, %c0_90], %84 {strides = array<i32>} : memref<20x128xf32, #tpu.memory_space<vmem>>, vector<20x128xf32>,
    %c0_91 = arith.constant 0 : index
    %c0_92 = arith.constant 0 : index
    %86 = vector.load %arg5[%c0_91, %c0_92] : memref<20x128xf32, #tpu.memory_space<vmem>>, vector<5x128xf32>
    %c1_93 = arith.constant 1 : index
    %c0_94 = arith.constant 0 : index
    %87 = vector.load %arg5[%c1_93, %c0_94] : memref<20x128xf32, #tpu.memory_space<vmem>>, vector<5x128xf32>
    %88 = arith.maximumf %86, %87 : vector<5x128xf32>
    %c2_95 = arith.constant 2 : index
    %c0_96 = arith.constant 0 : index
    %89 = vector.load %arg5[%c2_95, %c0_96] : memref<20x128xf32, #tpu.memory_space<vmem>>, vector<5x128xf32>
    %90 = arith.maximumf %88, %89 : vector<5x128xf32>
    %c5_97 = arith.constant 5 : index
    %c0_98 = arith.constant 0 : index
    %91 = vector.load %arg5[%c5_97, %c0_98] : memref<20x128xf32, #tpu.memory_space<vmem>>, vector<5x128xf32>
    %92 = arith.maximumf %90, %91 : vector<5x128xf32>
    %c6_99 = arith.constant 6 : index
    %c0_100 = arith.constant 0 : index
    %93 = vector.load %arg5[%c6_99, %c0_100] : memref<20x128xf32, #tpu.memory_space<vmem>>, vector<5x128xf32>
    %94 = arith.maximumf %92, %93 : vector<5x128xf32>
    %c7_101 = arith.constant 7 : index
    %c0_102 = arith.constant 0 : index
    %95 = vector.load %arg5[%c7_101, %c0_102] : memref<20x128xf32, #tpu.memory_space<vmem>>, vector<5x128xf32>
    %96 = arith.maximumf %94, %95 : vector<5x128xf32>
    %c10_103 = arith.constant 10 : index
    %c0_104 = arith.constant 0 : index
    %97 = vector.load %arg5[%c10_103, %c0_104] : memref<20x128xf32, #tpu.memory_space<vmem>>, vector<5x128xf32>
    %98 = arith.maximumf %96, %97 : vector<5x128xf32>
    %c11_105 = arith.constant 11 : index
    %c0_106 = arith.constant 0 : index
    %99 = vector.load %arg5[%c11_105, %c0_106] : memref<20x128xf32, #tpu.memory_space<vmem>>, vector<5x128xf32>
    %100 = arith.maximumf %98, %99 : vector<5x128xf32>
    %c12_107 = arith.constant 12 : index
    %c0_108 = arith.constant 0 : index
    %101 = vector.load %arg5[%c12_107, %c0_108] : memref<20x128xf32, #tpu.memory_space<vmem>>, vector<5x128xf32>
    %102 = arith.maximumf %100, %101 : vector<5x128xf32>
    %c0_109 = arith.constant 0 : index
    %c0_110 = arith.constant 0 : index
    %c0_111 = arith.constant 0 : index
    %103 = vector.load %arg4[%c0_109, %c0_110, %c0_111] : memref<1x5x128xf32, #tpu.memory_space<vmem>>, vector<1x5x128xf32>
    %104 = vector.shape_cast %103 : vector<1x5x128xf32> to vector<5x128xf32>
    %105 = vector.shape_cast %102 : vector<5x128xf32> to vector<1x5x128xf32>
    tpu.vector_store %arg4[%c0_109, %c0_110, %c0_111], %105 {strides = array<i32>} : memref<1x5x128xf32, #tpu.memory_space<vmem>>, vector<1x5x128xf32>,
    return
  }
  func.func @transform_0(%arg0: i32) -> (i32, i32, i32) {
    %c0_i32 = arith.constant 0 : i32
    %c0_i32_0 = arith.constant 0 : i32
    %c0_i32_1 = arith.constant 0 : i32
    return %arg0, %c0_i32, %c0_i32_0 : i32, i32, i32
  }
  func.func @transform_1(%arg0: i32) -> (i32, i32, i32) {
    %c0_i32 = arith.constant 0 : i32
    %c0_i32_0 = arith.constant 0 : i32
    %c0_i32_1 = arith.constant 0 : i32
    %c0_i32_2 = arith.constant 0 : i32
    return %c0_i32, %c0_i32_0, %c0_i32_1 : i32, i32, i32
  }
  func.func @transform_2(%arg0: i32) -> (i32, i32) {
    %c0_i32 = arith.constant 0 : i32
    %c0_i32_0 = arith.constant 0 : i32
    %c0_i32_1 = arith.constant 0 : i32
    return %c0_i32, %c0_i32_0 : i32, i32
  }
  func.func @transform_3(%arg0: i32) -> (i32, i32, i32) {
    %c0_i32 = arith.constant 0 : i32
    %c0_i32_0 = arith.constant 0 : i32
    %c0_i32_1 = arith.constant 0 : i32
    return %arg0, %c0_i32, %c0_i32_0 : i32, i32, i32
  }
}

module attributes {stable_mosaic.version = 11 : i64} {
  func.func @_head_kernel(%arg0: memref<2x32xf32, #tpu.memory_space<vmem>>, %arg1: memref<32x128xbf16, #tpu.memory_space<vmem>>, %arg2: memref<1x128xf32, #tpu.memory_space<vmem>>, %arg3: memref<1x128xf32, #tpu.memory_space<vmem>>, %arg4: memref<1x128xf32, #tpu.memory_space<vmem>>, %arg5: memref<128x128xbf16, #tpu.memory_space<vmem>>, %arg6: memref<1x128xf32, #tpu.memory_space<vmem>>, %arg7: memref<2x128xf32, #tpu.memory_space<vmem>>) attributes {dimension_semantics = [], scalar_prefetch = 0 : i64, scratch_operands = 0 : i64, tpu.core_type = #tpu.core_type<tc>} {
    %c0 = arith.constant 0 : index
    %c0_0 = arith.constant 0 : index
    %0 = vector.load %arg0[%c0, %c0_0] : memref<2x32xf32, #tpu.memory_space<vmem>>, vector<2x32xf32>
    %1 = arith.truncf %0 : vector<2x32xf32> to vector<2x32xbf16>
    %c0_1 = arith.constant 0 : index
    %c0_2 = arith.constant 0 : index
    %2 = vector.load %arg1[%c0_1, %c0_2] : memref<32x128xbf16, #tpu.memory_space<vmem>>, vector<32x128xbf16>
    %cst = arith.constant dense<0.000000e+00> : vector<2x128xf32>
    %3 = tpu.matmul %1, %2, %cst {dimension_numbers = #tpu.dot_dimension_numbers<[1], [0], [0], [1], [0, 0, 1, 1], [], []>} : vector<2x32xbf16>, vector<32x128xbf16>, vector<2x128xf32> -> vector<2x128xf32>
    %c0_3 = arith.constant 0 : index
    %c0_4 = arith.constant 0 : index
    %4 = vector.load %arg2[%c0_3, %c0_4] : memref<1x128xf32, #tpu.memory_space<vmem>>, vector<1x128xf32>
    %5 = vector.broadcast %4 : vector<1x128xf32> to vector<2x128xf32>
    %6 = arith.addf %3, %5 : vector<2x128xf32>
    %cst_5 = arith.constant 0.000000e+00 : f32
    %7 = vector.broadcast %cst_5 : f32 to vector<2x128xf32>
    %8 = arith.maximumf %6, %7 : vector<2x128xf32>
    %cst_6 = arith.constant dense<0.000000e+00> : vector<128xf32>
    %9 = vector.multi_reduction <add>, %8, %cst_6 [0] : vector<2x128xf32> to vector<128xf32>
    %10 = vector.shape_cast %9 : vector<128xf32> to vector<1x128xf32>
    %cst_7 = arith.constant 5.000000e-01 : f32
    %11 = vector.broadcast %cst_7 : f32 to vector<1x128xf32>
    %12 = arith.mulf %10, %11 : vector<1x128xf32>
    %13 = arith.mulf %8, %8 : vector<2x128xf32>
    %cst_8 = arith.constant dense<0.000000e+00> : vector<128xf32>
    %14 = vector.multi_reduction <add>, %13, %cst_8 [0] : vector<2x128xf32> to vector<128xf32>
    %15 = vector.shape_cast %14 : vector<128xf32> to vector<1x128xf32>
    %cst_9 = arith.constant 5.000000e-01 : f32
    %16 = vector.broadcast %cst_9 : f32 to vector<1x128xf32>
    %17 = arith.mulf %15, %16 : vector<1x128xf32>
    %18 = arith.mulf %12, %12 : vector<1x128xf32>
    %19 = arith.subf %17, %18 : vector<1x128xf32>
    %cst_10 = arith.constant 0.000000e+00 : f32
    %20 = vector.broadcast %cst_10 : f32 to vector<1x128xf32>
    %21 = arith.maximumf %19, %20 : vector<1x128xf32>
    %22 = vector.broadcast %12 : vector<1x128xf32> to vector<2x128xf32>
    %23 = arith.subf %8, %22 : vector<2x128xf32>
    %cst_11 = arith.constant 9.99999974E-6 : f32
    %24 = vector.broadcast %cst_11 : f32 to vector<1x128xf32>
    %25 = arith.addf %21, %24 : vector<1x128xf32>
    %26 = math.rsqrt %25 : vector<1x128xf32>
    %27 = vector.broadcast %26 : vector<1x128xf32> to vector<2x128xf32>
    %28 = arith.mulf %23, %27 : vector<2x128xf32>
    %c0_12 = arith.constant 0 : index
    %c0_13 = arith.constant 0 : index
    %29 = vector.load %arg3[%c0_12, %c0_13] : memref<1x128xf32, #tpu.memory_space<vmem>>, vector<1x128xf32>
    %30 = vector.broadcast %29 : vector<1x128xf32> to vector<2x128xf32>
    %31 = arith.mulf %28, %30 : vector<2x128xf32>
    %c0_14 = arith.constant 0 : index
    %c0_15 = arith.constant 0 : index
    %32 = vector.load %arg4[%c0_14, %c0_15] : memref<1x128xf32, #tpu.memory_space<vmem>>, vector<1x128xf32>
    %33 = vector.broadcast %32 : vector<1x128xf32> to vector<2x128xf32>
    %34 = arith.addf %31, %33 : vector<2x128xf32>
    %35 = arith.truncf %34 : vector<2x128xf32> to vector<2x128xbf16>
    %c0_16 = arith.constant 0 : index
    %c0_17 = arith.constant 0 : index
    %36 = vector.load %arg5[%c0_16, %c0_17] : memref<128x128xbf16, #tpu.memory_space<vmem>>, vector<128x128xbf16>
    %cst_18 = arith.constant dense<0.000000e+00> : vector<2x128xf32>
    %37 = tpu.matmul %35, %36, %cst_18 {dimension_numbers = #tpu.dot_dimension_numbers<[1], [0], [0], [1], [0, 0, 1, 1], [], []>} : vector<2x128xbf16>, vector<128x128xbf16>, vector<2x128xf32> -> vector<2x128xf32>
    %c0_19 = arith.constant 0 : index
    %c0_20 = arith.constant 0 : index
    %38 = vector.load %arg6[%c0_19, %c0_20] : memref<1x128xf32, #tpu.memory_space<vmem>>, vector<1x128xf32>
    %39 = vector.broadcast %38 : vector<1x128xf32> to vector<2x128xf32>
    %40 = arith.addf %37, %39 : vector<2x128xf32>
    %c0_21 = arith.constant 0 : index
    %c0_22 = arith.constant 0 : index
    %41 = vector.load %arg7[%c0_21, %c0_22] : memref<2x128xf32, #tpu.memory_space<vmem>>, vector<2x128xf32>
    tpu.vector_store %arg7[%c0_21, %c0_22], %40 {strides = array<i32>} : memref<2x128xf32, #tpu.memory_space<vmem>>, vector<2x128xf32>,
    return
  }
}

</mosaic_0001>

<bundles_post_ra>
// kernel: image_features_forward.8
= control target key start
LH: loop header
LB: loop body
LE: loop exit
PB: predicated region body
PF: predicated region fallthrough
CT: control target
= control target key end

     0   :  { %s807_s12 = smov 0   ;;  %s914_s0 = inlined_call_operand.vmem [shape: f32[2,30,32], index: 0, kind: input, shape index: {}]   ;;  %s915_s1 = inlined_call_operand.vmem [shape: bf16[9,32,128], index: 1, kind: input, shape index: {}]   ;;  %s916_s2 = inlined_call_operand.vmem [shape: f32[1,128], index: 2, kind: input, shape index: {}]   ;;  %s917_s3 = inlined_call_operand.vmem [shape: f32[2,15,128], index: 3, kind: output, shape index: {}]  }
   0x1 LB: > { %s626_s13 = sadd.s32 4294967295, %s785_s12   ;;  %p630_p0 = scmp.ge.s32.totalorder %s785_s12, 1  ;;  %s785_s12 = sphi %s807_s12, %s13_s12  }
   0x2   : > { %p137_p1 = scmp.lt.s32.totalorder %s785_s12, 3 }
   0x4   : > { %p138_p2 = pnand %p630_p0, %p137_p1 }
   0x5   : > { %p161_p3 = scmp.lt.s32.totalorder (!%p138_p2), %s626_s13, 1 }
   0x6   : > { %141 = sbr.rel (%p138_p2) target bundleno = 254 (0xfe), region = 32 }
   0xb   : > { %v753_v0 = vld [vmem:[%s915_s1 + $0x8] sm:$0xff]  ;;  %v755_v1 = vld [vmem:[%s915_s1 + $0x18] sm:$0xff]  ;;  %v752_v3 = vld [vmem:[%s915_s1] sm:$0xff]  ;;  %s919_s13 = smov (!%p161_p3, %s626_s13), 1  ;;  %vm191_vm0 = vcmask 261120  }
   0xc   : > { %v757_v2 = vld [vmem:[%s915_s1 + $0x28] sm:$0xff]  ;;  %201 = vmatpush.bf16.msra.mxu0 %v753_v0  ;;  %240 = vmatpush.bf16.msra.mxu1 %v755_v1  ;;  %v754_v4 = vld [vmem:[%s915_s1 + $0x10] sm:$0xff]  ;;  %v759_v5 = vld [vmem:[%s915_s1 + $0x38] sm:$0xff]  ;;  %s750_s30 = sshll.u32 %s919_s13, 5  ;;  %s751_s4 = sshll.u32 %s919_s13, 4 }
   0xd   : > { %283 = vmatpush.bf16.msra.mxu2 %v757_v2  ;;  %v756_v6 = vld [vmem:[%s915_s1 + $0x20] sm:$0xff]  ;;  %v761_v7 = vld [vmem:[%s915_s1 + $0x48] sm:$0xff]  ;;  %326 = vmatpush.bf16.msra.mxu3 %v759_v5  ;;  %v758_v8 = vld [vmem:[%s915_s1 + $0x30] sm:$0xff]  ;;  %s851_s10 = scalar_lea.vmem %s914_s0, %s750_s30  ;;  %s170_s7 = scalar_lea.vmem %s917_s3, %s751_s4 }
   0xe   : > { %v763_v9 = vld [vmem:[%s915_s1 + $0x58] sm:$0xff]  ;;  %v760_v10 = vld [vmem:[%s915_s1 + $0x40] sm:$0xff]  ;;  %v765_v11 = vld [vmem:[%s915_s1 + $0x68] sm:$0xff] }
   0xf   : > { %v172_v12 = vld [vmem:[%s851_s10] sm:$0xff]  ;;  %v173_v13 = vld [vmem:[%s851_s10 + $0x8] sm:$0x7f]  ;;  %v762_v15 = vld [vmem:[%s915_s1 + $0x50] sm:$0xff] }
  0x10   : > { %202 = vmatpush.bf16.msra.mxu0 %v752_v3  ;;  %241 = vmatpush.bf16.msra.mxu1 %v754_v4  ;;  %v211_v14 = vld [vmem:[%s851_s10 + $0x1] sm:$0xff]  ;;  %v174_v16 = vpack.c.bf16 %v173_v13, %v172_v12  ;;  %v212_v17 = vld [vmem:[%s851_s10 + $0x9] sm:$0x7f]  ;;  %v767_v24 = vld [vmem:[%s915_s1 + $0x78] sm:$0xff] }
  0x11   : > { %284 = vmatpush.bf16.msra.mxu2 %v756_v6  ;;  %v254_v18 = vld [vmem:[%s851_s10 + $0x2] sm:$0xff]  ;;  %v255_v19 = vld [vmem:[%s851_s10 + $0xa] sm:$0x7f]  ;;  %v213_v20 = vpack.c.bf16 %v212_v17, %v211_v14  ;;  %327 = vmatpush.bf16.msra.mxu3 %v758_v8  ;;  %v427_v35 = vld [vmem:[%s851_s10 + $0x12] sm:$0x7f] }
  0x12   : > { %v256_v21 = vpack.c.bf16 %v255_v19, %v254_v18  ;;  %v297_v22 = vld [vmem:[%s851_s10 + $0x5] sm:$0xff]  ;;  %v298_v23 = vld [vmem:[%s851_s10 + $0xd] sm:$0x7f]  ;;  %v513_v43 = vld [vmem:[%s851_s10 + $0x14] sm:$0x7f] }
  0x13   : > { %643 = vmatmul.msk.bf16.vlgmr.msra.gmra.mxu0 %vm191_vm0, %v174_v16  ;;  %v299_v25 = vpack.c.bf16 %v298_v23, %v297_v22  ;;  %v764_v26 = vld [vmem:[%s915_s1 + $0x60] sm:$0xff]  ;;  %v769_v27 = vld [vmem:[%s915_s1 + $0x88] sm:$0xff]  ;;  %656 = vmatmul.msk.bf16.vlgmr.msra.gmra.mxu1 %vm191_vm0, %v213_v20  ;;  %v766_v28 = vld [vmem:[%s915_s1 + $0x70] sm:$0xff] }
  0x14   : > { %369 = vmatpush.bf16.msrb.mxu0 %v761_v7  ;;  %412 = vmatpush.bf16.msrb.mxu1 %v763_v9  ;;  %v768_v29 = vld [vmem:[%s915_s1 + $0x80] sm:$0xff]  ;;  %v341_v31 = vld [vmem:[%s851_s10 + $0xe] sm:$0x7f] }
  0x15   : > { %455 = vmatpush.bf16.msrb.mxu2 %v765_v11  ;;  %682 = vmatmul.msk.bf16.vlgmr.msra.gmra.mxu3 %vm191_vm0, %v299_v25  ;;  %v340_v30 = vld [vmem:[%s851_s10 + $0x6] sm:$0xff]  ;;  %v384_v33 = vld [vmem:[%s851_s10 + $0xf] sm:$0x7f]  ;;  %v778_v5 = vld [vmem:[%s916_s2] ss:$0 sm:$0xff] }
  0x16   : > { %669 = vmatmul.msk.bf16.vlgmr.msra.gmra.mxu2 %vm191_vm0, %v256_v21  ;;  %498 = vmatpush.bf16.msrb.mxu3 %v767_v24  ;;  %v383_v32 = vld [vmem:[%s851_s10 + $0x7] sm:$0xff]  ;;  %v470_v37 = vld [vmem:[%s851_s10 + $0x13] sm:$0x7f]  ;;  %v342_v38 = vpack.c.bf16 %v341_v31, %v340_v30 }
  0x17   : > { %v426_v34 = vld [vmem:[%s851_s10 + $0xa] sm:$0xff]  ;;  %v385_v39 = vpack.c.bf16 %v384_v33, %v383_v32 }
  0x18   : > { %370 = vmatpush.bf16.msrb.mxu0 %v760_v10  ;;  %413 = vmatpush.bf16.msrb.mxu1 %v762_v15  ;;  %v469_v36 = vld [vmem:[%s851_s10 + $0xb] sm:$0xff]  ;;  %v428_v40 = vpack.c.bf16 %v427_v35, %v426_v34 }
  0x19   : > { %456 = vmatpush.bf16.msrb.mxu2 %v764_v26  ;;  %v471_v41 = vpack.c.bf16 %v470_v37, %v469_v36  ;;  %v512_v42 = vld [vmem:[%s851_s10 + $0xc] sm:$0xff] }
  0x1a   : > { %499 = vmatpush.bf16.msrb.mxu3 %v766_v28  ;;  %v514_v44 = vpack.c.bf16 %v513_v43, %v512_v42 }
  0x1c   : > { %541 = vmatpush.bf16.msra.mxu0 %v769_v27 }
  0x20   : > { %542 = vmatpush.bf16.msra.mxu0 %v768_v29 }
  0x23   : > { %695 = vmatmul.msk.bf16.vlgmr.msrb.gmra.mxu0 %vm191_vm0, %v342_v38  ;;  %708 = vmatmul.msk.bf16.vlgmr.msrb.gmra.mxu1 %vm191_vm0, %v385_v39 }
  0x25   : > { %734 = vmatmul.msk.bf16.vlgmr.msrb.gmra.mxu3 %vm191_vm0, %v471_v41 }
  0x26   : > { %721 = vmatmul.msk.bf16.vlgmr.msrb.gmra.mxu2 %vm191_vm0, %v428_v40 }
  0x33   : > { %747 = vmatmul.msk.bf16.vlgmr.msra.gmra.mxu0 %vm191_vm0, %v514_v44 }
  0x90   : > { %v204_v45 = vpop.f32.mrf.mxu0  ;;  %v243_v46 = vpop.f32.mrf.mxu1 }
  0x91   : > { %v250_v50 = vadd.f32 %v243_v46, %v204_v45 }
  0x98   : > { %v206_v48 = vpop.f32.mrf.mxu0  ;;  %v329_v49 = vpop.f32.mrf.mxu3 }
  0x99   : > { %v286_v47 = vpop.f32.mrf.mxu2  ;;  %210 = vst [vmem:[#allocation2 + $0x8] sm:$0x7f] %v206_v48  ;;  %v245_v51 = vpop.f32.mrf.mxu1 }
  0x9a   : > { %v293_v52 = vadd.f32 %v286_v47, %v250_v50 }
  0x9c   : > { %v336_v58 = vadd.f32 %v329_v49, %v293_v52 }
  0xa0   : > { %v249_v54 = vld [vmem:[#allocation2 + $0x8] sm:$0x7f]  ;;  %v372_v55 = vpop.f32.mrf.mxu0  ;;  %v331_v57 = vpop.f32.mrf.mxu3 }
  0xa1   : > { %v288_v53 = vpop.f32.mrf.mxu2  ;;  %v251_v56 = vadd.f32 %v249_v54, %v245_v51  ;;  %v379_v59 = vadd.f32 %v372_v55, %v336_v58  ;;  %v415_v60 = vpop.f32.mrf.mxu1 }
  0xa3   : > { %253 = vst [vmem:[#allocation2 + $0x8] sm:$0x7f] %v251_v56  ;;  %v422_v63 = vadd.f32 %v415_v60, %v379_v59 }
  0xa8   : > { %v374_v61 = vpop.f32.mrf.mxu0  ;;  %v501_v3 = vpop.f32.mrf.mxu3 }
  0xa9   : > { %v458_v62 = vpop.f32.mrf.mxu2  ;;  %v417_v14 = vpop.f32.mrf.mxu1 }
  0xaa   : > { %v292_v0 = vld [vmem:[#allocation2 + $0x8] sm:$0x7f]  ;;  %v465_v2 = vadd.f32 %v458_v62, %v422_v63 }
  0xab   : > { %v294_v1 = vadd.f32 %v292_v0, %v288_v53 }
  0xac   : > { %v508_v4 = vadd.f32 %v501_v3, %v465_v2 }
  0xad   : > { %296 = vst [vmem:[#allocation2 + $0x8] sm:$0x7f] %v294_v1 }
  0xb0   : > { %v544_v6 = vpop.f32.mrf.mxu0  ;;  %v503_v20 = vpop.f32.mrf.mxu3 }
  0xb1   : > { %v551_v7 = vadd.f32 %v544_v6, %v508_v4  ;;  %v460_v17 = vpop.f32.mrf.mxu2 }
  0xb3   : > { %v561_v8 = vadd.f32 %v778_v5, %v551_v7 }
  0xb4   : > { %v335_v9 = vld [vmem:[#allocation2 + $0x8] sm:$0x7f] }
  0xb5   : > { %v337_v10 = vadd.f32 %v335_v9, %v331_v57  ;;  %v563_v11 = vmax.f32 %v561_v8, 0.0 }
  0xb7   : > { %339 = vst [vmem:[#allocation2 + $0x8] sm:$0x7f] %v337_v10 }
  0xb8   : > { %569 = vst [vmem:[%s170_s7] sm:$0xff] %v563_v11  ;;  %v546_v23 = vpop.f32.mrf.mxu0 }
  0xbe   : > { %v378_v12 = vld [vmem:[#allocation2 + $0x8] sm:$0x7f] }
  0xbf   : > { %v380_v13 = vadd.f32 %v378_v12, %v374_v61 }
  0xc1   : > { %382 = vst [vmem:[#allocation2 + $0x8] sm:$0x7f] %v380_v13 }
  0xc8   : > { %v421_v15 = vld [vmem:[#allocation2 + $0x8] sm:$0x7f] }
  0xc9   : > { %v423_v16 = vadd.f32 %v421_v15, %v417_v14 }
  0xcb   : > { %425 = vst [vmem:[#allocation2 + $0x8] sm:$0x7f] %v423_v16 }
  0xd2   : > { %v464_v18 = vld [vmem:[#allocation2 + $0x8] sm:$0x7f] }
  0xd3   : > { %v466_v19 = vadd.f32 %v464_v18, %v460_v17 }
  0xd5   : > { %468 = vst [vmem:[#allocation2 + $0x8] sm:$0x7f] %v466_v19 }
  0xdc   : > { %v507_v21 = vld [vmem:[#allocation2 + $0x8] sm:$0x7f] }
  0xdd   : > { %v509_v22 = vadd.f32 %v507_v21, %v503_v20 }
  0xdf   : > { %511 = vst [vmem:[#allocation2 + $0x8] sm:$0x7f] %v509_v22 }
  0xe6   : > { %v550_v24 = vld [vmem:[#allocation2 + $0x8] sm:$0x7f] }
  0xe7   : > { %v552_v25 = vadd.f32 %v550_v24, %v546_v23 }
  0xe9   : > { %554 = vst [vmem:[#allocation2 + $0x8] sm:$0x7f] %v552_v25 }
  0xf0   : > { %v556_v26 = vld [vmem:[#allocation2 + $0x8] sm:$0x7f] }
  0xf1   : > { %v562_v27 = vadd.f32 %v778_v5, %v556_v26 }
  0xf3   : > { %v564_v28 = vmax.f32 %v562_v27, 0.0 }
  0xf5   : > { %566 = vst [vmem:[#allocation2 + $0x8] sm:$0x7f] %v564_v28 }
  0xfc   : > { %v568_v29 = vld [vmem:[#allocation2 + $0x8] sm:$0x7f] }
  0xfd   : > { %570 = vst [vmem:[%s170_s7 + $0x8] sm:$0x7f] %v568_v29 }
  0xfe PF: > { %s13_s12 = sadd.s32 1, %s785_s12  }
  0xff   : > { %p10_p4 = scmp.ge.s32.totalorder %s13_s12, 4  }
 0x101   :  { %12 = sbr.rel (!%p10_p4) target bundleno = 1 (0x1), region = 70 }

// kernel: image_features_forward.6
= control target key start
LH: loop header
LB: loop body
LE: loop exit
PB: predicated region body
PF: predicated region fallthrough
CT: control target
= control target key end

     0   :  { %s4004_s12 = smov 0   ;;  %s5186_s0 = inlined_call_operand.vmem [shape: f32[2,323,48], index: 0, kind: input, shape index: {}]   ;;  %s5187_s1 = inlined_call_operand.vmem [shape: bf16[9,48,128], index: 1, kind: input, shape index: {}]   ;;  %s5188_s2 = inlined_call_operand.vmem [shape: f32[1,128], index: 2, kind: input, shape index: {}]   ;;  %s5189_s3 = inlined_call_operand.vmem [shape: f32[2,221,128], index: 3, kind: output, shape index: {}]  }
   0x1 LB: > { %s3610_s13 = sadd.s32 4294967295, %s3982_s12   ;;  %p3614_p0 = scmp.ge.s32.totalorder %s3982_s12, 1  ;;  %s3982_s12 = sphi %s4004_s12, %s13_s12  }
   0x2   : > { %p137_p1 = scmp.lt.s32.totalorder %s3982_s12, 3 }
   0x4   : > { %p138_p2 = pnand %p3614_p0, %p137_p1 }
   0x5   : > { %p161_p3 = scmp.lt.s32.totalorder (!%p138_p2), %s3610_s13, 1 }
   0x6   : > { %141 = sbr.rel (%p138_p2) target bundleno = 784 (0x310), region = 32 }
   0xb   : > { %v3930_v0 = vld [vmem:[%s5187_s1 + $0x10] sm:$0xff]  ;;  %v3929_v1 = vld [vmem:[%s5187_s1 + $0x8] sm:$0xff]  ;;  %s5191_s13 = smov (!%p161_p3, %s3610_s13), 1  ;;  %v3928_v2 = vld [vmem:[%s5187_s1] sm:$0xff]  ;;  %vm247_vm0 = vcmask 392192  }
   0xc   : > { %3955 = vmatpush.bf16.msra.mxu1 %v3930_v0  ;;  %3956 = vmatpush.bf16.msra.mxu2 %v3930_v0  ;;  %s3964_s18 = smul.u32 328, %s5191_s13  ;;  %v3933_v3 = vld [vmem:[%s5187_s1 + $0x28] sm:$0xff]  ;;  %v3936_v4 = vld [vmem:[%s5187_s1 + $0x40] sm:$0xff]  ;;  %v3942_v13 = vld [vmem:[%s5187_s1 + $0x70] sm:$0xff] }
   0xd   : > { %304 = vmatpush.bf16.msra.mxu0 %v3930_v0  ;;  %3957 = vmatpush.bf16.msra.mxu3 %v3930_v0  ;;  %v3932_v15 = vld [vmem:[%s5187_s1 + $0x20] sm:$0xff]  ;;  %v3935_v16 = vld [vmem:[%s5187_s1 + $0x38] sm:$0xff]  ;;  %v3941_v30 = vld [vmem:[%s5187_s1 + $0x68] sm:$0xff]  ;;  %s3965_s26 = smul.u32 224, %s5191_s13 }
   0xe   : > { %s4027_s23 = scalar_lea.vmem %s5186_s0, %s3964_s18  ;;  %v3931_v29 = vld [vmem:[%s5187_s1 + $0x18] sm:$0xff]  ;;  %v3934_v31 = vld [vmem:[%s5187_s1 + $0x30] sm:$0xff]  ;;  %v3937_v46 = vld [vmem:[%s5187_s1 + $0x48] sm:$0xff] }
   0xf   : > { %v182_v5 = vld [vmem:[%s4027_s23 + $0x50] sm:$0xff]  ;;  %v183_v6 = vld [vmem:[%s4027_s23 + $0x58] sm:$0xff]  ;;  %v192_v7 = vld [vmem:[%s4027_s23 + $0xa0] sm:$0xff]  ;;  %s4781_s28 = scalar_lea.vmem %s5189_s3, %s3965_s26 }
  0x10   : > { %3958 = vmatpush.bf16.msra.mxu1 %v3929_v1  ;;  %3959 = vmatpush.bf16.msra.mxu2 %v3929_v1  ;;  %v193_v8 = vld [vmem:[%s4027_s23 + $0xa8] sm:$0xff]  ;;  %v211_v9 = vpack.c.bf16 %v183_v6, %v182_v5  ;;  %v172_v11 = vld [vmem:[%s4027_s23] sm:$0xff]  ;;  %v202_v17 = vld [vmem:[%s4027_s23 + $0xf0] sm:$0xff] }
  0x11   : > { %305 = vmatpush.bf16.msra.mxu0 %v3929_v1  ;;  %3960 = vmatpush.bf16.msra.mxu3 %v3929_v1  ;;  %v216_v10 = vpack.c.bf16 %v193_v8, %v192_v7  ;;  %v173_v12 = vld [vmem:[%s4027_s23 + $0x8] sm:$0xff]  ;;  %v203_v18 = vld [vmem:[%s4027_s23 + $0xf8] sm:$0xff]  ;;  %v184_v19 = vld [vmem:[%s4027_s23 + $0x60] sm:$0xff] }
  0x12   : > { %v206_v14 = vpack.c.bf16 %v173_v12, %v172_v11  ;;  %v221_v20 = vpack.c.bf16 %v203_v18, %v202_v17  ;;  %v185_v21 = vld [vmem:[%s4027_s23 + $0x68] sm:$0xff]  ;;  %v194_v22 = vld [vmem:[%s4027_s23 + $0xb0] sm:$0xff]  ;;  %v195_v23 = vld [vmem:[%s4027_s23 + $0xb8] sm:$0xff] }
  0x13   : > { %v174_v24 = vld [vmem:[%s4027_s23 + $0x10] sm:$0xff]  ;;  %v175_v25 = vld [vmem:[%s4027_s23 + $0x18] sm:$0xff]  ;;  %v212_v26 = vpack.c.bf16 %v185_v21, %v184_v19  ;;  %v217_v27 = vpack.c.bf16 %v195_v23, %v194_v22  ;;  %v204_v33 = vld [vmem:[%s4027_s23 + $0x100] sm:$0xff] }
  0x14   : > { %3961 = vmatpush.bf16.msra.mxu1 %v3928_v2  ;;  %3962 = vmatpush.bf16.msra.mxu2 %v3928_v2  ;;  %v207_v28 = vpack.c.bf16 %v175_v25, %v174_v24  ;;  %v3939_v32 = vld [vmem:[%s5187_s1 + $0x58] sm:$0xff]  ;;  %v205_v34 = vld [vmem:[%s4027_s23 + $0x108] sm:$0xff]  ;;  %v186_v35 = vld [vmem:[%s4027_s23 + $0x70] sm:$0xff] }
  0x15   : > { %306 = vmatpush.bf16.msra.mxu0 %v3928_v2  ;;  %3963 = vmatpush.bf16.msra.mxu3 %v3928_v2  ;;  %v222_v36 = vpack.c.bf16 %v205_v34, %v204_v33  ;;  %v187_v37 = vld [vmem:[%s4027_s23 + $0x78] sm:$0xff]  ;;  %v196_v38 = vld [vmem:[%s4027_s23 + $0xc0] sm:$0xff]  ;;  %v197_v39 = vld [vmem:[%s4027_s23 + $0xc8] sm:$0xff] }
  0x16   : > { %v176_v40 = vld [vmem:[%s4027_s23 + $0x20] sm:$0xff]  ;;  %v177_v41 = vld [vmem:[%s4027_s23 + $0x28] sm:$0xff]  ;;  %v213_v42 = vpack.c.bf16 %v187_v37, %v186_v35  ;;  %v218_v43 = vpack.c.bf16 %v197_v39, %v196_v38  ;;  %v3938_v45 = vld [vmem:[%s5187_s1 + $0x50] sm:$0xff] }
  0x17   : > { %3634 = vmatmul.msk.bf16.vlgmr.msra.gmra.mxu1 %vm247_vm0, %v211_v9  ;;  %3639 = vmatmul.msk.bf16.vlgmr.msra.gmra.mxu2 %vm247_vm0, %v216_v10  ;;  %v208_v44 = vpack.c.bf16 %v177_v41, %v176_v40  ;;  %v1073_v47 = vld [vmem:[%s4027_s23 + $0x11] sm:$0xff]  ;;  %v1074_v48 = vld [vmem:[%s4027_s23 + $0x19] sm:$0xff]  ;;  %v189_v51 = vld [vmem:[%s4027_s23 + $0x88] sm:$0xff] }
  0x18   : > { %559 = vmatpush.bf16.msrb.mxu1 %v3933_v3  ;;  %882 = vmatpush.bf16.msrb.mxu2 %v3936_v4  ;;  %v188_v49 = vld [vmem:[%s4027_s23 + $0x80] sm:$0xff]  ;;  %v1107_v50 = vpack.c.bf16 %v1074_v48, %v1073_v47  ;;  %v198_v52 = vld [vmem:[%s4027_s23 + $0xd0] sm:$0xff]  ;;  %v199_v53 = vld [vmem:[%s4027_s23 + $0xd8] sm:$0xff] }
  0x19   : > { %1528 = vmatpush.bf16.msrb.mxu0 %v3942_v13  ;;  %3644 = vmatmul.msk.bf16.vlgmr.msra.gmra.mxu3 %vm247_vm0, %v221_v20  ;;  %v178_v54 = vld [vmem:[%s4027_s23 + $0x30] sm:$0xff]  ;;  %v179_v55 = vld [vmem:[%s4027_s23 + $0x38] sm:$0xff]  ;;  %v214_v56 = vpack.c.bf16 %v189_v51, %v188_v49  ;;  %v219_v57 = vpack.c.bf16 %v199_v53, %v198_v52  ;;  %v3940_v58 = vld [vmem:[%s5187_s1 + $0x60] sm:$0xff] }
  0x1a   : > { %3629 = vmatmul.msk.bf16.vlgmr.msra.gmra.mxu0 %vm247_vm0, %v206_v14  ;;  %1205 = vmatpush.bf16.msrb.mxu3 %v3939_v32  ;;  %v209_v59 = vpack.c.bf16 %v179_v55, %v178_v54  ;;  %v3945_v60 = vld [vmem:[%s5187_s1 + $0x88] sm:$0xff]  ;;  %v3948_v61 = vld [vmem:[%s5187_s1 + $0xa0] sm:$0xff]  ;;  %v3951_v62 = vld [vmem:[%s5187_s1 + $0xb8] sm:$0xff] }
  0x1b   : > { %v1075_v63 = vld [vmem:[%s4027_s23 + $0x21] sm:$0xff]  ;;  %v1076_v0 = vld [vmem:[%s4027_s23 + $0x29] sm:$0xff]  ;;  %v191_v3 = vld [vmem:[%s4027_s23 + $0x98] sm:$0xff] }
  0x1c   : > { %560 = vmatpush.bf16.msrb.mxu1 %v3932_v15  ;;  %883 = vmatpush.bf16.msrb.mxu2 %v3935_v16  ;;  %v190_v1 = vld [vmem:[%s4027_s23 + $0x90] sm:$0xff]  ;;  %v1108_v2 = vpack.c.bf16 %v1076_v0, %v1075_v63  ;;  %v200_v4 = vld [vmem:[%s4027_s23 + $0xe0] sm:$0xff]  ;;  %v201_v5 = vld [vmem:[%s4027_s23 + $0xe8] sm:$0xff] }
  0x1d   : > { %1529 = vmatpush.bf16.msrb.mxu0 %v3941_v30  ;;  %v180_v6 = vld [vmem:[%s4027_s23 + $0x40] sm:$0xff]  ;;  %v181_v7 = vld [vmem:[%s4027_s23 + $0x48] sm:$0xff]  ;;  %v215_v8 = vpack.c.bf16 %v191_v3, %v190_v1  ;;  %v220_v9 = vpack.c.bf16 %v201_v5, %v200_v4  ;;  %v3954_v11 = vld [vmem:[%s5187_s1 + $0xd0] sm:$0xff] }
  0x1e   : > { %1206 = vmatpush.bf16.msrb.mxu3 %v3938_v45  ;;  %v210_v10 = vpack.c.bf16 %v181_v7, %v180_v6  ;;  %v1077_v12 = vld [vmem:[%s4027_s23 + $0x31] sm:$0xff]  ;;  %v1078_v13 = vld [vmem:[%s4027_s23 + $0x39] sm:$0xff]  ;;  %v427_v14 = vld [vmem:[%s4027_s23 + $0x1] sm:$0xff] }
  0x1f   : > { %v1109_v15 = vpack.c.bf16 %v1078_v13, %v1077_v12  ;;  %v428_v16 = vld [vmem:[%s4027_s23 + $0x9] sm:$0xff]  ;;  %v752_v19 = vld [vmem:[%s4027_s23 + $0x12] sm:$0xff]  ;;  %v753_v20 = vld [vmem:[%s4027_s23 + $0x1a] sm:$0xff] }
  0x20   : > { %561 = vmatpush.bf16.msrb.mxu1 %v3931_v29  ;;  %884 = vmatpush.bf16.msrb.mxu2 %v3934_v31  ;;  %v750_v17 = vld [vmem:[%s4027_s23 + $0x2] sm:$0xff]  ;;  %v751_v18 = vld [vmem:[%s4027_s23 + $0xa] sm:$0xff]  ;;  %v461_v21 = vpack.c.bf16 %v428_v16, %v427_v14  ;;  %v785_v23 = vpack.c.bf16 %v753_v20, %v752_v19  ;;  %v1082_v31 = vld [vmem:[%s4027_s23 + $0x59] sm:$0xff] }
  0x21   : > { %1530 = vmatpush.bf16.msrb.mxu0 %v3940_v58  ;;  %v784_v22 = vpack.c.bf16 %v751_v18, %v750_v17  ;;  %v1079_v24 = vld [vmem:[%s4027_s23 + $0x41] sm:$0xff]  ;;  %v1080_v25 = vld [vmem:[%s4027_s23 + $0x49] sm:$0xff]  ;;  %v1081_v30 = vld [vmem:[%s4027_s23 + $0x51] sm:$0xff] }
  0x22   : > { %1207 = vmatpush.bf16.msrb.mxu3 %v3937_v46  ;;  %v4156_v32 = vpack.c.bf16 %v1082_v31, %v1081_v30  ;;  %v756_v33 = vld [vmem:[%s4027_s23 + $0x32] sm:$0xff]  ;;  %v757_v34 = vld [vmem:[%s4027_s23 + $0x3a] sm:$0xff]  ;;  %v1084_v37 = vld [vmem:[%s4027_s23 + $0x69] sm:$0xff] }
  0x23   : > { %v787_v35 = vpack.c.bf16 %v757_v34, %v756_v33  ;;  %v758_v39 = vld [vmem:[%s4027_s23 + $0x42] sm:$0xff]  ;;  %v759_v40 = vld [vmem:[%s4027_s23 + $0x4a] sm:$0xff]  ;;  %v1086_v48 = vld [vmem:[%s4027_s23 + $0x79] sm:$0xff] }
  0x24   : > { %1851 = vmatpush.bf16.msra.mxu1 %v3945_v60  ;;  %2174 = vmatpush.bf16.msra.mxu2 %v3948_v61  ;;  %v1085_v47 = vld [vmem:[%s4027_s23 + $0x71] sm:$0xff]  ;;  %v761_v52 = vld [vmem:[%s4027_s23 + $0x5a] sm:$0xff]  ;;  %v1088_v1 = vld [vmem:[%s4027_s23 + $0x89] sm:$0xff] }
  0x25   : > { %2820 = vmatpush.bf16.msra.mxu0 %v3954_v11  ;;  %v4186_v49 = vpack.c.bf16 %v1086_v48, %v1085_v47  ;;  %v760_v51 = vld [vmem:[%s4027_s23 + $0x52] sm:$0xff]  ;;  %v3944_v53 = vld [vmem:[%s5187_s1 + $0x80] sm:$0xff]  ;;  %v763_v5 = vld [vmem:[%s4027_s23 + $0x6a] sm:$0xff] }
  0x26   : > { %2497 = vmatpush.bf16.msra.mxu3 %v3951_v62  ;;  %v3947_v55 = vld [vmem:[%s5187_s1 + $0x98] sm:$0xff]  ;;  %v3950_v61 = vld [vmem:[%s5187_s1 + $0xb0] sm:$0xff]  ;;  %v1087_v0 = vld [vmem:[%s4027_s23 + $0x81] sm:$0xff] }
  0x27   : > { %3635 = vmatmul.msk.bf16.gmra.mxu1 %vm247_vm0, %v212_v26  ;;  %3640 = vmatmul.msk.bf16.gmra.mxu2 %vm247_vm0, %v217_v27  ;;  %v1110_v26 = vpack.c.bf16 %v1080_v25, %v1079_v24  ;;  %v754_v27 = vld [vmem:[%s4027_s23 + $0x22] sm:$0xff]  ;;  %v1090_v16 = vld [vmem:[%s4027_s23 + $0x99] sm:$0xff]  ;;  %v767_v34 = vld [vmem:[%s4027_s23 + $0x8a] sm:$0xff] }
  0x28   : > { %1852 = vmatpush.bf16.msra.mxu1 %v3944_v53  ;;  %2175 = vmatpush.bf16.msra.mxu2 %v3947_v55  ;;  %v762_v4 = vld [vmem:[%s4027_s23 + $0x62] sm:$0xff]  ;;  %v764_v19 = vld [vmem:[%s4027_s23 + $0x72] sm:$0xff]  ;;  %v765_v20 = vld [vmem:[%s4027_s23 + $0x7a] sm:$0xff] }
  0x29   : > { %3645 = vmatmul.msk.bf16.gmra.mxu3 %vm247_vm0, %v222_v36  ;;  %v1083_v36 = vld [vmem:[%s4027_s23 + $0x61] sm:$0xff]  ;;  %v1092_v30 = vld [vmem:[%s4027_s23 + $0xa9] sm:$0xff]  ;;  %v1093_v47 = vld [vmem:[%s4027_s23 + $0xb1] sm:$0xff] }
  0x2a   : > { %3630 = vmatmul.msk.bf16.gmra.mxu0 %vm247_vm0, %v207_v28  ;;  %v755_v28 = vld [vmem:[%s4027_s23 + $0x2a] sm:$0xff]  ;;  %v4167_v38 = vpack.c.bf16 %v1084_v37, %v1083_v36  ;;  %2498 = vmatpush.bf16.msra.mxu3 %v3950_v61  ;;  %v766_v33 = vld [vmem:[%s4027_s23 + $0x82] sm:$0xff]  ;;  %v1094_v48 = vld [vmem:[%s4027_s23 + $0xb9] sm:$0xff] }
  0x2b   : > { %v786_v29 = vpack.c.bf16 %v755_v28, %v754_v27  ;;  %v3953_v12 = vld [vmem:[%s5187_s1 + $0xc8] sm:$0xff]  ;;  %v792_v37 = vpack.c.bf16 %v767_v34, %v766_v33  ;;  %v3946_v33 = vld [vmem:[%s5187_s1 + $0x90] sm:$0xff] }
  0x2c   : > { %2821 = vmatpush.bf16.msra.mxu0 %v3953_v12  ;;  %v770_v12 = vld [vmem:[%s4027_s23 + $0xa2] sm:$0xff]  ;;  %v1097_v34 = vld [vmem:[%s4027_s23 + $0xd1] sm:$0xff]  ;;  %2176 = vmatpush.bf16.msra.mxu2 %v3946_v33 }
  0x37   : > { %3636 = vmatmul.msk.bf16.gmra.mxu1 %vm247_vm0, %v213_v42  ;;  %3641 = vmatmul.msk.bf16.gmra.mxu2 %vm247_vm0, %v218_v43  ;;  %v788_v42 = vpack.c.bf16 %v759_v40, %v758_v39 }
  0x39   : > { %3734 = vmatmul.msk.bf16.vlgmr.msrb.gmra.mxu3 %vm247_vm0, %v1107_v50 }
  0x3a   : > { %3631 = vmatmul.msk.bf16.gmra.mxu0 %vm247_vm0, %v208_v44 }
  0x47   : > { %3637 = vmatmul.msk.bf16.gmra.mxu1 %vm247_vm0, %v214_v56  ;;  %3642 = vmatmul.msk.bf16.gmra.mxu2 %vm247_vm0, %v219_v57  ;;  %v789_v57 = vpack.c.bf16 %v761_v52, %v760_v51  ;;  %v768_v51 = vld [vmem:[%s4027_s23 + $0x92] sm:$0xff]  ;;  %v769_v52 = vld [vmem:[%s4027_s23 + $0x9a] sm:$0xff] }
  0x49   : > { %3735 = vmatmul.msk.bf16.gmra.mxu3 %vm247_vm0, %v1108_v2 }
  0x4a   : > { %3632 = vmatmul.msk.bf16.gmra.mxu0 %vm247_vm0, %v209_v59 }
  0x57   : > { %3638 = vmatmul.msk.bf16.gmra.mxu1 %vm247_vm0, %v215_v8  ;;  %3643 = vmatmul.msk.bf16.gmra.mxu2 %vm247_vm0, %v220_v9  ;;  %v790_v8 = vpack.c.bf16 %v763_v5, %v762_v4  ;;  %v1095_v5 = vld [vmem:[%s4027_s23 + $0xc1] sm:$0xff] }
  0x59   : > { %3736 = vmatmul.msk.bf16.gmra.mxu3 %vm247_vm0, %v1109_v15 }
  0x5a   : > { %3633 = vmatmul.msk.bf16.gmra.mxu0 %vm247_vm0, %v210_v10 }
  0x67   : > { %3664 = vmatmul.msk.bf16.vlgmr.msrb.gmra.mxu1 %vm247_vm0, %v461_v21  ;;  %3699 = vmatmul.msk.bf16.vlgmr.msrb.gmra.mxu2 %vm247_vm0, %v784_v22 }
  0x69   : > { %3737 = vmatmul.msk.bf16.gmra.mxu3 %vm247_vm0, %v1110_v26 }
  0x6a   : > { %3769 = vmatmul.msk.bf16.vlgmr.msrb.gmra.mxu0 %vm247_vm0, %v785_v23 }
  0x77   : > { %3665 = vmatmul.msk.bf16.gmra.mxu1 %vm247_vm0, %v1107_v50  ;;  %3700 = vmatmul.msk.bf16.gmra.mxu2 %vm247_vm0, %v785_v23  ;;  %v791_v23 = vpack.c.bf16 %v765_v20, %v764_v19 }
  0x79   : > { %3738 = vmatmul.msk.bf16.gmra.mxu3 %vm247_vm0, %v4156_v32 }
  0x7a   : > { %3770 = vmatmul.msk.bf16.gmra.mxu0 %vm247_vm0, %v786_v29 }
  0x87   : > { %3666 = vmatmul.msk.bf16.gmra.mxu1 %vm247_vm0, %v1108_v2  ;;  %3701 = vmatmul.msk.bf16.gmra.mxu2 %vm247_vm0, %v786_v29  ;;  %v4214_v2 = vpack.c.bf16 %v1088_v1, %v1087_v0  ;;  %v1091_v29 = vld [vmem:[%s4027_s23 + $0xa1] sm:$0xff] }
  0x88   : > { %v4257_v31 = vpack.c.bf16 %v1092_v30, %v1091_v29 }
  0x89   : > { %3739 = vmatmul.msk.bf16.gmra.mxu3 %vm247_vm0, %v4167_v38 }
  0x8a   : > { %3771 = vmatmul.msk.bf16.gmra.mxu0 %vm247_vm0, %v787_v35 }
  0x94   : > { %v4173_v41 = vpop.f32.mrf.mxu1 }
  0x97   : > { %v4175_v43 = vpop.f32.mrf.mxu0  ;;  %3667 = vmatmul.msk.bf16.gmra.mxu1 %vm247_vm0, %v1109_v15  ;;  %3702 = vmatmul.msk.bf16.gmra.mxu2 %vm247_vm0, %v787_v35  ;;  %v1089_v15 = vld [vmem:[%s4027_s23 + $0x91] sm:$0xff] }
  0x98   : > { %v4237_v17 = vpack.c.bf16 %v1090_v16, %v1089_v15 }
  0x99   : > { %3740 = vmatmul.msk.bf16.gmra.mxu3 %vm247_vm0, %v4186_v49 }
  0x9a   : > { %3772 = vmatmul.msk.bf16.gmra.mxu0 %vm247_vm0, %v788_v42  ;;  %v358_v44 = vpop.f32.mrf.mxu2 }
  0x9b   : > { %413 = vst [vmem:[#allocation2 + $0xa0] sm:$0xff] %v358_v44 }
  0x9c   : > { %v4180_v45 = vpop.f32.mrf.mxu1  ;;  %v383_v56 = vpop.f32.mrf.mxu3 }
  0x9d   : > { %423 = vst [vmem:[#allocation2 + $0xf0] sm:$0xff] %v383_v56  ;;  %v793_v56 = vpack.c.bf16 %v769_v52, %v768_v51  ;;  %v773_v51 = vld [vmem:[%s4027_s23 + $0xba] sm:$0xff] }
  0x9f   : > { %v4182_v46 = vpop.f32.mrf.mxu0 }
  0xa2   : > { %v360_v50 = vpop.f32.mrf.mxu2 }
  0xa3   : > { %414 = vst [vmem:[#allocation2 + $0xa8] sm:$0xff] %v360_v50  ;;  %v4279_v50 = vpack.c.bf16 %v1094_v48, %v1093_v47 }
  0xa4   : > { %v4195_v54 = vpop.f32.mrf.mxu1  ;;  %v385_v62 = vpop.f32.mrf.mxu3 }
  0xa5   : > { %424 = vst [vmem:[#allocation2 + $0xf8] sm:$0xff] %v385_v62 }
  0xa7   : > { %v4200_v58 = vpop.f32.mrf.mxu0  ;;  %3668 = vmatmul.msk.bf16.gmra.mxu1 %vm247_vm0, %v1110_v26  ;;  %3703 = vmatmul.msk.bf16.gmra.mxu2 %vm247_vm0, %v788_v42 }
  0xa9   : > { %3741 = vmatmul.msk.bf16.gmra.mxu3 %vm247_vm0, %v4214_v2 }
  0xaa   : > { %3773 = vmatmul.msk.bf16.gmra.mxu0 %vm247_vm0, %v789_v57  ;;  %v363_v59 = vpop.f32.mrf.mxu2 }
  0xab   : > { %415 = vst [vmem:[#allocation2 + $0xb0] sm:$0xff] %v363_v59 }
  0xac   : > { %v4205_v60 = vpop.f32.mrf.mxu1  ;;  %v388_v7 = vpop.f32.mrf.mxu3 }
  0xad   : > { %425 = vst [vmem:[#allocation2 + $0x100] sm:$0xff] %v388_v7  ;;  %v1096_v7 = vld [vmem:[%s4027_s23 + $0xc9] sm:$0xff] }
  0xaf   : > { %v4210_v63 = vpop.f32.mrf.mxu0 }
  0xb2   : > { %v365_v3 = vpop.f32.mrf.mxu2 }
  0xb3   : > { %416 = vst [vmem:[#allocation2 + $0xb8] sm:$0xff] %v365_v3 }
  0xb4   : > { %v4220_v6 = vpop.f32.mrf.mxu1  ;;  %v390_v13 = vpop.f32.mrf.mxu3 }
  0xb5   : > { %426 = vst [vmem:[#allocation2 + $0x108] sm:$0xff] %v390_v13  ;;  %v771_v13 = vld [vmem:[%s4027_s23 + $0xaa] sm:$0xff] }
  0xb6   : > { %v794_v20 = vpack.c.bf16 %v771_v13, %v770_v12 }
  0xb7   : > { %v4222_v9 = vpop.f32.mrf.mxu0  ;;  %3669 = vmatmul.msk.bf16.gmra.mxu1 %vm247_vm0, %v4156_v32  ;;  %3704 = vmatmul.msk.bf16.gmra.mxu2 %vm247_vm0, %v789_v57 }
  0xb9   : > { %3742 = vmatmul.msk.bf16.gmra.mxu3 %vm247_vm0, %v4237_v17 }
  0xba   : > { %3774 = vmatmul.msk.bf16.gmra.mxu0 %vm247_vm0, %v790_v8  ;;  %v368_v10 = vpop.f32.mrf.mxu2 }
  0xbb   : > { %417 = vst [vmem:[#allocation2 + $0xc0] sm:$0xff] %v368_v10  ;;  %v4296_v10 = vpack.c.bf16 %v1096_v7, %v1095_v5 }
  0xbc   : > { %v4228_v11 = vpop.f32.mrf.mxu1  ;;  %v1209_v22 = vpop.f32.mrf.mxu3 }
  0xbf   : > { %v4233_v14 = vpop.f32.mrf.mxu0 }
  0xc2   : > { %v370_v18 = vpop.f32.mrf.mxu2 }
  0xc3   : > { %418 = vst [vmem:[#allocation2 + $0xc8] sm:$0xff] %v370_v18 }
  0xc4   : > { %v4243_v21 = vpop.f32.mrf.mxu1  ;;  %v1211_v27 = vpop.f32.mrf.mxu3 }
  0xc7   : > { %v4245_v24 = vpop.f32.mrf.mxu0  ;;  %3670 = vmatmul.msk.bf16.gmra.mxu1 %vm247_vm0, %v4167_v38  ;;  %3705 = vmatmul.msk.bf16.gmra.mxu2 %vm247_vm0, %v790_v8 }
  0xc9   : > { %3743 = vmatmul.msk.bf16.gmra.mxu3 %vm247_vm0, %v4257_v31 }
  0xca   : > { %3775 = vmatmul.msk.bf16.gmra.mxu0 %vm247_vm0, %v791_v23  ;;  %v373_v25 = vpop.f32.mrf.mxu2 }
  0xcb   : > { %419 = vst [vmem:[#allocation2 + $0xd0] sm:$0xff] %v373_v25 }
  0xcc   : > { %v4251_v26 = vpop.f32.mrf.mxu1  ;;  %v1214_v36 = vpop.f32.mrf.mxu3 }
  0xcf   : > { %v4253_v28 = vpop.f32.mrf.mxu0 }
  0xd2   : > { %v375_v32 = vpop.f32.mrf.mxu2 }
  0xd3   : > { %420 = vst [vmem:[#allocation2 + $0xd8] sm:$0xff] %v375_v32 }
  0xd4   : > { %v4263_v35 = vpop.f32.mrf.mxu1  ;;  %v4273_v42 = vpop.f32.mrf.mxu3 }
  0xd7   : > { %v4265_v38 = vpop.f32.mrf.mxu0  ;;  %3671 = vmatmul.msk.bf16.gmra.mxu1 %vm247_vm0, %v4186_v49  ;;  %3706 = vmatmul.msk.bf16.gmra.mxu2 %vm247_vm0, %v791_v23 }
  0xd9   : > { %3744 = vmatmul.msk.bf16.gmra.mxu3 %vm247_vm0, %v4279_v50 }
  0xda   : > { %3776 = vmatmul.msk.bf16.gmra.mxu0 %vm247_vm0, %v792_v37  ;;  %v378_v39 = vpop.f32.mrf.mxu2 }
  0xdb   : > { %421 = vst [vmem:[#allocation2 + $0xe0] sm:$0xff] %v378_v39 }
  0xdc   : > { %v4271_v40 = vpop.f32.mrf.mxu1  ;;  %v4285_v55 = vpop.f32.mrf.mxu3 }
  0xdf   : > { %v4275_v44 = vpop.f32.mrf.mxu0 }
  0xe2   : > { %v380_v49 = vpop.f32.mrf.mxu2 }
  0xe3   : > { %422 = vst [vmem:[#allocation2 + $0xe8] sm:$0xff] %v380_v49  ;;  %v772_v49 = vld [vmem:[%s4027_s23 + $0xb2] sm:$0xff] }
  0xe4   : > { %v563_v53 = vpop.f32.mrf.mxu1  ;;  %v4292_v1 = vpop.f32.mrf.mxu3 }
  0xe5   : > { %v682_v59 = vadd.f32 %v563_v53, %v4175_v43 }
  0xe7   : > { %v1532_v57 = vpop.f32.mrf.mxu0  ;;  %3672 = vmatmul.msk.bf16.gmra.mxu1 %vm247_vm0, %v4214_v2  ;;  %3707 = vmatmul.msk.bf16.gmra.mxu2 %vm247_vm0, %v792_v37  ;;  %v1098_v37 = vld [vmem:[%s4027_s23 + $0xd9] sm:$0xff] }
  0xe8   : > { %v4320_v47 = vpack.c.bf16 %v1098_v37, %v1097_v34 }
  0xe9   : > { %3745 = vmatmul.msk.bf16.gmra.mxu3 %vm247_vm0, %v4296_v10 }
  0xea   : > { %3777 = vmatmul.msk.bf16.gmra.mxu0 %vm247_vm0, %v793_v56  ;;  %v886_v61 = vpop.f32.mrf.mxu2 }
  0xeb   : > { %v1005_v62 = vadd.f32 %v886_v61, %v682_v59  ;;  %v795_v59 = vpack.c.bf16 %v773_v51, %v772_v49  ;;  %v777_v49 = vld [vmem:[%s4027_s23 + $0xda] sm:$0xff] }
  0xec   : > { %v565_v0 = vpop.f32.mrf.mxu1  ;;  %v4303_v18 = vpop.f32.mrf.mxu3 }
  0xed   : > { %v1328_v3 = vadd.f32 %v1209_v22, %v1005_v62  ;;  %v683_v2 = vadd.f32 %v565_v0, %v4182_v46 }
  0xef   : > { %v1534_v4 = vpop.f32.mrf.mxu0  ;;  %v1651_v8 = vadd.f32 %v1532_v57, %v1328_v3 }
  0xf1   : > { %1685 = vst [vmem:[#allocation2] sm:$0xff] %v1651_v8  ;;  %v1099_v8 = vld [vmem:[%s4027_s23 + $0xe1] sm:$0xff] }
  0xf2   : > { %v888_v43 = vpop.f32.mrf.mxu2 }
  0xf3   : > { %v1006_v15 = vadd.f32 %v888_v43, %v683_v2 }
  0xf4   : > { %v568_v16 = vpop.f32.mrf.mxu1 }
  0xf5   : > { %v1329_v19 = vadd.f32 %v1211_v27, %v1006_v15  ;;  %v684_v23 = vadd.f32 %v568_v16, %v4200_v58  ;;  %v4310_v27 = vpop.f32.mrf.mxu3  ;;  %v774_v15 = vld [vmem:[%s4027_s23 + $0xc2] sm:$0xff]  ;;  %v775_v16 = vld [vmem:[%s4027_s23 + $0xca] sm:$0xff] }
  0xf7   : > { %v1537_v22 = vpop.f32.mrf.mxu0  ;;  %3673 = vmatmul.msk.bf16.gmra.mxu1 %vm247_vm0, %v4237_v17  ;;  %3708 = vmatmul.msk.bf16.gmra.mxu2 %vm247_vm0, %v793_v56  ;;  %v1652_v46 = vadd.f32 %v1534_v4, %v1329_v19  ;;  %v3943_v17 = vld [vmem:[%s5187_s1 + $0x78] sm:$0xff] }
  0xf8   : > { %1853 = vmatpush.bf16.msra.mxu1 %v3943_v17 }
  0xf9   : > { %1686 = vst [vmem:[#allocation2 + $0x8] sm:$0xff] %v1652_v46  ;;  %3746 = vmatmul.msk.bf16.gmra.mxu3 %vm247_vm0, %v4320_v47  ;;  %v796_v46 = vpack.c.bf16 %v775_v16, %v774_v15 }
  0xfa   : > { %3778 = vmatmul.msk.bf16.gmra.mxu0 %vm247_vm0, %v794_v20  ;;  %v891_v25 = vpop.f32.mrf.mxu2 }
  0xfb   : > { %v1007_v29 = vadd.f32 %v891_v25, %v684_v23 }
  0xfc   : > { %v570_v30 = vpop.f32.mrf.mxu1 }
  0xfd   : > { %v1330_v32 = vadd.f32 %v1214_v36, %v1007_v29  ;;  %v685_v48 = vadd.f32 %v570_v30, %v4210_v63  ;;  %v4327_v56 = vpop.f32.mrf.mxu3 }
  0xff   : > { %v1539_v58 = vpop.f32.mrf.mxu0  ;;  %v1653_v39 = vadd.f32 %v1537_v22, %v1330_v32 }
 0x101   : > { %1687 = vst [vmem:[#allocation2 + $0x10] sm:$0xff] %v1653_v39 }
 0x102   : > { %v893_v36 = vpop.f32.mrf.mxu2 }
 0x103   : > { %v1008_v52 = vadd.f32 %v893_v36, %v685_v48  ;;  %v776_v36 = vld [vmem:[%s4027_s23 + $0xd2] sm:$0xff] }
 0x104   : > { %v573_v53 = vpop.f32.mrf.mxu1 }
 0x105   : > { %v1331_v57 = vadd.f32 %v4273_v42, %v1008_v52  ;;  %v686_v62 = vadd.f32 %v573_v53, %v4222_v9  ;;  %v3949_v42 = vld [vmem:[%s5187_s1 + $0xa8] sm:$0xff]  ;;  %v4338_v5 = vpop.f32.mrf.mxu3 }
 0x106   : > { %2499 = vmatpush.bf16.msra.mxu3 %v3949_v42  ;;  %v1100_v9 = vld [vmem:[%s4027_s23 + $0xe9] sm:$0xff] }
 0x107   : > { %v1542_v61 = vpop.f32.mrf.mxu0  ;;  %3674 = vmatmul.msk.bf16.gmra.mxu1 %vm247_vm0, %v4257_v31  ;;  %3709 = vmatmul.msk.bf16.gmra.mxu2 %vm247_vm0, %v794_v20  ;;  %v1654_v63 = vadd.f32 %v1539_v58, %v1331_v57  ;;  %v4343_v43 = vpack.c.bf16 %v1100_v9, %v1099_v8  ;;  %v1101_v58 = vld [vmem:[%s4027_s23 + $0xf1] sm:$0xff]  ;;  %v797_v57 = vpack.c.bf16 %v777_v49, %v776_v36  ;;  %v778_v9 = vld [vmem:[%s4027_s23 + $0xe2] sm:$0xff] }
 0x109   : > { %1688 = vst [vmem:[#allocation2 + $0x18] sm:$0xff] %v1654_v63  ;;  %3747 = vmatmul.msk.bf16.gmra.mxu3 %vm247_vm0, %v4343_v43 }
 0x10a   : > { %3779 = vmatmul.msk.bf16.gmra.mxu0 %vm247_vm0, %v795_v59  ;;  %v896_v0 = vpop.f32.mrf.mxu2 }
 0x10b   : > { %v1009_v3 = vadd.f32 %v896_v0, %v686_v62 }
 0x10c   : > { %v575_v4 = vpop.f32.mrf.mxu1 }
 0x10d   : > { %v1332_v31 = vadd.f32 %v4285_v55, %v1009_v3  ;;  %v687_v12 = vadd.f32 %v575_v4, %v4233_v14  ;;  %v4350_v22 = vpop.f32.mrf.mxu3  ;;  %v1103_v4 = vld [vmem:[%s4027_s23 + $0x101] sm:$0xff] }
 0x10f   : > { %v1544_v7 = vpop.f32.mrf.mxu0  ;;  %v1655_v2 = vadd.f32 %v1542_v61, %v1332_v31 }
 0x111   : > { %1689 = vst [vmem:[#allocation2 + $0x20] sm:$0xff] %v1655_v2  ;;  %v779_v2 = vld [vmem:[%s4027_s23 + $0xea] sm:$0xff] }
 0x112   : > { %v898_v13 = vpop.f32.mrf.mxu2  ;;  %v798_v16 = vpack.c.bf16 %v779_v2, %v778_v9 }
 0x113   : > { %v1010_v19 = vadd.f32 %v898_v13, %v687_v12 }
 0x114   : > { %v578_v20 = vpop.f32.mrf.mxu1 }
 0x115   : > { %v1333_v55 = vadd.f32 %v4292_v1, %v1010_v19  ;;  %v688_v25 = vadd.f32 %v578_v20, %v4245_v24  ;;  %v3952_v1 = vld [vmem:[%s5187_s1 + $0xc0] sm:$0xff]  ;;  %v4361_v17 = vpop.f32.mrf.mxu3 }
 0x116   : > { %2822 = vmatpush.bf16.msra.mxu0 %v3952_v1  ;;  %v1102_v24 = vld [vmem:[%s4027_s23 + $0xf9] sm:$0xff] }
 0x117   : > { %v1547_v23 = vpop.f32.mrf.mxu0  ;;  %3675 = vmatmul.msk.bf16.gmra.mxu1 %vm247_vm0, %v4279_v50  ;;  %3710 = vmatmul.msk.bf16.gmra.mxu2 %vm247_vm0, %v795_v59  ;;  %v1656_v14 = vadd.f32 %v1544_v7, %v1333_v55  ;;  %v4366_v37 = vpack.c.bf16 %v1102_v24, %v1101_v58 }
 0x119   : > { %1690 = vst [vmem:[#allocation2 + $0x28] sm:$0xff] %v1656_v14  ;;  %3748 = vmatmul.msk.bf16.gmra.mxu3 %vm247_vm0, %v4366_v37 }
 0x11a   : > { %3780 = vmatmul.msk.bf16.gmra.mxu0 %vm247_vm0, %v796_v46  ;;  %v901_v29 = vpop.f32.mrf.mxu2 }
 0x11b   : > { %v1011_v30 = vadd.f32 %v901_v29, %v688_v25  ;;  %v1105_v29 = vld [vmem:[%s4027_s23 + $0x111] sm:$0xff] }
 0x11c   : > { %v580_v32 = vpop.f32.mrf.mxu1 }
 0x11d   : > { %v1334_v50 = vadd.f32 %v4303_v18, %v1011_v30  ;;  %v689_v39 = vadd.f32 %v580_v32, %v4253_v28  ;;  %v4373_v53 = vpop.f32.mrf.mxu3 }
 0x11f   : > { %v1549_v33 = vpop.f32.mrf.mxu0  ;;  %v1657_v34 = vadd.f32 %v1547_v23, %v1334_v50  ;;  %v780_v50 = vld [vmem:[%s4027_s23 + $0xf2] sm:$0xff] }
 0x121   : > { %1691 = vst [vmem:[#allocation2 + $0x30] sm:$0xff] %v1657_v34 }
 0x122   : > { %v903_v48 = vpop.f32.mrf.mxu2 }
 0x123   : > { %v1012_v51 = vadd.f32 %v903_v48, %v689_v39 }
 0x124   : > { %v583_v52 = vpop.f32.mrf.mxu1 }
 0x125   : > { %v1335_v18 = vadd.f32 %v4310_v27, %v1012_v51  ;;  %v690_v61 = vadd.f32 %v583_v52, %v4265_v38  ;;  %v4381_v27 = vpop.f32.mrf.mxu3 }
 0x127   : > { %v1552_v59 = vpop.f32.mrf.mxu0  ;;  %3676 = vmatmul.msk.bf16.gmra.mxu1 %vm247_vm0, %v4296_v10  ;;  %3711 = vmatmul.msk.bf16.gmra.mxu2 %vm247_vm0, %v796_v46  ;;  %v1658_v28 = vadd.f32 %v1549_v33, %v1335_v18  ;;  %v1104_v10 = vld [vmem:[%s4027_s23 + $0x109] sm:$0xff]  ;;  %v781_v33 = vld [vmem:[%s4027_s23 + $0xfa] sm:$0xff] }
 0x128   : > { %v4386_v7 = vpack.c.bf16 %v1104_v10, %v1103_v4  ;;  %v799_v39 = vpack.c.bf16 %v781_v33, %v780_v50  ;;  %v2369_v50 = vld [vmem:[%s4027_s23 + $0x43] sm:$0xff]  ;;  %v2370_v33 = vld [vmem:[%s4027_s23 + $0x4b] sm:$0xff] }
 0x129   : > { %1692 = vst [vmem:[#allocation2 + $0x38] sm:$0xff] %v1658_v28 }
 0x12a   : > { %3781 = vmatmul.msk.bf16.gmra.mxu0 %vm247_vm0, %v797_v57  ;;  %v906_v63 = vpop.f32.mrf.mxu2  ;;  %3749 = vmatmul.msk.bf16.gmra.mxu3 %vm247_vm0, %v4386_v7 }
 0x12b   : > { %v1013_v62 = vadd.f32 %v906_v63, %v690_v61 }
 0x12c   : > { %v585_v0 = vpop.f32.mrf.mxu1 }
 0x12d   : > { %v1336_v3 = vadd.f32 %v4327_v56, %v1013_v62  ;;  %v691_v38 = vadd.f32 %v585_v0, %v4275_v44  ;;  %v4393_v15 = vpop.f32.mrf.mxu3  ;;  %v782_v62 = vld [vmem:[%s4027_s23 + $0x102] sm:$0xff]  ;;  %v783_v0 = vld [vmem:[%s4027_s23 + $0x10a] sm:$0xff] }
 0x12e   : > { %v800_v10 = vpack.c.bf16 %v783_v0, %v782_v62 }
 0x12f   : > { %v1554_v42 = vpop.f32.mrf.mxu0  ;;  %v1659_v31 = vadd.f32 %v1552_v59, %v1336_v3  ;;  %v2365_v59 = vld [vmem:[%s4027_s23 + $0x23] sm:$0xff] }
 0x131   : > { %1693 = vst [vmem:[#allocation2 + $0x40] sm:$0xff] %v1659_v31 }
 0x132   : > { %v908_v8 = vpop.f32.mrf.mxu2 }
 0x133   : > { %v1014_v12 = vadd.f32 %v908_v8, %v691_v38 }
 0x134   : > { %v588_v13 = vpop.f32.mrf.mxu1 }
 0x135   : > { %v1337_v56 = vadd.f32 %v4338_v5, %v1014_v12  ;;  %v692_v20 = vadd.f32 %v588_v13, %v4173_v41  ;;  %v4401_v5 = vpop.f32.mrf.mxu3 }
 0x137   : > { %v1557_v19 = vpop.f32.mrf.mxu0  ;;  %3677 = vmatmul.msk.bf16.gmra.mxu1 %vm247_vm0, %v4320_v47  ;;  %3712 = vmatmul.msk.bf16.gmra.mxu2 %vm247_vm0, %v797_v57  ;;  %v1660_v44 = vadd.f32 %v1554_v42, %v1337_v56  ;;  %v1106_v47 = vld [vmem:[%s4027_s23 + $0x119] sm:$0xff] }
 0x138   : > { %v1123_v1 = vpack.c.bf16 %v1106_v47, %v1105_v29  ;;  %v2367_v56 = vld [vmem:[%s4027_s23 + $0x33] sm:$0xff] }
 0x139   : > { %1694 = vst [vmem:[#allocation2 + $0x48] sm:$0xff] %v1660_v44 }
 0x13a   : > { %3782 = vmatmul.msk.bf16.gmra.mxu0 %vm247_vm0, %v798_v16  ;;  %v911_v55 = vpop.f32.mrf.mxu2  ;;  %3750 = vmatmul.msk.bf16.gmra.mxu3 %vm247_vm0, %v1123_v1 }
 0x13b   : > { %v1015_v46 = vadd.f32 %v911_v55, %v692_v20  ;;  %v1428_v20 = vld [vmem:[%s4027_s23 + $0x112] sm:$0xff]  ;;  %v1429_v55 = vld [vmem:[%s4027_s23 + $0x11a] sm:$0xff] }
 0x13c   : > { %v590_v23 = vpop.f32.mrf.mxu1 }
 0x13d   : > { %v1338_v14 = vadd.f32 %v4350_v22, %v1015_v46  ;;  %v693_v32 = vadd.f32 %v590_v23, %v4180_v45  ;;  %v4410_v34 = vpop.f32.mrf.mxu3 }
 0x13f   : > { %v1559_v25 = vpop.f32.mrf.mxu0  ;;  %v1661_v30 = vadd.f32 %v1557_v19, %v1338_v14 }
 0x141   : > { %1695 = vst [vmem:[#allocation2 + $0x50] sm:$0xff] %v1661_v30 }
 0x142   : > { %v913_v41 = vpop.f32.mrf.mxu2 }
 0x143   : > { %v1016_v58 = vadd.f32 %v913_v41, %v693_v32 }
 0x144   : > { %v593_v24 = vpop.f32.mrf.mxu1 }
 0x145   : > { %v1339_v22 = vadd.f32 %v4361_v17, %v1016_v58  ;;  %v694_v36 = vadd.f32 %v593_v24, %v4195_v54  ;;  %v4418_v17 = vpop.f32.mrf.mxu3  ;;  %v1719_v58 = vld [vmem:[%s4027_s23 + $0x13] sm:$0xff] }
 0x147   : > { %v1562_v48 = vpop.f32.mrf.mxu0  ;;  %3678 = vmatmul.msk.bf16.gmra.mxu1 %vm247_vm0, %v4343_v43  ;;  %3713 = vmatmul.msk.bf16.gmra.mxu2 %vm247_vm0, %v798_v16  ;;  %v1662_v45 = vadd.f32 %v1559_v25, %v1339_v22  ;;  %v2366_v43 = vld [vmem:[%s4027_s23 + $0x2b] sm:$0xff]  ;;  %v1446_v25 = vpack.c.bf16 %v1429_v55, %v1428_v20  ;;  %v4464_v22 = vpack.c.bf16 %v2370_v33, %v2369_v50  ;;  %v668_v55 = vld [vmem:[#allocation2 + $0xa0] sm:$0xff] }
 0x148   : > { %v4423_v61 = vpack.c.bf16 %v2366_v43, %v2365_v59 }
 0x149   : > { %1696 = vst [vmem:[#allocation2 + $0x58] sm:$0xff] %v1662_v45 }
 0x14a   : > { %3783 = vmatmul.msk.bf16.gmra.mxu0 %vm247_vm0, %v799_v39  ;;  %v916_v49 = vpop.f32.mrf.mxu2  ;;  %3874 = vmatmul.msk.bf16.vlgmr.msra.gmra.mxu3 %vm247_vm0, %v4423_v61 }
 0x14b   : > { %v1017_v51 = vadd.f32 %v916_v49, %v694_v36  ;;  %v2688_v49 = vld [vmem:[%s4027_s23 + $0x24] sm:$0xff] }
 0x14c   : > { %v595_v52 = vpop.f32.mrf.mxu1 }
 0x14d   : > { %v1340_v18 = vadd.f32 %v4373_v53, %v1017_v51  ;;  %v695_v54 = vadd.f32 %v595_v52, %v4205_v60  ;;  %v4430_v4 = vpop.f32.mrf.mxu3  ;;  %v2689_v51 = vld [vmem:[%s4027_s23 + $0x2c] sm:$0xff] }
 0x14f   : > { %v1564_v57 = vpop.f32.mrf.mxu0  ;;  %v1663_v28 = vadd.f32 %v1562_v48, %v1340_v18  ;;  %v2043_v48 = vld [vmem:[%s4027_s23 + $0x2a] sm:$0xff] }
 0x151   : > { %1697 = vst [vmem:[#allocation2 + $0x60] sm:$0xff] %v1663_v28  ;;  %v2722_v28 = vpack.c.bf16 %v2689_v51, %v2688_v49 }
 0x152   : > { %v918_v63 = vpop.f32.mrf.mxu2 }
 0x153   : > { %v1018_v3 = vadd.f32 %v918_v63, %v695_v54 }
 0x154   : > { %v598_v42 = vpop.f32.mrf.mxu1 }
 0x155   : > { %v1341_v53 = vadd.f32 %v4381_v27, %v1018_v3  ;;  %v696_v38 = vadd.f32 %v598_v42, %v4220_v6  ;;  %v4438_v27 = vpop.f32.mrf.mxu3 }
 0x157   : > { %v1567_v31 = vpop.f32.mrf.mxu0  ;;  %3679 = vmatmul.msk.bf16.gmra.mxu1 %vm247_vm0, %v4366_v37  ;;  %3714 = vmatmul.msk.bf16.gmra.mxu2 %vm247_vm0, %v799_v39  ;;  %v1664_v60 = vadd.f32 %v1564_v57, %v1341_v53  ;;  %v2368_v37 = vld [vmem:[%s4027_s23 + $0x3b] sm:$0xff] }
 0x158   : > { %v4443_v19 = vpack.c.bf16 %v2368_v37, %v2367_v56  ;;  %v2042_v39 = vld [vmem:[%s4027_s23 + $0x22] sm:$0xff] }
 0x159   : > { %1698 = vst [vmem:[#allocation2 + $0x68] sm:$0xff] %v1664_v60  ;;  %v2076_v18 = vpack.c.bf16 %v2043_v48, %v2042_v39 }
 0x15a   : > { %3784 = vmatmul.msk.bf16.gmra.mxu0 %vm247_vm0, %v800_v10  ;;  %v921_v8 = vpop.f32.mrf.mxu2  ;;  %3875 = vmatmul.msk.bf16.gmra.mxu3 %vm247_vm0, %v4443_v19 }
 0x15b   : > { %v1019_v9 = vadd.f32 %v921_v8, %v696_v38  ;;  %v2044_v8 = vld [vmem:[%s4027_s23 + $0x32] sm:$0xff] }
 0x15c   : > { %v600_v2 = vpop.f32.mrf.mxu1 }
 0x15d   : > { %v1342_v12 = vadd.f32 %v4393_v15, %v1019_v9  ;;  %v697_v6 = vadd.f32 %v600_v2, %v4228_v11  ;;  %v4450_v14 = vpop.f32.mrf.mxu3 }
 0x15f   : > { %v1569_v13 = vpop.f32.mrf.mxu0  ;;  %v1665_v16 = vadd.f32 %v1567_v31, %v1342_v12  ;;  %v2372_v31 = vld [vmem:[%s4027_s23 + $0x5b] sm:$0xff] }
 0x160   : > { %v2690_v12 = vld [vmem:[%s4027_s23 + $0x34] sm:$0xff] }
 0x161   : > { %1699 = vst [vmem:[#allocation2 + $0x70] sm:$0xff] %v1665_v16 }
 0x162   : > { %v923_v44 = vpop.f32.mrf.mxu2 }
 0x163   : > { %v1020_v46 = vadd.f32 %v923_v44, %v697_v6 }
 0x164   : > { %v603_v23 = vpop.f32.mrf.mxu1 }
 0x165   : > { %v1343_v15 = vadd.f32 %v4401_v5, %v1020_v46  ;;  %v698_v47 = vadd.f32 %v603_v23, %v4243_v21  ;;  %v4458_v32 = vpop.f32.mrf.mxu3  ;;  %v1720_v21 = vld [vmem:[%s4027_s23 + $0x1b] sm:$0xff] }
 0x166   : > { %v1753_v52 = vpack.c.bf16 %v1720_v21, %v1719_v58  ;;  %v2692_v58 = vld [vmem:[%s4027_s23 + $0x44] sm:$0xff] }
 0x167   : > { %v1572_v29 = vpop.f32.mrf.mxu0  ;;  %3680 = vmatmul.msk.bf16.gmra.mxu1 %vm247_vm0, %v4386_v7  ;;  %3715 = vmatmul.msk.bf16.gmra.mxu2 %vm247_vm0, %v800_v10  ;;  %v1666_v11 = vadd.f32 %v1569_v13, %v1343_v15  ;;  %v2371_v10 = vld [vmem:[%s4027_s23 + $0x53] sm:$0xff]  ;;  %v2691_v13 = vld [vmem:[%s4027_s23 + $0x3c] sm:$0xff] }
 0x168   : > { %v4486_v38 = vpack.c.bf16 %v2372_v31, %v2371_v10  ;;  %v2723_v44 = vpack.c.bf16 %v2691_v13, %v2690_v12  ;;  %v2694_v31 = vld [vmem:[%s4027_s23 + $0x54] sm:$0xff] }
 0x169   : > { %1700 = vst [vmem:[#allocation2 + $0x78] sm:$0xff] %v1666_v11  ;;  %v2373_v11 = vld [vmem:[%s4027_s23 + $0x63] sm:$0xff] }
 0x16a   : > { %3785 = vmatmul.msk.bf16.gmra.mxu0 %vm247_vm0, %v1446_v25  ;;  %v926_v30 = vpop.f32.mrf.mxu2  ;;  %3876 = vmatmul.msk.bf16.gmra.mxu3 %vm247_vm0, %v4464_v22 }
 0x16b   : > { %v1021_v5 = vadd.f32 %v926_v30, %v698_v47  ;;  %v2374_v47 = vld [vmem:[%s4027_s23 + $0x6b] sm:$0xff] }
 0x16c   : > { %v605_v1 = vpop.f32.mrf.mxu1 }
 0x16d   : > { %v1344_v7 = vadd.f32 %v4410_v34, %v1021_v5  ;;  %v699_v45 = vadd.f32 %v605_v1, %v4251_v26  ;;  %v4474_v59 = vpop.f32.mrf.mxu3  ;;  %v4507_v5 = vpack.c.bf16 %v2374_v47, %v2373_v11  ;;  %v669_v1 = vld [vmem:[#allocation2 + $0xa8] sm:$0xff] }
 0x16f   : > { %v1574_v41 = vpop.f32.mrf.mxu0  ;;  %v1667_v24 = vadd.f32 %v1572_v29, %v1344_v7  ;;  %v2046_v7 = vld [vmem:[%s4027_s23 + $0x42] sm:$0xff] }
 0x171   : > { %1701 = vst [vmem:[#allocation2 + $0x80] sm:$0xff] %v1667_v24  ;;  %v2693_v24 = vld [vmem:[%s4027_s23 + $0x4c] sm:$0xff] }
 0x172   : > { %v928_v36 = vpop.f32.mrf.mxu2 }
 0x173   : > { %v1022_v34 = vadd.f32 %v928_v36, %v699_v45  ;;  %v2724_v36 = vpack.c.bf16 %v2693_v24, %v2692_v58 }
 0x174   : > { %v608_v57 = vpop.f32.mrf.mxu1 }
 0x175   : > { %v1345_v43 = vadd.f32 %v4418_v17, %v1022_v34  ;;  %v700_v63 = vadd.f32 %v608_v57, %v4263_v35  ;;  %v4481_v3 = vpop.f32.mrf.mxu3  ;;  %v2045_v35 = vld [vmem:[%s4027_s23 + $0x3a] sm:$0xff]  ;;  %v670_v34 = vld [vmem:[#allocation2 + $0xb0] sm:$0xff] }
 0x176   : > { %v2077_v37 = vpack.c.bf16 %v2045_v35, %v2044_v8 }
 0x177   : > { %v1577_v54 = vpop.f32.mrf.mxu0  ;;  %3804 = vmatmul.msk.bf16.vlgmr.msra.gmra.mxu1 %vm247_vm0, %v1753_v52  ;;  %3839 = vmatmul.msk.bf16.vlgmr.msra.gmra.mxu2 %vm247_vm0, %v2076_v18  ;;  %v1668_v26 = vadd.f32 %v1574_v41, %v1345_v43  ;;  %v2047_v41 = vld [vmem:[%s4027_s23 + $0x4a] sm:$0xff] }
 0x178   : > { %v2078_v39 = vpack.c.bf16 %v2047_v41, %v2046_v7 }
 0x179   : > { %1702 = vst [vmem:[#allocation2 + $0x88] sm:$0xff] %v1668_v26  ;;  %v2376_v26 = vld [vmem:[%s4027_s23 + $0x7b] sm:$0xff] }
 0x17a   : > { %3909 = vmatmul.msk.bf16.vlgmr.msra.gmra.mxu0 %vm247_vm0, %v2722_v28  ;;  %v931_v62 = vpop.f32.mrf.mxu2  ;;  %3877 = vmatmul.msk.bf16.gmra.mxu3 %vm247_vm0, %v4486_v38 }
 0x17b   : > { %v1023_v0 = vadd.f32 %v931_v62, %v700_v63 }
 0x17c   : > { %v610_v17 = vpop.f32.mrf.mxu1 }
 0x17d   : > { %v1346_v42 = vadd.f32 %v4430_v4, %v1023_v0  ;;  %v701_v9 = vadd.f32 %v610_v17, %v4271_v40  ;;  %v4495_v16 = vpop.f32.mrf.mxu3  ;;  %v671_v0 = vld [vmem:[#allocation2 + $0xb8] sm:$0xff] }
 0x17e   : > { %v2048_v17 = vld [vmem:[%s4027_s23 + $0x52] sm:$0xff] }
 0x17f   : > { %v1579_v53 = vpop.f32.mrf.mxu0  ;;  %v1669_v60 = vadd.f32 %v1577_v54, %v1346_v42  ;;  %v2375_v54 = vld [vmem:[%s4027_s23 + $0x73] sm:$0xff] }
 0x180   : > { %v4527_v62 = vpack.c.bf16 %v2376_v26, %v2375_v54  ;;  %v2049_v42 = vld [vmem:[%s4027_s23 + $0x5a] sm:$0xff] }
 0x181   : > { %1703 = vst [vmem:[#allocation2 + $0x90] sm:$0xff] %v1669_v60  ;;  %v2695_v60 = vld [vmem:[%s4027_s23 + $0x5c] sm:$0xff]  ;;  %v2079_v35 = vpack.c.bf16 %v2049_v42, %v2048_v17 }
 0x182   : > { %v933_v2 = vpop.f32.mrf.mxu2  ;;  %v2725_v12 = vpack.c.bf16 %v2695_v60, %v2694_v31 }
 0x183   : > { %v1024_v56 = vadd.f32 %v933_v2, %v701_v9 }
 0x184   : > { %v613_v4 = vpop.f32.mrf.mxu1 }
 0x185   : > { %v1347_v6 = vadd.f32 %v4438_v27, %v1024_v56  ;;  %v702_v46 = vadd.f32 %v668_v55, %v613_v4  ;;  %v4502_v25 = vpop.f32.mrf.mxu3  ;;  %v2377_v55 = vld [vmem:[%s4027_s23 + $0x83] sm:$0xff] }
 0x187   : > { %v1582_v20 = vpop.f32.mrf.mxu0  ;;  %3805 = vmatmul.msk.bf16.gmra.mxu1 %vm247_vm0, %v4423_v61  ;;  %3840 = vmatmul.msk.bf16.gmra.mxu2 %vm247_vm0, %v2077_v37  ;;  %v1670_v40 = vadd.f32 %v1579_v53, %v1347_v6  ;;  %v672_v37 = vld [vmem:[#allocation2 + $0xc0] sm:$0xff] }
 0x189   : > { %1704 = vst [vmem:[#allocation2 + $0x98] sm:$0xff] %v1670_v40 }
 0x18a   : > { %3910 = vmatmul.msk.bf16.gmra.mxu0 %vm247_vm0, %v2723_v44  ;;  %v936_v23 = vpop.f32.mrf.mxu2  ;;  %3878 = vmatmul.msk.bf16.gmra.mxu3 %vm247_vm0, %v4507_v5 }
 0x18b   : > { %v1025_v15 = vadd.f32 %v936_v23, %v702_v46  ;;  %v2378_v46 = vld [vmem:[%s4027_s23 + $0x8b] sm:$0xff] }
 0x18c   : > { %v615_v27 = vpop.f32.mrf.mxu1 }
 0x18d   : > { %v1348_v29 = vadd.f32 %v4450_v14, %v1025_v15  ;;  %v703_v50 = vadd.f32 %v669_v1, %v615_v27  ;;  %v4515_v48 = vpop.f32.mrf.mxu3  ;;  %v4547_v15 = vpack.c.bf16 %v2378_v46, %v2377_v55  ;;  %v673_v27 = vld [vmem:[#allocation2 + $0xc8] sm:$0xff] }
 0x18e   : > { %v2697_v1 = vld [vmem:[%s4027_s23 + $0x6c] sm:$0xff] }
 0x18f   : > { %v1584_v61 = vpop.f32.mrf.mxu0  ;;  %v1671_v30 = vadd.f32 %v1582_v20, %v1348_v29  ;;  %v2050_v29 = vld [vmem:[%s4027_s23 + $0x62] sm:$0xff] }
 0x191   : > { %1705 = vst [vmem:[#allocation2 + $0xa0] sm:$0xff] %v1671_v30  ;;  %v2696_v30 = vld [vmem:[%s4027_s23 + $0x64] sm:$0xff] }
 0x192   : > { %v938_v33 = vpop.f32.mrf.mxu2  ;;  %v2726_v58 = vpack.c.bf16 %v2697_v1, %v2696_v30 }
 0x193   : > { %v1026_v21 = vadd.f32 %v938_v33, %v703_v50 }
 0x194   : > { %v618_v14 = vpop.f32.mrf.mxu1 }
 0x195   : > { %v1349_v45 = vadd.f32 %v4458_v32, %v1026_v21  ;;  %v704_v52 = vadd.f32 %v670_v34, %v618_v14  ;;  %v4522_v43 = vpop.f32.mrf.mxu3  ;;  %v2379_v34 = vld [vmem:[%s4027_s23 + $0x93] sm:$0xff] }
 0x197   : > { %v1587_v49 = vpop.f32.mrf.mxu0  ;;  %3806 = vmatmul.msk.bf16.gmra.mxu1 %vm247_vm0, %v4443_v19  ;;  %3841 = vmatmul.msk.bf16.gmra.mxu2 %vm247_vm0, %v2078_v39  ;;  %v1672_v51 = vadd.f32 %v1584_v61, %v1349_v45  ;;  %v2051_v61 = vld [vmem:[%s4027_s23 + $0x6a] sm:$0xff] }
 0x198   : > { %v2080_v41 = vpack.c.bf16 %v2051_v61, %v2050_v29  ;;  %v674_v39 = vld [vmem:[#allocation2 + $0xd0] sm:$0xff] }
 0x199   : > { %1706 = vst [vmem:[#allocation2 + $0xa8] sm:$0xff] %v1672_v51 }
 0x19a   : > { %3911 = vmatmul.msk.bf16.gmra.mxu0 %vm247_vm0, %v2724_v36  ;;  %v941_v18 = vpop.f32.mrf.mxu2  ;;  %3879 = vmatmul.msk.bf16.gmra.mxu3 %vm247_vm0, %v4527_v62 }
 0x19b   : > { %v1027_v57 = vadd.f32 %v941_v18, %v704_v52  ;;  %v2380_v52 = vld [vmem:[%s4027_s23 + $0x9b] sm:$0xff] }
 0x19c   : > { %v620_v32 = vpop.f32.mrf.mxu1 }
 0x19d   : > { %v1350_v28 = vadd.f32 %v4474_v59, %v1027_v57  ;;  %v705_v53 = vadd.f32 %v671_v0, %v620_v32  ;;  %v4535_v9 = vpop.f32.mrf.mxu3  ;;  %v4567_v57 = vpack.c.bf16 %v2380_v52, %v2379_v34  ;;  %v675_v32 = vld [vmem:[#allocation2 + $0xd8] sm:$0xff] }
 0x19e   : > { %v2699_v0 = vld [vmem:[%s4027_s23 + $0x7c] sm:$0xff] }
 0x19f   : > { %v1589_v19 = vpop.f32.mrf.mxu0  ;;  %v1673_v63 = vadd.f32 %v1587_v49, %v1350_v28  ;;  %v2052_v28 = vld [vmem:[%s4027_s23 + $0x72] sm:$0xff] }
 0x1a1   : > { %1707 = vst [vmem:[#allocation2 + $0xb0] sm:$0xff] %v1673_v63  ;;  %v2698_v63 = vld [vmem:[%s4027_s23 + $0x74] sm:$0xff] }
 0x1a2   : > { %v943_v10 = vpop.f32.mrf.mxu2  ;;  %v2727_v31 = vpack.c.bf16 %v2699_v0, %v2698_v63 }
 0x1a3   : > { %v1028_v8 = vadd.f32 %v943_v10, %v705_v53 }
 0x1a4   : > { %v623_v59 = vpop.f32.mrf.mxu1 }
 0x1a5   : > { %v1351_v2 = vadd.f32 %v4481_v3, %v1028_v8  ;;  %v706_v4 = vadd.f32 %v672_v37, %v623_v59  ;;  %v4542_v20 = vpop.f32.mrf.mxu3  ;;  %v2381_v37 = vld [vmem:[%s4027_s23 + $0xa3] sm:$0xff] }
 0x1a7   : > { %v1592_v13 = vpop.f32.mrf.mxu0  ;;  %3807 = vmatmul.msk.bf16.gmra.mxu1 %vm247_vm0, %v4464_v22  ;;  %3842 = vmatmul.msk.bf16.gmra.mxu2 %vm247_vm0, %v2079_v35  ;;  %v1674_v56 = vadd.f32 %v1589_v19, %v1351_v2  ;;  %v2053_v19 = vld [vmem:[%s4027_s23 + $0x7a] sm:$0xff] }
 0x1a8   : > { %v2081_v42 = vpack.c.bf16 %v2053_v19, %v2052_v28  ;;  %v676_v35 = vld [vmem:[#allocation2 + $0xe0] sm:$0xff] }
 0x1a9   : > { %1708 = vst [vmem:[#allocation2 + $0xb8] sm:$0xff] %v1674_v56 }
 0x1aa   : > { %3912 = vmatmul.msk.bf16.gmra.mxu0 %vm247_vm0, %v2725_v12  ;;  %v946_v6 = vpop.f32.mrf.mxu2  ;;  %3880 = vmatmul.msk.bf16.gmra.mxu3 %vm247_vm0, %v4547_v15 }
 0x1ab   : > { %v1029_v44 = vadd.f32 %v946_v6, %v706_v4  ;;  %v2382_v4 = vld [vmem:[%s4027_s23 + $0xab] sm:$0xff] }
 0x1ac   : > { %v625_v3 = vpop.f32.mrf.mxu1 }
 0x1ad   : > { %v1352_v40 = vadd.f32 %v4495_v16, %v1029_v44  ;;  %v707_v11 = vadd.f32 %v673_v27, %v625_v3  ;;  %v4555_v50 = vpop.f32.mrf.mxu3  ;;  %v4587_v44 = vpack.c.bf16 %v2382_v4, %v2381_v37  ;;  %v677_v3 = vld [vmem:[#allocation2 + $0xe8] sm:$0xff] }
 0x1ae   : > { %v2701_v27 = vld [vmem:[%s4027_s23 + $0x8c] sm:$0xff] }
 0x1af   : > { %v1594_v22 = vpop.f32.mrf.mxu0  ;;  %v1675_v23 = vadd.f32 %v1592_v13, %v1352_v40  ;;  %v2054_v40 = vld [vmem:[%s4027_s23 + $0x82] sm:$0xff] }
 0x1b1   : > { %1709 = vst [vmem:[#allocation2 + $0xc0] sm:$0xff] %v1675_v23  ;;  %v2700_v23 = vld [vmem:[%s4027_s23 + $0x84] sm:$0xff] }
 0x1b2   : > { %v948_v47 = vpop.f32.mrf.mxu2  ;;  %v2728_v30 = vpack.c.bf16 %v2701_v27, %v2700_v23 }
 0x1b3   : > { %v1030_v7 = vadd.f32 %v948_v47, %v707_v11 }
 0x1b4   : > { %v628_v16 = vpop.f32.mrf.mxu1 }
 0x1b5   : > { %v1353_v33 = vadd.f32 %v4502_v25, %v1030_v7  ;;  %v708_v14 = vadd.f32 %v674_v39, %v628_v16  ;;  %v4562_v49 = vpop.f32.mrf.mxu3  ;;  %v2383_v39 = vld [vmem:[%s4027_s23 + $0xb3] sm:$0xff] }
 0x1b7   : > { %v1597_v24 = vpop.f32.mrf.mxu0  ;;  %3808 = vmatmul.msk.bf16.gmra.mxu1 %vm247_vm0, %v4486_v38  ;;  %3843 = vmatmul.msk.bf16.gmra.mxu2 %vm247_vm0, %v2080_v41  ;;  %v1676_v21 = vadd.f32 %v1594_v22, %v1353_v33  ;;  %v2055_v22 = vld [vmem:[%s4027_s23 + $0x8a] sm:$0xff] }
 0x1b8   : > { %v2082_v61 = vpack.c.bf16 %v2055_v22, %v2054_v40  ;;  %v678_v41 = vld [vmem:[#allocation2 + $0xf0] sm:$0xff] }
 0x1b9   : > { %1710 = vst [vmem:[#allocation2 + $0xc8] sm:$0xff] %v1676_v21 }
 0x1ba   : > { %3913 = vmatmul.msk.bf16.gmra.mxu0 %vm247_vm0, %v2726_v58  ;;  %v951_v45 = vpop.f32.mrf.mxu2  ;;  %3881 = vmatmul.msk.bf16.gmra.mxu3 %vm247_vm0, %v4567_v57 }
 0x1bb   : > { %v1031_v36 = vadd.f32 %v951_v45, %v708_v14  ;;  %v2384_v14 = vld [vmem:[%s4027_s23 + $0xbb] sm:$0xff] }
 0x1bc   : > { %v630_v25 = vpop.f32.mrf.mxu1 }
 0x1bd   : > { %v1354_v51 = vadd.f32 %v4515_v48, %v1031_v36  ;;  %v709_v54 = vadd.f32 %v675_v32, %v630_v25  ;;  %v4575_v53 = vpop.f32.mrf.mxu3  ;;  %v4607_v36 = vpack.c.bf16 %v2384_v14, %v2383_v39  ;;  %v679_v25 = vld [vmem:[#allocation2 + $0xf8] sm:$0xff] }
 0x1be   : > { %v2703_v32 = vld [vmem:[%s4027_s23 + $0x9c] sm:$0xff] }
 0x1bf   : > { %v1599_v38 = vpop.f32.mrf.mxu0  ;;  %v1677_v18 = vadd.f32 %v1597_v24, %v1354_v51  ;;  %v2056_v51 = vld [vmem:[%s4027_s23 + $0x92] sm:$0xff]  ;;  %v2061_v39 = vld [vmem:[%s4027_s23 + $0xba] sm:$0xff] }
 0x1c1   : > { %1711 = vst [vmem:[#allocation2 + $0xd0] sm:$0xff] %v1677_v18  ;;  %v2702_v18 = vld [vmem:[%s4027_s23 + $0x94] sm:$0xff] }
 0x1c2   : > { %v953_v26 = vpop.f32.mrf.mxu2  ;;  %v2729_v63 = vpack.c.bf16 %v2703_v32, %v2702_v18 }
 0x1c3   : > { %v1032_v17 = vadd.f32 %v953_v26, %v709_v54 }
 0x1c4   : > { %v633_v48 = vpop.f32.mrf.mxu1 }
 0x1c5   : > { %v1355_v10 = vadd.f32 %v4522_v43, %v1032_v17  ;;  %v710_v59 = vadd.f32 %v676_v35, %v633_v48  ;;  %v4582_v13 = vpop.f32.mrf.mxu3  ;;  %v2385_v35 = vld [vmem:[%s4027_s23 + $0xc3] sm:$0xff] }
 0x1c7   : > { %v1602_v60 = vpop.f32.mrf.mxu0  ;;  %3809 = vmatmul.msk.bf16.gmra.mxu1 %vm247_vm0, %v4507_v5  ;;  %3844 = vmatmul.msk.bf16.gmra.mxu2 %vm247_vm0, %v2081_v42  ;;  %v1678_v8 = vadd.f32 %v1599_v38, %v1355_v10  ;;  %v2057_v38 = vld [vmem:[%s4027_s23 + $0x9a] sm:$0xff] }
 0x1c8   : > { %v2083_v19 = vpack.c.bf16 %v2057_v38, %v2056_v51  ;;  %v680_v42 = vld [vmem:[#allocation2 + $0x100] sm:$0xff] }
 0x1c9   : > { %1712 = vst [vmem:[#allocation2 + $0xd8] sm:$0xff] %v1678_v8  ;;  %v2707_v51 = vld [vmem:[%s4027_s23 + $0xbc] sm:$0xff] }
 0x1ca   : > { %3914 = vmatmul.msk.bf16.gmra.mxu0 %vm247_vm0, %v2727_v31  ;;  %v956_v2 = vpop.f32.mrf.mxu2  ;;  %3882 = vmatmul.msk.bf16.gmra.mxu3 %vm247_vm0, %v4587_v44 }
 0x1cb   : > { %v1033_v12 = vadd.f32 %v956_v2, %v710_v59  ;;  %v2386_v59 = vld [vmem:[%s4027_s23 + $0xcb] sm:$0xff] }
 0x1cc   : > { %v635_v43 = vpop.f32.mrf.mxu1 }
 0x1cd   : > { %v1356_v56 = vadd.f32 %v4535_v9, %v1033_v12  ;;  %v711_v55 = vadd.f32 %v677_v3, %v635_v43  ;;  %v4595_v11 = vpop.f32.mrf.mxu3  ;;  %v4627_v12 = vpack.c.bf16 %v2386_v59, %v2385_v35  ;;  %v681_v43 = vld [vmem:[#allocation2 + $0x108] sm:$0xff]  ;;  %v1943_v59 = vld [vmem:[#allocation2 + $0x18] sm:$0xff] }
 0x1ce   : > { %v2705_v3 = vld [vmem:[%s4027_s23 + $0xac] sm:$0xff] }
 0x1cf   : > { %v1604_v5 = vpop.f32.mrf.mxu0  ;;  %v1679_v6 = vadd.f32 %v1602_v60, %v1356_v56  ;;  %v2058_v56 = vld [vmem:[%s4027_s23 + $0xa2] sm:$0xff]  ;;  %v2390_v35 = vld [vmem:[%s4027_s23 + $0xeb] sm:$0xff] }
 0x1d1   : > { %1713 = vst [vmem:[#allocation2 + $0xe0] sm:$0xff] %v1679_v6  ;;  %v2704_v6 = vld [vmem:[%s4027_s23 + $0xa4] sm:$0xff] }
 0x1d2   : > { %v958_v46 = vpop.f32.mrf.mxu2  ;;  %v2730_v23 = vpack.c.bf16 %v2705_v3, %v2704_v6  ;;  %v2709_v6 = vld [vmem:[%s4027_s23 + $0xcc] sm:$0xff] }
 0x1d3   : > { %v1034_v29 = vadd.f32 %v958_v46, %v711_v55 }
 0x1d4   : > { %v638_v9 = vpop.f32.mrf.mxu1 }
 0x1d5   : > { %v1357_v47 = vadd.f32 %v4542_v20, %v1034_v29  ;;  %v712_v16 = vadd.f32 %v678_v41, %v638_v9  ;;  %v4602_v24 = vpop.f32.mrf.mxu3 }
 0x1d7   : > { %v1607_v1 = vpop.f32.mrf.mxu0  ;;  %3810 = vmatmul.msk.bf16.gmra.mxu1 %vm247_vm0, %v4527_v62  ;;  %3845 = vmatmul.msk.bf16.gmra.mxu2 %vm247_vm0, %v2082_v61  ;;  %v1680_v7 = vadd.f32 %v1604_v5, %v1357_v47  ;;  %v2059_v5 = vld [vmem:[%s4027_s23 + $0xaa] sm:$0xff]  ;;  %v1940_v61 = vld [vmem:[#allocation2] sm:$0xff] }
 0x1d8   : > { %v2084_v22 = vpack.c.bf16 %v2059_v5, %v2058_v56 }
 0x1d9   : > { %1714 = vst [vmem:[#allocation2 + $0xe8] sm:$0xff] %v1680_v7 }
 0x1da   : > { %3915 = vmatmul.msk.bf16.gmra.mxu0 %vm247_vm0, %v2728_v30  ;;  %v961_v33 = vpop.f32.mrf.mxu2  ;;  %3883 = vmatmul.msk.bf16.gmra.mxu3 %vm247_vm0, %v4607_v36 }
 0x1db   : > { %v1035_v58 = vadd.f32 %v961_v33, %v712_v16  ;;  %v2387_v16 = vld [vmem:[%s4027_s23 + $0xd3] sm:$0xff]  ;;  %v2388_v33 = vld [vmem:[%s4027_s23 + $0xdb] sm:$0xff] }
 0x1dc   : > { %v640_v20 = vpop.f32.mrf.mxu1 }
 0x1dd   : > { %v1358_v21 = vadd.f32 %v4555_v50, %v1035_v58  ;;  %v713_v34 = vadd.f32 %v679_v25, %v640_v20  ;;  %v4615_v54 = vpop.f32.mrf.mxu3  ;;  %v4652_v20 = vpack.c.bf16 %v2388_v33, %v2387_v16  ;;  %v2706_v25 = vld [vmem:[%s4027_s23 + $0xb4] sm:$0xff] }
 0x1df   : > { %v1609_v62 = vpop.f32.mrf.mxu0  ;;  %v1681_v45 = vadd.f32 %v1607_v1, %v1358_v21  ;;  %v1941_v21 = vld [vmem:[#allocation2 + $0x8] sm:$0xff] }
 0x1e1   : > { %1715 = vst [vmem:[#allocation2 + $0xf0] sm:$0xff] %v1681_v45 }
 0x1e2   : > { %v963_v52 = vpop.f32.mrf.mxu2 }
 0x1e3   : > { %v1036_v28 = vadd.f32 %v963_v52, %v713_v34 }
 0x1e4   : > { %v643_v50 = vpop.f32.mrf.mxu1 }
 0x1e5   : > { %v1359_v26 = vadd.f32 %v4562_v49, %v1036_v28  ;;  %v714_v48 = vadd.f32 %v680_v42, %v643_v50  ;;  %v4622_v60 = vpop.f32.mrf.mxu3 }
 0x1e7   : > { %v1612_v0 = vpop.f32.mrf.mxu0  ;;  %3811 = vmatmul.msk.bf16.gmra.mxu1 %vm247_vm0, %v4547_v15  ;;  %3846 = vmatmul.msk.bf16.gmra.mxu2 %vm247_vm0, %v2083_v19  ;;  %v1682_v17 = vadd.f32 %v1609_v62, %v1359_v26  ;;  %v2060_v62 = vld [vmem:[%s4027_s23 + $0xb2] sm:$0xff]  ;;  %v2731_v19 = vpack.c.bf16 %v2707_v51, %v2706_v25 }
 0x1e8   : > { %v2085_v34 = vpack.c.bf16 %v2061_v39, %v2060_v62  ;;  %v2065_v39 = vld [vmem:[%s4027_s23 + $0xda] sm:$0xff] }
 0x1e9   : > { %1716 = vst [vmem:[#allocation2 + $0xf8] sm:$0xff] %v1682_v17 }
 0x1ea   : > { %3916 = vmatmul.msk.bf16.gmra.mxu0 %vm247_vm0, %v2729_v63  ;;  %v966_v10 = vpop.f32.mrf.mxu2  ;;  %3884 = vmatmul.msk.bf16.gmra.mxu3 %vm247_vm0, %v4627_v12  ;;  %v1942_v63 = vld [vmem:[#allocation2 + $0x10] sm:$0xff] }
 0x1eb   : > { %v1037_v31 = vadd.f32 %v966_v10, %v714_v48 }
 0x1ec   : > { %v645_v49 = vpop.f32.mrf.mxu1 }
 0x1ed   : > { %v1360_v8 = vadd.f32 %v4575_v53, %v1037_v31  ;;  %v715_v37 = vadd.f32 %v681_v43, %v645_v49  ;;  %v4635_v55 = vpop.f32.mrf.mxu3  ;;  %v2063_v43 = vld [vmem:[%s4027_s23 + $0xca] sm:$0xff] }
 0x1ef   : > { %v1614_v15 = vpop.f32.mrf.mxu0  ;;  %v1683_v2 = vadd.f32 %v1612_v0, %v1360_v8 }
 0x1f1   : > { %1717 = vst [vmem:[#allocation2 + $0x100] sm:$0xff] %v1683_v2  ;;  %v2062_v2 = vld [vmem:[%s4027_s23 + $0xc2] sm:$0xff] }
 0x1f2   : > { %v968_v4 = vpop.f32.mrf.mxu2 }
 0x1f3   : > { %v1038_v40 = vadd.f32 %v968_v4, %v715_v37 }
 0x1f4   : > { %v1855_v53 = vpop.f32.mrf.mxu1 }
 0x1f5   : > { %v1361_v46 = vadd.f32 %v4582_v13, %v1038_v40  ;;  %v1974_v9 = vadd.f32 %v1940_v61, %v1855_v53  ;;  %v4642_v1 = vpop.f32.mrf.mxu3  ;;  %v2086_v40 = vpack.c.bf16 %v2063_v43, %v2062_v2 }
 0x1f7   : > { %v2824_v27 = vpop.f32.mrf.mxu0  ;;  %3812 = vmatmul.msk.bf16.gmra.mxu1 %vm247_vm0, %v4567_v57  ;;  %3847 = vmatmul.msk.bf16.gmra.mxu2 %vm247_vm0, %v2084_v22  ;;  %v1684_v29 = vadd.f32 %v1614_v15, %v1361_v46  ;;  %v4648_v57 = vld [vmem:[%s5188_s2] ss:$0 sm:$0xff]  ;;  %v2389_v15 = vld [vmem:[%s4027_s23 + $0xe3] sm:$0xff] }
 0x1f8   : > { %v4686_v56 = vpack.c.bf16 %v2390_v35, %v2389_v15  ;;  %v1946_v35 = vld [vmem:[#allocation2 + $0x30] sm:$0xff] }
 0x1f9   : > { %1718 = vst [vmem:[#allocation2 + $0x108] sm:$0xff] %v1684_v29 }
 0x1fa   : > { %3917 = vmatmul.msk.bf16.gmra.mxu0 %vm247_vm0, %v2730_v23  ;;  %v2178_v47 = vpop.f32.mrf.mxu2  ;;  %3885 = vmatmul.msk.bf16.gmra.mxu3 %vm247_vm0, %v4652_v20 }
 0x1fb   : > { %v2297_v30 = vadd.f32 %v2178_v47, %v1974_v9  ;;  %v1944_v9 = vld [vmem:[#allocation2 + $0x20] sm:$0xff] }
 0x1fc   : > { %v1857_v13 = vpop.f32.mrf.mxu1 }
 0x1fd   : > { %v2620_v7 = vadd.f32 %v4595_v11, %v2297_v30  ;;  %v1975_v14 = vadd.f32 %v1941_v21, %v1857_v13  ;;  %v4664_v32 = vpop.f32.mrf.mxu3  ;;  %v2064_v21 = vld [vmem:[%s4027_s23 + $0xd2] sm:$0xff] }
 0x1ff   : > { %v2826_v41 = vpop.f32.mrf.mxu0  ;;  %v2943_v58 = vadd.f32 %v2824_v27, %v2620_v7 }
 0x201   : > { %v4657_v45 = vadd.f32 %v4648_v57, %v2943_v58  ;;  %v1945_v58 = vld [vmem:[#allocation2 + $0x28] sm:$0xff] }
 0x202   : > { %v2180_v11 = vpop.f32.mrf.mxu2 }
 0x203   : > { %v2298_v38 = vadd.f32 %v2180_v11, %v1975_v14  ;;  %v3083_v52 = vmax.f32 %v4657_v45, 0.0  ;;  %v2391_v14 = vld [vmem:[%s4027_s23 + $0xf3] sm:$0xff]  ;;  %v2392_v11 = vld [vmem:[%s4027_s23 + $0xfb] sm:$0xff] }
 0x204   : > { %v1860_v18 = vpop.f32.mrf.mxu1 }
 0x205   : > { %v2621_v28 = vadd.f32 %v4602_v24, %v2298_v38  ;;  %3117 = vst [vmem:[#allocation2] sm:$0xff] %v3083_v52  ;;  %v1976_v0 = vadd.f32 %v1942_v63, %v1860_v18  ;;  %v4680_v31 = vpop.f32.mrf.mxu3  ;;  %v4721_v38 = vpack.c.bf16 %v2392_v11, %v2391_v14  ;;  %v2710_v18 = vld [vmem:[%s4027_s23 + $0xd4] sm:$0xff] }
 0x207   : > { %v2829_v50 = vpop.f32.mrf.mxu0  ;;  %3813 = vmatmul.msk.bf16.gmra.mxu1 %vm247_vm0, %v4587_v44  ;;  %3848 = vmatmul.msk.bf16.gmra.mxu2 %vm247_vm0, %v2085_v34  ;;  %v2944_v26 = vadd.f32 %v2826_v41, %v2621_v28  ;;  %v2711_v28 = vld [vmem:[%s4027_s23 + $0xdc] sm:$0xff] }
 0x209   : > { %v4673_v17 = vadd.f32 %v4648_v57, %v2944_v26 }
 0x20a   : > { %3918 = vmatmul.msk.bf16.gmra.mxu0 %vm247_vm0, %v2731_v19  ;;  %v2183_v24 = vpop.f32.mrf.mxu2  ;;  %3886 = vmatmul.msk.bf16.gmra.mxu3 %vm247_vm0, %v4686_v56 }
 0x20b   : > { %v2299_v42 = vadd.f32 %v2183_v24, %v1976_v0  ;;  %v3084_v48 = vmax.f32 %v4673_v17, 0.0  ;;  %v2393_v17 = vld [vmem:[%s4027_s23 + $0x103] sm:$0xff] }
 0x20c   : > { %v1862_v44 = vpop.f32.mrf.mxu1 }
 0x20d   : > { %v2622_v10 = vadd.f32 %v4615_v54, %v2299_v42  ;;  %3118 = vst [vmem:[#allocation2 + $0x8] sm:$0xff] %v3084_v48  ;;  %v1977_v5 = vadd.f32 %v1943_v59, %v1862_v44  ;;  %v2708_v54 = vld [vmem:[%s4027_s23 + $0xc4] sm:$0xff]  ;;  %v4699_v27 = vpop.f32.mrf.mxu3  ;;  %v2733_v42 = vpack.c.bf16 %v2711_v28, %v2710_v18 }
 0x20e   : > { %v2732_v23 = vpack.c.bf16 %v2709_v6, %v2708_v54 }
 0x20f   : > { %v2831_v49 = vpop.f32.mrf.mxu0  ;;  %v2945_v8 = vadd.f32 %v2829_v50, %v2622_v10  ;;  %v2087_v50 = vpack.c.bf16 %v2065_v39, %v2064_v21  ;;  %v2713_v39 = vld [vmem:[%s4027_s23 + $0xec] sm:$0xff] }
 0x211   : > { %v4689_v37 = vadd.f32 %v4648_v57, %v2945_v8 }
 0x212   : > { %v2185_v4 = vpop.f32.mrf.mxu2 }
 0x213   : > { %v2300_v3 = vadd.f32 %v2185_v4, %v1977_v5  ;;  %v3085_v22 = vmax.f32 %v4689_v37, 0.0 }
 0x214   : > { %v1865_v53 = vpop.f32.mrf.mxu1  ;;  %v3235_v8 = vld [vmem:[#allocation2 + $0x2] sm:$0xff] }
 0x215   : > { %v2623_v46 = vadd.f32 %v4622_v60, %v2300_v3  ;;  %3119 = vst [vmem:[#allocation2 + $0x10] sm:$0xff] %v3085_v22  ;;  %v1978_v47 = vadd.f32 %v1944_v9, %v1865_v53  ;;  %v4712_v33 = vpop.f32.mrf.mxu3  ;;  %v2067_v9 = vld [vmem:[%s4027_s23 + $0xea] sm:$0xff] }
 0x217   : > { %v2834_v29 = vpop.f32.mrf.mxu0  ;;  %3814 = vmatmul.msk.bf16.gmra.mxu1 %vm247_vm0, %v4607_v36  ;;  %3849 = vmatmul.msk.bf16.gmra.mxu2 %vm247_vm0, %v2086_v40  ;;  %v2946_v61 = vadd.f32 %v2831_v49, %v2623_v46  ;;  %v1947_v40 = vld [vmem:[#allocation2 + $0x38] sm:$0xff] }
 0x219   : > { %v4705_v60 = vadd.f32 %v4648_v57, %v2946_v61  ;;  %v2066_v61 = vld [vmem:[%s4027_s23 + $0xe2] sm:$0xff] }
 0x21a   : > { %3919 = vmatmul.msk.bf16.gmra.mxu0 %vm247_vm0, %v2732_v23  ;;  %v2188_v30 = vpop.f32.mrf.mxu2  ;;  %3887 = vmatmul.msk.bf16.gmra.mxu3 %vm247_vm0, %v4721_v38  ;;  %v2088_v21 = vpack.c.bf16 %v2067_v9, %v2066_v61 }
 0x21b   : > { %v2301_v13 = vadd.f32 %v2188_v30, %v1978_v47  ;;  %v3086_v7 = vmax.f32 %v4705_v60, 0.0 }
 0x21c   : > { %v1867_v41 = vpop.f32.mrf.mxu1  ;;  %v3180_v59 = vld [vmem:[#allocation2 + $0x9] sm:$0xff] }
 0x21d   : > { %v2624_v36 = vadd.f32 %v4635_v55, %v2301_v13  ;;  %3120 = vst [vmem:[#allocation2 + $0x18] sm:$0xff] %v3086_v7  ;;  %v1979_v25 = vadd.f32 %v1945_v58, %v1867_v41  ;;  %v3179_v55 = vld [vmem:[#allocation2 + $0x1] sm:$0xff]  ;;  %v4733_v10 = vpop.f32.mrf.mxu3  ;;  %v3208_v54 = vmax.f32 %v3084_v48, %v3180_v59  ;;  %v3236_v23 = vld [vmem:[#allocation2 + $0xa] sm:$0xff] }
 0x21e   : > { %v3207_v0 = vmax.f32 %v3083_v52, %v3179_v55  ;;  %v2394_v48 = vld [vmem:[%s4027_s23 + $0x10b] sm:$0xff] }
 0x21f   : > { %v2836_v16 = vpop.f32.mrf.mxu0  ;;  %v2947_v62 = vadd.f32 %v2834_v29, %v2624_v36  ;;  %v4757_v36 = vpack.c.bf16 %v2394_v48, %v2393_v17  ;;  %v1949_v17 = vld [vmem:[#allocation2 + $0x48] sm:$0xff]  ;;  %v2068_v48 = vld [vmem:[%s4027_s23 + $0xf2] sm:$0xff] }
 0x220   : > { %v3263_v45 = vmax.f32 %v3207_v0, %v3235_v8 }
 0x221   : > { %v4719_v51 = vadd.f32 %v4648_v57, %v2947_v62  ;;  %v2712_v62 = vld [vmem:[%s4027_s23 + $0xe4] sm:$0xff] }
 0x222   : > { %v2190_v34 = vpop.f32.mrf.mxu2 }
 0x223   : > { %v2302_v19 = vadd.f32 %v2190_v34, %v1979_v25  ;;  %v3087_v26 = vmax.f32 %v4719_v51, 0.0 }
 0x224   : > { %v1870_v63 = vpop.f32.mrf.mxu1  ;;  %v3181_v15 = vld [vmem:[#allocation2 + $0x11] sm:$0xff] }
 0x225   : > { %v2625_v24 = vadd.f32 %v4642_v1, %v2302_v19  ;;  %3121 = vst [vmem:[#allocation2 + $0x20] sm:$0xff] %v3087_v26  ;;  %v1980_v52 = vadd.f32 %v1946_v35, %v1870_v63  ;;  %v3294_v43 = vmax.f32 %v3263_v45, %v3181_v15  ;;  %v3237_v3 = vld [vmem:[#allocation2 + $0x12] sm:$0xff]  ;;  %v4748_v46 = vpop.f32.mrf.mxu3  ;;  %v2734_v19 = vpack.c.bf16 %v2713_v39, %v2712_v62 }
 0x227   : > { %v2839_v44 = vpop.f32.mrf.mxu0  ;;  %3815 = vmatmul.msk.bf16.gmra.mxu1 %vm247_vm0, %v4627_v12  ;;  %3850 = vmatmul.msk.bf16.gmra.mxu2 %vm247_vm0, %v2087_v50  ;;  %v2948_v49 = vadd.f32 %v2836_v16, %v2625_v24  ;;  %v3325_v29 = vmax.f32 %v3294_v43, %v3237_v3  ;;  %v3353_v16 = vld [vmem:[#allocation2 + $0x13] sm:$0xff]  ;;  %v3209_v50 = vmax.f32 %v3085_v22, %v3181_v15  ;;  %v1948_v22 = vld [vmem:[#allocation2 + $0x40] sm:$0xff] }
 0x229   : > { %v4739_v1 = vadd.f32 %v4648_v57, %v2948_v49  ;;  %v3381_v14 = vmax.f32 %v3325_v29, %v3353_v16  ;;  %v2396_v16 = vld [vmem:[%s4027_s23 + $0x11b] sm:$0xff] }
 0x22a   : > { %3920 = vmatmul.msk.bf16.gmra.mxu0 %vm247_vm0, %v2733_v42  ;;  %v2193_v2 = vpop.f32.mrf.mxu2  ;;  %3888 = vmatmul.msk.bf16.gmra.mxu3 %vm247_vm0, %v4757_v36 }
 0x22b   : > { %v2303_v5 = vadd.f32 %v2193_v2, %v1980_v52  ;;  %v3088_v12 = vmax.f32 %v4739_v1, 0.0  ;;  %v3265_v52 = vmax.f32 %v3209_v50, %v3237_v3  ;;  %v2071_v1 = vld [vmem:[%s4027_s23 + $0x10a] sm:$0xff] }
 0x22c   : > { %v1872_v4 = vpop.f32.mrf.mxu1  ;;  %v3182_v30 = vld [vmem:[#allocation2 + $0x19] sm:$0xff] }
 0x22d   : > { %v2626_v6 = vadd.f32 %v4664_v32, %v2303_v5  ;;  %3122 = vst [vmem:[#allocation2 + $0x28] sm:$0xff] %v3088_v12  ;;  %v3264_v32 = vmax.f32 %v3208_v54, %v3236_v23  ;;  %v1981_v13 = vadd.f32 %v1947_v40, %v1872_v4  ;;  %v3238_v63 = vld [vmem:[#allocation2 + $0x1a] sm:$0xff] }
 0x22e   : > { %v3354_v59 = vld [vmem:[#allocation2 + $0x1b] sm:$0xff] }
 0x22f   : > { %v2841_v53 = vpop.f32.mrf.mxu0  ;;  %v2949_v47 = vadd.f32 %v2839_v44, %v2626_v6  ;;  %v3295_v11 = vmax.f32 %v3264_v32, %v3182_v30  ;;  %v4773_v44 = vpop.f32.mrf.mxu3  ;;  %v2069_v32 = vld [vmem:[%s4027_s23 + $0xfa] sm:$0xff] }
 0x231   : > { %v4755_v41 = vadd.f32 %v4648_v57, %v2949_v47  ;;  %v3326_v49 = vmax.f32 %v3295_v11, %v3238_v63 }
 0x232   : > { %v2195_v58 = vpop.f32.mrf.mxu2 }
 0x233   : > { %v2304_v25 = vadd.f32 %v2195_v58, %v1981_v13  ;;  %v3089_v55 = vmax.f32 %v4755_v41, 0.0  ;;  %v3382_v43 = vmax.f32 %v3326_v49, %v3354_v59 }
 0x234   : > { %v4765_v34 = vld [vmem:[#allocation2 + $0x22] sm:$0xff]  ;;  %v1875_v18 = vpop.f32.mrf.mxu1 }
 0x235   : > { %v3412_v28 = vmax.f32 %v3381_v14, %v4765_v34  ;;  %3123 = vst [vmem:[#allocation2 + $0x30] sm:$0xff] %v3089_v55  ;;  %v3355_v0 = vld [vmem:[#allocation2 + $0x23] sm:$0xff]  ;;  %v2627_v24 = vadd.f32 %v4680_v31, %v2304_v25  ;;  %v1982_v45 = vadd.f32 %v1948_v22, %v1875_v18  ;;  %v2714_v25 = vld [vmem:[%s4027_s23 + $0xf4] sm:$0xff] }
 0x236   : > { %v3471_v37 = vld [vmem:[#allocation2 + $0x24] sm:$0xff]  ;;  %v2715_v18 = vld [vmem:[%s4027_s23 + $0xfc] sm:$0xff] }
 0x237   : > { %v2844_v42 = vpop.f32.mrf.mxu0  ;;  %v3443_v8 = vmax.f32 %v3412_v28, %v3355_v0  ;;  %3816 = vmatmul.msk.bf16.gmra.mxu1 %vm247_vm0, %v4652_v20  ;;  %3851 = vmatmul.msk.bf16.gmra.mxu2 %vm247_vm0, %v2088_v21  ;;  %v2950_v15 = vadd.f32 %v2841_v53, %v2627_v24  ;;  %v3183_v31 = vld [vmem:[#allocation2 + $0x21] sm:$0xff]  ;;  %v3210_v53 = vmax.f32 %v3086_v7, %v3182_v30  ;;  %v4797_v9 = vpop.f32.mrf.mxu3  ;;  %v2395_v30 = vld [vmem:[%s4027_s23 + $0x113] sm:$0xff] }
 0x238   : > { %v3296_v4 = vmax.f32 %v3265_v52, %v3183_v31  ;;  %v4804_v62 = vpack.c.bf16 %v2396_v16, %v2395_v30  ;;  %v2735_v22 = vpack.c.bf16 %v2715_v18, %v2714_v25  ;;  %v1950_v52 = vld [vmem:[#allocation2 + $0x50] sm:$0xff] }
 0x239   : > { %v3499_v35 = vmax.f32 %v3443_v8, %v3471_v37  ;;  %v4785_v20 = vadd.f32 %v4648_v57, %v2950_v15  ;;  %v3266_v39 = vmax.f32 %v3210_v53, %v3238_v63  ;;  %v3211_v63 = vmax.f32 %v3087_v26, %v3183_v31 }
 0x23a   : > { %3921 = vmatmul.msk.bf16.gmra.mxu0 %vm247_vm0, %v2734_v19  ;;  %v2198_v2 = vpop.f32.mrf.mxu2  ;;  %v3327_v13 = vmax.f32 %v3296_v4, %v4765_v34  ;;  %v2089_v19 = vpack.c.bf16 %v2069_v32, %v2068_v48  ;;  %3889 = vmatmul.msk.bf16.gmra.mxu3 %vm247_vm0, %v4804_v62  ;;  %v1951_v32 = vld [vmem:[#allocation2 + $0x58] sm:$0xff] }
 0x23b   : > { %3527 = vst [vmem:[%s4781_s28] sm:$0xff] %v3499_v35  ;;  %v2305_v5 = vadd.f32 %v2198_v2, %v1982_v45  ;;  %v3090_v40 = vmax.f32 %v4785_v20, 0.0  ;;  %v3267_v59 = vmax.f32 %v3211_v63, %v4765_v34 }
 0x23c   : > { %v4788_v54 = vld [vmem:[#allocation2 + $0x2a] sm:$0xff]  ;;  %v1877_v6 = vpop.f32.mrf.mxu1  ;;  %v3383_v50 = vmax.f32 %v3327_v13, %v3355_v0 }
 0x23d   : > { %v3413_v3 = vmax.f32 %v3382_v43, %v4788_v54  ;;  %v3356_v23 = vld [vmem:[#allocation2 + $0x2b] sm:$0xff]  ;;  %v2628_v29 = vadd.f32 %v4699_v27, %v2305_v5  ;;  %3124 = vst [vmem:[#allocation2 + $0x38] sm:$0xff] %v3090_v40  ;;  %v1983_v21 = vadd.f32 %v1949_v17, %v1877_v6 }
 0x23e   : > { %v3472_v60 = vld [vmem:[#allocation2 + $0x2c] sm:$0xff] }
 0x23f   : > { %v2846_v61 = vpop.f32.mrf.mxu0  ;;  %v3444_v47 = vmax.f32 %v3413_v3, %v3356_v23  ;;  %v2951_v7 = vadd.f32 %v2844_v42, %v2628_v29  ;;  %v3184_v27 = vld [vmem:[#allocation2 + $0x29] sm:$0xff]  ;;  %v4823_v45 = vpop.f32.mrf.mxu3 }
 0x240   : > { %v3297_v24 = vmax.f32 %v3266_v39, %v3184_v27  ;;  %v3212_v34 = vmax.f32 %v3088_v12, %v3184_v27 }
 0x241   : > { %v3500_v58 = vmax.f32 %v3444_v47, %v3472_v60  ;;  %v4807_v11 = vadd.f32 %v4648_v57, %v2951_v7  ;;  %v2070_v7 = vld [vmem:[%s4027_s23 + $0x102] sm:$0xff] }
 0x242   : > { %v2200_v14 = vpop.f32.mrf.mxu2  ;;  %v3328_v26 = vmax.f32 %v3297_v24, %v4788_v54  ;;  %v2716_v24 = vld [vmem:[%s4027_s23 + $0x104] sm:$0xff] }
 0x243   : > { %3528 = vst [vmem:[%s4781_s28 + $0x8] sm:$0xff] %v3500_v58  ;;  %v2306_v28 = vadd.f32 %v2200_v14, %v1983_v21  ;;  %v3091_v49 = vmax.f32 %v4807_v11, 0.0  ;;  %v2398_v58 = vld [vmem:[%s4027_s23 + $0x12b] sm:$0xff]  ;;  %v3268_v21 = vmax.f32 %v3212_v34, %v4788_v54 }
 0x244   : > { %v1880_v42 = vpop.f32.mrf.mxu1  ;;  %v4817_v8 = vld [vmem:[#allocation2 + $0x32] sm:$0xff]  ;;  %v3384_v29 = vmax.f32 %v3328_v26, %v3356_v23 }
 0x245   : > { %v2629_v37 = vadd.f32 %v4712_v33, %v2306_v28  ;;  %v3414_v15 = vmax.f32 %v3383_v50, %v4817_v8  ;;  %3125 = vst [vmem:[#allocation2 + $0x40] sm:$0xff] %v3091_v49  ;;  %v3357_v0 = vld [vmem:[#allocation2 + $0x33] sm:$0xff]  ;;  %v1984_v43 = vadd.f32 %v1950_v52, %v1880_v42  ;;  %v2090_v50 = vpack.c.bf16 %v2071_v1, %v2070_v7 }
 0x246   : > { %v3185_v33 = vld [vmem:[#allocation2 + $0x31] sm:$0xff] }
 0x247   : > { %v2849_v35 = vpop.f32.mrf.mxu0  ;;  %3817 = vmatmul.msk.bf16.gmra.mxu1 %vm247_vm0, %v4686_v56  ;;  %3852 = vmatmul.msk.bf16.gmra.mxu2 %vm247_vm0, %v2089_v19  ;;  %v2952_v51 = vadd.f32 %v2846_v61, %v2629_v37  ;;  %v3445_v31 = vmax.f32 %v3414_v15, %v3357_v0  ;;  %v3473_v2 = vld [vmem:[#allocation2 + $0x34] sm:$0xff]  ;;  %v3298_v6 = vmax.f32 %v3267_v59, %v3185_v33  ;;  %v4847_v27 = vpop.f32.mrf.mxu3  ;;  %v2717_v42 = vld [vmem:[%s4027_s23 + $0x10c] sm:$0xff] }
 0x248   : > { %v2736_v26 = vpack.c.bf16 %v2717_v42, %v2716_v24 }
 0x249   : > { %v4831_v5 = vadd.f32 %v4648_v57, %v2952_v51  ;;  %v3501_v4 = vmax.f32 %v3445_v31, %v3473_v2  ;;  %v3329_v23 = vmax.f32 %v3298_v6, %v4817_v8  ;;  %v3213_v31 = vmax.f32 %v3089_v55, %v3185_v33 }
 0x24a   : > { %3922 = vmatmul.msk.bf16.gmra.mxu0 %vm247_vm0, %v2735_v22  ;;  %v2203_v56 = vpop.f32.mrf.mxu2 }
 0x24b   : > { %v2307_v3 = vadd.f32 %v2203_v56, %v1984_v43  ;;  %v3092_v53 = vmax.f32 %v4831_v5, 0.0  ;;  %3529 = vst [vmem:[%s4781_s28 + $0x10] sm:$0xff] %v3501_v4  ;;  %v3385_v63 = vmax.f32 %v3329_v23, %v3357_v0  ;;  %v1952_v56 = vld [vmem:[#allocation2 + $0x60] sm:$0xff]  ;;  %v2075_v5 = vld [vmem:[%s4027_s23 + $0x12a] sm:$0xff] }
 0x24c   : > { %v1882_v61 = vpop.f32.mrf.mxu1  ;;  %v4838_v47 = vld [vmem:[#allocation2 + $0x3a] sm:$0xff] }
 0x24d   : > { %v2630_v17 = vadd.f32 %v4733_v10, %v2307_v3  ;;  %3126 = vst [vmem:[#allocation2 + $0x48] sm:$0xff] %v3092_v53  ;;  %v3415_v48 = vmax.f32 %v3384_v29, %v4838_v47  ;;  %v3358_v60 = vld [vmem:[#allocation2 + $0x3b] sm:$0xff]  ;;  %v2397_v10 = vld [vmem:[%s4027_s23 + $0x123] sm:$0xff]  ;;  %v1985_v14 = vadd.f32 %v1951_v32, %v1882_v61 }
 0x24e   : > { %v3186_v30 = vld [vmem:[#allocation2 + $0x39] sm:$0xff]  ;;  %v2415_v18 = vpack.c.bf16 %v2398_v58, %v2397_v10 }
 0x24f   : > { %v2851_v13 = vpop.f32.mrf.mxu0  ;;  %v2953_v12 = vadd.f32 %v2849_v35, %v2630_v17  ;;  %v3446_v16 = vmax.f32 %v3415_v48, %v3358_v60  ;;  %v3474_v39 = vld [vmem:[#allocation2 + $0x3c] sm:$0xff]  ;;  %v3299_v37 = vmax.f32 %v3268_v21, %v3186_v30  ;;  %v4877_v61 = vpop.f32.mrf.mxu3  ;;  %v2072_v21 = vld [vmem:[%s4027_s23 + $0x112] sm:$0xff] }
 0x250   : > { %3890 = vmatmul.msk.bf16.gmra.mxu3 %vm247_vm0, %v2415_v18 }
 0x251   : > { %v4853_v25 = vadd.f32 %v4648_v57, %v2953_v12  ;;  %v3502_v28 = vmax.f32 %v3446_v16, %v3474_v39  ;;  %v3330_v2 = vmax.f32 %v3299_v37, %v4838_v47  ;;  %v1953_v16 = vld [vmem:[#allocation2 + $0x68] sm:$0xff]  ;;  %v2073_v39 = vld [vmem:[%s4027_s23 + $0x11a] sm:$0xff] }
 0x252   : > { %v2205_v19 = vpop.f32.mrf.mxu2  ;;  %v2091_v42 = vpack.c.bf16 %v2073_v39, %v2072_v21 }
 0x253   : > { %v2308_v22 = vadd.f32 %v2205_v19, %v1985_v14  ;;  %v3093_v15 = vmax.f32 %v4853_v25, 0.0  ;;  %3530 = vst [vmem:[%s4781_s28 + $0x18] sm:$0xff] %v3502_v28  ;;  %v3386_v34 = vmax.f32 %v3330_v2, %v3358_v60  ;;  %v2718_v19 = vld [vmem:[%s4027_s23 + $0x114] sm:$0xff] }
 0x254   : > { %v4860_v54 = vld [vmem:[#allocation2 + $0x42] sm:$0xff]  ;;  %v1885_v35 = vpop.f32.mrf.mxu1 }
 0x255   : > { %v3416_v51 = vmax.f32 %v3385_v63, %v4860_v54  ;;  %3127 = vst [vmem:[#allocation2 + $0x50] sm:$0xff] %v3093_v15  ;;  %v3359_v0 = vld [vmem:[#allocation2 + $0x43] sm:$0xff]  ;;  %v2631_v52 = vadd.f32 %v4748_v46, %v2308_v22  ;;  %v1986_v41 = vadd.f32 %v1952_v56, %v1885_v35  ;;  %v3269_v46 = vmax.f32 %v3213_v31, %v4817_v8 }
 0x256   : > { %v3475_v4 = vld [vmem:[#allocation2 + $0x44] sm:$0xff]  ;;  %v3214_v8 = vmax.f32 %v3090_v40, %v3186_v30 }
 0x257   : > { %v2854_v59 = vpop.f32.mrf.mxu0  ;;  %v3447_v43 = vmax.f32 %v3416_v51, %v3359_v0  ;;  %3818 = vmatmul.msk.bf16.gmra.mxu1 %vm247_vm0, %v4721_v38  ;;  %3853 = vmatmul.msk.bf16.gmra.mxu2 %vm247_vm0, %v2090_v50  ;;  %v2954_v6 = vadd.f32 %v2851_v13, %v2631_v52  ;;  %v3187_v3 = vld [vmem:[#allocation2 + $0x41] sm:$0xff]  ;;  %v4900_v51 = vpop.f32.mrf.mxu3 }
 0x258   : > { %v3300_v17 = vmax.f32 %v3269_v46, %v3187_v3  ;;  %v2719_v50 = vld [vmem:[%s4027_s23 + $0x11c] sm:$0xff] }
 0x259   : > { %v3503_v29 = vmax.f32 %v3447_v43, %v3475_v4  ;;  %v4875_v33 = vadd.f32 %v4648_v57, %v2954_v6  ;;  %v2737_v52 = vpack.c.bf16 %v2719_v50, %v2718_v19  ;;  %v2721_v19 = vld [vmem:[%s4027_s23 + $0x12c] sm:$0xff] }
 0x25a   : > { %3923 = vmatmul.msk.bf16.gmra.mxu0 %vm247_vm0, %v2736_v26  ;;  %v2208_v55 = vpop.f32.mrf.mxu2  ;;  %v3331_v10 = vmax.f32 %v3300_v17, %v4860_v54  ;;  %v3215_v26 = vmax.f32 %v3091_v49, %v3187_v3 }
 0x25b   : > { %3531 = vst [vmem:[%s4781_s28 + $0x20] sm:$0xff] %v3503_v29  ;;  %v2309_v38 = vadd.f32 %v2208_v55, %v1986_v41  ;;  %v3094_v13 = vmax.f32 %v4875_v33, 0.0 }
 0x25c   : > { %v4880_v48 = vld [vmem:[#allocation2 + $0x4a] sm:$0xff]  ;;  %v1887_v32 = vpop.f32.mrf.mxu1  ;;  %v3387_v63 = vmax.f32 %v3331_v10, %v3359_v0  ;;  %v3271_v56 = vmax.f32 %v3215_v26, %v4860_v54 }
 0x25d   : > { %v3417_v23 = vmax.f32 %v3386_v34, %v4880_v48  ;;  %v3360_v7 = vld [vmem:[#allocation2 + $0x4b] sm:$0xff]  ;;  %v2632_v1 = vadd.f32 %v4773_v44, %v2309_v38  ;;  %3128 = vst [vmem:[#allocation2 + $0x58] sm:$0xff] %v3094_v13  ;;  %v1987_v30 = vadd.f32 %v1953_v16, %v1887_v32  ;;  %v3270_v44 = vmax.f32 %v3214_v8, %v4838_v47  ;;  %v2074_v16 = vld [vmem:[%s4027_s23 + $0x122] sm:$0xff] }
 0x25e   : > { %v3476_v58 = vld [vmem:[#allocation2 + $0x4c] sm:$0xff] }
 0x25f   : > { %v2856_v60 = vpop.f32.mrf.mxu0  ;;  %v3448_v12 = vmax.f32 %v3417_v23, %v3360_v7  ;;  %v2955_v14 = vadd.f32 %v2854_v59, %v2632_v1  ;;  %v3188_v20 = vld [vmem:[#allocation2 + $0x49] sm:$0xff] }
 0x260   : > { %v3301_v37 = vmax.f32 %v3270_v44, %v3188_v20  ;;  %v3216_v54 = vmax.f32 %v3092_v53, %v3188_v20  ;;  %v2092_v44 = vpack.c.bf16 %v2075_v5, %v2074_v16  ;;  %v1957_v16 = vld [vmem:[#allocation2 + $0x88] sm:$0xff] }
 0x261   : > { %v3504_v40 = vmax.f32 %v3448_v12, %v3476_v58  ;;  %v4894_v28 = vadd.f32 %v4648_v57, %v2955_v14 }
 0x262   : > { %v2210_v18 = vpop.f32.mrf.mxu2  ;;  %v3332_v11 = vmax.f32 %v3301_v37, %v4880_v48  ;;  %v3272_v21 = vmax.f32 %v3216_v54, %v4880_v48 }
 0x263   : > { %3532 = vst [vmem:[%s4781_s28 + $0x28] sm:$0xff] %v3504_v40  ;;  %v2310_v24 = vadd.f32 %v2210_v18, %v1987_v30  ;;  %v3095_v35 = vmax.f32 %v4894_v28, 0.0  ;;  %v2720_v18 = vld [vmem:[%s4027_s23 + $0x124] sm:$0xff] }
 0x264   : > { %v1890_v22 = vpop.f32.mrf.mxu1  ;;  %v4904_v47 = vld [vmem:[#allocation2 + $0x52] sm:$0xff]  ;;  %v3388_v38 = vmax.f32 %v3332_v11, %v3360_v7  ;;  %v2738_v26 = vpack.c.bf16 %v2721_v19, %v2720_v18 }
 0x265   : > { %v2633_v31 = vadd.f32 %v4797_v9, %v2310_v24  ;;  %v3418_v59 = vmax.f32 %v3387_v63, %v4904_v47  ;;  %3129 = vst [vmem:[#allocation2 + $0x60] sm:$0xff] %v3095_v35  ;;  %v3361_v2 = vld [vmem:[#allocation2 + $0x53] sm:$0xff] }
 0x266   : > { %v3189_v49 = vld [vmem:[#allocation2 + $0x51] sm:$0xff] }
 0x267   : > { %v2859_v0 = vpop.f32.mrf.mxu0  ;;  %3819 = vmatmul.msk.bf16.gmra.mxu1 %vm247_vm0, %v4757_v36  ;;  %3854 = vmatmul.msk.bf16.gmra.mxu2 %vm247_vm0, %v2091_v42  ;;  %v2956_v43 = vadd.f32 %v2856_v60, %v2633_v31  ;;  %v3449_v4 = vmax.f32 %v3418_v59, %v3361_v2  ;;  %v1954_v9 = vld [vmem:[#allocation2 + $0x70] sm:$0xff]  ;;  %v3302_v46 = vmax.f32 %v3271_v56, %v3189_v49  ;;  %v4929_v60 = vpop.f32.mrf.mxu3 }
 0x268   : > { %v3477_v6 = vld [vmem:[#allocation2 + $0x54] sm:$0xff]  ;;  %v1988_v3 = vadd.f32 %v1954_v9, %v1890_v22  ;;  %v3217_v31 = vmax.f32 %v3093_v15, %v3189_v49 }
 0x269   : > { %v4916_v29 = vadd.f32 %v4648_v57, %v2956_v43  ;;  %v3505_v41 = vmax.f32 %v3449_v4, %v3477_v6  ;;  %v3333_v7 = vmax.f32 %v3302_v46, %v4904_v47  ;;  %v1956_v4 = vld [vmem:[#allocation2 + $0x80] sm:$0xff] }
 0x26a   : > { %3924 = vmatmul.msk.bf16.gmra.mxu0 %vm247_vm0, %v2737_v52  ;;  %v2213_v36 = vpop.f32.mrf.mxu2 }
 0x26b   : > { %v2311_v55 = vadd.f32 %v2213_v36, %v1988_v3  ;;  %v3096_v34 = vmax.f32 %v4916_v29, 0.0  ;;  %3533 = vst [vmem:[%s4781_s28 + $0x30] sm:$0xff] %v3505_v41  ;;  %v3389_v50 = vmax.f32 %v3333_v7, %v3361_v2 }
 0x26c   : > { %v1892_v17 = vpop.f32.mrf.mxu1  ;;  %v4923_v32 = vld [vmem:[#allocation2 + $0x5a] sm:$0xff] }
 0x26d   : > { %v2634_v23 = vadd.f32 %v4823_v45, %v2311_v55  ;;  %3130 = vst [vmem:[#allocation2 + $0x68] sm:$0xff] %v3096_v34  ;;  %v3419_v8 = vmax.f32 %v3388_v38, %v4923_v32  ;;  %v3362_v12 = vld [vmem:[#allocation2 + $0x5b] sm:$0xff] }
 0x26e   : > { %v3190_v10 = vld [vmem:[#allocation2 + $0x59] sm:$0xff] }
 0x26f   : > { %v2861_v1 = vpop.f32.mrf.mxu0  ;;  %v2957_v53 = vadd.f32 %v2859_v0, %v2634_v23  ;;  %v3450_v58 = vmax.f32 %v3419_v8, %v3362_v12  ;;  %v1955_v45 = vld [vmem:[#allocation2 + $0x78] sm:$0xff]  ;;  %v3303_v24 = vmax.f32 %v3272_v21, %v3190_v10  ;;  %v4954_v56 = vpop.f32.mrf.mxu3  ;;  %v3218_v54 = vmax.f32 %v3094_v13, %v3190_v10 }
 0x270   : > { %v3478_v39 = vld [vmem:[#allocation2 + $0x5c] sm:$0xff]  ;;  %v1989_v14 = vadd.f32 %v1955_v45, %v1892_v17 }
 0x271   : > { %v4936_v20 = vadd.f32 %v4648_v57, %v2957_v53  ;;  %v3506_v40 = vmax.f32 %v3450_v58, %v3478_v39  ;;  %v3334_v2 = vmax.f32 %v3303_v24, %v4923_v32  ;;  %v3274_v33 = vmax.f32 %v3218_v54, %v4923_v32  ;;  %v1959_v54 = vld [vmem:[#allocation2 + $0x98] sm:$0xff] }
 0x272   : > { %v2215_v30 = vpop.f32.mrf.mxu2 }
 0x273   : > { %v2312_v42 = vadd.f32 %v2215_v30, %v1989_v14  ;;  %v3097_v63 = vmax.f32 %v4936_v20, 0.0  ;;  %3534 = vst [vmem:[%s4781_s28 + $0x38] sm:$0xff] %v3506_v40  ;;  %v3390_v41 = vmax.f32 %v3334_v2, %v3362_v12 }
 0x274   : > { %v4942_v37 = vld [vmem:[#allocation2 + $0x62] sm:$0xff]  ;;  %v1895_v22 = vpop.f32.mrf.mxu1 }
 0x275   : > { %v3420_v48 = vmax.f32 %v3389_v50, %v4942_v37  ;;  %3131 = vst [vmem:[#allocation2 + $0x70] sm:$0xff] %v3097_v63  ;;  %v3363_v52 = vld [vmem:[#allocation2 + $0x63] sm:$0xff]  ;;  %v2635_v59 = vadd.f32 %v4847_v27, %v2312_v42  ;;  %v1990_v49 = vadd.f32 %v1956_v4, %v1895_v22  ;;  %v3273_v27 = vmax.f32 %v3217_v31, %v4904_v47  ;;  %v1958_v31 = vld [vmem:[#allocation2 + $0x90] sm:$0xff] }
 0x276   : > { %v3479_v11 = vld [vmem:[#allocation2 + $0x64] sm:$0xff] }
 0x277   : > { %v2864_v0 = vpop.f32.mrf.mxu0  ;;  %v3451_v43 = vmax.f32 %v3420_v48, %v3363_v52  ;;  %3820 = vmatmul.msk.bf16.gmra.mxu1 %vm247_vm0, %v4804_v62  ;;  %3855 = vmatmul.msk.bf16.gmra.mxu2 %vm247_vm0, %v2092_v44  ;;  %v2958_v9 = vadd.f32 %v2861_v1, %v2635_v59  ;;  %v3191_v25 = vld [vmem:[#allocation2 + $0x61] sm:$0xff] }
 0x278   : > { %v3304_v36 = vmax.f32 %v3273_v27, %v3191_v25  ;;  %v3219_v44 = vmax.f32 %v3095_v35, %v3191_v25 }
 0x279   : > { %v3507_v15 = vmax.f32 %v3451_v43, %v3479_v11  ;;  %v4959_v3 = vadd.f32 %v4648_v57, %v2958_v9 }
 0x27a   : > { %3925 = vmatmul.msk.bf16.gmra.mxu0 %vm247_vm0, %v2738_v26  ;;  %v2218_v6 = vpop.f32.mrf.mxu2  ;;  %v3335_v7 = vmax.f32 %v3304_v36, %v4942_v37  ;;  %v3275_v28 = vmax.f32 %v3219_v44, %v4942_v37 }
 0x27b   : > { %3535 = vst [vmem:[%s4781_s28 + $0x40] sm:$0xff] %v3507_v15  ;;  %v2313_v62 = vadd.f32 %v2218_v6, %v1990_v49  ;;  %v3098_v38 = vmax.f32 %v4959_v3, 0.0 }
 0x27c   : > { %v4962_v46 = vld [vmem:[#allocation2 + $0x6a] sm:$0xff]  ;;  %v1897_v55 = vpop.f32.mrf.mxu1  ;;  %v3391_v39 = vmax.f32 %v3335_v7, %v3363_v52 }
 0x27d   : > { %v3421_v17 = vmax.f32 %v3390_v41, %v4962_v46  ;;  %v3364_v23 = vld [vmem:[#allocation2 + $0x6b] sm:$0xff]  ;;  %v2636_v47 = vadd.f32 %v4877_v61, %v2313_v62  ;;  %3132 = vst [vmem:[#allocation2 + $0x78] sm:$0xff] %v3098_v38  ;;  %v1991_v45 = vadd.f32 %v1957_v16, %v1897_v55  ;;  %v4976_v61 = vpop.f32.mrf.mxu3 }
 0x27e   : > { %v3480_v12 = vld [vmem:[#allocation2 + $0x6c] sm:$0xff] }
 0x27f   : > { %v2866_v8 = vpop.f32.mrf.mxu0  ;;  %v3452_v1 = vmax.f32 %v3421_v17, %v3364_v23  ;;  %v2959_v5 = vadd.f32 %v2864_v0, %v2636_v47  ;;  %v3192_v53 = vld [vmem:[#allocation2 + $0x69] sm:$0xff] }
 0x280   : > { %v3305_v14 = vmax.f32 %v3274_v33, %v3192_v53  ;;  %v3220_v15 = vmax.f32 %v3096_v34, %v3192_v53 }
 0x281   : > { %v3508_v58 = vmax.f32 %v3452_v1, %v3480_v12  ;;  %v4974_v10 = vadd.f32 %v4648_v57, %v2959_v5 }
 0x282   : > { %v2220_v13 = vpop.f32.mrf.mxu2  ;;  %v3336_v22 = vmax.f32 %v3305_v14, %v4962_v46  ;;  %v3276_v29 = vmax.f32 %v3220_v15, %v4962_v46 }
 0x283   : > { %3536 = vst [vmem:[%s4781_s28 + $0x48] sm:$0xff] %v3508_v58  ;;  %v2314_v21 = vadd.f32 %v2220_v13, %v1991_v45  ;;  %v3099_v30 = vmax.f32 %v4974_v10, 0.0 }
 0x284   : > { %v1900_v40 = vpop.f32.mrf.mxu1  ;;  %v4982_v18 = vld [vmem:[#allocation2 + $0x72] sm:$0xff]  ;;  %v3392_v4 = vmax.f32 %v3336_v22, %v3364_v23 }
 0x285   : > { %v2637_v32 = vadd.f32 %v4900_v51, %v2314_v21  ;;  %v3422_v19 = vmax.f32 %v3391_v39, %v4982_v18  ;;  %3133 = vst [vmem:[#allocation2 + $0x80] sm:$0xff] %v3099_v30  ;;  %v3365_v24 = vld [vmem:[#allocation2 + $0x73] sm:$0xff]  ;;  %v1992_v52 = vadd.f32 %v1958_v31, %v1900_v40  ;;  %v4995_v25 = vpop.f32.mrf.mxu3  ;;  %v1960_v40 = vld [vmem:[#allocation2 + $0xa0] sm:$0xff] }
 0x286   : > { %v3193_v48 = vld [vmem:[#allocation2 + $0x71] sm:$0xff] }
 0x287   : > { %v2869_v50 = vpop.f32.mrf.mxu0  ;;  %v2960_v42 = vadd.f32 %v2866_v8, %v2637_v32  ;;  %v3453_v26 = vmax.f32 %v3422_v19, %v3365_v24  ;;  %v3481_v35 = vld [vmem:[#allocation2 + $0x74] sm:$0xff]  ;;  %v3306_v2 = vmax.f32 %v3275_v28, %v3193_v48 }
 0x289   : > { %v4991_v51 = vadd.f32 %v4648_v57, %v2960_v42  ;;  %v3509_v59 = vmax.f32 %v3453_v26, %v3481_v35  ;;  %v3337_v41 = vmax.f32 %v3306_v2, %v4982_v18 }
 0x28a   : > { %v2223_v0 = vpop.f32.mrf.mxu2 }
 0x28b   : > { %v2315_v43 = vadd.f32 %v2223_v0, %v1992_v52  ;;  %v3100_v11 = vmax.f32 %v4991_v51, 0.0  ;;  %3537 = vst [vmem:[%s4781_s28 + $0x50] sm:$0xff] %v3509_v59  ;;  %v3393_v1 = vmax.f32 %v3337_v41, %v3365_v24 }
 0x28c   : > { %v1902_v9 = vpop.f32.mrf.mxu1  ;;  %v4999_v37 = vld [vmem:[#allocation2 + $0x7a] sm:$0xff] }
 0x28d   : > { %v2638_v49 = vadd.f32 %v4929_v60, %v2315_v43  ;;  %3134 = vst [vmem:[#allocation2 + $0x88] sm:$0xff] %v3100_v11  ;;  %v3423_v27 = vmax.f32 %v3392_v4, %v4999_v37  ;;  %v3366_v62 = vld [vmem:[#allocation2 + $0x7b] sm:$0xff]  ;;  %v1993_v23 = vadd.f32 %v1959_v54, %v1902_v9  ;;  %v5020_v13 = vpop.f32.mrf.mxu3  ;;  %v1961_v9 = vld [vmem:[#allocation2 + $0xa8] sm:$0xff] }
 0x28e   : > { %v3194_v55 = vld [vmem:[#allocation2 + $0x79] sm:$0xff] }
 0x28f   : > { %v2871_v6 = vpop.f32.mrf.mxu0  ;;  %v2961_v36 = vadd.f32 %v2869_v50, %v2638_v49  ;;  %v3454_v17 = vmax.f32 %v3423_v27, %v3366_v62  ;;  %v3482_v34 = vld [vmem:[#allocation2 + $0x7c] sm:$0xff]  ;;  %v3307_v7 = vmax.f32 %v3276_v29, %v3194_v55  ;;  %v3222_v35 = vmax.f32 %v3098_v38, %v3194_v55 }
 0x291   : > { %v5008_v60 = vadd.f32 %v4648_v57, %v2961_v36  ;;  %v3510_v47 = vmax.f32 %v3454_v17, %v3482_v34  ;;  %v3221_v57 = vmax.f32 %v3097_v63, %v3193_v48  ;;  %v3338_v21 = vmax.f32 %v3307_v7, %v4999_v37  ;;  %v5027_v63 = vld [vmem:[%s5188_s2] ss:$0 sm:$0xff] }
 0x292   : > { %v2225_v8 = vpop.f32.mrf.mxu2  ;;  %v3278_v38 = vmax.f32 %v3222_v35, %v4999_v37 }
 0x293   : > { %v2316_v12 = vadd.f32 %v2225_v8, %v1993_v23  ;;  %v3101_v16 = vmax.f32 %v5008_v60, 0.0  ;;  %3538 = vst [vmem:[%s4781_s28 + $0x58] sm:$0xff] %v3510_v47  ;;  %v3277_v24 = vmax.f32 %v3221_v57, %v4982_v18  ;;  %v3394_v42 = vmax.f32 %v3338_v21, %v3366_v62 }
 0x294   : > { %v5012_v5 = vld [vmem:[#allocation2 + $0x82] sm:$0xff]  ;;  %v1905_v53 = vpop.f32.mrf.mxu1 }
 0x295   : > { %v3424_v58 = vmax.f32 %v3393_v1, %v5012_v5  ;;  %3135 = vst [vmem:[#allocation2 + $0x90] sm:$0xff] %v3101_v16  ;;  %v3367_v46 = vld [vmem:[#allocation2 + $0x83] sm:$0xff]  ;;  %v2639_v45 = vadd.f32 %v4954_v56, %v2316_v12  ;;  %v1994_v50 = vadd.f32 %v1960_v40, %v1905_v53  ;;  %v5043_v49 = vpop.f32.mrf.mxu3 }
 0x296   : > { %v3483_v14 = vld [vmem:[#allocation2 + $0x84] sm:$0xff] }
 0x297   : > { %v2874_v33 = vpop.f32.mrf.mxu0  ;;  %v3455_v39 = vmax.f32 %v3424_v58, %v3367_v46  ;;  %v2962_v44 = vadd.f32 %v2871_v6, %v2639_v45  ;;  %v3195_v32 = vld [vmem:[#allocation2 + $0x81] sm:$0xff]  ;;  %v1962_v58 = vld [vmem:[#allocation2 + $0xb0] sm:$0xff] }
 0x298   : > { %v3308_v48 = vmax.f32 %v3277_v24, %v3195_v32  ;;  %v3223_v29 = vmax.f32 %v3099_v30, %v3195_v32 }
 0x299   : > { %v3511_v19 = vmax.f32 %v3455_v39, %v3483_v14  ;;  %v5030_v56 = vadd.f32 %v5027_v63, %v2962_v44 }
 0x29a   : > { %v2228_v20 = vpop.f32.mrf.mxu2  ;;  %v3339_v43 = vmax.f32 %v3308_v48, %v5012_v5  ;;  %v3279_v10 = vmax.f32 %v3223_v29, %v5012_v5 }
 0x29b   : > { %3539 = vst [vmem:[%s4781_s28 + $0x60] sm:$0xff] %v3511_v19  ;;  %v2317_v22 = vadd.f32 %v2228_v20, %v1994_v50  ;;  %v3102_v28 = vmax.f32 %v5030_v56, 0.0 }
 0x29c   : > { %v5033_v26 = vld [vmem:[#allocation2 + $0x8a] sm:$0xff]  ;;  %v1907_v31 = vpop.f32.mrf.mxu1  ;;  %v3395_v36 = vmax.f32 %v3339_v43, %v3367_v46 }
 0x29d   : > { %v3425_v18 = vmax.f32 %v3394_v42, %v5033_v26  ;;  %v3368_v52 = vld [vmem:[#allocation2 + $0x8b] sm:$0xff]  ;;  %v2640_v59 = vadd.f32 %v4976_v61, %v2317_v22  ;;  %3136 = vst [vmem:[#allocation2 + $0x98] sm:$0xff] %v3102_v28  ;;  %v1995_v3 = vadd.f32 %v1961_v9, %v1907_v31 }
 0x29e   : > { %v3484_v4 = vld [vmem:[#allocation2 + $0x8c] sm:$0xff] }
 0x29f   : > { %v2876_v0 = vpop.f32.mrf.mxu0  ;;  %v3456_v2 = vmax.f32 %v3425_v18, %v3368_v52  ;;  %v2963_v15 = vadd.f32 %v2874_v33, %v2640_v59  ;;  %v3196_v27 = vld [vmem:[#allocation2 + $0x89] sm:$0xff]  ;;  %v2561_v33 = vpop.f32.mrf.mxu3  ;;  %v1963_v18 = vld [vmem:[#allocation2 + $0xb8] sm:$0xff] }
 0x2a0   : > { %v3309_v55 = vmax.f32 %v3278_v38, %v3196_v27  ;;  %v3224_v32 = vmax.f32 %v3100_v11, %v3196_v27 }
 0x2a1   : > { %v3512_v6 = vmax.f32 %v3456_v2, %v3484_v4  ;;  %v5047_v61 = vadd.f32 %v5027_v63, %v2963_v15 }
 0x2a2   : > { %v2230_v41 = vpop.f32.mrf.mxu2  ;;  %v3340_v7 = vmax.f32 %v3309_v55, %v5033_v26  ;;  %v3280_v51 = vmax.f32 %v3224_v32, %v5033_v26 }
 0x2a3   : > { %3540 = vst [vmem:[%s4781_s28 + $0x68] sm:$0xff] %v3512_v6  ;;  %v2318_v62 = vadd.f32 %v2230_v41, %v1995_v3  ;;  %v3103_v54 = vmax.f32 %v5047_v61, 0.0 }
 0x2a4   : > { %v1910_v17 = vpop.f32.mrf.mxu1  ;;  %v5053_v34 = vld [vmem:[#allocation2 + $0x92] sm:$0xff]  ;;  %v3396_v40 = vmax.f32 %v3340_v7, %v3368_v52 }
 0x2a5   : > { %v2641_v23 = vadd.f32 %v4995_v25, %v2318_v62  ;;  %v3426_v37 = vmax.f32 %v3395_v36, %v5053_v34  ;;  %3137 = vst [vmem:[#allocation2 + $0xa0] sm:$0xff] %v3103_v54  ;;  %v3369_v8 = vld [vmem:[#allocation2 + $0x93] sm:$0xff]  ;;  %v1996_v57 = vadd.f32 %v1962_v58, %v1910_v17  ;;  %v1964_v17 = vld [vmem:[#allocation2 + $0xc0] sm:$0xff] }
 0x2a6   : > { %v3197_v12 = vld [vmem:[#allocation2 + $0x91] sm:$0xff] }
 0x2a7   : > { %v2879_v47 = vpop.f32.mrf.mxu0  ;;  %v2964_v1 = vadd.f32 %v2876_v0, %v2641_v23  ;;  %v3457_v53 = vmax.f32 %v3426_v37, %v3369_v8  ;;  %v3485_v30 = vld [vmem:[#allocation2 + $0x94] sm:$0xff]  ;;  %v3310_v21 = vmax.f32 %v3279_v10, %v3197_v12  ;;  %v2563_v27 = vpop.f32.mrf.mxu3  ;;  %v3225_v26 = vmax.f32 %v3101_v16, %v3197_v12 }
 0x2a9   : > { %v5062_v25 = vadd.f32 %v5027_v63, %v2964_v1  ;;  %v3513_v46 = vmax.f32 %v3457_v53, %v3485_v30  ;;  %v3341_v20 = vmax.f32 %v3310_v21, %v5053_v34 }
 0x2aa   : > { %v2233_v45 = vpop.f32.mrf.mxu2 }
 0x2ab   : > { %v2319_v39 = vadd.f32 %v2233_v45, %v1996_v57  ;;  %v3104_v14 = vmax.f32 %v5062_v25, 0.0  ;;  %3541 = vst [vmem:[%s4781_s28 + $0x70] sm:$0xff] %v3513_v46  ;;  %v3397_v0 = vmax.f32 %v3341_v20, %v3369_v8  ;;  %v3281_v8 = vmax.f32 %v3225_v26, %v5053_v34 }
 0x2ac   : > { %v1912_v44 = vpop.f32.mrf.mxu1  ;;  %v5068_v19 = vld [vmem:[#allocation2 + $0x9a] sm:$0xff] }
 0x2ad   : > { %v2642_v5 = vadd.f32 %v5020_v13, %v2319_v39  ;;  %3138 = vst [vmem:[#allocation2 + $0xa8] sm:$0xff] %v3104_v14  ;;  %v3427_v50 = vmax.f32 %v3396_v40, %v5068_v19  ;;  %v3370_v42 = vld [vmem:[#allocation2 + $0x9b] sm:$0xff]  ;;  %v1997_v35 = vadd.f32 %v1963_v18, %v1912_v44  ;;  %v1965_v44 = vld [vmem:[#allocation2 + $0xc8] sm:$0xff] }
 0x2ae   : > { %v3198_v48 = vld [vmem:[#allocation2 + $0x99] sm:$0xff] }
 0x2af   : > { %v2881_v24 = vpop.f32.mrf.mxu0  ;;  %v2965_v22 = vadd.f32 %v2879_v47, %v2642_v5  ;;  %v3458_v31 = vmax.f32 %v3427_v50, %v3370_v42  ;;  %v3486_v11 = vld [vmem:[#allocation2 + $0x9c] sm:$0xff]  ;;  %v3311_v2 = vmax.f32 %v3280_v51, %v3198_v48  ;;  %v3226_v30 = vmax.f32 %v3102_v28, %v3198_v48  ;;  %v2566_v46 = vpop.f32.mrf.mxu3 }
 0x2b1   : > { %v5077_v13 = vadd.f32 %v5027_v63, %v2965_v22  ;;  %v3514_v52 = vmax.f32 %v3458_v31, %v3486_v11  ;;  %v3342_v62 = vmax.f32 %v3311_v2, %v5068_v19  ;;  %v3282_v56 = vmax.f32 %v3226_v30, %v5068_v19 }
 0x2b2   : > { %v2235_v59 = vpop.f32.mrf.mxu2 }
 0x2b3   : > { %v2320_v43 = vadd.f32 %v2235_v59, %v1997_v35  ;;  %v3105_v4 = vmax.f32 %v5077_v13, 0.0  ;;  %3542 = vst [vmem:[%s4781_s28 + $0x78] sm:$0xff] %v3514_v52  ;;  %v3398_v16 = vmax.f32 %v3342_v62, %v3370_v42 }
 0x2b4   : > { %v5081_v9 = vld [vmem:[#allocation2 + $0xa2] sm:$0xff]  ;;  %v1915_v15 = vpop.f32.mrf.mxu1 }
 0x2b5   : > { %v3428_v6 = vmax.f32 %v3397_v0, %v5081_v9  ;;  %3139 = vst [vmem:[#allocation2 + $0xb0] sm:$0xff] %v3105_v4  ;;  %v3371_v3 = vld [vmem:[#allocation2 + $0xa3] sm:$0xff]  ;;  %v2643_v38 = vadd.f32 %v5043_v49, %v2320_v43  ;;  %v1998_v47 = vadd.f32 %v1964_v17, %v1915_v15  ;;  %v1966_v15 = vld [vmem:[#allocation2 + $0xd0] sm:$0xff] }
 0x2b6   : > { %v3487_v55 = vld [vmem:[#allocation2 + $0xa4] sm:$0xff] }
 0x2b7   : > { %v2884_v41 = vpop.f32.mrf.mxu0  ;;  %v3459_v36 = vmax.f32 %v3428_v6, %v3371_v3  ;;  %v2966_v29 = vadd.f32 %v2881_v24, %v2643_v38  ;;  %v3199_v23 = vld [vmem:[#allocation2 + $0xa1] sm:$0xff]  ;;  %v2568_v6 = vpop.f32.mrf.mxu3 }
 0x2b8   : > { %v3312_v49 = vmax.f32 %v3281_v8, %v3199_v23  ;;  %v3227_v18 = vmax.f32 %v3103_v54, %v3199_v23 }
 0x2b9   : > { %v3515_v37 = vmax.f32 %v3459_v36, %v3487_v55  ;;  %v5092_v60 = vadd.f32 %v5027_v63, %v2966_v29 }
 0x2ba   : > { %v2238_v1 = vpop.f32.mrf.mxu2  ;;  %v3343_v39 = vmax.f32 %v3312_v49, %v5081_v9  ;;  %v3283_v61 = vmax.f32 %v3227_v18, %v5081_v9 }
 0x2bb   : > { %3543 = vst [vmem:[%s4781_s28 + $0x80] sm:$0xff] %v3515_v37  ;;  %v2321_v7 = vadd.f32 %v2238_v1, %v1998_v47  ;;  %v3106_v58 = vmax.f32 %v5092_v60, 0.0 }
 0x2bc   : > { %v5095_v12 = vld [vmem:[#allocation2 + $0xaa] sm:$0xff]  ;;  %v1917_v53 = vpop.f32.mrf.mxu1  ;;  %v3399_v42 = vmax.f32 %v3343_v39, %v3371_v3 }
 0x2bd   : > { %v3429_v10 = vmax.f32 %v3398_v16, %v5095_v12  ;;  %v3372_v57 = vld [vmem:[#allocation2 + $0xab] sm:$0xff]  ;;  %v2644_v34 = vadd.f32 %v2561_v33, %v2321_v7  ;;  %3140 = vst [vmem:[#allocation2 + $0xb8] sm:$0xff] %v3106_v58  ;;  %v1999_v24 = vadd.f32 %v1965_v44, %v1917_v53  ;;  %v1967_v53 = vld [vmem:[#allocation2 + $0xd8] sm:$0xff] }
 0x2be   : > { %v3488_v40 = vld [vmem:[#allocation2 + $0xac] sm:$0xff] }
 0x2bf   : > { %v2886_v45 = vpop.f32.mrf.mxu0  ;;  %v3460_v21 = vmax.f32 %v3429_v10, %v3372_v57  ;;  %v2967_v32 = vadd.f32 %v2884_v41, %v2644_v34  ;;  %v3200_v5 = vld [vmem:[#allocation2 + $0xa9] sm:$0xff] }
 0x2c0   : > { %v3313_v22 = vmax.f32 %v3282_v56, %v3200_v5  ;;  %v3228_v29 = vmax.f32 %v3104_v14, %v3200_v5 }
 0x2c1   : > { %v3516_v50 = vmax.f32 %v3460_v21, %v3488_v40  ;;  %v5106_v20 = vadd.f32 %v5027_v63, %v2967_v32 }
 0x2c2   : > { %v2240_v28 = vpop.f32.mrf.mxu2  ;;  %v3344_v0 = vmax.f32 %v3313_v22, %v5095_v12  ;;  %v3284_v25 = vmax.f32 %v3228_v29, %v5095_v12  ;;  %v1968_v22 = vld [vmem:[#allocation2 + $0xe0] sm:$0xff] }
 0x2c3   : > { %3544 = vst [vmem:[%s4781_s28 + $0x88] sm:$0xff] %v3516_v50  ;;  %v2322_v33 = vadd.f32 %v2240_v28, %v1999_v24  ;;  %v3107_v31 = vmax.f32 %v5106_v20, 0.0 }
 0x2c4   : > { %v1920_v48 = vpop.f32.mrf.mxu1  ;;  %v5112_v51 = vld [vmem:[#allocation2 + $0xb2] sm:$0xff]  ;;  %v3400_v55 = vmax.f32 %v3344_v0, %v3372_v57 }
 0x2c5   : > { %v2645_v11 = vadd.f32 %v2563_v27, %v2322_v33  ;;  %v3430_v35 = vmax.f32 %v3399_v42, %v5112_v51  ;;  %3141 = vst [vmem:[#allocation2 + $0xc0] sm:$0xff] %v3107_v31  ;;  %v3373_v52 = vld [vmem:[#allocation2 + $0xb3] sm:$0xff]  ;;  %v2000_v26 = vadd.f32 %v1966_v15, %v1920_v48 }
 0x2c6   : > { %v3201_v2 = vld [vmem:[#allocation2 + $0xb1] sm:$0xff] }
 0x2c7   : > { %v2889_v19 = vpop.f32.mrf.mxu0  ;;  %v2968_v59 = vadd.f32 %v2886_v45, %v2645_v11  ;;  %v3461_v43 = vmax.f32 %v3430_v35, %v3373_v52  ;;  %v3489_v54 = vld [vmem:[#allocation2 + $0xb4] sm:$0xff]  ;;  %v3314_v41 = vmax.f32 %v3283_v61, %v3201_v2  ;;  %v3229_v56 = vmax.f32 %v3105_v4, %v3201_v2 }
 0x2c9   : > { %v5120_v27 = vadd.f32 %v5027_v63, %v2968_v59  ;;  %v3517_v3 = vmax.f32 %v3461_v43, %v3489_v54  ;;  %v3345_v8 = vmax.f32 %v3314_v41, %v5112_v51  ;;  %v3285_v59 = vmax.f32 %v3229_v56, %v5112_v51 }
 0x2ca   : > { %v2243_v38 = vpop.f32.mrf.mxu2 }
 0x2cb   : > { %v2323_v62 = vadd.f32 %v2243_v38, %v2000_v26  ;;  %v3108_v36 = vmax.f32 %v5120_v27, 0.0  ;;  %3545 = vst [vmem:[%s4781_s28 + $0x90] sm:$0xff] %v3517_v3  ;;  %v3401_v45 = vmax.f32 %v3345_v8, %v3373_v52 }
 0x2cc   : > { %v1922_v17 = vpop.f32.mrf.mxu1  ;;  %v5126_v23 = vld [vmem:[#allocation2 + $0xba] sm:$0xff] }
 0x2cd   : > { %v2646_v9 = vadd.f32 %v2566_v46, %v2323_v62  ;;  %3142 = vst [vmem:[#allocation2 + $0xc8] sm:$0xff] %v3108_v36  ;;  %v3431_v37 = vmax.f32 %v3400_v55, %v5126_v23  ;;  %v3374_v1 = vld [vmem:[#allocation2 + $0xbb] sm:$0xff]  ;;  %v2001_v10 = vadd.f32 %v1967_v53, %v1922_v17  ;;  %v2571_v46 = vpop.f32.mrf.mxu3  ;;  %v1969_v62 = vld [vmem:[#allocation2 + $0xe8] sm:$0xff] }
 0x2ce   : > { %v3202_v7 = vld [vmem:[#allocation2 + $0xb9] sm:$0xff] }
 0x2cf   : > { %v2891_v47 = vpop.f32.mrf.mxu0  ;;  %v2969_v16 = vadd.f32 %v2889_v19, %v2646_v9  ;;  %v3462_v49 = vmax.f32 %v3431_v37, %v3374_v1  ;;  %v3490_v14 = vld [vmem:[#allocation2 + $0xbc] sm:$0xff]  ;;  %v3315_v21 = vmax.f32 %v3284_v25, %v3202_v7  ;;  %v3230_v54 = vmax.f32 %v3106_v58, %v3202_v7 }
 0x2d1   : > { %v5134_v30 = vadd.f32 %v5027_v63, %v2969_v16  ;;  %v3518_v57 = vmax.f32 %v3462_v49, %v3490_v14  ;;  %v3346_v28 = vmax.f32 %v3315_v21, %v5126_v23 }
 0x2d2   : > { %v2245_v34 = vpop.f32.mrf.mxu2 }
 0x2d3   : > { %v2324_v39 = vadd.f32 %v2245_v34, %v2001_v10  ;;  %v3109_v40 = vmax.f32 %v5134_v30, 0.0  ;;  %3546 = vst [vmem:[%s4781_s28 + $0x98] sm:$0xff] %v3518_v57  ;;  %v3402_v0 = vmax.f32 %v3346_v28, %v3374_v1 }
 0x2d4   : > { %v5138_v44 = vld [vmem:[#allocation2 + $0xc2] sm:$0xff]  ;;  %v1925_v32 = vpop.f32.mrf.mxu1 }
 0x2d5   : > { %v3432_v5 = vmax.f32 %v3401_v45, %v5138_v44  ;;  %3143 = vst [vmem:[#allocation2 + $0xd0] sm:$0xff] %v3109_v40  ;;  %v3375_v12 = vld [vmem:[#allocation2 + $0xc3] sm:$0xff]  ;;  %v2647_v50 = vadd.f32 %v2568_v6, %v2324_v39  ;;  %v2002_v11 = vadd.f32 %v1968_v22, %v1925_v32  ;;  %v2573_v2 = vpop.f32.mrf.mxu3  ;;  %v1970_v45 = vld [vmem:[#allocation2 + $0xf0] sm:$0xff] }
 0x2d6   : > { %v3491_v42 = vld [vmem:[#allocation2 + $0xc4] sm:$0xff] }
 0x2d7   : > { %v2894_v24 = vpop.f32.mrf.mxu0  ;;  %v3463_v33 = vmax.f32 %v3432_v5, %v3375_v12  ;;  %v2970_v48 = vadd.f32 %v2891_v47, %v2647_v50  ;;  %v3203_v35 = vld [vmem:[#allocation2 + $0xc1] sm:$0xff]  ;;  %v3286_v47 = vmax.f32 %v3230_v54, %v5126_v23 }
 0x2d8   : > { %v3316_v6 = vmax.f32 %v3285_v59, %v3203_v35  ;;  %v3231_v25 = vmax.f32 %v3107_v31, %v3203_v35 }
 0x2d9   : > { %v3519_v18 = vmax.f32 %v3463_v33, %v3491_v42  ;;  %v3076_v52 = vadd.f32 %v5027_v63, %v2970_v48 }
 0x2da   : > { %v2248_v19 = vpop.f32.mrf.mxu2  ;;  %v3347_v17 = vmax.f32 %v3316_v6, %v5138_v44  ;;  %v3287_v20 = vmax.f32 %v3231_v25, %v5138_v44 }
 0x2db   : > { %3547 = vst [vmem:[%s4781_s28 + $0xa0] sm:$0xff] %v3519_v18  ;;  %v2325_v43 = vadd.f32 %v2248_v19, %v2002_v11  ;;  %v3110_v4 = vmax.f32 %v3076_v52, 0.0 }
 0x2dc   : > { %v5149_v15 = vld [vmem:[#allocation2 + $0xca] sm:$0xff]  ;;  %v1927_v13 = vpop.f32.mrf.mxu1  ;;  %v3403_v49 = vmax.f32 %v3347_v17, %v3375_v12 }
 0x2dd   : > { %v3433_v61 = vmax.f32 %v3402_v0, %v5149_v15  ;;  %v3376_v26 = vld [vmem:[#allocation2 + $0xcb] sm:$0xff]  ;;  %v2648_v3 = vadd.f32 %v2571_v46, %v2325_v43  ;;  %3144 = vst [vmem:[#allocation2 + $0xd8] sm:$0xff] %v3110_v4  ;;  %v2003_v37 = vadd.f32 %v1969_v62, %v1927_v13  ;;  %v2576_v10 = vpop.f32.mrf.mxu3  ;;  %v1971_v43 = vld [vmem:[#allocation2 + $0xf8] sm:$0xff] }
 0x2de   : > { %v3492_v41 = vld [vmem:[#allocation2 + $0xcc] sm:$0xff] }
 0x2df   : > { %v2896_v38 = vpop.f32.mrf.mxu0  ;;  %v3464_v51 = vmax.f32 %v3433_v61, %v3376_v26  ;;  %v2971_v55 = vadd.f32 %v2894_v24, %v2648_v3  ;;  %v3204_v29 = vld [vmem:[#allocation2 + $0xc9] sm:$0xff] }
 0x2e0   : > { %v3317_v1 = vmax.f32 %v3286_v47, %v3204_v29  ;;  %v3232_v48 = vmax.f32 %v3108_v36, %v3204_v29 }
 0x2e1   : > { %v3520_v9 = vmax.f32 %v3464_v51, %v3492_v41  ;;  %v3077_v60 = vadd.f32 %v5027_v63, %v2971_v55 }
 0x2e2   : > { %v2250_v8 = vpop.f32.mrf.mxu2  ;;  %v3348_v34 = vmax.f32 %v3317_v1, %v5149_v15  ;;  %v3288_v4 = vmax.f32 %v3232_v48, %v5149_v15 }
 0x2e3   : > { %3548 = vst [vmem:[%s4781_s28 + $0xa8] sm:$0xff] %v3520_v9  ;;  %v2326_v58 = vadd.f32 %v2250_v8, %v2003_v37  ;;  %v3111_v7 = vmax.f32 %v3077_v60, 0.0 }
 0x2e4   : > { %v1930_v16 = vpop.f32.mrf.mxu1  ;;  %v5160_v14 = vld [vmem:[#allocation2 + $0xd2] sm:$0xff]  ;;  %v3404_v33 = vmax.f32 %v3348_v34, %v3376_v26 }
 0x2e5   : > { %v2649_v53 = vadd.f32 %v2573_v2, %v2326_v58  ;;  %3145 = vst [vmem:[#allocation2 + $0xe0] sm:$0xff] %v3111_v7  ;;  %v3434_v57 = vmax.f32 %v3403_v49, %v5160_v14  ;;  %v3377_v46 = vld [vmem:[#allocation2 + $0xd3] sm:$0xff]  ;;  %v2004_v5 = vadd.f32 %v1970_v45, %v1930_v16  ;;  %v2578_v13 = vpop.f32.mrf.mxu3  ;;  %v1972_v16 = vld [vmem:[#allocation2 + $0x100] sm:$0xff] }
 0x2e6   : > { %v3205_v39 = vld [vmem:[#allocation2 + $0xd1] sm:$0xff]  ;;  %v3206_v3 = vld [vmem:[#allocation2 + $0xd9] sm:$0x1f] }
 0x2e7   : > { %v2972_v23 = vadd.f32 %v2896_v38, %v2649_v53  ;;  %v2899_v21 = vpop.f32.mrf.mxu0  ;;  %v3465_v32 = vmax.f32 %v3434_v57, %v3377_v46  ;;  %v3493_v31 = vld [vmem:[#allocation2 + $0xd4] sm:$0xff]  ;;  %v3318_v42 = vmax.f32 %v3287_v20, %v3205_v39  ;;  %v3233_v17 = vmax.f32 %v3109_v40, %v3205_v39 }
 0x2e8   : > { %v3178_v26 = vld [vmem:[#allocation2 + $0xd8] sm:$0x1f] }
 0x2e9   : > { %v3078_v12 = vadd.f32 %v5027_v63, %v2972_v23  ;;  %v3521_v24 = vmax.f32 %v3465_v32, %v3493_v31  ;;  %v3349_v44 = vmax.f32 %v3318_v42, %v5160_v14  ;;  %v3234_v9 = vmax.f32 %v3178_v26, %v3206_v3  ;;  %v3262_v7 = vld [vmem:[#allocation2 + $0xda] sm:$0x1f] }
 0x2ea   : > { %v2253_v50 = vpop.f32.mrf.mxu2  ;;  %v3289_v49 = vmax.f32 %v3233_v17, %v5160_v14 }
 0x2eb   : > { %v2327_v56 = vadd.f32 %v2253_v50, %v2004_v5  ;;  %v3112_v28 = vmax.f32 %v3078_v12, 0.0  ;;  %3549 = vst [vmem:[%s4781_s28 + $0xb0] sm:$0xff] %v3521_v24  ;;  %v3405_v62 = vmax.f32 %v3349_v44, %v3377_v46  ;;  %v3290_v40 = vmax.f32 %v3234_v9, %v3262_v7 }
 0x2ec   : > { %v1932_v22 = vpop.f32.mrf.mxu1  ;;  %v3322_v18 = vld [vmem:[#allocation2 + $0xda] sm:$0xff] }
 0x2ed   : > { %v2650_v11 = vadd.f32 %v2576_v10, %v2327_v56  ;;  %v3435_v35 = vmax.f32 %v3404_v33, %v3322_v18  ;;  %3146 = vst [vmem:[#allocation2 + $0xe8] sm:$0xff] %v3112_v28  ;;  %v3378_v19 = vld [vmem:[#allocation2 + $0xdb] sm:$0xff]  ;;  %v2005_v6 = vadd.f32 %v1971_v43, %v1932_v22  ;;  %v2581_v34 = vpop.f32.mrf.mxu3  ;;  %v1973_v22 = vld [vmem:[#allocation2 + $0x108] sm:$0xff] }
 0x2ee   : > { %v3291_v59 = vld [vmem:[#allocation2 + $0xd9] sm:$0xff] }
 0x2ef   : > { %v2973_v52 = vadd.f32 %v2899_v21, %v2650_v11  ;;  %v3466_v0 = vmax.f32 %v3435_v35, %v3378_v19  ;;  %v3494_v2 = vld [vmem:[#allocation2 + $0xdc] sm:$0xff]  ;;  %v2901_v54 = vpop.f32.mrf.mxu0  ;;  %v3319_v38 = vmax.f32 %v3288_v4, %v3291_v59 }
 0x2f1   : > { %v3079_v27 = vadd.f32 %v5027_v63, %v2973_v52  ;;  %v3522_v36 = vmax.f32 %v3466_v0, %v3494_v2  ;;  %v3350_v47 = vmax.f32 %v3319_v38, %v3322_v18 }
 0x2f2   : > { %v2255_v61 = vpop.f32.mrf.mxu2 }
 0x2f3   : > { %v2328_v51 = vadd.f32 %v2255_v61, %v2005_v6  ;;  %v3113_v41 = vmax.f32 %v3079_v27, 0.0  ;;  %3550 = vst [vmem:[%s4781_s28 + $0xb8] sm:$0xff] %v3522_v36  ;;  %v3406_v46 = vmax.f32 %v3350_v47, %v3378_v19 }
 0x2f4   : > { %v1935_v55 = vpop.f32.mrf.mxu1  ;;  %v3323_v29 = vld [vmem:[#allocation2 + $0xe2] sm:$0xff]  ;;  %v3324_v33 = vld [vmem:[#allocation2 + $0xea] sm:$0x1f] }
 0x2f5   : > { %v2651_v15 = vadd.f32 %v2578_v13, %v2328_v51  ;;  %3147 = vst [vmem:[#allocation2 + $0xf0] sm:$0xff] %v3113_v41  ;;  %v3436_v37 = vmax.f32 %v3405_v62, %v3323_v29  ;;  %v3379_v8 = vld [vmem:[#allocation2 + $0xe3] sm:$0xff]  ;;  %v2006_v25 = vadd.f32 %v1972_v16, %v1935_v55  ;;  %v3380_v0 = vld [vmem:[#allocation2 + $0xeb] sm:$0x1f]  ;;  %v2583_v4 = vpop.f32.mrf.mxu3 }
 0x2f6   : > { %v3292_v58 = vld [vmem:[#allocation2 + $0xe1] sm:$0xff]  ;;  %v3293_v10 = vld [vmem:[#allocation2 + $0xe9] sm:$0x1f] }
 0x2f7   : > { %v2974_v60 = vadd.f32 %v2901_v54, %v2651_v15  ;;  %v3467_v1 = vmax.f32 %v3436_v37, %v3379_v8  ;;  %v3495_v53 = vld [vmem:[#allocation2 + $0xe4] sm:$0xff]  ;;  %v3320_v45 = vmax.f32 %v3289_v49, %v3292_v58  ;;  %v2904_v5 = vpop.f32.mrf.mxu0  ;;  %v3321_v12 = vmax.f32 %v3290_v40, %v3293_v10 }
 0x2f9   : > { %v3080_v30 = vadd.f32 %v5027_v63, %v2974_v60  ;;  %v3523_v57 = vmax.f32 %v3467_v1, %v3495_v53  ;;  %v3351_v24 = vmax.f32 %v3320_v45, %v3323_v29  ;;  %v3352_v48 = vmax.f32 %v3321_v12, %v3324_v33 }
 0x2fa   : > { %v2258_v23 = vpop.f32.mrf.mxu2 }
 0x2fb   : > { %v2329_v21 = vadd.f32 %v2258_v23, %v2006_v25  ;;  %v3114_v39 = vmax.f32 %v3080_v30, 0.0  ;;  %3551 = vst [vmem:[%s4781_s28 + $0xc0] sm:$0xff] %v3523_v57  ;;  %v3407_v52 = vmax.f32 %v3351_v24, %v3379_v8  ;;  %v3408_v2 = vmax.f32 %v3352_v48, %v3380_v0 }
 0x2fc   : > { %v3409_v32 = vld [vmem:[#allocation2 + $0xea] sm:$0xff]  ;;  %v1937_v50 = vpop.f32.mrf.mxu1 }
 0x2fd   : > { %v3437_v20 = vmax.f32 %v3406_v46, %v3409_v32  ;;  %v2652_v31 = vadd.f32 %v2581_v34, %v2329_v21  ;;  %3148 = vst [vmem:[#allocation2 + $0xf8] sm:$0xff] %v3114_v39  ;;  %v3440_v14 = vld [vmem:[#allocation2 + $0xeb] sm:$0xff]  ;;  %v2007_v11 = vadd.f32 %v1973_v22, %v1937_v50 }
 0x2fe   : > { %v3496_v42 = vld [vmem:[#allocation2 + $0xec] sm:$0xff] }
 0x2ff   : > { %v3468_v56 = vmax.f32 %v3437_v20, %v3440_v14  ;;  %v2975_v28 = vadd.f32 %v2904_v5, %v2652_v31  ;;  %v2906_v61 = vpop.f32.mrf.mxu0 }
 0x301   : > { %v3524_v18 = vmax.f32 %v3468_v56, %v3496_v42  ;;  %v3081_v35 = vadd.f32 %v5027_v63, %v2975_v28 }
 0x302   : > { %v2260_v19 = vpop.f32.mrf.mxu2 }
 0x303   : > { %3552 = vst [vmem:[%s4781_s28 + $0xc8] sm:$0xff] %v3524_v18  ;;  %v2330_v44 = vadd.f32 %v2260_v19, %v2007_v11  ;;  %v3115_v59 = vmax.f32 %v3081_v35, 0.0 }
 0x304   : > { %v3410_v43 = vld [vmem:[#allocation2 + $0xf2] sm:$0xff]  ;;  %v3411_v13 = vld [vmem:[#allocation2 + $0xfa] sm:$0x1f] }
 0x305   : > { %v3438_v6 = vmax.f32 %v3407_v52, %v3410_v43  ;;  %v2653_v27 = vadd.f32 %v2583_v4, %v2330_v44  ;;  %3149 = vst [vmem:[#allocation2 + $0x100] sm:$0xff] %v3115_v59  ;;  %v3441_v36 = vld [vmem:[#allocation2 + $0xf3] sm:$0xff]  ;;  %v3439_v54 = vmax.f32 %v3408_v2, %v3411_v13  ;;  %v3442_v62 = vld [vmem:[#allocation2 + $0xfb] sm:$0x1f] }
 0x306   : > { %v3497_v38 = vld [vmem:[#allocation2 + $0xf4] sm:$0xff] }
 0x307   : > { %v3469_v26 = vmax.f32 %v3438_v6, %v3441_v36  ;;  %v2976_v3 = vadd.f32 %v2906_v61, %v2653_v27  ;;  %v3470_v55 = vmax.f32 %v3439_v54, %v3442_v62 }
 0x309   : > { %v3525_v51 = vmax.f32 %v3469_v26, %v3497_v38  ;;  %v3082_v41 = vadd.f32 %v5027_v63, %v2976_v3 }
 0x30b   : > { %3553 = vst [vmem:[%s4781_s28 + $0xd0] sm:$0xff] %v3525_v51  ;;  %v3116_v17 = vmax.f32 %v3082_v41, 0.0 }
 0x30c   : > { %v3498_v29 = vld [vmem:[#allocation2 + $0xfc] sm:$0x1f] }
 0x30d   : > { %v3526_v15 = vmax.f32 %v3470_v55, %v3498_v29  ;;  %3150 = vst [vmem:[#allocation2 + $0x108] sm:$0xff] %v3116_v17 }
 0x30f   : > { %3554 = vst [vmem:[%s4781_s28 + $0xd8] sm:$0x1f] %v3526_v15 }
 0x310 PF: > { %s13_s12 = sadd.s32 1, %s3982_s12  }
 0x311   : > { %p10_p4 = scmp.ge.s32.totalorder %s13_s12, 4  }
 0x313   :  { %12 = sbr.rel (!%p10_p4) target bundleno = 1 (0x1), region = 70 }

// kernel: image_features_forward.9
= control target key start
LH: loop header
LB: loop body
LE: loop exit
PB: predicated region body
PF: predicated region fallthrough
CT: control target
= control target key end

     0   :  { %s940_s12 = smov 0   ;;  %s1074_s0 = inlined_call_operand.vmem [shape: f32[2,30,48], index: 0, kind: input, shape index: {}]   ;;  %s1075_s1 = inlined_call_operand.vmem [shape: bf16[9,48,128], index: 1, kind: input, shape index: {}]   ;;  %s1076_s2 = inlined_call_operand.vmem [shape: f32[1,128], index: 2, kind: input, shape index: {}]   ;;  %s1077_s3 = inlined_call_operand.vmem [shape: f32[2,15,128], index: 3, kind: output, shape index: {}]  }
   0x1 LB: > { %s698_s13 = sadd.s32 4294967295, %s918_s12   ;;  %p702_p0 = scmp.ge.s32.totalorder %s918_s12, 1  ;;  %s918_s12 = sphi %s940_s12, %s13_s12  }
   0x2   : > { %p137_p1 = scmp.lt.s32.totalorder %s918_s12, 3 }
   0x4   : > { %p138_p2 = pnand %p702_p0, %p137_p1 }
   0x5   : > { %p161_p3 = scmp.lt.s32.totalorder (!%p138_p2), %s698_s13, 1 }
   0x6   : > { %141 = sbr.rel (%p138_p2) target bundleno = 258 (0x102), region = 32 }
   0xb   : > { %v878_v0 = vld [vmem:[%s1075_s1 + $0x10] sm:$0xff]  ;;  %v881_v1 = vld [vmem:[%s1075_s1 + $0x28] sm:$0xff]  ;;  %v884_v2 = vld [vmem:[%s1075_s1 + $0x40] sm:$0xff]  ;;  %s1079_s13 = smov (!%p161_p3, %s698_s13), 1  ;;  %vm199_vm0 = vcmask 392192  }
   0xc   : > { %208 = vmatpush.bf16.msra.mxu0 %v878_v0  ;;  %255 = vmatpush.bf16.msra.mxu1 %v881_v1  ;;  %v877_v3 = vld [vmem:[%s1075_s1 + $0x8] sm:$0xff]  ;;  %v880_v4 = vld [vmem:[%s1075_s1 + $0x20] sm:$0xff]  ;;  %v883_v5 = vld [vmem:[%s1075_s1 + $0x38] sm:$0xff]  ;;  %s874_s5 = sshll.u32 %s1079_s13, 5  ;;  %s875_s24 = sshll.u32 %s1079_s13, 4 }
   0xd   : > { %306 = vmatpush.bf16.msra.mxu2 %v884_v2  ;;  %v887_v6 = vld [vmem:[%s1075_s1 + $0x58] sm:$0xff]  ;;  %v876_v7 = vld [vmem:[%s1075_s1] sm:$0xff]  ;;  %s981_s8 = scalar_lea.vmem %s1074_s0, %s874_s5  ;;  %v882_v9 = vld [vmem:[%s1075_s1 + $0x30] sm:$0xff]  ;;  %s170_s27 = scalar_lea.vmem %s1077_s3, %s875_s24 }
   0xe   : > { %v879_v8 = vld [vmem:[%s1075_s1 + $0x18] sm:$0xff]  ;;  %357 = vmatpush.bf16.msra.mxu3 %v887_v6  ;;  %v886_v10 = vld [vmem:[%s1075_s1 + $0x50] sm:$0xff]  ;;  %v172_v12 = vld [vmem:[%s981_s8] sm:$0xff] }
   0xf   : > { %v890_v11 = vld [vmem:[%s1075_s1 + $0x70] sm:$0xff]  ;;  %v173_v13 = vld [vmem:[%s981_s8 + $0x8] sm:$0x7f]  ;;  %v896_v19 = vld [vmem:[%s1075_s1 + $0xa0] sm:$0xff] }
  0x10   : > { %209 = vmatpush.bf16.msra.mxu0 %v877_v3  ;;  %256 = vmatpush.bf16.msra.mxu1 %v880_v4  ;;  %v219_v14 = vld [vmem:[%s981_s8 + $0x1] sm:$0xff]  ;;  %v220_v15 = vld [vmem:[%s981_s8 + $0x9] sm:$0x7f]  ;;  %v174_v20 = vpack.c.bf16 %v173_v13, %v172_v12  ;;  %v899_v27 = vld [vmem:[%s1075_s1 + $0xb8] sm:$0xff] }
  0x11   : > { %307 = vmatpush.bf16.msra.mxu2 %v883_v5  ;;  %v270_v16 = vld [vmem:[%s981_s8 + $0x2] sm:$0xff]  ;;  %v271_v17 = vld [vmem:[%s981_s8 + $0xa] sm:$0x7f]  ;;  %v221_v21 = vpack.c.bf16 %v220_v15, %v219_v14  ;;  %v895_v29 = vld [vmem:[%s1075_s1 + $0x98] sm:$0xff] }
  0x12   : > { %v893_v18 = vld [vmem:[%s1075_s1 + $0x88] sm:$0xff]  ;;  %358 = vmatpush.bf16.msra.mxu3 %v886_v10  ;;  %v272_v22 = vpack.c.bf16 %v271_v17, %v270_v16  ;;  %v892_v28 = vld [vmem:[%s1075_s1 + $0x80] sm:$0xff]  ;;  %v898_v32 = vld [vmem:[%s1075_s1 + $0xb0] sm:$0xff] }
  0x13   : > { %v885_v23 = vld [vmem:[%s1075_s1 + $0x48] sm:$0xff]  ;;  %v888_v31 = vld [vmem:[%s1075_s1 + $0x60] sm:$0xff]  ;;  %v891_v33 = vld [vmem:[%s1075_s1 + $0x78] sm:$0xff] }
  0x14   : > { %210 = vmatpush.bf16.msra.mxu0 %v876_v7  ;;  %257 = vmatpush.bf16.msra.mxu1 %v879_v8  ;;  %v321_v24 = vld [vmem:[%s981_s8 + $0x5] sm:$0xff]  ;;  %v322_v25 = vld [vmem:[%s981_s8 + $0xd] sm:$0x7f]  ;;  %v577_v52 = vld [vmem:[%s981_s8 + $0x14] sm:$0x7f] }
  0x15   : > { %308 = vmatpush.bf16.msra.mxu2 %v882_v9  ;;  %v889_v26 = vld [vmem:[%s1075_s1 + $0x68] sm:$0xff]  ;;  %v323_v30 = vpack.c.bf16 %v322_v25, %v321_v24  ;;  %v894_v34 = vld [vmem:[%s1075_s1 + $0x90] sm:$0xff]  ;;  %v900_v49 = vld [vmem:[%s1075_s1 + $0xc0] sm:$0xff] }
  0x16   : > { %359 = vmatpush.bf16.msra.mxu3 %v885_v23  ;;  %v902_v35 = vld [vmem:[%s1075_s1 + $0xd0] sm:$0xff]  ;;  %v897_v36 = vld [vmem:[%s1075_s1 + $0xa8] sm:$0xff]  ;;  %v911_v14 = vld [vmem:[%s1076_s2] ss:$0 sm:$0xff] }
  0x17   : > { %719 = vmatmul.msk.bf16.vlgmr.msra.gmra.mxu0 %vm199_vm0, %v174_v20  ;;  %738 = vmatmul.msk.bf16.vlgmr.msra.gmra.mxu1 %vm199_vm0, %v221_v21  ;;  %v372_v37 = vld [vmem:[%s981_s8 + $0x6] sm:$0xff]  ;;  %v373_v39 = vld [vmem:[%s981_s8 + $0xe] sm:$0x7f] }
  0x18   : > { %408 = vmatpush.bf16.msrb.mxu0 %v890_v11  ;;  %459 = vmatpush.bf16.msrb.mxu1 %v893_v18  ;;  %v901_v38 = vld [vmem:[%s1075_s1 + $0xc8] sm:$0xff]  ;;  %v475_v43 = vld [vmem:[%s981_s8 + $0x12] sm:$0x7f]  ;;  %v374_v44 = vpack.c.bf16 %v373_v39, %v372_v37 }
  0x19   : > { %510 = vmatpush.bf16.msrb.mxu2 %v896_v19  ;;  %776 = vmatmul.msk.bf16.vlgmr.msra.gmra.mxu3 %vm199_vm0, %v323_v30  ;;  %v423_v40 = vld [vmem:[%s981_s8 + $0x7] sm:$0xff]  ;;  %v424_v41 = vld [vmem:[%s981_s8 + $0xf] sm:$0x7f] }
  0x1a   : > { %757 = vmatmul.msk.bf16.vlgmr.msra.gmra.mxu2 %vm199_vm0, %v272_v22  ;;  %561 = vmatpush.bf16.msrb.mxu3 %v899_v27  ;;  %v474_v42 = vld [vmem:[%s981_s8 + $0xa] sm:$0xff]  ;;  %v425_v45 = vpack.c.bf16 %v424_v41, %v423_v40  ;;  %v526_v48 = vld [vmem:[%s981_s8 + $0x13] sm:$0x7f] }
  0x1b   : > { %v476_v46 = vpack.c.bf16 %v475_v43, %v474_v42  ;;  %v525_v47 = vld [vmem:[%s981_s8 + $0xb] sm:$0xff] }
  0x1c   : > { %409 = vmatpush.bf16.msrb.mxu0 %v889_v26  ;;  %460 = vmatpush.bf16.msrb.mxu1 %v892_v28  ;;  %v527_v50 = vpack.c.bf16 %v526_v48, %v525_v47  ;;  %v576_v51 = vld [vmem:[%s981_s8 + $0xc] sm:$0xff] }
  0x1d   : > { %511 = vmatpush.bf16.msrb.mxu2 %v895_v29  ;;  %v578_v53 = vpack.c.bf16 %v577_v52, %v576_v51 }
  0x1e   : > { %562 = vmatpush.bf16.msrb.mxu3 %v898_v32 }
  0x20   : > { %410 = vmatpush.bf16.msrb.mxu0 %v888_v31  ;;  %461 = vmatpush.bf16.msrb.mxu1 %v891_v33 }
  0x21   : > { %512 = vmatpush.bf16.msrb.mxu2 %v894_v34 }
  0x22   : > { %563 = vmatpush.bf16.msrb.mxu3 %v897_v36 }
  0x24   : > { %612 = vmatpush.bf16.msra.mxu0 %v902_v35 }
  0x27   : > { %795 = vmatmul.msk.bf16.vlgmr.msrb.gmra.mxu0 %vm199_vm0, %v374_v44  ;;  %814 = vmatmul.msk.bf16.vlgmr.msrb.gmra.mxu1 %vm199_vm0, %v425_v45 }
  0x28   : > { %613 = vmatpush.bf16.msra.mxu0 %v901_v38 }
  0x29   : > { %852 = vmatmul.msk.bf16.vlgmr.msrb.gmra.mxu3 %vm199_vm0, %v527_v50 }
  0x2a   : > { %833 = vmatmul.msk.bf16.vlgmr.msrb.gmra.mxu2 %vm199_vm0, %v476_v46 }
  0x2c   : > { %614 = vmatpush.bf16.msra.mxu0 %v900_v49 }
  0x37   : > { %871 = vmatmul.msk.bf16.vlgmr.msra.gmra.mxu0 %vm199_vm0, %v578_v53 }
  0x94   : > { %v212_v54 = vpop.f32.mrf.mxu0  ;;  %v259_v55 = vpop.f32.mrf.mxu1 }
  0x95   : > { %v266_v59 = vadd.f32 %v259_v55, %v212_v54 }
  0x9c   : > { %v214_v57 = vpop.f32.mrf.mxu0  ;;  %v361_v58 = vpop.f32.mrf.mxu3 }
  0x9d   : > { %v310_v56 = vpop.f32.mrf.mxu2  ;;  %218 = vst [vmem:[#allocation2 + $0x8] sm:$0x7f] %v214_v57  ;;  %v261_v60 = vpop.f32.mrf.mxu1 }
  0x9e   : > { %v317_v61 = vadd.f32 %v310_v56, %v266_v59 }
  0xa0   : > { %v368_v3 = vadd.f32 %v361_v58, %v317_v61 }
  0xa4   : > { %v265_v63 = vld [vmem:[#allocation2 + $0x8] sm:$0x7f]  ;;  %v412_v0 = vpop.f32.mrf.mxu0  ;;  %v363_v2 = vpop.f32.mrf.mxu3 }
  0xa5   : > { %v312_v62 = vpop.f32.mrf.mxu2  ;;  %v267_v1 = vadd.f32 %v265_v63, %v261_v60  ;;  %v419_v4 = vadd.f32 %v412_v0, %v368_v3  ;;  %v463_v5 = vpop.f32.mrf.mxu1 }
  0xa7   : > { %269 = vst [vmem:[#allocation2 + $0x8] sm:$0x7f] %v267_v1  ;;  %v470_v8 = vadd.f32 %v463_v5, %v419_v4 }
  0xac   : > { %v414_v6 = vpop.f32.mrf.mxu0  ;;  %v565_v12 = vpop.f32.mrf.mxu3 }
  0xad   : > { %v514_v7 = vpop.f32.mrf.mxu2  ;;  %v465_v23 = vpop.f32.mrf.mxu1 }
  0xae   : > { %v316_v9 = vld [vmem:[#allocation2 + $0x8] sm:$0x7f]  ;;  %v521_v11 = vadd.f32 %v514_v7, %v470_v8 }
  0xaf   : > { %v318_v10 = vadd.f32 %v316_v9, %v312_v62 }
  0xb0   : > { %v572_v13 = vadd.f32 %v565_v12, %v521_v11 }
  0xb1   : > { %320 = vst [vmem:[#allocation2 + $0x8] sm:$0x7f] %v318_v10 }
  0xb4   : > { %v616_v15 = vpop.f32.mrf.mxu0  ;;  %v567_v29 = vpop.f32.mrf.mxu3 }
  0xb5   : > { %v623_v16 = vadd.f32 %v616_v15, %v572_v13  ;;  %v516_v26 = vpop.f32.mrf.mxu2 }
  0xb7   : > { %v633_v17 = vadd.f32 %v911_v14, %v623_v16 }
  0xb8   : > { %v367_v18 = vld [vmem:[#allocation2 + $0x8] sm:$0x7f] }
  0xb9   : > { %v369_v19 = vadd.f32 %v367_v18, %v363_v2  ;;  %v635_v20 = vmax.f32 %v633_v17, 0.0 }
  0xbb   : > { %371 = vst [vmem:[#allocation2 + $0x8] sm:$0x7f] %v369_v19 }
  0xbc   : > { %641 = vst [vmem:[%s170_s27] sm:$0xff] %v635_v20  ;;  %v618_v32 = vpop.f32.mrf.mxu0 }
  0xc2   : > { %v418_v21 = vld [vmem:[#allocation2 + $0x8] sm:$0x7f] }
  0xc3   : > { %v420_v22 = vadd.f32 %v418_v21, %v414_v6 }
  0xc5   : > { %422 = vst [vmem:[#allocation2 + $0x8] sm:$0x7f] %v420_v22 }
  0xcc   : > { %v469_v24 = vld [vmem:[#allocation2 + $0x8] sm:$0x7f] }
  0xcd   : > { %v471_v25 = vadd.f32 %v469_v24, %v465_v23 }
  0xcf   : > { %473 = vst [vmem:[#allocation2 + $0x8] sm:$0x7f] %v471_v25 }
  0xd6   : > { %v520_v27 = vld [vmem:[#allocation2 + $0x8] sm:$0x7f] }
  0xd7   : > { %v522_v28 = vadd.f32 %v520_v27, %v516_v26 }
  0xd9   : > { %524 = vst [vmem:[#allocation2 + $0x8] sm:$0x7f] %v522_v28 }
  0xe0   : > { %v571_v30 = vld [vmem:[#allocation2 + $0x8] sm:$0x7f] }
  0xe1   : > { %v573_v31 = vadd.f32 %v571_v30, %v567_v29 }
  0xe3   : > { %575 = vst [vmem:[#allocation2 + $0x8] sm:$0x7f] %v573_v31 }
  0xea   : > { %v622_v33 = vld [vmem:[#allocation2 + $0x8] sm:$0x7f] }
  0xeb   : > { %v624_v34 = vadd.f32 %v622_v33, %v618_v32 }
  0xed   : > { %626 = vst [vmem:[#allocation2 + $0x8] sm:$0x7f] %v624_v34 }
  0xf4   : > { %v628_v35 = vld [vmem:[#allocation2 + $0x8] sm:$0x7f] }
  0xf5   : > { %v634_v36 = vadd.f32 %v911_v14, %v628_v35 }
  0xf7   : > { %v636_v37 = vmax.f32 %v634_v36, 0.0 }
  0xf9   : > { %638 = vst [vmem:[#allocation2 + $0x8] sm:$0x7f] %v636_v37 }
 0x100   : > { %v640_v38 = vld [vmem:[#allocation2 + $0x8] sm:$0x7f] }
 0x101   : > { %642 = vst [vmem:[%s170_s27 + $0x8] sm:$0x7f] %v640_v38 }
 0x102 PF: > { %s13_s12 = sadd.s32 1, %s918_s12  }
 0x103   : > { %p10_p4 = scmp.ge.s32.totalorder %s13_s12, 4  }
 0x105   :  { %12 = sbr.rel (!%p10_p4) target bundleno = 1 (0x1), region = 70 }

// kernel: image_features_forward.7
= control target key start
LH: loop header
LB: loop body
LE: loop exit
PB: predicated region body
PF: predicated region fallthrough
CT: control target
= control target key end

     0   :  { %s3625_s12 = smov 0   ;;  %s4538_s0 = inlined_call_operand.vmem [shape: f32[2,143,16], index: 0, kind: input, shape index: {}]   ;;  %s4539_s1 = inlined_call_operand.vmem [shape: bf16[25,16,128], index: 1, kind: input, shape index: {}]   ;;  %s4540_s2 = inlined_call_operand.vmem [shape: f32[1,128], index: 2, kind: input, shape index: {}]   ;;  %s4541_s3 = inlined_call_operand.vmem [shape: f32[2,55,128], index: 3, kind: output, shape index: {}]  }
   0x1 LB: > { %s3251_s13 = sadd.s32 4294967295, %s3603_s12   ;;  %p3255_p0 = scmp.ge.s32.totalorder %s3603_s12, 1  ;;  %s3603_s12 = sphi %s3625_s12, %s13_s12  }
   0x2   : > { %p137_p1 = scmp.lt.s32.totalorder %s3603_s12, 3 }
   0x4   : > { %p138_p2 = pnand %p3255_p0, %p137_p1 }
   0x5   : > { %p161_p3 = scmp.lt.s32.totalorder (!%p138_p2), %s3251_s13, 1 }
   0x6   : > { %141 = sbr.rel (%p138_p2) target bundleno = 760 (0x2f8), region = 32 }
   0xb   : > { %v3558_v0 = vld [vmem:[%s4539_s1] sm:$0xff]  ;;  %v3559_v1 = vld [vmem:[%s4539_s1 + $0x8] sm:$0xff]  ;;  %v3560_v2 = vld [vmem:[%s4539_s1 + $0x10] sm:$0xff]  ;;  %s4543_s13 = smov (!%p161_p3, %s3251_s13), 1  ;;  %vm197_vm0 = vcmask 130048  }
   0xc   : > { %v3561_v3 = vld [vmem:[%s4539_s1 + $0x18] sm:$0xff]  ;;  %3583 = vmatpush.bf16.msra.mxu1 %v3558_v0  ;;  %3584 = vmatpush.bf16.msra.mxu2 %v3558_v0  ;;  %s3586_s22 = smul.u32 144, %s4543_s13  ;;  %v3563_v15 = vld [vmem:[%s4539_s1 + $0x28] sm:$0xff]  ;;  %v3564_v16 = vld [vmem:[%s4539_s1 + $0x30] sm:$0xff] }
   0xd   : > { %3585 = vmatpush.bf16.msra.mxu3 %v3558_v0  ;;  %223 = vmatpush.bf16.msra.mxu0 %v3558_v0  ;;  %v3562_v17 = vld [vmem:[%s4539_s1 + $0x20] sm:$0xff]  ;;  %v3565_v18 = vld [vmem:[%s4539_s1 + $0x38] sm:$0xff]  ;;  %s3587_s20 = smul.u32 56, %s4543_s13 }
   0xe   : > { %s3651_s25 = scalar_lea.vmem %s4538_s0, %s3586_s22  ;;  %v3566_v31 = vld [vmem:[%s4539_s1 + $0x40] sm:$0xff] }
   0xf   : > { %v174_v4 = vld [vmem:[%s3651_s25 + $0x10] sm:$0xff]  ;;  %v3655_v5 = vld [vmem:[%s3651_s25 + $0x18] sm:$0xff]  ;;  %v172_v12 = vld [vmem:[%s3651_s25] sm:$0xff]  ;;  %s4502_s23 = scalar_lea.vmem %s4541_s3, %s3587_s20 }
  0x10   : > { %316 = vmatpush.bf16.msrb.mxu1 %v3559_v1  ;;  %431 = vmatpush.bf16.msrb.mxu2 %v3560_v2  ;;  %v178_v6 = vld [vmem:[%s3651_s25 + $0x30] sm:$0xff]  ;;  %v184_v7 = vpack.c.bf16 %v3655_v5, %v174_v4  ;;  %v179_v8 = vld [vmem:[%s3651_s25 + $0x38] sm:$0xff]  ;;  %v173_v13 = vld [vmem:[%s3651_s25 + $0x8] sm:$0xff] }
  0x11   : > { %546 = vmatpush.bf16.msrb.mxu3 %v3561_v3  ;;  %v186_v9 = vpack.c.bf16 %v179_v8, %v178_v6  ;;  %v182_v10 = vld [vmem:[%s3651_s25 + $0x50] sm:$0xff]  ;;  %v183_v14 = vpack.c.bf16 %v173_v13, %v172_v12  ;;  %661 = vmatpush.bf16.msrb.mxu0 %v3562_v17  ;;  %v3680_v19 = vld [vmem:[%s3651_s25 + $0x20] sm:$0xff]  ;;  %v3683_v20 = vld [vmem:[%s3651_s25 + $0x28] sm:$0xff] }
  0x12   : > { %3263 = vmatmul.msk.bf16.vlgmr.msra.gmra.mxu1 %vm197_vm0, %v184_v7  ;;  %v188_v11 = vpack.c.bf16 %v182_v10, %v182_v10  ;;  %v180_v21 = vld [vmem:[%s3651_s25 + $0x40] sm:$0xff]  ;;  %v181_v22 = vld [vmem:[%s3651_s25 + $0x48] sm:$0xff]  ;;  %v185_v25 = vpack.c.bf16 %v3683_v20, %v3680_v19  ;;  %v3711_v36 = vld [vmem:[%s3651_s25 + $0x13] sm:$0xff] }
  0x13   : > { %3265 = vmatmul.msk.bf16.vlgmr.msra.gmra.mxu2 %vm197_vm0, %v186_v9  ;;  %3262 = vmatmul.msk.bf16.vlgmr.msra.gmra.mxu0 %vm197_vm0, %v183_v14  ;;  %v495_v23 = vld [vmem:[%s3651_s25 + $0x3] sm:$0xff]  ;;  %v3689_v24 = vld [vmem:[%s3651_s25 + $0xb] sm:$0xff]  ;;  %v187_v28 = vpack.c.bf16 %v181_v22, %v180_v21  ;;  %v3714_v37 = vld [vmem:[%s3651_s25 + $0x1b] sm:$0xff] }
  0x14   : > { %3267 = vmatmul.msk.bf16.vlgmr.msra.gmra.mxu3 %vm197_vm0, %v188_v11  ;;  %776 = vmatpush.bf16.msra.mxu1 %v3563_v15  ;;  %v610_v26 = vld [vmem:[%s3651_s25 + $0x4] sm:$0xff]  ;;  %v3695_v27 = vld [vmem:[%s3651_s25 + $0xc] sm:$0xff]  ;;  %v506_v29 = vpack.c.bf16 %v3689_v24, %v495_v23  ;;  %v3717_v39 = vld [vmem:[%s3651_s25 + $0x14] sm:$0xff]  ;;  %v507_v42 = vpack.c.bf16 %v3714_v37, %v3711_v36 }
  0x15   : > { %891 = vmatpush.bf16.msra.mxu2 %v3564_v16  ;;  %1006 = vmatpush.bf16.msra.mxu3 %v3565_v18  ;;  %v621_v30 = vpack.c.bf16 %v3695_v27, %v610_v26  ;;  %v265_v32 = vld [vmem:[%s3651_s25 + $0x1] sm:$0xff]  ;;  %v266_v33 = vld [vmem:[%s3651_s25 + $0x9] sm:$0xff]  ;;  %v267_v44 = vld [vmem:[%s3651_s25 + $0x11] sm:$0xff] }
  0x16   : > { %1121 = vmatpush.bf16.msra.mxu0 %v3566_v31  ;;  %v380_v34 = vld [vmem:[%s3651_s25 + $0x2] sm:$0xff]  ;;  %v381_v35 = vld [vmem:[%s3651_s25 + $0xa] sm:$0xff]  ;;  %v276_v38 = vpack.c.bf16 %v266_v33, %v265_v32  ;;  %v268_v45 = vld [vmem:[%s3651_s25 + $0x19] sm:$0xff] }
  0x17   : > { %v3720_v40 = vld [vmem:[%s3651_s25 + $0x1c] sm:$0xff]  ;;  %v391_v41 = vpack.c.bf16 %v381_v35, %v380_v34  ;;  %v382_v46 = vld [vmem:[%s3651_s25 + $0x12] sm:$0xff]  ;;  %v277_v50 = vpack.c.bf16 %v268_v45, %v267_v44  ;;  %v3741_v51 = vld [vmem:[%s3651_s25 + $0x24] sm:$0xff] }
  0x18   : > { %v622_v43 = vpack.c.bf16 %v3720_v40, %v3717_v39  ;;  %v383_v47 = vld [vmem:[%s3651_s25 + $0x1a] sm:$0xff]  ;;  %v3735_v48 = vld [vmem:[%s3651_s25 + $0x23] sm:$0xff]  ;;  %v3738_v49 = vld [vmem:[%s3651_s25 + $0x2b] sm:$0xff] }
  0x19   : > { %v3744_v52 = vld [vmem:[%s3651_s25 + $0x2c] sm:$0xff]  ;;  %v392_v53 = vpack.c.bf16 %v383_v47, %v382_v46  ;;  %v508_v54 = vpack.c.bf16 %v3738_v49, %v3735_v48  ;;  %v269_v56 = vld [vmem:[%s3651_s25 + $0x21] sm:$0xff]  ;;  %v3765_v63 = vld [vmem:[%s3651_s25 + $0x34] sm:$0xff] }
  0x1a   : > { %v623_v55 = vpack.c.bf16 %v3744_v52, %v3741_v51  ;;  %v270_v57 = vld [vmem:[%s3651_s25 + $0x29] sm:$0xff]  ;;  %v3759_v60 = vld [vmem:[%s3651_s25 + $0x33] sm:$0xff]  ;;  %v3762_v61 = vld [vmem:[%s3651_s25 + $0x3b] sm:$0xff] }
  0x1b   : > { %v384_v58 = vld [vmem:[%s3651_s25 + $0x22] sm:$0xff]  ;;  %v385_v59 = vld [vmem:[%s3651_s25 + $0x2a] sm:$0xff]  ;;  %v278_v62 = vpack.c.bf16 %v270_v57, %v269_v56  ;;  %v509_v2 = vpack.c.bf16 %v3762_v61, %v3759_v60  ;;  %v272_v6 = vld [vmem:[%s3651_s25 + $0x39] sm:$0xff] }
  0x1c   : > { %v3768_v0 = vld [vmem:[%s3651_s25 + $0x3c] sm:$0xff]  ;;  %v393_v1 = vpack.c.bf16 %v385_v59, %v384_v58  ;;  %v271_v4 = vld [vmem:[%s3651_s25 + $0x31] sm:$0xff]  ;;  %v3789_v12 = vld [vmem:[%s3651_s25 + $0x44] sm:$0xff]  ;;  %v851_v58 = vpack.c.bf16 %v3717_v39, %v3695_v27 }
  0x1d   : > { %v624_v3 = vpack.c.bf16 %v3768_v0, %v3765_v63  ;;  %v386_v7 = vld [vmem:[%s3651_s25 + $0x32] sm:$0xff]  ;;  %v387_v8 = vld [vmem:[%s3651_s25 + $0x3a] sm:$0xff]  ;;  %v3783_v9 = vld [vmem:[%s3651_s25 + $0x43] sm:$0xff]  ;;  %v279_v11 = vpack.c.bf16 %v272_v6, %v271_v4 }
  0x1e   : > { %v3786_v10 = vld [vmem:[%s3651_s25 + $0x4b] sm:$0xff]  ;;  %v394_v14 = vpack.c.bf16 %v387_v8, %v386_v7  ;;  %v273_v17 = vld [vmem:[%s3651_s25 + $0x41] sm:$0xff]  ;;  %v3807_v23 = vld [vmem:[%s3651_s25 + $0x53] sm:$0xff]  ;;  %v737_v7 = vpack.c.bf16 %v3735_v48, %v3714_v37 }
  0x1f   : > { %v3792_v13 = vld [vmem:[%s3651_s25 + $0x4c] sm:$0xff]  ;;  %v510_v15 = vpack.c.bf16 %v3786_v10, %v3783_v9  ;;  %v388_v21 = vld [vmem:[%s3651_s25 + $0x42] sm:$0xff]  ;;  %v3810_v26 = vld [vmem:[%s3651_s25 + $0x54] sm:$0xff] }
  0x20   : > { %v625_v16 = vpack.c.bf16 %v3792_v13, %v3789_v12  ;;  %v274_v18 = vld [vmem:[%s3651_s25 + $0x49] sm:$0xff]  ;;  %v275_v33 = vld [vmem:[%s3651_s25 + $0x51] sm:$0xff] }
  0x21   : > { %v389_v22 = vld [vmem:[%s3651_s25 + $0x4a] sm:$0xff]  ;;  %v390_v34 = vld [vmem:[%s3651_s25 + $0x52] sm:$0xff] }
  0x22   : > { %3264 = vmatmul.msk.bf16.gmra.mxu1 %vm197_vm0, %v185_v25  ;;  %v280_v25 = vpack.c.bf16 %v274_v18, %v273_v17  ;;  %v3567_v31 = vld [vmem:[%s4539_s1 + $0x48] sm:$0xff]  ;;  %v3568_v32 = vld [vmem:[%s4539_s1 + $0x50] sm:$0xff]  ;;  %v396_v44 = vpack.c.bf16 %v390_v34, %v390_v34  ;;  %v3569_v45 = vld [vmem:[%s4539_s1 + $0x58] sm:$0xff] }
  0x23   : > { %3266 = vmatmul.msk.bf16.gmra.mxu2 %vm197_vm0, %v187_v28  ;;  %3310 = vmatmul.msk.bf16.vlgmr.msrb.gmra.mxu0 %vm197_vm0, %v621_v30  ;;  %v395_v28 = vpack.c.bf16 %v389_v22, %v388_v21  ;;  %v626_v30 = vpack.c.bf16 %v3810_v26, %v3810_v26  ;;  %v955_v35 = vld [vmem:[%s3651_s25 + $0xd] sm:$0xff]  ;;  %v960_v4 = vld [vmem:[%s3651_s25 + $0x35] sm:$0xff]  ;;  %v961_v22 = vld [vmem:[%s3651_s25 + $0x3d] sm:$0xff] }
  0x24   : > { %3298 = vmatmul.msk.bf16.vlgmr.msrb.gmra.mxu3 %vm197_vm0, %v506_v29  ;;  %v511_v29 = vpack.c.bf16 %v3807_v23, %v3807_v23  ;;  %v3850_v56 = vld [vmem:[%s3651_s25 + $0x26] sm:$0xff]  ;;  %v3876_v8 = vld [vmem:[%s3651_s25 + $0x2e] sm:$0xff] }
  0x25   : > { %1466 = vmatpush.bf16.msrb.mxu3 %v3569_v45 }
  0x32   : > { %3274 = vmatmul.msk.bf16.vlgmr.msrb.gmra.mxu1 %vm197_vm0, %v276_v38  ;;  %v956_v38 = vld [vmem:[%s3651_s25 + $0x15] sm:$0xff] }
  0x33   : > { %3286 = vmatmul.msk.bf16.vlgmr.msrb.gmra.mxu2 %vm197_vm0, %v391_v41  ;;  %3311 = vmatmul.msk.bf16.gmra.mxu0 %vm197_vm0, %v622_v43  ;;  %v281_v41 = vpack.c.bf16 %v275_v33, %v275_v33  ;;  %v3832_v43 = vld [vmem:[%s3651_s25 + $0x16] sm:$0xff]  ;;  %v966_v46 = vpack.c.bf16 %v956_v38, %v955_v35  ;;  %v853_v33 = vpack.c.bf16 %v3765_v63, %v3744_v52 }
  0x34   : > { %3299 = vmatmul.msk.bf16.gmra.mxu3 %vm197_vm0, %v507_v42  ;;  %1236 = vmatpush.bf16.msrb.mxu1 %v3567_v31  ;;  %v1070_v42 = vld [vmem:[%s3651_s25 + $0xe] sm:$0xff]  ;;  %v3905_v31 = vld [vmem:[%s3651_s25 + $0x46] sm:$0xff] }
  0x35   : > { %1351 = vmatpush.bf16.msrb.mxu2 %v3568_v32  ;;  %v1081_v47 = vpack.c.bf16 %v3832_v43, %v1070_v42 }
  0x42   : > { %3275 = vmatmul.msk.bf16.gmra.mxu1 %vm197_vm0, %v277_v50  ;;  %v957_v50 = vld [vmem:[%s3651_s25 + $0x1d] sm:$0xff] }
  0x43   : > { %3287 = vmatmul.msk.bf16.gmra.mxu2 %vm197_vm0, %v392_v53  ;;  %3312 = vmatmul.msk.bf16.gmra.mxu0 %vm197_vm0, %v623_v55  ;;  %v958_v53 = vld [vmem:[%s3651_s25 + $0x25] sm:$0xff] }
  0x44   : > { %3300 = vmatmul.msk.bf16.gmra.mxu3 %vm197_vm0, %v508_v54  ;;  %v736_v54 = vpack.c.bf16 %v3711_v36, %v3689_v24  ;;  %v3847_v55 = vld [vmem:[%s3651_s25 + $0x1e] sm:$0xff]  ;;  %v967_v59 = vpack.c.bf16 %v958_v53, %v957_v50  ;;  %v963_v50 = vld [vmem:[%s3651_s25 + $0x4d] sm:$0xff]  ;;  %v964_v53 = vld [vmem:[%s3651_s25 + $0x55] sm:$0xff] }
  0x45   : > { %v1082_v24 = vpack.c.bf16 %v3850_v56, %v3847_v55 }
  0x52   : > { %3276 = vmatmul.msk.bf16.gmra.mxu1 %vm197_vm0, %v278_v62  ;;  %v3570_v62 = vld [vmem:[%s4539_s1 + $0x60] sm:$0xff] }
  0x53   : > { %3288 = vmatmul.msk.bf16.gmra.mxu2 %vm197_vm0, %v393_v1  ;;  %3313 = vmatmul.msk.bf16.gmra.mxu0 %vm197_vm0, %v624_v3  ;;  %v959_v3 = vld [vmem:[%s3651_s25 + $0x2d] sm:$0xff] }
  0x54   : > { %3301 = vmatmul.msk.bf16.gmra.mxu3 %vm197_vm0, %v509_v2  ;;  %1581 = vmatpush.bf16.msrb.mxu0 %v3570_v62  ;;  %v968_v17 = vpack.c.bf16 %v960_v4, %v959_v3  ;;  %v3925_v62 = vld [vmem:[%s3651_s25 + $0x56] sm:$0xff]  ;;  %v970_v4 = vpack.c.bf16 %v964_v53, %v963_v50 }
  0x55   : > { %v850_v53 = vld [vmem:[%s3651_s25 + $0x5c] sm:$0xff] }
  0x62   : > { %3277 = vmatmul.msk.bf16.gmra.mxu1 %vm197_vm0, %v279_v11  ;;  %v3879_v11 = vld [vmem:[%s3651_s25 + $0x36] sm:$0xff] }
  0x63   : > { %3289 = vmatmul.msk.bf16.gmra.mxu2 %vm197_vm0, %v394_v14  ;;  %3314 = vmatmul.msk.bf16.gmra.mxu0 %vm197_vm0, %v625_v16  ;;  %v1083_v18 = vpack.c.bf16 %v3879_v11, %v3876_v8 }
  0x64   : > { %3302 = vmatmul.msk.bf16.gmra.mxu3 %vm197_vm0, %v510_v15  ;;  %v852_v15 = vpack.c.bf16 %v3741_v51, %v3720_v40 }
  0x72   : > { %3278 = vmatmul.msk.bf16.gmra.mxu1 %vm197_vm0, %v280_v25  ;;  %v962_v25 = vld [vmem:[%s3651_s25 + $0x45] sm:$0xff] }
  0x73   : > { %3290 = vmatmul.msk.bf16.gmra.mxu2 %vm197_vm0, %v395_v28  ;;  %3315 = vmatmul.msk.bf16.gmra.mxu0 %vm197_vm0, %v626_v30  ;;  %v3902_v30 = vld [vmem:[%s3651_s25 + $0x3e] sm:$0xff]  ;;  %v969_v38 = vpack.c.bf16 %v962_v25, %v961_v22 }
  0x74   : > { %3303 = vmatmul.msk.bf16.gmra.mxu3 %vm197_vm0, %v511_v29  ;;  %v738_v29 = vpack.c.bf16 %v3759_v60, %v3738_v49  ;;  %v965_v22 = vld [vmem:[%s3651_s25 + $0x5d] sm:$0xff] }
  0x82   : > { %3279 = vmatmul.msk.bf16.gmra.mxu1 %vm197_vm0, %v281_v41  ;;  %v1084_v41 = vpack.c.bf16 %v3905_v31, %v3902_v30 }
  0x83   : > { %3291 = vmatmul.msk.bf16.gmra.mxu2 %vm197_vm0, %v396_v44  ;;  %3358 = vmatmul.msk.bf16.vlgmr.msra.gmra.mxu0 %vm197_vm0, %v1081_v47 }
  0x84   : > { %3346 = vmatmul.msk.bf16.vlgmr.msra.gmra.mxu3 %vm197_vm0, %v966_v46 }
  0x8f   : > { %v3852_v57 = vpop.f32.mrf.mxu1 }
  0x90   : > { %v225_v36 = vpop.f32.mrf.mxu0 }
  0x92   : > { %3322 = vmatmul.msk.bf16.vlgmr.msra.gmra.mxu1 %vm197_vm0, %v736_v54 }
  0x93   : > { %3334 = vmatmul.msk.bf16.vlgmr.msra.gmra.mxu2 %vm197_vm0, %v851_v58  ;;  %3359 = vmatmul.msk.bf16.gmra.mxu0 %vm197_vm0, %v1082_v24  ;;  %v739_v58 = vpack.c.bf16 %v3783_v9, %v3762_v61 }
  0x94   : > { %3347 = vmatmul.msk.bf16.gmra.mxu3 %vm197_vm0, %v967_v59  ;;  %v3922_v59 = vld [vmem:[%s3651_s25 + $0x4e] sm:$0xff] }
  0x96   : > { %v3865_v27 = vpop.f32.mrf.mxu2 }
  0x97   : > { %v3867_v39 = vpop.f32.mrf.mxu1  ;;  %v250_v1 = vpop.f32.mrf.mxu3 }
  0x98   : > { %v227_v2 = vpop.f32.mrf.mxu0  ;;  %v854_v1 = vpack.c.bf16 %v3789_v12, %v3768_v0 }
  0x9e   : > { %v3871_v6 = vpop.f32.mrf.mxu2 }
  0x9f   : > { %v3881_v14 = vpop.f32.mrf.mxu1  ;;  %v252_v16 = vpop.f32.mrf.mxu3 }
  0xa0   : > { %v663_v37 = vpop.f32.mrf.mxu0 }
  0xa2   : > { %3323 = vmatmul.msk.bf16.gmra.mxu1 %vm197_vm0, %v737_v7 }
  0xa3   : > { %3335 = vmatmul.msk.bf16.gmra.mxu2 %vm197_vm0, %v852_v15  ;;  %3360 = vmatmul.msk.bf16.gmra.mxu0 %vm197_vm0, %v1083_v18  ;;  %v1085_v15 = vpack.c.bf16 %v3925_v62, %v3922_v59 }
  0xa4   : > { %3348 = vmatmul.msk.bf16.gmra.mxu3 %vm197_vm0, %v968_v17 }
  0xa6   : > { %v3891_v48 = vpop.f32.mrf.mxu2 }
  0xa7   : > { %v3893_v21 = vpop.f32.mrf.mxu1  ;;  %v548_v40 = vpop.f32.mrf.mxu3 }
  0xa8   : > { %v665_v51 = vpop.f32.mrf.mxu0 }
  0xae   : > { %v3897_v28 = vpop.f32.mrf.mxu2 }
  0xaf   : > { %v318_v32 = vpop.f32.mrf.mxu1  ;;  %v550_v34 = vpop.f32.mrf.mxu3 }
  0xb0   : > { %v358_v35 = vadd.f32 %v318_v32, %v225_v36  ;;  %v668_v42 = vpop.f32.mrf.mxu0 }
  0xb2   : > { %3324 = vmatmul.msk.bf16.gmra.mxu1 %vm197_vm0, %v738_v29  ;;  %v3945_v29 = vld [vmem:[%s3651_s25 + $0x5e] sm:$0xff] }
  0xb3   : > { %3336 = vmatmul.msk.bf16.gmra.mxu2 %vm197_vm0, %v853_v33  ;;  %3361 = vmatmul.msk.bf16.gmra.mxu0 %vm197_vm0, %v1084_v41 }
  0xb4   : > { %3349 = vmatmul.msk.bf16.gmra.mxu3 %vm197_vm0, %v969_v38 }
  0xb6   : > { %v433_v49 = vpop.f32.mrf.mxu2 }
  0xb7   : > { %v473_v52 = vadd.f32 %v433_v49, %v358_v35  ;;  %v320_v60 = vpop.f32.mrf.mxu1  ;;  %v553_v63 = vpop.f32.mrf.mxu3 }
  0xb8   : > { %v359_v44 = vadd.f32 %v320_v60, %v227_v2  ;;  %v670_v46 = vpop.f32.mrf.mxu0  ;;  %v3572_v60 = vld [vmem:[%s4539_s1 + $0x70] sm:$0xff] }
  0xb9   : > { %v588_v45 = vadd.f32 %v548_v40, %v473_v52  ;;  %1811 = vmatpush.bf16.msra.mxu2 %v3572_v60 }
  0xbb   : > { %v3915_v47 = vadd.f32 %v663_v37, %v588_v45 }
  0xbe   : > { %v435_v54 = vpop.f32.mrf.mxu2 }
  0xbf   : > { %v474_v24 = vadd.f32 %v435_v54, %v359_v44  ;;  %v323_v36 = vpop.f32.mrf.mxu1  ;;  %v555_v2 = vpop.f32.mrf.mxu3  ;;  %v1186_v54 = vld [vmem:[%s3651_s25 + $0x17] sm:$0xff] }
  0xc0   : > { %v360_v3 = vadd.f32 %v323_v36, %v3852_v57  ;;  %v673_v61 = vpop.f32.mrf.mxu0 }
  0xc1   : > { %v589_v7 = vadd.f32 %v550_v34, %v474_v24  ;;  %v855_v34 = vpack.c.bf16 %v3810_v26, %v3792_v13  ;;  %v3571_v13 = vld [vmem:[%s4539_s1 + $0x68] sm:$0xff] }
  0xc2   : > { %3325 = vmatmul.msk.bf16.gmra.mxu1 %vm197_vm0, %v739_v58  ;;  %v3971_v58 = vld [vmem:[%s3651_s25 + $0x1f] sm:$0xff] }
  0xc3   : > { %3337 = vmatmul.msk.bf16.gmra.mxu2 %vm197_vm0, %v854_v1  ;;  %v3934_v9 = vadd.f32 %v665_v51, %v589_v7  ;;  %3362 = vmatmul.msk.bf16.gmra.mxu0 %vm197_vm0, %v1085_v15  ;;  %v740_v51 = vpack.c.bf16 %v3807_v23, %v3786_v10  ;;  %v1426_v7 = vpack.c.bf16 %v3971_v58, %v1186_v54 }
  0xc4   : > { %3350 = vmatmul.msk.bf16.gmra.mxu3 %vm197_vm0, %v970_v4  ;;  %1696 = vmatpush.bf16.msra.mxu1 %v3571_v13 }
  0xc6   : > { %v438_v0 = vpop.f32.mrf.mxu2 }
  0xc7   : > { %v475_v12 = vadd.f32 %v438_v0, %v360_v3  ;;  %v325_v57 = vpop.f32.mrf.mxu1  ;;  %v558_v16 = vpop.f32.mrf.mxu3  ;;  %v856_v3 = vpack.c.bf16 %v850_v53, %v850_v53 }
  0xc8   : > { %v361_v17 = vadd.f32 %v325_v57, %v3867_v39  ;;  %v675_v37 = vpop.f32.mrf.mxu0  ;;  %v971_v39 = vpack.c.bf16 %v965_v22, %v965_v22 }
  0xc9   : > { %v590_v18 = vadd.f32 %v553_v63, %v475_v12 }
  0xcb   : > { %v3939_v40 = vadd.f32 %v668_v42, %v590_v18  ;;  %v1086_v42 = vpack.c.bf16 %v3945_v29, %v3945_v29 }
  0xce   : > { %v440_v25 = vpop.f32.mrf.mxu2 }
  0xcf   : > { %v476_v32 = vadd.f32 %v440_v25, %v361_v17  ;;  %v328_v33 = vpop.f32.mrf.mxu1  ;;  %v560_v35 = vpop.f32.mrf.mxu3  ;;  %v1185_v25 = vld [vmem:[%s3651_s25 + $0xf] sm:$0xff] }
  0xd0   : > { %v362_v38 = vadd.f32 %v328_v33, %v3881_v14  ;;  %v678_v49 = vpop.f32.mrf.mxu0  ;;  %v3992_v33 = vld [vmem:[%s3651_s25 + $0x2f] sm:$0xff] }
  0xd1   : > { %v591_v41 = vadd.f32 %v555_v2, %v476_v32 }
  0xd2   : > { %3326 = vmatmul.msk.bf16.gmra.mxu1 %vm197_vm0, %v740_v51 }
  0xd3   : > { %3338 = vmatmul.msk.bf16.gmra.mxu2 %vm197_vm0, %v855_v34  ;;  %v3954_v10 = vadd.f32 %v670_v46, %v591_v41  ;;  %3363 = vmatmul.msk.bf16.gmra.mxu0 %vm197_vm0, %v1086_v42  ;;  %v735_v46 = vld [vmem:[%s3651_s25 + $0x5b] sm:$0xff]  ;;  %v1311_v41 = vpack.c.bf16 %v3847_v55, %v3832_v43 }
  0xd4   : > { %3351 = vmatmul.msk.bf16.gmra.mxu3 %vm197_vm0, %v971_v39  ;;  %v741_v36 = vpack.c.bf16 %v735_v46, %v735_v46 }
  0xd6   : > { %v443_v23 = vpop.f32.mrf.mxu2 }
  0xd7   : > { %v477_v26 = vadd.f32 %v443_v23, %v362_v38  ;;  %v330_v14 = vpop.f32.mrf.mxu1  ;;  %v563_v52 = vpop.f32.mrf.mxu3  ;;  %v1533_v38 = vld [vmem:[%s3651_s25 + $0x30] sm:$0xff] }
  0xd8   : > { %v363_v63 = vadd.f32 %v330_v14, %v3893_v21  ;;  %v680_v45 = vpop.f32.mrf.mxu0  ;;  %v3573_v21 = vld [vmem:[%s4539_s1 + $0x78] sm:$0xff] }
  0xd9   : > { %v592_v44 = vadd.f32 %v558_v16, %v477_v26  ;;  %1926 = vmatpush.bf16.msra.mxu3 %v3573_v21 }
  0xdb   : > { %v3966_v50 = vadd.f32 %v673_v61, %v592_v44  ;;  %v1541_v61 = vpack.c.bf16 %v3680_v19, %v3655_v5 }
  0xde   : > { %v445_v24 = vpop.f32.mrf.mxu2 }
  0xdf   : > { %v478_v1 = vadd.f32 %v445_v24, %v363_v63  ;;  %v333_v2 = vpop.f32.mrf.mxu1  ;;  %v565_v4 = vpop.f32.mrf.mxu3 }
  0xe0   : > { %v683_v0 = vpop.f32.mrf.mxu0  ;;  %v364_v57 = vadd.f32 %v333_v2, %v3865_v27  ;;  %v1535_v2 = vld [vmem:[%s3651_s25 + $0x40] sm:$0xff] }
  0xe1   : > { %v593_v15 = vadd.f32 %v560_v35, %v478_v1  ;;  %v1196_v35 = vpack.c.bf16 %v1186_v54, %v1185_v25  ;;  %v1420_v54 = vld [vmem:[%s3651_s25 + $0x3f] sm:$0xff]  ;;  %v1537_v25 = vld [vmem:[%s3651_s25 + $0x50] sm:$0xff] }
  0xe2   : > { %3327 = vmatmul.msk.bf16.gmra.mxu1 %vm197_vm0, %v741_v36  ;;  %v1534_v1 = vld [vmem:[%s3651_s25 + $0x38] sm:$0xff] }
  0xe3   : > { %3339 = vmatmul.msk.bf16.gmra.mxu2 %vm197_vm0, %v856_v3  ;;  %v3981_v12 = vadd.f32 %v675_v37, %v593_v15  ;;  %3406 = vmatmul.msk.bf16.vlgmr.msrb.gmra.mxu0 %vm197_vm0, %v1541_v61  ;;  %v1188_v37 = vld [vmem:[%s3651_s25 + $0x27] sm:$0xff]  ;;  %v1543_v61 = vpack.c.bf16 %v1535_v2, %v1534_v1 }
  0xe4   : > { %3394 = vmatmul.msk.bf16.vlgmr.msrb.gmra.mxu3 %vm197_vm0, %v1426_v7  ;;  %v1427_v13 = vpack.c.bf16 %v3992_v33, %v1188_v37  ;;  %v1197_v36 = vpack.c.bf16 %v1188_v37, %v3971_v58 }
  0xe6   : > { %v448_v16 = vpop.f32.mrf.mxu2 }
  0xe7   : > { %v479_v17 = vadd.f32 %v448_v16, %v364_v57  ;;  %v335_v5 = vpop.f32.mrf.mxu1  ;;  %v568_v19 = vpop.f32.mrf.mxu3  ;;  %v1192_v16 = vld [vmem:[%s3651_s25 + $0x47] sm:$0xff] }
  0xe8   : > { %v685_v22 = vpop.f32.mrf.mxu0  ;;  %v365_v32 = vadd.f32 %v335_v5, %v3871_v6  ;;  %v1542_v6 = vpack.c.bf16 %v1533_v38, %v3683_v20 }
  0xe9   : > { %v594_v18 = vadd.f32 %v563_v52, %v479_v17  ;;  %v4027_v17 = vld [vmem:[%s3651_s25 + $0x4f] sm:$0xff] }
  0xeb   : > { %v3987_v51 = vadd.f32 %v678_v49, %v594_v18  ;;  %v3574_v49 = vld [vmem:[%s4539_s1 + $0x80] sm:$0xff]  ;;  %v1536_v18 = vld [vmem:[%s3651_s25 + $0x48] sm:$0xff] }
  0xec   : > { %2041 = vmatpush.bf16.msra.mxu0 %v3574_v49  ;;  %v1544_v38 = vpack.c.bf16 %v1537_v25, %v1536_v18  ;;  %v1194_v49 = vld [vmem:[%s3651_s25 + $0x57] sm:$0xff] }
  0xed   : > { %v3576_v25 = vld [vmem:[%s4539_s1 + $0x90] sm:$0xff] }
  0xee   : > { %v450_v34 = vpop.f32.mrf.mxu2 }
  0xef   : > { %v480_v27 = vadd.f32 %v450_v34, %v365_v32  ;;  %v338_v39 = vpop.f32.mrf.mxu1  ;;  %v570_v42 = vpop.f32.mrf.mxu3 }
  0xf0   : > { %v688_v26 = vpop.f32.mrf.mxu0  ;;  %v366_v43 = vadd.f32 %v338_v39, %v3891_v48 }
  0xf1   : > { %v595_v23 = vadd.f32 %v565_v4, %v480_v27  ;;  %v1312_v4 = vpack.c.bf16 %v3876_v8, %v3850_v56  ;;  %v1199_v26 = vpack.c.bf16 %v1192_v16, %v1420_v54 }
  0xf2   : > { %3370 = vmatmul.msk.bf16.vlgmr.msrb.gmra.mxu1 %vm197_vm0, %v1196_v35  ;;  %v1429_v35 = vpack.c.bf16 %v4027_v17, %v1192_v16 }
  0xf3   : > { %3382 = vmatmul.msk.bf16.vlgmr.msrb.gmra.mxu2 %vm197_vm0, %v1311_v41  ;;  %v4004_v14 = vadd.f32 %v680_v45, %v595_v23  ;;  %3407 = vmatmul.msk.bf16.gmra.mxu0 %vm197_vm0, %v1542_v6  ;;  %v1190_v45 = vld [vmem:[%s3651_s25 + $0x37] sm:$0xff]  ;;  %v4045_v23 = vld [vmem:[%s3651_s25 + $0x5f] sm:$0xff] }
  0xf4   : > { %3395 = vmatmul.msk.bf16.gmra.mxu3 %vm197_vm0, %v1427_v13  ;;  %v1428_v21 = vpack.c.bf16 %v1420_v54, %v1190_v45  ;;  %2271 = vmatpush.bf16.msrb.mxu2 %v3576_v25  ;;  %v1880_v25 = vld [vmem:[%s3651_s25 + $0x49] sm:$0xff] }
  0xf6   : > { %v453_v55 = vpop.f32.mrf.mxu2 }
  0xf7   : > { %v481_v20 = vadd.f32 %v453_v55, %v366_v43  ;;  %v340_v52 = vpop.f32.mrf.mxu1  ;;  %v573_v60 = vpop.f32.mrf.mxu3  ;;  %v1538_v43 = vld [vmem:[%s3651_s25 + $0x58] sm:$0xff]  ;;  %v1539_v55 = vld [vmem:[%s3651_s25 + $0x60] sm:$0xff] }
  0xf8   : > { %v690_v44 = vpop.f32.mrf.mxu0  ;;  %v367_v53 = vadd.f32 %v340_v52, %v3897_v28  ;;  %v1314_v60 = vpack.c.bf16 %v3922_v59, %v3905_v31 }
  0xf9   : > { %v596_v63 = vadd.f32 %v568_v19, %v481_v20  ;;  %v1198_v19 = vpack.c.bf16 %v1190_v45, %v3992_v33  ;;  %v1545_v45 = vpack.c.bf16 %v1539_v55, %v1538_v43 }
  0xfb   : > { %v4009_v46 = vadd.f32 %v683_v0, %v596_v63 }
  0xfe   : > { %v455_v24 = vpop.f32.mrf.mxu2 }
  0xff   : > { %v482_v48 = vadd.f32 %v455_v24, %v367_v53  ;;  %v343_v3 = vpop.f32.mrf.mxu1  ;;  %v575_v7 = vpop.f32.mrf.mxu3 }
 0x100   : > { %v1123_v28 = vpop.f32.mrf.mxu0 }
 0x101   : > { %v597_v15 = vadd.f32 %v570_v42, %v482_v48 }
 0x102   : > { %3371 = vmatmul.msk.bf16.gmra.mxu1 %vm197_vm0, %v1197_v36 }
 0x103   : > { %3383 = vmatmul.msk.bf16.gmra.mxu2 %vm197_vm0, %v1312_v4  ;;  %v4021_v58 = vadd.f32 %v685_v22, %v597_v15  ;;  %3408 = vmatmul.msk.bf16.gmra.mxu0 %vm197_vm0, %v1543_v61  ;;  %v1313_v22 = vpack.c.bf16 %v3902_v30, %v3879_v11  ;;  %v1425_v4 = vld [vmem:[%s3651_s25 + $0x67] sm:$0xff] }
 0x104   : > { %3396 = vmatmul.msk.bf16.gmra.mxu3 %vm197_vm0, %v1428_v21  ;;  %v1200_v21 = vpack.c.bf16 %v1194_v49, %v4027_v17  ;;  %v1540_v15 = vld [vmem:[%s3651_s25 + $0x68] sm:$0xff] }
 0x105   : > { %v3575_v17 = vld [vmem:[%s4539_s1 + $0x88] sm:$0xff] }
 0x106   : > { %v458_v0 = vpop.f32.mrf.mxu2  ;;  %2156 = vmatpush.bf16.msrb.mxu1 %v3575_v17 }
 0x107   : > { %v345_v56 = vpop.f32.mrf.mxu1  ;;  %v1008_v8 = vpop.f32.mrf.mxu3  ;;  %v1315_v0 = vpack.c.bf16 %v3945_v29, %v3925_v62 }
 0x108   : > { %v1125_v57 = vpop.f32.mrf.mxu0 }
 0x10e   : > { %v460_v5 = vpop.f32.mrf.mxu2 }
 0x10f   : > { %v778_v32 = vpop.f32.mrf.mxu1  ;;  %v1010_v37 = vpop.f32.mrf.mxu3 }
 0x110   : > { %v818_v34 = vadd.f32 %v778_v32, %v3915_v47  ;;  %v1128_v27 = vpop.f32.mrf.mxu0 }
 0x112   : > { %3372 = vmatmul.msk.bf16.gmra.mxu1 %vm197_vm0, %v1198_v19 }
 0x113   : > { %3384 = vmatmul.msk.bf16.gmra.mxu2 %vm197_vm0, %v1313_v22  ;;  %3409 = vmatmul.msk.bf16.gmra.mxu0 %vm197_vm0, %v1544_v38  ;;  %v1646_v38 = vld [vmem:[%s3651_s25 + $0x21] sm:$0xff] }
 0x114   : > { %3397 = vmatmul.msk.bf16.gmra.mxu3 %vm197_vm0, %v1429_v35  ;;  %v1310_v35 = vld [vmem:[%s3651_s25 + $0x66] sm:$0xff] }
 0x116   : > { %v893_v11 = vpop.f32.mrf.mxu2 }
 0x117   : > { %v933_v30 = vadd.f32 %v893_v11, %v818_v34  ;;  %v780_v33 = vpop.f32.mrf.mxu1  ;;  %v1013_v47 = vpop.f32.mrf.mxu3 }
 0x118   : > { %v819_v39 = vadd.f32 %v780_v33, %v3934_v9  ;;  %v1130_v42 = vpop.f32.mrf.mxu0  ;;  %v1430_v9 = vpack.c.bf16 %v4045_v23, %v1194_v49  ;;  %v4091_v33 = vld [vmem:[%s3651_s25 + $0x2a] sm:$0xff]  ;;  %v1761_v49 = vld [vmem:[%s3651_s25 + $0x22] sm:$0xff] }
 0x119   : > { %v1048_v41 = vadd.f32 %v1008_v8, %v933_v30  ;;  %v1201_v30 = vpack.c.bf16 %v4045_v23, %v4045_v23  ;;  %v2001_v55 = vpack.c.bf16 %v4091_v33, %v1761_v49 }
 0x11b   : > { %v4041_v13 = vadd.f32 %v1123_v28, %v1048_v41  ;;  %v1316_v41 = vpack.c.bf16 %v1310_v35, %v1310_v35 }
 0x11e   : > { %v895_v6 = vpop.f32.mrf.mxu2 }
 0x11f   : > { %v934_v20 = vadd.f32 %v895_v6, %v819_v39  ;;  %v783_v52 = vpop.f32.mrf.mxu1  ;;  %v1015_v63 = vpop.f32.mrf.mxu3 }
 0x120   : > { %v820_v44 = vadd.f32 %v783_v52, %v3939_v40  ;;  %v1133_v24 = vpop.f32.mrf.mxu0 }
 0x121   : > { %v1049_v53 = vadd.f32 %v1010_v37, %v934_v20 }
 0x122   : > { %3373 = vmatmul.msk.bf16.gmra.mxu1 %vm197_vm0, %v1199_v26  ;;  %v3577_v26 = vld [vmem:[%s4539_s1 + $0x98] sm:$0xff] }
 0x123   : > { %3385 = vmatmul.msk.bf16.gmra.mxu2 %vm197_vm0, %v1314_v60  ;;  %v4055_v54 = vadd.f32 %v1125_v57, %v1049_v53  ;;  %3410 = vmatmul.msk.bf16.gmra.mxu0 %vm197_vm0, %v1545_v45  ;;  %v1431_v57 = vpack.c.bf16 %v1425_v4, %v1425_v4  ;;  %v1645_v45 = vld [vmem:[%s3651_s25 + $0x19] sm:$0xff] }
 0x124   : > { %3398 = vmatmul.msk.bf16.gmra.mxu3 %vm197_vm0, %v1430_v9 }
 0x125   : > { %2386 = vmatpush.bf16.msrb.mxu3 %v3577_v26  ;;  %v1652_v26 = vld [vmem:[%s3651_s25 + $0x51] sm:$0xff] }
 0x126   : > { %v898_v31 = vpop.f32.mrf.mxu2 }
 0x127   : > { %v935_v59 = vadd.f32 %v898_v31, %v820_v44  ;;  %v785_v40 = vpop.f32.mrf.mxu1  ;;  %v1018_v36 = vpop.f32.mrf.mxu3  ;;  %v1760_v31 = vld [vmem:[%s3651_s25 + $0x1a] sm:$0xff] }
 0x128   : > { %v821_v1 = vadd.f32 %v785_v40, %v3954_v10  ;;  %v1135_v48 = vpop.f32.mrf.mxu0  ;;  %v1546_v10 = vpack.c.bf16 %v1540_v15, %v1540_v15  ;;  %v4113_v40 = vld [vmem:[%s3651_s25 + $0x39] sm:$0xff] }
 0x129   : > { %v1050_v2 = vadd.f32 %v1013_v47, %v935_v59  ;;  %v1648_v59 = vld [vmem:[%s3651_s25 + $0x31] sm:$0xff] }
 0x12a   : > { %v1763_v15 = vld [vmem:[%s3651_s25 + $0x32] sm:$0xff] }
 0x12b   : > { %v4060_v3 = vadd.f32 %v1128_v27, %v1050_v2  ;;  %v4086_v27 = vld [vmem:[%s3651_s25 + $0x29] sm:$0xff]  ;;  %v4116_v2 = vld [vmem:[%s3651_s25 + $0x3a] sm:$0xff] }
 0x12c   : > { %v1886_v6 = vpack.c.bf16 %v4086_v27, %v1646_v38 }
 0x12e   : > { %v900_v7 = vpop.f32.mrf.mxu2 }
 0x12f   : > { %v936_v61 = vadd.f32 %v900_v7, %v821_v1  ;;  %v788_v28 = vpop.f32.mrf.mxu1  ;;  %v1020_v56 = vpop.f32.mrf.mxu3  ;;  %v1656_v1 = vpack.c.bf16 %v1646_v38, %v1645_v45  ;;  %v1771_v7 = vpack.c.bf16 %v1761_v49, %v1760_v31 }
 0x130   : > { %v822_v8 = vadd.f32 %v788_v28, %v3966_v50  ;;  %v1138_v5 = vpop.f32.mrf.mxu0  ;;  %v3578_v28 = vld [vmem:[%s4539_s1 + $0xa0] sm:$0xff] }
 0x131   : > { %v1051_v16 = vadd.f32 %v1015_v63, %v936_v61  ;;  %v1887_v61 = vpack.c.bf16 %v4113_v40, %v1648_v59  ;;  %2501 = vmatpush.bf16.msrb.mxu0 %v3578_v28 }
 0x132   : > { %3374 = vmatmul.msk.bf16.gmra.mxu1 %vm197_vm0, %v1200_v21 }
 0x133   : > { %3386 = vmatmul.msk.bf16.gmra.mxu2 %vm197_vm0, %v1315_v0  ;;  %v4070_v19 = vadd.f32 %v1130_v42, %v1051_v16  ;;  %3411 = vmatmul.msk.bf16.gmra.mxu0 %vm197_vm0, %v1546_v10 }
 0x134   : > { %3399 = vmatmul.msk.bf16.gmra.mxu3 %vm197_vm0, %v1431_v57 }
 0x136   : > { %v903_v62 = vpop.f32.mrf.mxu2 }
 0x137   : > { %v937_v29 = vadd.f32 %v903_v62, %v822_v8  ;;  %v790_v50 = vpop.f32.mrf.mxu1  ;;  %v1023_v18 = vpop.f32.mrf.mxu3 }
 0x138   : > { %v823_v32 = vadd.f32 %v790_v50, %v3981_v12  ;;  %v1140_v37 = vpop.f32.mrf.mxu0 }
 0x139   : > { %v1052_v22 = vadd.f32 %v1018_v36, %v937_v29 }
 0x13b   : > { %v4081_v34 = vadd.f32 %v1133_v24, %v1052_v22  ;;  %v1657_v22 = vpack.c.bf16 %v1648_v59, %v4086_v27 }
 0x13e   : > { %v905_v11 = vpop.f32.mrf.mxu2 }
 0x13f   : > { %v938_v47 = vadd.f32 %v905_v11, %v823_v32  ;;  %v793_v39 = vpop.f32.mrf.mxu1  ;;  %v1025_v12 = vpop.f32.mrf.mxu3  ;;  %v1772_v11 = vpack.c.bf16 %v1763_v15, %v4091_v33 }
 0x140   : > { %v824_v42 = vadd.f32 %v793_v39, %v3987_v51  ;;  %v1143_v23 = vpop.f32.mrf.mxu0 }
 0x141   : > { %v1053_v43 = vadd.f32 %v1020_v56, %v938_v47  ;;  %v2002_v56 = vpack.c.bf16 %v4116_v2, %v1763_v15  ;;  %v1765_v47 = vld [vmem:[%s3651_s25 + $0x42] sm:$0xff]  ;;  %v1659_v15 = vpack.c.bf16 %v1652_v26, %v1880_v25 }
 0x142   : > { %3375 = vmatmul.msk.bf16.gmra.mxu1 %vm197_vm0, %v1201_v30 }
 0x143   : > { %3387 = vmatmul.msk.bf16.gmra.mxu2 %vm197_vm0, %v1316_v41  ;;  %v4102_v51 = vadd.f32 %v1135_v48, %v1053_v43  ;;  %3454 = vmatmul.msk.bf16.vlgmr.msra.gmra.mxu0 %vm197_vm0, %v2001_v55  ;;  %v4148_v43 = vld [vmem:[%s3651_s25 + $0x59] sm:$0xff] }
 0x144   : > { %3442 = vmatmul.msk.bf16.vlgmr.msra.gmra.mxu3 %vm197_vm0, %v1886_v6 }
 0x146   : > { %v908_v20 = vpop.f32.mrf.mxu2 }
 0x147   : > { %v939_v52 = vadd.f32 %v908_v20, %v824_v42  ;;  %v795_v60 = vpop.f32.mrf.mxu1  ;;  %v1028_v63 = vpop.f32.mrf.mxu3  ;;  %v4152_v20 = vld [vmem:[%s3651_s25 + $0x5a] sm:$0xff] }
 0x148   : > { %v825_v44 = vadd.f32 %v795_v60, %v4004_v14  ;;  %v1145_v53 = vpop.f32.mrf.mxu0  ;;  %v1773_v60 = vpack.c.bf16 %v1765_v47, %v4116_v2 }
 0x149   : > { %v1054_v9 = vadd.f32 %v1023_v18, %v939_v52  ;;  %v1650_v18 = vld [vmem:[%s3651_s25 + $0x41] sm:$0xff] }
 0x14a   : > { %v1888_v39 = vpack.c.bf16 %v1880_v25, %v1650_v18 }
 0x14b   : > { %v4108_v24 = vadd.f32 %v1138_v5, %v1054_v9  ;;  %v1767_v9 = vld [vmem:[%s3651_s25 + $0x52] sm:$0xff] }
 0x14c   : > { %v2004_v45 = vpack.c.bf16 %v4152_v20, %v1767_v9 }
 0x14e   : > { %v910_v36 = vpop.f32.mrf.mxu2 }
 0x14f   : > { %v940_v48 = vadd.f32 %v910_v36, %v825_v44  ;;  %v798_v4 = vpop.f32.mrf.mxu1  ;;  %v1030_v21 = vpop.f32.mrf.mxu3 }
 0x150   : > { %v826_v14 = vadd.f32 %v798_v4, %v4009_v46  ;;  %v1148_v8 = vpop.f32.mrf.mxu0 }
 0x151   : > { %v1055_v0 = vadd.f32 %v1025_v12, %v940_v48 }
 0x152   : > { %3418 = vmatmul.msk.bf16.vlgmr.msra.gmra.mxu1 %vm197_vm0, %v1656_v1 }
 0x153   : > { %3430 = vmatmul.msk.bf16.vlgmr.msra.gmra.mxu2 %vm197_vm0, %v1771_v7  ;;  %v4127_v46 = vadd.f32 %v1140_v37, %v1055_v0  ;;  %3455 = vmatmul.msk.bf16.gmra.mxu0 %vm197_vm0, %v2002_v56  ;;  %v1766_v37 = vld [vmem:[%s3651_s25 + $0x4a] sm:$0xff]  ;;  %v1654_v7 = vld [vmem:[%s3651_s25 + $0x61] sm:$0xff] }
 0x154   : > { %3443 = vmatmul.msk.bf16.gmra.mxu3 %vm197_vm0, %v1887_v61  ;;  %v2003_v41 = vpack.c.bf16 %v1766_v37, %v1765_v47  ;;  %v4171_v61 = vld [vmem:[%s3651_s25 + $0x6a] sm:$0xff]  ;;  %v1774_v56 = vpack.c.bf16 %v1767_v9, %v1766_v37  ;;  %v2000_v47 = vld [vmem:[%s3651_s25 + $0x72] sm:$0xff] }
 0x156   : > { %v913_v57 = vpop.f32.mrf.mxu2 }
 0x157   : > { %v941_v16 = vadd.f32 %v913_v57, %v826_v14  ;;  %v800_v10 = vpop.f32.mrf.mxu1  ;;  %v1033_v5 = vpop.f32.mrf.mxu3 }
 0x158   : > { %v827_v17 = vadd.f32 %v800_v10, %v4021_v58  ;;  %v1150_v29 = vpop.f32.mrf.mxu0 }
 0x159   : > { %v1056_v62 = vadd.f32 %v1028_v63, %v941_v16  ;;  %v1769_v16 = vld [vmem:[%s3651_s25 + $0x62] sm:$0xff] }
 0x15a   : > { %v2005_v5 = vpack.c.bf16 %v4171_v61, %v1769_v16 }
 0x15b   : > { %v4132_v50 = vadd.f32 %v1143_v23, %v1056_v62  ;;  %v1658_v23 = vpack.c.bf16 %v1650_v18, %v4113_v40 }
 0x15e   : > { %v915_v32 = vpop.f32.mrf.mxu2 }
 0x15f   : > { %v942_v35 = vadd.f32 %v915_v32, %v827_v17  ;;  %v803_v38 = vpop.f32.mrf.mxu1  ;;  %v1035_v30 = vpop.f32.mrf.mxu3 }
 0x160   : > { %v1583_v12 = vpop.f32.mrf.mxu0  ;;  %v1885_v38 = vld [vmem:[%s3651_s25 + $0x71] sm:$0xff]  ;;  %v1660_v30 = vpack.c.bf16 %v1654_v7, %v4148_v43 }
 0x161   : > { %v1057_v58 = vadd.f32 %v1030_v21, %v942_v35  ;;  %v4168_v21 = vld [vmem:[%s3651_s25 + $0x69] sm:$0xff] }
 0x162   : > { %3419 = vmatmul.msk.bf16.gmra.mxu1 %vm197_vm0, %v1657_v22 }
 0x163   : > { %3431 = vmatmul.msk.bf16.gmra.mxu2 %vm197_vm0, %v1772_v11  ;;  %v4142_v42 = vadd.f32 %v1145_v53, %v1057_v58  ;;  %3456 = vmatmul.msk.bf16.gmra.mxu0 %vm197_vm0, %v2003_v41  ;;  %v1889_v53 = vpack.c.bf16 %v4148_v43, %v1652_v26  ;;  %v1775_v41 = vpack.c.bf16 %v1769_v16, %v4152_v20  ;;  %v3579_v43 = vld [vmem:[%s4539_s1 + $0xa8] sm:$0xff] }
 0x164   : > { %3444 = vmatmul.msk.bf16.gmra.mxu3 %vm197_vm0, %v1888_v39  ;;  %2616 = vmatpush.bf16.msra.mxu1 %v3579_v43 }
 0x166   : > { %v918_v27 = vpop.f32.mrf.mxu2 }
 0x167   : > { %v805_v33 = vpop.f32.mrf.mxu1  ;;  %v1468_v49 = vpop.f32.mrf.mxu3 }
 0x168   : > { %v1585_v6 = vpop.f32.mrf.mxu0  ;;  %v1891_v33 = vpack.c.bf16 %v1885_v38, %v1885_v38 }
 0x16e   : > { %v920_v55 = vpop.f32.mrf.mxu2 }
 0x16f   : > { %v1238_v52 = vpop.f32.mrf.mxu1  ;;  %v1470_v63 = vpop.f32.mrf.mxu3 }
 0x170   : > { %v1278_v44 = vadd.f32 %v1238_v52, %v4041_v13  ;;  %v1588_v31 = vpop.f32.mrf.mxu0  ;;  %v3580_v52 = vld [vmem:[%s4539_s1 + $0xb0] sm:$0xff] }
 0x171   : > { %2731 = vmatpush.bf16.msra.mxu2 %v3580_v52 }
 0x172   : > { %3420 = vmatmul.msk.bf16.gmra.mxu1 %vm197_vm0, %v1658_v23 }
 0x173   : > { %3432 = vmatmul.msk.bf16.gmra.mxu2 %vm197_vm0, %v1773_v60  ;;  %3457 = vmatmul.msk.bf16.gmra.mxu0 %vm197_vm0, %v2004_v45  ;;  %v4208_v45 = vld [vmem:[%s3651_s25 + $0x2d] sm:$0xff] }
 0x174   : > { %3445 = vmatmul.msk.bf16.gmra.mxu3 %vm197_vm0, %v1889_v53  ;;  %v2335_v53 = vld [vmem:[%s3651_s25 + $0x25] sm:$0xff] }
 0x176   : > { %v1353_v59 = vpop.f32.mrf.mxu2 }
 0x177   : > { %v1393_v40 = vadd.f32 %v1353_v59, %v1278_v44  ;;  %v1240_v13 = vpop.f32.mrf.mxu1  ;;  %v1473_v36 = vpop.f32.mrf.mxu3  ;;  %v1661_v59 = vpack.c.bf16 %v4168_v21, %v4168_v21 }
 0x178   : > { %v1279_v1 = vadd.f32 %v1240_v13, %v4055_v54  ;;  %v1590_v48 = vpop.f32.mrf.mxu0  ;;  %v1890_v54 = vpack.c.bf16 %v4168_v21, %v1654_v7  ;;  %v2346_v7 = vpack.c.bf16 %v4208_v45, %v2335_v53 }
 0x179   : > { %v1508_v2 = vadd.f32 %v1468_v49, %v1393_v40  ;;  %v4213_v40 = vld [vmem:[%s3651_s25 + $0x34] sm:$0xff] }
 0x17b   : > { %v4164_v4 = vadd.f32 %v1583_v12, %v1508_v2 }
 0x17e   : > { %v1355_v14 = vpop.f32.mrf.mxu2 }
 0x17f   : > { %v1394_v28 = vadd.f32 %v1355_v14, %v1279_v1  ;;  %v1243_v0 = vpop.f32.mrf.mxu1  ;;  %v1475_v8 = vpop.f32.mrf.mxu3  ;;  %v1776_v1 = vpack.c.bf16 %v4171_v61, %v4171_v61  ;;  %v3581_v14 = vld [vmem:[%s4539_s1 + $0xb8] sm:$0xff] }
 0x180   : > { %v1280_v57 = vadd.f32 %v1243_v0, %v4060_v3  ;;  %v1593_v17 = vpop.f32.mrf.mxu0  ;;  %2846 = vmatpush.bf16.msra.mxu3 %v3581_v14 }
 0x181   : > { %v1509_v10 = vadd.f32 %v1470_v63, %v1394_v28 }
 0x182   : > { %3421 = vmatmul.msk.bf16.gmra.mxu1 %vm197_vm0, %v1659_v15 }
 0x183   : > { %3433 = vmatmul.msk.bf16.gmra.mxu2 %vm197_vm0, %v1774_v56  ;;  %v4179_v62 = vadd.f32 %v1585_v6, %v1509_v10  ;;  %3458 = vmatmul.msk.bf16.gmra.mxu0 %vm197_vm0, %v2005_v5  ;;  %v2006_v6 = vpack.c.bf16 %v2000_v47, %v2000_v47  ;;  %v2105_v10 = vld [vmem:[%s3651_s25 + $0x23] sm:$0xff]  ;;  %v2106_v5 = vld [vmem:[%s3651_s25 + $0x2b] sm:$0xff] }
 0x184   : > { %3446 = vmatmul.msk.bf16.gmra.mxu3 %vm197_vm0, %v1890_v54  ;;  %v2223_v47 = vld [vmem:[%s3651_s25 + $0x3c] sm:$0xff] }
 0x186   : > { %v1358_v3 = vpop.f32.mrf.mxu2 }
 0x187   : > { %v1395_v29 = vadd.f32 %v1358_v3, %v1280_v57  ;;  %v1245_v18 = vpop.f32.mrf.mxu1  ;;  %v1478_v25 = vpop.f32.mrf.mxu3  ;;  %v2220_v3 = vld [vmem:[%s3651_s25 + $0x24] sm:$0xff] }
 0x188   : > { %v1281_v32 = vadd.f32 %v1245_v18, %v4070_v19  ;;  %v1595_v37 = vpop.f32.mrf.mxu0  ;;  %v4240_v18 = vld [vmem:[%s3651_s25 + $0x3d] sm:$0xff] }
 0x189   : > { %v1510_v22 = vadd.f32 %v1473_v36, %v1395_v29  ;;  %v4237_v29 = vld [vmem:[%s3651_s25 + $0x35] sm:$0xff] }
 0x18b   : > { %v4184_v35 = vadd.f32 %v1588_v31, %v1510_v22  ;;  %v4243_v22 = vld [vmem:[%s3651_s25 + $0x44] sm:$0xff] }
 0x18e   : > { %v1360_v11 = vpop.f32.mrf.mxu2 }
 0x18f   : > { %v1396_v39 = vadd.f32 %v1360_v11, %v1281_v32  ;;  %v1248_v58 = vpop.f32.mrf.mxu1  ;;  %v1480_v12 = vpop.f32.mrf.mxu3  ;;  %v2116_v32 = vpack.c.bf16 %v2106_v5, %v2105_v10  ;;  %v4293_v10 = vld [vmem:[%s3651_s25 + $0x64] sm:$0xff] }
 0x190   : > { %v1282_v27 = vadd.f32 %v1248_v58, %v4081_v34  ;;  %v1598_v19 = vpop.f32.mrf.mxu0  ;;  %v3582_v58 = vld [vmem:[%s4539_s1 + $0xc0] sm:$0xff] }
 0x191   : > { %v1511_v49 = vadd.f32 %v1475_v8, %v1396_v39  ;;  %v2347_v39 = vpack.c.bf16 %v4240_v18, %v4237_v29  ;;  %2961 = vmatpush.bf16.msra.mxu0 %v3582_v58 }
 0x192   : > { %3422 = vmatmul.msk.bf16.gmra.mxu1 %vm197_vm0, %v1660_v30 }
 0x193   : > { %3434 = vmatmul.msk.bf16.gmra.mxu2 %vm197_vm0, %v1775_v41  ;;  %v4193_v26 = vadd.f32 %v1590_v48, %v1511_v49  ;;  %3459 = vmatmul.msk.bf16.gmra.mxu0 %vm197_vm0, %v2006_v6  ;;  %v2221_v48 = vld [vmem:[%s3651_s25 + $0x2c] sm:$0xff] }
 0x194   : > { %3447 = vmatmul.msk.bf16.gmra.mxu3 %vm197_vm0, %v1891_v33  ;;  %v2461_v21 = vpack.c.bf16 %v4213_v40, %v2221_v48  ;;  %v2231_v11 = vpack.c.bf16 %v2221_v48, %v2220_v3 }
 0x196   : > { %v1363_v34 = vpop.f32.mrf.mxu2 }
 0x197   : > { %v1397_v55 = vadd.f32 %v1363_v34, %v1282_v27  ;;  %v1250_v23 = vpop.f32.mrf.mxu1  ;;  %v1483_v20 = vpop.f32.mrf.mxu3 }
 0x198   : > { %v1283_v60 = vadd.f32 %v1250_v23, %v4102_v51  ;;  %v1600_v44 = vpop.f32.mrf.mxu0  ;;  %v2107_v23 = vld [vmem:[%s3651_s25 + $0x33] sm:$0xff] }
 0x199   : > { %v1512_v63 = vadd.f32 %v1478_v25, %v1397_v55 }
 0x19b   : > { %v4204_v9 = vadd.f32 %v1593_v17, %v1512_v63  ;;  %v4268_v63 = vld [vmem:[%s3651_s25 + $0x4d] sm:$0xff] }
 0x19e   : > { %v1365_v31 = vpop.f32.mrf.mxu2 }
 0x19f   : > { %v1398_v13 = vadd.f32 %v1365_v31, %v1283_v60  ;;  %v1253_v36 = vpop.f32.mrf.mxu1  ;;  %v1485_v51 = vpop.f32.mrf.mxu3  ;;  %v4265_v60 = vld [vmem:[%s3651_s25 + $0x45] sm:$0xff]  ;;  %v4271_v31 = vld [vmem:[%s3651_s25 + $0x54] sm:$0xff] }
 0x1a0   : > { %v1284_v2 = vadd.f32 %v1253_v36, %v4108_v24  ;;  %v1603_v61 = vpop.f32.mrf.mxu0  ;;  %v2232_v36 = vpack.c.bf16 %v2223_v47, %v4213_v40 }
 0x1a1   : > { %v1513_v15 = vadd.f32 %v1480_v12, %v1398_v13  ;;  %v2462_v12 = vpack.c.bf16 %v4243_v22, %v2223_v47 }
 0x1a2   : > { %3423 = vmatmul.msk.bf16.gmra.mxu1 %vm197_vm0, %v1661_v59 }
 0x1a3   : > { %3435 = vmatmul.msk.bf16.gmra.mxu2 %vm197_vm0, %v1776_v1  ;;  %v4226_v24 = vadd.f32 %v1595_v37, %v1513_v15  ;;  %3502 = vmatmul.msk.bf16.vlgmr.msrb.gmra.mxu0 %vm197_vm0, %v2461_v21  ;;  %v2225_v1 = vld [vmem:[%s3651_s25 + $0x4c] sm:$0xff] }
 0x1a4   : > { %3490 = vmatmul.msk.bf16.vlgmr.msrb.gmra.mxu3 %vm197_vm0, %v2346_v7  ;;  %v2463_v48 = vpack.c.bf16 %v4271_v31, %v2225_v1  ;;  %v2233_v5 = vpack.c.bf16 %v2225_v1, %v4243_v22 }
 0x1a6   : > { %v1368_v28 = vpop.f32.mrf.mxu2 }
 0x1a7   : > { %v1399_v0 = vadd.f32 %v1368_v28, %v1284_v2  ;;  %v1255_v56 = vpop.f32.mrf.mxu1  ;;  %v1488_v8 = vpop.f32.mrf.mxu3  ;;  %v2109_v28 = vld [vmem:[%s3651_s25 + $0x43] sm:$0xff] }
 0x1a8   : > { %v1285_v57 = vadd.f32 %v1255_v56, %v4127_v46  ;;  %v1605_v54 = vpop.f32.mrf.mxu0  ;;  %v4287_v56 = vld [vmem:[%s3651_s25 + $0x55] sm:$0xff] }
 0x1a9   : > { %v1514_v16 = vadd.f32 %v1483_v20, %v1399_v0  ;;  %v2108_v20 = vld [vmem:[%s3651_s25 + $0x3b] sm:$0xff]  ;;  %v2110_v0 = vld [vmem:[%s3651_s25 + $0x4b] sm:$0xff] }
 0x1aa   : > { %v2117_v53 = vpack.c.bf16 %v2108_v20, %v2107_v23 }
 0x1ab   : > { %v4233_v17 = vadd.f32 %v1598_v19, %v1514_v16  ;;  %v2118_v16 = vpack.c.bf16 %v2110_v0, %v2109_v28  ;;  %v4337_v28 = vld [vmem:[%s3651_s25 + $0x75] sm:$0xff] }
 0x1ae   : > { %v1370_v25 = vpop.f32.mrf.mxu2 }
 0x1af   : > { %v1400_v37 = vadd.f32 %v1370_v25, %v1285_v57  ;;  %v1258_v38 = vpop.f32.mrf.mxu1  ;;  %v1490_v46 = vpop.f32.mrf.mxu3 }
 0x1b0   : > { %v1286_v30 = vadd.f32 %v1258_v38, %v4132_v50  ;;  %v1608_v27 = vpop.f32.mrf.mxu0 }
 0x1b1   : > { %v1515_v41 = vadd.f32 %v1485_v51, %v1400_v37  ;;  %v2348_v51 = vpack.c.bf16 %v4268_v63, %v4265_v60 }
 0x1b2   : > { %3466 = vmatmul.msk.bf16.vlgmr.msrb.gmra.mxu1 %vm197_vm0, %v2116_v32  ;;  %v2227_v32 = vld [vmem:[%s3651_s25 + $0x5c] sm:$0xff] }
 0x1b3   : > { %3478 = vmatmul.msk.bf16.vlgmr.msrb.gmra.mxu2 %vm197_vm0, %v2231_v11  ;;  %v4255_v50 = vadd.f32 %v1600_v44, %v1515_v41  ;;  %3503 = vmatmul.msk.bf16.gmra.mxu0 %vm197_vm0, %v2462_v12  ;;  %v2464_v38 = vpack.c.bf16 %v4293_v10, %v2227_v32  ;;  %v2111_v41 = vld [vmem:[%s3651_s25 + $0x53] sm:$0xff]  ;;  %v2112_v12 = vld [vmem:[%s3651_s25 + $0x5b] sm:$0xff]  ;;  %v2234_v23 = vpack.c.bf16 %v2227_v32, %v4271_v31 }
 0x1b4   : > { %3491 = vmatmul.msk.bf16.gmra.mxu3 %vm197_vm0, %v2347_v39 }
 0x1b6   : > { %v1373_v33 = vpop.f32.mrf.mxu2 }
 0x1b7   : > { %v1401_v49 = vadd.f32 %v1373_v33, %v1286_v30  ;;  %v1260_v6 = vpop.f32.mrf.mxu1  ;;  %v1493_v19 = vpop.f32.mrf.mxu3  ;;  %v4311_v33 = vld [vmem:[%s3651_s25 + $0x65] sm:$0xff] }
 0x1b8   : > { %v1287_v43 = vadd.f32 %v1260_v6, %v4142_v42  ;;  %v1610_v55 = vpop.f32.mrf.mxu0  ;;  %v2119_v19 = vpack.c.bf16 %v2112_v12, %v2111_v41  ;;  %v2795_v12 = vld [vmem:[%s3651_s25 + $0x2f] sm:$0xff] }
 0x1b9   : > { %v1516_v34 = vadd.f32 %v1488_v8, %v1401_v49  ;;  %v4290_v8 = vld [vmem:[%s3651_s25 + $0x5d] sm:$0xff]  ;;  %v4314_v49 = vld [vmem:[%s3651_s25 + $0x6d] sm:$0xff] }
 0x1ba   : > { %v2349_v37 = vpack.c.bf16 %v4290_v8, %v4287_v56 }
 0x1bb   : > { %v4262_v52 = vadd.f32 %v1603_v61, %v1516_v34 }
 0x1be   : > { %v1375_v44 = vpop.f32.mrf.mxu2 }
 0x1bf   : > { %v1402_v59 = vadd.f32 %v1375_v44, %v1287_v43  ;;  %v1263_v13 = vpop.f32.mrf.mxu1  ;;  %v1495_v42 = vpop.f32.mrf.mxu3  ;;  %v4317_v43 = vld [vmem:[%s3651_s25 + $0x74] sm:$0xff]  ;;  %v2229_v44 = vld [vmem:[%s3651_s25 + $0x6c] sm:$0xff] }
 0x1c0   : > { %v2043_v7 = vpop.f32.mrf.mxu0  ;;  %v2465_v13 = vpack.c.bf16 %v4317_v43, %v2229_v44 }
 0x1c1   : > { %v1517_v2 = vadd.f32 %v1490_v46, %v1402_v59 }
 0x1c2   : > { %3467 = vmatmul.msk.bf16.gmra.mxu1 %vm197_vm0, %v2117_v53  ;;  %v2350_v53 = vpack.c.bf16 %v4314_v49, %v4311_v33 }
 0x1c3   : > { %3479 = vmatmul.msk.bf16.gmra.mxu2 %vm197_vm0, %v2232_v36  ;;  %v4280_v14 = vadd.f32 %v1605_v54, %v1517_v2  ;;  %3504 = vmatmul.msk.bf16.gmra.mxu0 %vm197_vm0, %v2463_v48 }
 0x1c4   : > { %3492 = vmatmul.msk.bf16.gmra.mxu3 %vm197_vm0, %v2348_v51 }
 0x1c6   : > { %v1378_v40 = vpop.f32.mrf.mxu2 }
 0x1c7   : > { %v1265_v15 = vpop.f32.mrf.mxu1  ;;  %v1928_v21 = vpop.f32.mrf.mxu3  ;;  %v2113_v40 = vld [vmem:[%s3651_s25 + $0x63] sm:$0xff] }
 0x1c8   : > { %v2045_v61 = vpop.f32.mrf.mxu0  ;;  %v2114_v15 = vld [vmem:[%s3651_s25 + $0x6b] sm:$0xff] }
 0x1c9   : > { %v2120_v0 = vpack.c.bf16 %v2114_v15, %v2113_v40  ;;  %v2680_v15 = vld [vmem:[%s3651_s25 + $0x2e] sm:$0xff] }
 0x1ce   : > { %v1380_v57 = vpop.f32.mrf.mxu2 }
 0x1cf   : > { %v1698_v54 = vpop.f32.mrf.mxu1  ;;  %v1930_v3 = vpop.f32.mrf.mxu3  ;;  %v2460_v57 = vld [vmem:[%s3651_s25 + $0x7c] sm:$0xff] }
 0x1d0   : > { %v1738_v25 = vadd.f32 %v1698_v54, %v4164_v4  ;;  %v2048_v11 = vpop.f32.mrf.mxu0 }
 0x1d2   : > { %3468 = vmatmul.msk.bf16.gmra.mxu1 %vm197_vm0, %v2118_v16 }
 0x1d3   : > { %3480 = vmatmul.msk.bf16.gmra.mxu2 %vm197_vm0, %v2233_v5  ;;  %3505 = vmatmul.msk.bf16.gmra.mxu0 %vm197_vm0, %v2464_v38  ;;  %v2235_v5 = vpack.c.bf16 %v2229_v44, %v4293_v10 }
 0x1d4   : > { %3493 = vmatmul.msk.bf16.gmra.mxu3 %vm197_vm0, %v2349_v37  ;;  %v2466_v37 = vpack.c.bf16 %v2460_v57, %v2460_v57 }
 0x1d6   : > { %v1813_v4 = vpop.f32.mrf.mxu2 }
 0x1d7   : > { %v1853_v22 = vadd.f32 %v1813_v4, %v1738_v25  ;;  %v1700_v46 = vpop.f32.mrf.mxu1  ;;  %v1933_v30 = vpop.f32.mrf.mxu3 }
 0x1d8   : > { %v1739_v47 = vadd.f32 %v1700_v46, %v4179_v62  ;;  %v2050_v58 = vpop.f32.mrf.mxu0 }
 0x1d9   : > { %v1968_v39 = vadd.f32 %v1928_v21, %v1853_v22 }
 0x1db   : > { %v4308_v27 = vadd.f32 %v2043_v7, %v1968_v39  ;;  %v2115_v39 = vld [vmem:[%s3651_s25 + $0x73] sm:$0xff] }
 0x1de   : > { %v1815_v6 = vpop.f32.mrf.mxu2 }
 0x1df   : > { %v1854_v34 = vadd.f32 %v1815_v6, %v1739_v47  ;;  %v1703_v55 = vpop.f32.mrf.mxu1  ;;  %v1935_v62 = vpop.f32.mrf.mxu3 }
 0x1e0   : > { %v1740_v20 = vadd.f32 %v1703_v55, %v4184_v35  ;;  %v2053_v36 = vpop.f32.mrf.mxu0  ;;  %v2911_v55 = vld [vmem:[%s3651_s25 + $0x38] sm:$0xff] }
 0x1e1   : > { %v1969_v59 = vadd.f32 %v1930_v3, %v1854_v34  ;;  %v2910_v34 = vld [vmem:[%s3651_s25 + $0x30] sm:$0xff] }
 0x1e2   : > { %3469 = vmatmul.msk.bf16.gmra.mxu1 %vm197_vm0, %v2119_v19  ;;  %v2121_v19 = vpack.c.bf16 %v2115_v39, %v2115_v39 }
 0x1e3   : > { %3481 = vmatmul.msk.bf16.gmra.mxu2 %vm197_vm0, %v2234_v23  ;;  %v4327_v42 = vadd.f32 %v2045_v61, %v1969_v59  ;;  %3506 = vmatmul.msk.bf16.gmra.mxu0 %vm197_vm0, %v2465_v13  ;;  %v2921_v13 = vpack.c.bf16 %v2911_v55, %v2910_v34  ;;  %v2577_v55 = vpack.c.bf16 %v4265_v60, %v4240_v18 }
 0x1e4   : > { %3494 = vmatmul.msk.bf16.gmra.mxu3 %vm197_vm0, %v2350_v53 }
 0x1e6   : > { %v1818_v35 = vpop.f32.mrf.mxu2 }
 0x1e7   : > { %v1855_v31 = vadd.f32 %v1818_v35, %v1740_v20  ;;  %v1705_v1 = vpop.f32.mrf.mxu1  ;;  %v1938_v51 = vpop.f32.mrf.mxu3  ;;  %v2236_v20 = vpack.c.bf16 %v4317_v43, %v4317_v43 }
 0x1e8   : > { %v1741_v2 = vadd.f32 %v1705_v1, %v4193_v26  ;;  %v2055_v7 = vpop.f32.mrf.mxu0  ;;  %v2351_v26 = vpack.c.bf16 %v4337_v28, %v4337_v28 }
 0x1e9   : > { %v1970_v48 = vadd.f32 %v1933_v30, %v1855_v31 }
 0x1eb   : > { %v4334_v21 = vadd.f32 %v2048_v11, %v1970_v48 }
 0x1ee   : > { %v1820_v61 = vpop.f32.mrf.mxu2 }
 0x1ef   : > { %v1856_v16 = vadd.f32 %v1820_v61, %v1741_v2  ;;  %v1708_v54 = vpop.f32.mrf.mxu1  ;;  %v1940_v3 = vpop.f32.mrf.mxu3  ;;  %v2681_v61 = vld [vmem:[%s3651_s25 + $0x36] sm:$0xff] }
 0x1f0   : > { %v1742_v25 = vadd.f32 %v1708_v54, %v4204_v9  ;;  %v2058_v38 = vpop.f32.mrf.mxu0  ;;  %v2912_v54 = vld [vmem:[%s3651_s25 + $0x40] sm:$0xff] }
 0x1f1   : > { %v1971_v32 = vadd.f32 %v1935_v62, %v1856_v16  ;;  %v2576_v16 = vpack.c.bf16 %v4237_v29, %v4208_v45 }
 0x1f2   : > { %3470 = vmatmul.msk.bf16.gmra.mxu1 %vm197_vm0, %v2120_v0  ;;  %v2798_v0 = vld [vmem:[%s3651_s25 + $0x47] sm:$0xff] }
 0x1f3   : > { %3482 = vmatmul.msk.bf16.gmra.mxu2 %vm197_vm0, %v2235_v5  ;;  %v4346_v11 = vadd.f32 %v2050_v58, %v1971_v32  ;;  %3507 = vmatmul.msk.bf16.gmra.mxu0 %vm197_vm0, %v2466_v37  ;;  %v2796_v58 = vld [vmem:[%s3651_s25 + $0x37] sm:$0xff]  ;;  %v2913_v5 = vld [vmem:[%s3651_s25 + $0x48] sm:$0xff] }
 0x1f4   : > { %3495 = vmatmul.msk.bf16.gmra.mxu3 %vm197_vm0, %v2351_v26  ;;  %v2691_v26 = vpack.c.bf16 %v2681_v61, %v2680_v15  ;;  %v2802_v15 = vld [vmem:[%s3651_s25 + $0x67] sm:$0xff] }
 0x1f6   : > { %v1823_v9 = vpop.f32.mrf.mxu2 }
 0x1f7   : > { %v1857_v10 = vadd.f32 %v1823_v9, %v1742_v25  ;;  %v1710_v4 = vpop.f32.mrf.mxu1  ;;  %v1943_v22 = vpop.f32.mrf.mxu3 }
 0x1f8   : > { %v1743_v46 = vadd.f32 %v1710_v4, %v4226_v24  ;;  %v2060_v47 = vpop.f32.mrf.mxu0  ;;  %v2806_v24 = vpack.c.bf16 %v2796_v58, %v2795_v12  ;;  %v2682_v58 = vld [vmem:[%s3651_s25 + $0x3e] sm:$0xff] }
 0x1f9   : > { %v1972_v30 = vadd.f32 %v1938_v51, %v1857_v10 }
 0x1fb   : > { %v4352_v41 = vadd.f32 %v2053_v36, %v1972_v30 }
 0x1fe   : > { %v1825_v6 = vpop.f32.mrf.mxu2 }
 0x1ff   : > { %v1858_v23 = vadd.f32 %v1825_v6, %v1743_v46  ;;  %v1713_v62 = vpop.f32.mrf.mxu1  ;;  %v1945_v44 = vpop.f32.mrf.mxu3  ;;  %v2683_v6 = vld [vmem:[%s3651_s25 + $0x46] sm:$0xff] }
 0x200   : > { %v1744_v53 = vadd.f32 %v1713_v62, %v4233_v17  ;;  %v2063_v36 = vpop.f32.mrf.mxu0  ;;  %v2915_v62 = vld [vmem:[%s3651_s25 + $0x58] sm:$0xff] }
 0x201   : > { %v1973_v59 = vadd.f32 %v1940_v3, %v1858_v23  ;;  %v2914_v23 = vld [vmem:[%s3651_s25 + $0x50] sm:$0xff] }
 0x202   : > { %3471 = vmatmul.msk.bf16.gmra.mxu1 %vm197_vm0, %v2121_v19  ;;  %v2800_v19 = vld [vmem:[%s3651_s25 + $0x57] sm:$0xff] }
 0x203   : > { %3483 = vmatmul.msk.bf16.gmra.mxu2 %vm197_vm0, %v2236_v20  ;;  %v4363_v35 = vadd.f32 %v2055_v7, %v1973_v59  ;;  %3550 = vmatmul.msk.bf16.vlgmr.msra.gmra.mxu0 %vm197_vm0, %v2921_v13  ;;  %v2797_v7 = vld [vmem:[%s3651_s25 + $0x3f] sm:$0xff]  ;;  %v2923_v13 = vpack.c.bf16 %v2915_v62, %v2914_v23 }
 0x204   : > { %3538 = vmatmul.msk.bf16.vlgmr.msra.gmra.mxu3 %vm197_vm0, %v2806_v24  ;;  %v2807_v37 = vpack.c.bf16 %v2798_v0, %v2797_v7  ;;  %v2578_v7 = vpack.c.bf16 %v4287_v56, %v4268_v63  ;;  %v2916_v0 = vld [vmem:[%s3651_s25 + $0x60] sm:$0xff] }
 0x206   : > { %v1828_v17 = vpop.f32.mrf.mxu2 }
 0x207   : > { %v1859_v43 = vadd.f32 %v1828_v17, %v1744_v53  ;;  %v1715_v31 = vpop.f32.mrf.mxu1  ;;  %v1948_v1 = vpop.f32.mrf.mxu3  ;;  %v2692_v53 = vpack.c.bf16 %v2683_v6, %v2682_v58 }
 0x208   : > { %v1745_v51 = vadd.f32 %v1715_v31, %v4255_v50  ;;  %v2065_v48 = vpop.f32.mrf.mxu0 }
 0x209   : > { %v1974_v2 = vadd.f32 %v1943_v22, %v1859_v43 }
 0x20b   : > { %v4368_v40 = vadd.f32 %v2058_v38, %v1974_v2  ;;  %v2922_v38 = vpack.c.bf16 %v2913_v5, %v2912_v54  ;;  %v2801_v2 = vld [vmem:[%s3651_s25 + $0x5f] sm:$0xff] }
 0x20e   : > { %v1830_v57 = vpop.f32.mrf.mxu2 }
 0x20f   : > { %v1860_v3 = vadd.f32 %v1830_v57, %v1745_v51  ;;  %v1718_v25 = vpop.f32.mrf.mxu1  ;;  %v1950_v32 = vpop.f32.mrf.mxu3  ;;  %v2685_v51 = vld [vmem:[%s3651_s25 + $0x56] sm:$0xff]  ;;  %v2917_v57 = vld [vmem:[%s3651_s25 + $0x68] sm:$0xff] }
 0x210   : > { %v1746_v50 = vadd.f32 %v1718_v25, %v4262_v52  ;;  %v2068_v10 = vpop.f32.mrf.mxu0  ;;  %v2924_v25 = vpack.c.bf16 %v2917_v57, %v2916_v0 }
 0x211   : > { %v1975_v9 = vadd.f32 %v1945_v44, %v1860_v3  ;;  %v2809_v3 = vpack.c.bf16 %v2802_v15, %v2801_v2  ;;  %v2686_v10 = vld [vmem:[%s3651_s25 + $0x5e] sm:$0xff] }
 0x212   : > { %3514 = vmatmul.msk.bf16.vlgmr.msra.gmra.mxu1 %vm197_vm0, %v2576_v16 }
 0x213   : > { %3526 = vmatmul.msk.bf16.vlgmr.msra.gmra.mxu2 %vm197_vm0, %v2691_v26  ;;  %v4381_v45 = vadd.f32 %v2060_v47, %v1975_v9  ;;  %3551 = vmatmul.msk.bf16.gmra.mxu0 %vm197_vm0, %v2922_v38  ;;  %v2799_v47 = vld [vmem:[%s3651_s25 + $0x4f] sm:$0xff] }
 0x214   : > { %3539 = vmatmul.msk.bf16.gmra.mxu3 %vm197_vm0, %v2807_v37  ;;  %v2808_v24 = vpack.c.bf16 %v2800_v19, %v2799_v47 }
 0x216   : > { %v1833_v29 = vpop.f32.mrf.mxu2 }
 0x217   : > { %v1861_v52 = vadd.f32 %v1833_v29, %v1746_v50  ;;  %v1720_v4 = vpop.f32.mrf.mxu1  ;;  %v1953_v22 = vpop.f32.mrf.mxu3  ;;  %v2687_v29 = vld [vmem:[%s3651_s25 + $0x66] sm:$0xff] }
 0x218   : > { %v1747_v46 = vadd.f32 %v1720_v4, %v4280_v14  ;;  %v2070_v39 = vpop.f32.mrf.mxu0  ;;  %v2804_v4 = vld [vmem:[%s3651_s25 + $0x77] sm:$0xff]  ;;  %v2694_v47 = vpack.c.bf16 %v2687_v29, %v2686_v10 }
 0x219   : > { %v1976_v30 = vadd.f32 %v1948_v1, %v1861_v52  ;;  %v2684_v1 = vld [vmem:[%s3651_s25 + $0x4e] sm:$0xff]  ;;  %v2919_v39 = vld [vmem:[%s3651_s25 + $0x78] sm:$0xff] }
 0x21a   : > { %v2693_v16 = vpack.c.bf16 %v2685_v51, %v2684_v1  ;;  %v2803_v52 = vld [vmem:[%s3651_s25 + $0x6f] sm:$0xff] }
 0x21b   : > { %v4386_v12 = vadd.f32 %v2063_v36, %v1976_v30  ;;  %v2918_v30 = vld [vmem:[%s3651_s25 + $0x70] sm:$0xff] }
 0x21c   : > { %v2925_v23 = vpack.c.bf16 %v2919_v39, %v2918_v30 }
 0x21e   : > { %v1835_v34 = vpop.f32.mrf.mxu2 }
 0x21f   : > { %v1862_v20 = vadd.f32 %v1835_v34, %v1747_v46  ;;  %v1723_v44 = vpop.f32.mrf.mxu1  ;;  %v1955_v14 = vpop.f32.mrf.mxu3  ;;  %v2579_v46 = vpack.c.bf16 %v4311_v33, %v4290_v8  ;;  %v2810_v34 = vpack.c.bf16 %v2804_v4, %v2803_v52 }
 0x220   : > { %v2503_v36 = vpop.f32.mrf.mxu0 }
 0x221   : > { %v1977_v59 = vadd.f32 %v1950_v32, %v1862_v20 }
 0x222   : > { %3515 = vmatmul.msk.bf16.gmra.mxu1 %vm197_vm0, %v2577_v55 }
 0x223   : > { %3527 = vmatmul.msk.bf16.gmra.mxu2 %vm197_vm0, %v2692_v53  ;;  %v4398_v18 = vadd.f32 %v2065_v48, %v1977_v59  ;;  %3552 = vmatmul.msk.bf16.gmra.mxu0 %vm197_vm0, %v2923_v13  ;;  %v2688_v13 = vld [vmem:[%s3651_s25 + $0x6e] sm:$0xff] }
 0x224   : > { %3540 = vmatmul.msk.bf16.gmra.mxu3 %vm197_vm0, %v2808_v24 }
 0x226   : > { %v1838_v60 = vpop.f32.mrf.mxu2 }
 0x227   : > { %v1725_v17 = vpop.f32.mrf.mxu1  ;;  %v2388_v43 = vpop.f32.mrf.mxu3  ;;  %v2805_v60 = vld [vmem:[%s3651_s25 + $0x7f] sm:$0xff] }
 0x228   : > { %v2505_v31 = vpop.f32.mrf.mxu0 }
 0x22e   : > { %v1840_v61 = vpop.f32.mrf.mxu2 }
 0x22f   : > { %v2158_v48 = vpop.f32.mrf.mxu1  ;;  %v2390_v54 = vpop.f32.mrf.mxu3 }
 0x230   : > { %v2198_v5 = vadd.f32 %v2158_v48, %v4308_v27  ;;  %v2508_v26 = vpop.f32.mrf.mxu0 }
 0x232   : > { %3516 = vmatmul.msk.bf16.gmra.mxu1 %vm197_vm0, %v2578_v7  ;;  %v2811_v7 = vpack.c.bf16 %v2805_v60, %v2805_v60 }
 0x233   : > { %3528 = vmatmul.msk.bf16.gmra.mxu2 %vm197_vm0, %v2693_v16  ;;  %3553 = vmatmul.msk.bf16.gmra.mxu0 %vm197_vm0, %v2924_v25  ;;  %v2575_v25 = vld [vmem:[%s3651_s25 + $0x7d] sm:$0xff] }
 0x234   : > { %3541 = vmatmul.msk.bf16.gmra.mxu3 %vm197_vm0, %v2809_v3 }
 0x236   : > { %v2273_v63 = vpop.f32.mrf.mxu2 }
 0x237   : > { %v2313_v56 = vadd.f32 %v2273_v63, %v2198_v5  ;;  %v2160_v27 = vpop.f32.mrf.mxu1  ;;  %v2393_v32 = vpop.f32.mrf.mxu3  ;;  %v2690_v63 = vld [vmem:[%s3651_s25 + $0x7e] sm:$0xff] }
 0x238   : > { %v2199_v50 = vadd.f32 %v2160_v27, %v4327_v42  ;;  %v2510_v9 = vpop.f32.mrf.mxu0  ;;  %v2581_v27 = vpack.c.bf16 %v2575_v25, %v2575_v25 }
 0x239   : > { %v2428_v37 = vadd.f32 %v2388_v43, %v2313_v56  ;;  %v2580_v43 = vpack.c.bf16 %v4337_v28, %v4314_v49 }
 0x23b   : > { %v4416_v38 = vadd.f32 %v2503_v36, %v2428_v37  ;;  %v2689_v36 = vld [vmem:[%s3651_s25 + $0x76] sm:$0xff]  ;;  %v2696_v37 = vpack.c.bf16 %v2690_v63, %v2690_v63 }
 0x23c   : > { %v2695_v2 = vpack.c.bf16 %v2689_v36, %v2688_v13 }
 0x23e   : > { %v2275_v22 = vpop.f32.mrf.mxu2 }
 0x23f   : > { %v2314_v58 = vadd.f32 %v2275_v22, %v2199_v50  ;;  %v2163_v6 = vpop.f32.mrf.mxu1  ;;  %v2395_v19 = vpop.f32.mrf.mxu3 }
 0x240   : > { %v2200_v42 = vadd.f32 %v2163_v6, %v4334_v21  ;;  %v2513_v62 = vpop.f32.mrf.mxu0 }
 0x241   : > { %v2429_v55 = vadd.f32 %v2390_v54, %v2314_v58 }
 0x242   : > { %3517 = vmatmul.msk.bf16.gmra.mxu1 %vm197_vm0, %v2579_v46 }
 0x243   : > { %3529 = vmatmul.msk.bf16.gmra.mxu2 %vm197_vm0, %v2694_v47  ;;  %v4429_v8 = vadd.f32 %v2505_v31, %v2429_v55  ;;  %3554 = vmatmul.msk.bf16.gmra.mxu0 %vm197_vm0, %v2925_v23  ;;  %v2920_v31 = vld [vmem:[%s3651_s25 + $0x80] sm:$0xff] }
 0x244   : > { %3542 = vmatmul.msk.bf16.gmra.mxu3 %vm197_vm0, %v2810_v34  ;;  %v2926_v0 = vpack.c.bf16 %v2920_v31, %v2920_v31 }
 0x246   : > { %v2278_v33 = vpop.f32.mrf.mxu2 }
 0x247   : > { %v2315_v21 = vadd.f32 %v2278_v33, %v2200_v42  ;;  %v2165_v20 = vpop.f32.mrf.mxu1  ;;  %v2398_v44 = vpop.f32.mrf.mxu3 }
 0x248   : > { %v2201_v53 = vadd.f32 %v2165_v20, %v4346_v11  ;;  %v2515_v24 = vpop.f32.mrf.mxu0 }
 0x249   : > { %v2430_v14 = vadd.f32 %v2393_v32, %v2315_v21 }
 0x24b   : > { %v4434_v59 = vadd.f32 %v2508_v26, %v2430_v14 }
 0x24e   : > { %v2280_v17 = vpop.f32.mrf.mxu2 }
 0x24f   : > { %v2316_v1 = vadd.f32 %v2280_v17, %v2201_v53  ;;  %v2168_v51 = vpop.f32.mrf.mxu1  ;;  %v2400_v15 = vpop.f32.mrf.mxu3 }
 0x250   : > { %v2202_v61 = vadd.f32 %v2168_v51, %v4352_v41  ;;  %v2518_v57 = vpop.f32.mrf.mxu0 }
 0x251   : > { %v2431_v11 = vadd.f32 %v2395_v19, %v2316_v1 }
 0x252   : > { %3518 = vmatmul.msk.bf16.gmra.mxu1 %vm197_vm0, %v2580_v43 }
 0x253   : > { %3530 = vmatmul.msk.bf16.gmra.mxu2 %vm197_vm0, %v2695_v2  ;;  %v4445_v48 = vadd.f32 %v2510_v9, %v2431_v11  ;;  %3555 = vmatmul.msk.bf16.gmra.mxu0 %vm197_vm0, %v2926_v0 }
 0x254   : > { %3543 = vmatmul.msk.bf16.gmra.mxu3 %vm197_vm0, %v2811_v7 }
 0x256   : > { %v2283_v49 = vpop.f32.mrf.mxu2 }
 0x257   : > { %v2317_v28 = vadd.f32 %v2283_v49, %v2202_v61  ;;  %v2170_v16 = vpop.f32.mrf.mxu1  ;;  %v2403_v41 = vpop.f32.mrf.mxu3 }
 0x258   : > { %v2203_v54 = vadd.f32 %v2170_v16, %v4363_v35  ;;  %v2520_v3 = vpop.f32.mrf.mxu0 }
 0x259   : > { %v2432_v5 = vadd.f32 %v2398_v44, %v2317_v28 }
 0x25b   : > { %v4451_v26 = vadd.f32 %v2513_v62, %v2432_v5  ;;  %v4474_v5 = vld [vmem:[%s4540_s2] ss:$0 sm:$0xff] }
 0x25e   : > { %v2285_v56 = vpop.f32.mrf.mxu2 }
 0x25f   : > { %v2318_v32 = vadd.f32 %v2285_v56, %v2203_v54  ;;  %v2173_v50 = vpop.f32.mrf.mxu1  ;;  %v2405_v9 = vpop.f32.mrf.mxu3 }
 0x260   : > { %v2204_v10 = vadd.f32 %v2173_v50, %v4368_v40  ;;  %v2523_v52 = vpop.f32.mrf.mxu0 }
 0x261   : > { %v2433_v29 = vadd.f32 %v2400_v15, %v2318_v32 }
 0x262   : > { %3519 = vmatmul.msk.bf16.gmra.mxu1 %vm197_vm0, %v2581_v27 }
 0x263   : > { %3531 = vmatmul.msk.bf16.gmra.mxu2 %vm197_vm0, %v2696_v37  ;;  %v4457_v35 = vadd.f32 %v2515_v24, %v2433_v29 }
 0x266   : > { %v2288_v4 = vpop.f32.mrf.mxu2 }
 0x267   : > { %v2319_v22 = vadd.f32 %v2288_v4, %v2204_v10  ;;  %v2175_v46 = vpop.f32.mrf.mxu1  ;;  %v2408_v30 = vpop.f32.mrf.mxu3 }
 0x268   : > { %v2205_v39 = vadd.f32 %v2175_v46, %v4381_v45  ;;  %v2525_v6 = vpop.f32.mrf.mxu0 }
 0x269   : > { %v2434_v58 = vadd.f32 %v2403_v41, %v2319_v22 }
 0x26b   : > { %v4460_v47 = vadd.f32 %v2518_v57, %v2434_v58 }
 0x26e   : > { %v2290_v19 = vpop.f32.mrf.mxu2 }
 0x26f   : > { %v2320_v40 = vadd.f32 %v2290_v19, %v2205_v39  ;;  %v2178_v42 = vpop.f32.mrf.mxu1  ;;  %v2410_v34 = vpop.f32.mrf.mxu3 }
 0x270   : > { %v2206_v55 = vadd.f32 %v2178_v42, %v4386_v12  ;;  %v2528_v62 = vpop.f32.mrf.mxu0 }
 0x271   : > { %v2435_v23 = vadd.f32 %v2405_v9, %v2320_v40 }
 0x273   : > { %v4463_v33 = vadd.f32 %v2520_v3, %v2435_v23 }
 0x276   : > { %v2293_v21 = vpop.f32.mrf.mxu2 }
 0x277   : > { %v2321_v20 = vadd.f32 %v2293_v21, %v2206_v55  ;;  %v2180_v44 = vpop.f32.mrf.mxu1  ;;  %v2413_v53 = vpop.f32.mrf.mxu3 }
 0x278   : > { %v2207_v45 = vadd.f32 %v2180_v44, %v4398_v18  ;;  %v2530_v24 = vpop.f32.mrf.mxu0 }
 0x279   : > { %v2436_v14 = vadd.f32 %v2408_v30, %v2321_v20 }
 0x27b   : > { %v4466_v13 = vadd.f32 %v2523_v52, %v2436_v14 }
 0x27e   : > { %v2295_v36 = vpop.f32.mrf.mxu2 }
 0x27f   : > { %v2322_v60 = vadd.f32 %v2295_v36, %v2207_v45  ;;  %v2183_v17 = vpop.f32.mrf.mxu1  ;;  %v2415_v43 = vpop.f32.mrf.mxu3 }
 0x280   : > { %v2963_v12 = vpop.f32.mrf.mxu0 }
 0x281   : > { %v2437_v31 = vadd.f32 %v2410_v34, %v2322_v60 }
 0x283   : > { %v4468_v1 = vadd.f32 %v2525_v6, %v2437_v31 }
 0x286   : > { %v2298_v51 = vpop.f32.mrf.mxu2 }
 0x287   : > { %v2185_v2 = vpop.f32.mrf.mxu1  ;;  %v2848_v15 = vpop.f32.mrf.mxu3 }
 0x288   : > { %v2965_v61 = vpop.f32.mrf.mxu0 }
 0x28e   : > { %v2300_v7 = vpop.f32.mrf.mxu2 }
 0x28f   : > { %v2618_v11 = vpop.f32.mrf.mxu1  ;;  %v2850_v0 = vpop.f32.mrf.mxu3 }
 0x290   : > { %v2968_v18 = vpop.f32.mrf.mxu0  ;;  %v2658_v57 = vadd.f32 %v2618_v11, %v4416_v38 }
 0x296   : > { %v2733_v49 = vpop.f32.mrf.mxu2 }
 0x297   : > { %v2773_v28 = vadd.f32 %v2733_v49, %v2658_v57  ;;  %v2620_v16 = vpop.f32.mrf.mxu1  ;;  %v2853_v41 = vpop.f32.mrf.mxu3 }
 0x298   : > { %v2970_v3 = vpop.f32.mrf.mxu0  ;;  %v2659_v63 = vadd.f32 %v2620_v16, %v4429_v8 }
 0x299   : > { %v2888_v54 = vadd.f32 %v2848_v15, %v2773_v28 }
 0x29b   : > { %v3003_v25 = vadd.f32 %v2963_v12, %v2888_v54 }
 0x29d   : > { %v3040_v56 = vadd.f32 %v4474_v5, %v3003_v25 }
 0x29e   : > { %v2735_v27 = vpop.f32.mrf.mxu2 }
 0x29f   : > { %v2774_v32 = vadd.f32 %v2735_v27, %v2659_v63  ;;  %v2623_v50 = vpop.f32.mrf.mxu1  ;;  %v3051_v38 = vmax.f32 %v3040_v56, 0.0  ;;  %v2855_v37 = vpop.f32.mrf.mxu3 }
 0x2a0   : > { %v2973_v10 = vpop.f32.mrf.mxu0  ;;  %v2660_v52 = vadd.f32 %v2623_v50, %v4434_v59 }
 0x2a1   : > { %v2889_v9 = vadd.f32 %v2850_v0, %v2774_v32  ;;  %3062 = vst [vmem:[#allocation2] sm:$0xff] %v3051_v38 }
 0x2a3   : > { %v3004_v29 = vadd.f32 %v2965_v61, %v2889_v9 }
 0x2a5   : > { %v3041_v4 = vadd.f32 %v4474_v5, %v3004_v29 }
 0x2a6   : > { %v2738_v22 = vpop.f32.mrf.mxu2 }
 0x2a7   : > { %v2775_v46 = vadd.f32 %v2738_v22, %v2660_v52  ;;  %v2625_v30 = vpop.f32.mrf.mxu1  ;;  %v3052_v39 = vmax.f32 %v3041_v4, 0.0  ;;  %v2858_v8 = vpop.f32.mrf.mxu3 }
 0x2a8   : > { %v2975_v6 = vpop.f32.mrf.mxu0  ;;  %v2661_v40 = vadd.f32 %v2625_v30, %v4445_v48 }
 0x2a9   : > { %v2890_v58 = vadd.f32 %v2853_v41, %v2775_v46  ;;  %3063 = vst [vmem:[#allocation2 + $0x8] sm:$0xff] %v3052_v39 }
 0x2ab   : > { %v3005_v19 = vadd.f32 %v2968_v18, %v2890_v58 }
 0x2ad   : > { %v3042_v42 = vadd.f32 %v4474_v5, %v3005_v19 }
 0x2ae   : > { %v2740_v34 = vpop.f32.mrf.mxu2 }
 0x2af   : > { %v2776_v55 = vadd.f32 %v2740_v34, %v2661_v40  ;;  %v2628_v23 = vpop.f32.mrf.mxu1  ;;  %v3053_v62 = vmax.f32 %v3042_v42, 0.0  ;;  %v2860_v59 = vpop.f32.mrf.mxu3 }
 0x2b0   : > { %v3080_v21 = vld [vmem:[#allocation2 + $0x1] sm:$0xff]  ;;  %v4482_v44 = vpop.f32.mrf.mxu0  ;;  %v2662_v14 = vadd.f32 %v2628_v23, %v4451_v26 }
 0x2b1   : > { %v2891_v20 = vadd.f32 %v2855_v37, %v2776_v55  ;;  %3064 = vst [vmem:[#allocation2 + $0x10] sm:$0xff] %v3053_v62  ;;  %v3087_v53 = vmax.f32 %v3051_v38, %v3080_v21  ;;  %v3094_v36 = vld [vmem:[#allocation2 + $0x2] sm:$0xff] }
 0x2b3   : > { %v3006_v45 = vadd.f32 %v2970_v3, %v2891_v20  ;;  %v3101_v60 = vmax.f32 %v3087_v53, %v3094_v36 }
 0x2b5   : > { %v3043_v24 = vadd.f32 %v4474_v5, %v3006_v45 }
 0x2b6   : > { %v2743_v48 = vpop.f32.mrf.mxu2 }
 0x2b7   : > { %v2777_v17 = vadd.f32 %v2743_v48, %v2662_v14  ;;  %v2630_v43 = vpop.f32.mrf.mxu1  ;;  %v4486_v31 = vmax.f32 %v3043_v24, 0.0  ;;  %v2863_v12 = vpop.f32.mrf.mxu3 }
 0x2b8   : > { %v3081_v51 = vld [vmem:[#allocation2 + $0x9] sm:$0xff]  ;;  %v4489_v7 = vpop.f32.mrf.mxu0  ;;  %v2663_v57 = vadd.f32 %v2630_v43, %v4457_v35 }
 0x2b9   : > { %v3108_v2 = vld [vmem:[#allocation2 + $0xb] sm:$0xff]  ;;  %v2892_v61 = vadd.f32 %v2858_v8, %v2777_v17  ;;  %3065 = vst [vmem:[#allocation2 + $0x18] sm:$0xff] %v4486_v31  ;;  %v3088_v11 = vmax.f32 %v3052_v39, %v3081_v51 }
 0x2ba   : > { %v3115_v15 = vmax.f32 %v3101_v60, %v3108_v2  ;;  %v3122_v26 = vld [vmem:[#allocation2 + $0xc] sm:$0xff] }
 0x2bb   : > { %v3007_v0 = vadd.f32 %v2973_v10, %v2892_v61  ;;  %v3095_v28 = vld [vmem:[#allocation2 + $0xa] sm:$0xff] }
 0x2bc   : > { %v3129_v18 = vmax.f32 %v3115_v15, %v3122_v26  ;;  %v3102_v41 = vmax.f32 %v3088_v11, %v3095_v28  ;;  %v3136_v54 = vld [vmem:[#allocation2 + $0xd] sm:$0xff] }
 0x2bd   : > { %v3044_v49 = vadd.f32 %v4474_v5, %v3007_v0 }
 0x2be   : > { %v2745_v16 = vpop.f32.mrf.mxu2  ;;  %v3143_v27 = vmax.f32 %v3129_v18, %v3136_v54 }
 0x2bf   : > { %v2778_v3 = vadd.f32 %v2745_v16, %v2663_v57  ;;  %v2633_v25 = vpop.f32.mrf.mxu1  ;;  %v4493_v63 = vmax.f32 %v3044_v49, 0.0  ;;  %v2865_v56 = vpop.f32.mrf.mxu3 }
 0x2c0   : > { %v3082_v32 = vld [vmem:[#allocation2 + $0x11] sm:$0xff]  ;;  %v4497_v10 = vpop.f32.mrf.mxu0  ;;  %v2664_v39 = vadd.f32 %v2633_v25, %v4460_v47 }
 0x2c1   : > { %v3109_v50 = vld [vmem:[#allocation2 + $0x13] sm:$0xff]  ;;  %v2893_v9 = vadd.f32 %v2860_v59, %v2778_v3  ;;  %3066 = vst [vmem:[#allocation2 + $0x20] sm:$0xff] %v4493_v63  ;;  %v3089_v29 = vmax.f32 %v3053_v62, %v3082_v32 }
 0x2c2   : > { %v3116_v38 = vmax.f32 %v3102_v41, %v3109_v50  ;;  %v3150_v37 = vld [vmem:[#allocation2 + $0x16] sm:$0xff] }
 0x2c3   : > { %v3157_v35 = vmax.f32 %v3143_v27, %v3150_v37  ;;  %v3123_v52 = vld [vmem:[#allocation2 + $0x14] sm:$0xff]  ;;  %v3008_v22 = vadd.f32 %v2975_v6, %v2893_v9 }
 0x2c4   : > { %v3164_v4 = vld [vmem:[#allocation2 + $0x17] sm:$0xff]  ;;  %v3130_v46 = vmax.f32 %v3116_v38, %v3123_v52 }
 0x2c5   : > { %v3171_v30 = vmax.f32 %v3157_v35, %v3164_v4  ;;  %v3045_v8 = vadd.f32 %v4474_v5, %v3008_v22  ;;  %v3096_v58 = vld [vmem:[#allocation2 + $0x12] sm:$0xff] }
 0x2c6   : > { %v2748_v40 = vpop.f32.mrf.mxu2  ;;  %v3103_v42 = vmax.f32 %v3089_v29, %v3096_v58  ;;  %v3137_v34 = vld [vmem:[#allocation2 + $0x15] sm:$0xff] }
 0x2c7   : > { %v3182_v19 = vmax.f32 %v3171_v30, %v4486_v31  ;;  %v2779_v55 = vadd.f32 %v2748_v40, %v2664_v39  ;;  %v2635_v6 = vpop.f32.mrf.mxu1  ;;  %v4507_v23 = vmax.f32 %v3045_v8, 0.0  ;;  %v2868_v62 = vpop.f32.mrf.mxu3  ;;  %v3144_v59 = vmax.f32 %v3130_v46, %v3137_v34 }
 0x2c8   : > { %v3083_v21 = vld [vmem:[#allocation2 + $0x19] sm:$0xff]  ;;  %v4511_v24 = vpop.f32.mrf.mxu0  ;;  %v2665_v2 = vadd.f32 %v2635_v6, %v4463_v33 }
 0x2c9   : > { %3189 = vst [vmem:[%s4502_s23] sm:$0xff] %v3182_v19  ;;  %v3110_v20 = vld [vmem:[#allocation2 + $0x1b] sm:$0xff]  ;;  %v2894_v47 = vadd.f32 %v2863_v12, %v2779_v55  ;;  %v3090_v36 = vmax.f32 %v4486_v31, %v3083_v21 }
 0x2ca   : > { %v3117_v53 = vmax.f32 %v3103_v42, %v3110_v20  ;;  %v3151_v45 = vld [vmem:[#allocation2 + $0x1e] sm:$0xff]  ;;  %3067 = vst [vmem:[#allocation2 + $0x28] sm:$0xff] %v4507_v23 }
 0x2cb   : > { %v3158_v14 = vmax.f32 %v3144_v59, %v3151_v45  ;;  %v3124_v48 = vld [vmem:[#allocation2 + $0x1c] sm:$0xff]  ;;  %v3009_v17 = vadd.f32 %v4482_v44, %v2894_v47 }
 0x2cc   : > { %v3165_v60 = vld [vmem:[#allocation2 + $0x1f] sm:$0xff]  ;;  %v3131_v43 = vmax.f32 %v3117_v53, %v3124_v48 }
 0x2cd   : > { %v3172_v51 = vmax.f32 %v3158_v14, %v3165_v60  ;;  %v3046_v15 = vadd.f32 %v4474_v5, %v3009_v17  ;;  %v3097_v61 = vld [vmem:[#allocation2 + $0x1a] sm:$0xff] }
 0x2ce   : > { %v2750_v11 = vpop.f32.mrf.mxu2  ;;  %v3104_v26 = vmax.f32 %v3090_v36, %v3097_v61  ;;  %v3138_v0 = vld [vmem:[#allocation2 + $0x1d] sm:$0xff] }
 0x2cf   : > { %v3183_v12 = vmax.f32 %v3172_v51, %v4493_v63  ;;  %v2780_v18 = vadd.f32 %v2750_v11, %v2665_v2  ;;  %v2638_v57 = vpop.f32.mrf.mxu1  ;;  %v3057_v31 = vmax.f32 %v3046_v15, 0.0  ;;  %v2870_v49 = vpop.f32.mrf.mxu3  ;;  %v3145_v28 = vmax.f32 %v3131_v43, %v3138_v0 }
 0x2d0   : > { %v2988_v25 = vpop.f32.mrf.mxu0  ;;  %v2666_v35 = vadd.f32 %v2638_v57, %v4466_v13 }
 0x2d1   : > { %3190 = vst [vmem:[%s4502_s23 + $0x8] sm:$0xff] %v3183_v12  ;;  %v3111_v16 = vld [vmem:[#allocation2 + $0x23] sm:$0xff]  ;;  %v2895_v3 = vadd.f32 %v2865_v56, %v2780_v18 }
 0x2d2   : > { %v3084_v44 = vld [vmem:[#allocation2 + $0x21] sm:$0xff]  ;;  %v3118_v41 = vmax.f32 %v3104_v26, %v3111_v16  ;;  %3068 = vst [vmem:[#allocation2 + $0x30] sm:$0xff] %v3057_v31 }
 0x2d3   : > { %v3152_v54 = vld [vmem:[#allocation2 + $0x26] sm:$0xff]  ;;  %v3010_v32 = vadd.f32 %v4489_v7, %v2895_v3  ;;  %v3091_v50 = vmax.f32 %v4493_v63, %v3084_v44 }
 0x2d4   : > { %v3159_v33 = vmax.f32 %v3145_v28, %v3152_v54  ;;  %v3166_v27 = vld [vmem:[#allocation2 + $0x27] sm:$0xff] }
 0x2d5   : > { %v3125_v38 = vld [vmem:[#allocation2 + $0x24] sm:$0xff]  ;;  %v3047_v29 = vadd.f32 %v4474_v5, %v3010_v32 }
 0x2d6   : > { %v3173_v37 = vmax.f32 %v3159_v33, %v3166_v27  ;;  %v3132_v9 = vmax.f32 %v3118_v41, %v3125_v38  ;;  %v2753_v4 = vpop.f32.mrf.mxu2  ;;  %v3098_v56 = vld [vmem:[#allocation2 + $0x22] sm:$0xff] }
 0x2d7   : > { %v2781_v22 = vadd.f32 %v2753_v4, %v2666_v35  ;;  %v2640_v46 = vpop.f32.mrf.mxu1  ;;  %v3058_v30 = vmax.f32 %v3047_v29, 0.0  ;;  %v2873_v39 = vpop.f32.mrf.mxu3  ;;  %v3105_v8 = vmax.f32 %v3091_v50, %v3098_v56  ;;  %v3139_v7 = vld [vmem:[#allocation2 + $0x25] sm:$0xff] }
 0x2d8   : > { %v3184_v52 = vmax.f32 %v3173_v37, %v4507_v23  ;;  %v3146_v63 = vmax.f32 %v3132_v9, %v3139_v7  ;;  %v2990_v34 = vpop.f32.mrf.mxu0  ;;  %v2667_v47 = vadd.f32 %v2640_v46, %v4468_v1 }
 0x2d9   : > { %v3085_v58 = vld [vmem:[#allocation2 + $0x29] sm:$0xff]  ;;  %v2896_v40 = vadd.f32 %v2868_v62, %v2781_v22  ;;  %3069 = vst [vmem:[#allocation2 + $0x38] sm:$0xff] %v3058_v30  ;;  %v3086_v0 = vld [vmem:[#allocation2 + $0x31] sm:$0x7f] }
 0x2da   : > { %3191 = vst [vmem:[%s4502_s23 + $0x10] sm:$0xff] %v3184_v52  ;;  %v3112_v19 = vld [vmem:[#allocation2 + $0x2b] sm:$0xff]  ;;  %v3092_v55 = vmax.f32 %v4507_v23, %v3085_v58 }
 0x2db   : > { %v3119_v42 = vmax.f32 %v3105_v8, %v3112_v19  ;;  %v3153_v13 = vld [vmem:[#allocation2 + $0x2e] sm:$0xff]  ;;  %v3011_v21 = vadd.f32 %v4497_v10, %v2896_v40 }
 0x2dc   : > { %v3126_v6 = vld [vmem:[#allocation2 + $0x2c] sm:$0xff]  ;;  %v3160_v59 = vmax.f32 %v3146_v63, %v3153_v13 }
 0x2dd   : > { %v3133_v20 = vmax.f32 %v3119_v42, %v3126_v6  ;;  %v3167_v53 = vld [vmem:[#allocation2 + $0x2f] sm:$0xff]  ;;  %v3048_v14 = vadd.f32 %v4474_v5, %v3011_v21 }
 0x2de   : > { %v3174_v45 = vmax.f32 %v3160_v59, %v3167_v53  ;;  %v3099_v36 = vld [vmem:[#allocation2 + $0x2a] sm:$0xff]  ;;  %v2755_v62 = vpop.f32.mrf.mxu2 }
 0x2df   : > { %v3106_v48 = vmax.f32 %v3092_v55, %v3099_v36  ;;  %v3140_v60 = vld [vmem:[#allocation2 + $0x2d] sm:$0xff]  ;;  %v2782_v43 = vadd.f32 %v2755_v62, %v2667_v47  ;;  %v2643_v51 = vpop.f32.mrf.mxu1  ;;  %v3059_v23 = vmax.f32 %v3048_v14, 0.0  ;;  %v2875_v2 = vpop.f32.mrf.mxu3 }
 0x2e0   : > { %v3185_v17 = vmax.f32 %v3174_v45, %v3057_v31  ;;  %v3147_v15 = vmax.f32 %v3133_v20, %v3140_v60  ;;  %v3113_v61 = vld [vmem:[#allocation2 + $0x33] sm:$0xff] }
 0x2e1   : > { %v3120_v10 = vmax.f32 %v3106_v48, %v3113_v61  ;;  %v3154_v12 = vld [vmem:[#allocation2 + $0x36] sm:$0xff]  ;;  %v2897_v11 = vadd.f32 %v2870_v49, %v2782_v43  ;;  %3070 = vst [vmem:[#allocation2 + $0x40] sm:$0xff] %v3059_v23 }
 0x2e2   : > { %3192 = vst [vmem:[%s4502_s23 + $0x18] sm:$0xff] %v3185_v17  ;;  %v3161_v26 = vmax.f32 %v3147_v15, %v3154_v12  ;;  %v3079_v1 = vld [vmem:[#allocation2 + $0x30] sm:$0x7f]  ;;  %v3168_v18 = vld [vmem:[#allocation2 + $0x37] sm:$0xff] }
 0x2e3   : > { %v3012_v57 = vadd.f32 %v4511_v24, %v2897_v11  ;;  %v3127_v28 = vld [vmem:[#allocation2 + $0x34] sm:$0xff]  ;;  %v3093_v54 = vmax.f32 %v3079_v1, %v3086_v0 }
 0x2e4   : > { %v3175_v31 = vmax.f32 %v3161_v26, %v3168_v18  ;;  %v3100_v16 = vld [vmem:[#allocation2 + $0x32] sm:$0x7f]  ;;  %v3134_v44 = vmax.f32 %v3120_v10, %v3127_v28 }
 0x2e5   : > { %v3049_v41 = vadd.f32 %v4474_v5, %v3012_v57  ;;  %v3107_v49 = vmax.f32 %v3093_v54, %v3100_v16  ;;  %v3141_v32 = vld [vmem:[#allocation2 + $0x35] sm:$0xff] }
 0x2e6   : > { %v3186_v3 = vmax.f32 %v3175_v31, %v3058_v30  ;;  %v2758_v33 = vpop.f32.mrf.mxu2  ;;  %v3148_v50 = vmax.f32 %v3134_v44, %v3141_v32 }
 0x2e7   : > { %v2645_v25 = vpop.f32.mrf.mxu1  ;;  %v3060_v27 = vmax.f32 %v3049_v41, 0.0 }
 0x2e8   : > { %3193 = vst [vmem:[%s4502_s23 + $0x20] sm:$0xff] %v3186_v3  ;;  %v3114_v38 = vld [vmem:[#allocation2 + $0x3b] sm:$0x7f] }
 0x2e9   : > { %v3121_v37 = vmax.f32 %v3107_v49, %v3114_v38  ;;  %v3155_v9 = vld [vmem:[#allocation2 + $0x3e] sm:$0xff]  ;;  %3071 = vst [vmem:[#allocation2 + $0x48] sm:$0xff] %v3060_v27 }
 0x2ea   : > { %v3128_v24 = vld [vmem:[#allocation2 + $0x3c] sm:$0x7f]  ;;  %v3162_v35 = vmax.f32 %v3148_v50, %v3155_v9 }
 0x2eb   : > { %v3135_v29 = vmax.f32 %v3121_v37, %v3128_v24  ;;  %v3169_v52 = vld [vmem:[#allocation2 + $0x3f] sm:$0xff] }
 0x2ec   : > { %v3176_v5 = vmax.f32 %v3162_v35, %v3169_v52  ;;  %v3142_v56 = vld [vmem:[#allocation2 + $0x3d] sm:$0x7f] }
 0x2ed   : > { %v3149_v46 = vmax.f32 %v3135_v29, %v3142_v56 }
 0x2ee   : > { %v2760_v4 = vpop.f32.mrf.mxu2  ;;  %v3187_v22 = vmax.f32 %v3176_v5, %v3059_v23 }
 0x2f0   : > { %3194 = vst [vmem:[%s4502_s23 + $0x28] sm:$0xff] %v3187_v22  ;;  %v3156_v30 = vld [vmem:[#allocation2 + $0x46] sm:$0x7f] }
 0x2f1   : > { %v3163_v39 = vmax.f32 %v3149_v46, %v3156_v30  ;;  %v3170_v8 = vld [vmem:[#allocation2 + $0x47] sm:$0x7f] }
 0x2f2   : > { %v3181_v58 = vld [vmem:[#allocation2 + $0x48] sm:$0x7f] }
 0x2f3   : > { %v3177_v7 = vmax.f32 %v3163_v39, %v3170_v8 }
 0x2f5   : > { %v3188_v63 = vmax.f32 %v3177_v7, %v3181_v58 }
 0x2f7   : > { %3195 = vst [vmem:[%s4502_s23 + $0x30] sm:$0x7f] %v3188_v63 }
 0x2f8 PF: > { %s13_s12 = sadd.s32 1, %s3603_s12  }
 0x2f9   : > { %p10_p4 = scmp.ge.s32.totalorder %s13_s12, 4  }
 0x2fb   :  { %12 = sbr.rel (!%p10_p4) target bundleno = 1 (0x1), region = 86 }

// kernel: image_features_forward.10
= control target key start
LH: loop header
LB: loop body
LE: loop exit
PB: predicated region body
PF: predicated region fallthrough
CT: control target
= control target key end

     0   :  { %s935_s12 = smov 0   ;;  %s1059_s0 = inlined_call_operand.vmem [shape: f32[2,35,32], index: 0, kind: input, shape index: {}]   ;;  %s1060_s1 = inlined_call_operand.vmem [shape: bf16[9,32,128], index: 1, kind: input, shape index: {}]   ;;  %s1061_s2 = inlined_call_operand.vmem [shape: f32[1,128], index: 2, kind: input, shape index: {}]   ;;  %s1062_s3 = inlined_call_operand.vmem [shape: f32[2,5,128], index: 3, kind: output, shape index: {}]  }
   0x1 LB: > { %s746_s13 = sadd.s32 4294967295, %s913_s12   ;;  %p750_p0 = scmp.ge.s32.totalorder %s913_s12, 1  ;;  %s913_s12 = sphi %s935_s12, %s13_s12  }
   0x2   : > { %p137_p1 = scmp.lt.s32.totalorder %s913_s12, 3 }
   0x4   : > { %p138_p2 = pnand %p750_p0, %p137_p1 }
   0x5   : > { %p160_p3 = scmp.lt.s32.totalorder (!%p138_p2), %s746_s13, 1 }
   0x6   : > { %141 = sbr.rel (%p138_p2) target bundleno = 272 (0x110), region = 32 }
   0xb   : > { %v878_v0 = vld [vmem:[%s1060_s1 + $0x8] sm:$0xff]  ;;  %v877_v2 = vld [vmem:[%s1060_s1] sm:$0xff]  ;;  %s1064_s13 = smov (!%p160_p3, %s746_s13), 1  ;;  %v884_v3 = vld [vmem:[%s1060_s1 + $0x38] sm:$0xff]  ;;  %vm191_vm0 = vcmask 261120  }
   0xc   : > { %v882_v1 = vld [vmem:[%s1060_s1 + $0x28] sm:$0xff]  ;;  %204 = vmatpush.bf16.msra.mxu0 %v878_v0  ;;  %895 = vmatpush.bf16.msra.mxu1 %v878_v0  ;;  %v880_v4 = vld [vmem:[%s1060_s1 + $0x18] sm:$0xff]  ;;  %v881_v5 = vld [vmem:[%s1060_s1 + $0x20] sm:$0xff]  ;;  %s897_s26 = smul.u32 40, %s1064_s13  ;;  %s752_s4 = sshll.u32 %s1064_s13, 3 }
   0xd   : > { %308 = vmatpush.bf16.msra.mxu2 %v882_v1  ;;  %363 = vmatpush.bf16.msra.mxu3 %v884_v3  ;;  %v883_v6 = vld [vmem:[%s1060_s1 + $0x30] sm:$0xff]  ;;  %v890_v7 = vld [vmem:[%s1060_s1 + $0x68] sm:$0xff]  ;;  %v888_v17 = vld [vmem:[%s1060_s1 + $0x58] sm:$0xff]  ;;  %s168_s7 = scalar_lea.vmem %s1062_s3, %s752_s4 }
   0xe   : > { %v886_v8 = vld [vmem:[%s1060_s1 + $0x48] sm:$0xff]  ;;  %s976_s8 = scalar_lea.vmem %s1059_s0, %s897_s26  ;;  %v879_v9 = vld [vmem:[%s1060_s1 + $0x10] sm:$0xff]  ;;  %v885_v21 = vld [vmem:[%s1060_s1 + $0x40] sm:$0xff] }
   0xf   : > { %v170_v10 = vld [vmem:[%s976_s8] sm:$0xff]  ;;  %v171_v11 = vld [vmem:[%s976_s8 + $0x8] sm:$0xff]  ;;  %v172_v12 = vld [vmem:[%s976_s8 + $0x10] sm:$0xf] }
  0x10   : > { %205 = vmatpush.bf16.msra.mxu0 %v877_v2  ;;  %896 = vmatpush.bf16.msra.mxu1 %v877_v2  ;;  %v173_v13 = vpack.c.bf16 %v171_v11, %v170_v10  ;;  %v174_v14 = vpack.c.bf16 %v172_v12, %v172_v12  ;;  %v274_v15 = vld [vmem:[%s976_s8 + $0x2] sm:$0xff]  ;;  %v275_v16 = vld [vmem:[%s976_s8 + $0xa] sm:$0xff]  ;;  %v892_v23 = vld [vmem:[%s1060_s1 + $0x78] sm:$0xff] }
  0x11   : > { %309 = vmatpush.bf16.msra.mxu2 %v881_v5  ;;  %364 = vmatpush.bf16.msra.mxu3 %v883_v6  ;;  %v277_v18 = vpack.c.bf16 %v275_v16, %v274_v15  ;;  %v329_v19 = vld [vmem:[%s976_s8 + $0x5] sm:$0xff]  ;;  %v330_v20 = vld [vmem:[%s976_s8 + $0xd] sm:$0xff]  ;;  %v331_v32 = vld [vmem:[%s976_s8 + $0x15] sm:$0xf] }
  0x12   : > { %v332_v22 = vpack.c.bf16 %v330_v20, %v329_v19  ;;  %v887_v24 = vld [vmem:[%s1060_s1 + $0x50] sm:$0xff]  ;;  %v889_v25 = vld [vmem:[%s1060_s1 + $0x60] sm:$0xff]  ;;  %v894_v36 = vld [vmem:[%s1060_s1 + $0x88] sm:$0xff]  ;;  %v333_v37 = vpack.c.bf16 %v331_v32, %v331_v32 }
  0x13   : > { %761 = vmatmul.msk.bf16.vlgmr.msra.gmra.mxu0 %vm191_vm0, %v173_v13  ;;  %762 = vmatmul.msk.bf16.vlgmr.msra.gmra.mxu1 %vm191_vm0, %v174_v14  ;;  %v219_v26 = vld [vmem:[%s976_s8 + $0x1] sm:$0xff]  ;;  %v220_v27 = vld [vmem:[%s976_s8 + $0x9] sm:$0xff]  ;;  %v276_v31 = vld [vmem:[%s976_s8 + $0x12] sm:$0xf] }
  0x14   : > { %253 = vmatpush.bf16.msrb.mxu1 %v880_v4  ;;  %418 = vmatpush.bf16.msrb.mxu0 %v886_v8  ;;  %v384_v28 = vld [vmem:[%s976_s8 + $0x6] sm:$0xff]  ;;  %v385_v29 = vld [vmem:[%s976_s8 + $0xe] sm:$0xff]  ;;  %v222_v33 = vpack.c.bf16 %v220_v27, %v219_v26  ;;  %v278_v35 = vpack.c.bf16 %v276_v31, %v276_v31  ;;  %v386_v40 = vld [vmem:[%s976_s8 + $0x16] sm:$0xf] }
  0x15   : > { %528 = vmatpush.bf16.msrb.mxu2 %v890_v7  ;;  %803 = vmatmul.msk.bf16.vlgmr.msra.gmra.mxu3 %vm191_vm0, %v332_v22  ;;  %v891_v30 = vld [vmem:[%s1060_s1 + $0x70] sm:$0xff]  ;;  %v387_v34 = vpack.c.bf16 %v385_v29, %v384_v28  ;;  %v893_v38 = vld [vmem:[%s1060_s1 + $0x80] sm:$0xff]  ;;  %v388_v45 = vpack.c.bf16 %v386_v40, %v386_v40  ;;  %v496_v52 = vld [vmem:[%s976_s8 + $0x1a] sm:$0xf] }
  0x16   : > { %789 = vmatmul.msk.bf16.vlgmr.msra.gmra.mxu2 %vm191_vm0, %v277_v18  ;;  %583 = vmatpush.bf16.msrb.mxu3 %v892_v23  ;;  %v221_v39 = vld [vmem:[%s976_s8 + $0x11] sm:$0xf]  ;;  %v439_v48 = vld [vmem:[%s976_s8 + $0x7] sm:$0xff]  ;;  %v551_v53 = vld [vmem:[%s976_s8 + $0x1b] sm:$0xf]  ;;  %v498_v56 = vpack.c.bf16 %v496_v52, %v496_v52 }
  0x17   : > { %v495_v41 = vld [vmem:[%s976_s8 + $0x12] sm:$0xff]  ;;  %v223_v44 = vpack.c.bf16 %v221_v39, %v221_v39  ;;  %v553_v57 = vpack.c.bf16 %v551_v53, %v551_v53  ;;  %v606_v59 = vld [vmem:[%s976_s8 + $0x1c] sm:$0xf]  ;;  %v906_v40 = vld [vmem:[%s1061_s2] ss:$0 sm:$0xff] }
  0x18   : > { %254 = vmatpush.bf16.msrb.mxu1 %v879_v9  ;;  %419 = vmatpush.bf16.msrb.mxu0 %v885_v21  ;;  %v549_v42 = vld [vmem:[%s976_s8 + $0xb] sm:$0xff]  ;;  %v550_v43 = vld [vmem:[%s976_s8 + $0x13] sm:$0xff]  ;;  %v497_v46 = vpack.c.bf16 %v495_v41, %v275_v16  ;;  %v608_v61 = vpack.c.bf16 %v606_v59, %v606_v59 }
  0x19   : > { %529 = vmatpush.bf16.msrb.mxu2 %v889_v25  ;;  %v552_v47 = vpack.c.bf16 %v550_v43, %v549_v42  ;;  %v440_v49 = vld [vmem:[%s976_s8 + $0xf] sm:$0xff]  ;;  %v441_v58 = vld [vmem:[%s976_s8 + $0x17] sm:$0xf] }
  0x1a   : > { %584 = vmatpush.bf16.msrb.mxu3 %v891_v30  ;;  %v604_v50 = vld [vmem:[%s976_s8 + $0xc] sm:$0xff]  ;;  %v605_v51 = vld [vmem:[%s976_s8 + $0x14] sm:$0xff]  ;;  %v442_v54 = vpack.c.bf16 %v440_v49, %v439_v48  ;;  %v443_v60 = vpack.c.bf16 %v441_v58, %v441_v58 }
  0x1b   : > { %v607_v55 = vpack.c.bf16 %v605_v51, %v604_v50 }
  0x1c   : > { %473 = vmatpush.bf16.msra.mxu1 %v888_v17  ;;  %638 = vmatpush.bf16.msra.mxu0 %v894_v36 }
  0x20   : > { %474 = vmatpush.bf16.msra.mxu1 %v887_v24  ;;  %639 = vmatpush.bf16.msra.mxu0 %v893_v38 }
  0x23   : > { %775 = vmatmul.msk.bf16.vlgmr.msrb.gmra.mxu1 %vm191_vm0, %v222_v33  ;;  %817 = vmatmul.msk.bf16.vlgmr.msrb.gmra.mxu0 %vm191_vm0, %v387_v34 }
  0x25   : > { %804 = vmatmul.msk.bf16.gmra.mxu3 %vm191_vm0, %v333_v37 }
  0x26   : > { %790 = vmatmul.msk.bf16.gmra.mxu2 %vm191_vm0, %v278_v35 }
  0x33   : > { %776 = vmatmul.msk.bf16.gmra.mxu1 %vm191_vm0, %v223_v44  ;;  %818 = vmatmul.msk.bf16.gmra.mxu0 %vm191_vm0, %v388_v45 }
  0x35   : > { %859 = vmatmul.msk.bf16.vlgmr.msrb.gmra.mxu3 %vm191_vm0, %v552_v47 }
  0x36   : > { %845 = vmatmul.msk.bf16.vlgmr.msrb.gmra.mxu2 %vm191_vm0, %v497_v46 }
  0x43   : > { %831 = vmatmul.msk.bf16.vlgmr.msra.gmra.mxu1 %vm191_vm0, %v442_v54  ;;  %873 = vmatmul.msk.bf16.vlgmr.msra.gmra.mxu0 %vm191_vm0, %v607_v55 }
  0x45   : > { %860 = vmatmul.msk.bf16.gmra.mxu3 %vm191_vm0, %v553_v57 }
  0x46   : > { %846 = vmatmul.msk.bf16.gmra.mxu2 %vm191_vm0, %v498_v56 }
  0x53   : > { %832 = vmatmul.msk.bf16.gmra.mxu1 %vm191_vm0, %v443_v60  ;;  %874 = vmatmul.msk.bf16.gmra.mxu0 %vm191_vm0, %v608_v61 }
  0x90   : > { %v207_v62 = vpop.f32.mrf.mxu0  ;;  %v212_v63 = vpop.f32.mrf.mxu1 }
  0x91   : > { %218 = vst [vmem:[#allocation2 + $0x10] sm:$0xf] %v212_v63 }
  0x98   : > { %v209_v1 = vpop.f32.mrf.mxu0  ;;  %v214_v2 = vpop.f32.mrf.mxu1  ;;  %v267_v14 = vld [vmem:[#allocation2 + $0x10] sm:$0xf] }
  0x99   : > { %v311_v0 = vpop.f32.mrf.mxu2  ;;  %v366_v3 = vpop.f32.mrf.mxu3 }
  0xa0   : > { %v256_v5 = vpop.f32.mrf.mxu1  ;;  %v421_v6 = vpop.f32.mrf.mxu0 }
  0xa1   : > { %v313_v4 = vpop.f32.mrf.mxu2  ;;  %v368_v7 = vpop.f32.mrf.mxu3  ;;  %v268_v18 = vadd.f32 %v256_v5, %v207_v62 }
  0xa3   : > { %v323_v19 = vadd.f32 %v311_v0, %v268_v18 }
  0xa5   : > { %v378_v26 = vadd.f32 %v366_v3, %v323_v19 }
  0xa7   : > { %v433_v29 = vadd.f32 %v421_v6, %v378_v26 }
  0xa8   : > { %v258_v9 = vpop.f32.mrf.mxu1  ;;  %v423_v10 = vpop.f32.mrf.mxu0 }
  0xa9   : > { %v316_v8 = vpop.f32.mrf.mxu2  ;;  %v371_v11 = vpop.f32.mrf.mxu3  ;;  %v269_v25 = vadd.f32 %v258_v9, %v209_v1 }
  0xab   : > { %v324_v28 = vadd.f32 %v313_v4, %v269_v25 }
  0xad   : > { %v379_v35 = vadd.f32 %v368_v7, %v324_v28 }
  0xaf   : > { %v434_v41 = vadd.f32 %v423_v10, %v379_v35 }
  0xb0   : > { %v261_v13 = vpop.f32.mrf.mxu1  ;;  %v426_v15 = vpop.f32.mrf.mxu0 }
  0xb1   : > { %v318_v12 = vpop.f32.mrf.mxu2  ;;  %v270_v16 = vadd.f32 %v267_v14, %v261_v13  ;;  %v373_v17 = vpop.f32.mrf.mxu3 }
  0xb3   : > { %273 = vst [vmem:[#allocation2 + $0x10] sm:$0xf] %v270_v16 }
  0xb8   : > { %v263_v21 = vpop.f32.mrf.mxu1  ;;  %v428_v22 = vpop.f32.mrf.mxu0 }
  0xb9   : > { %v531_v20 = vpop.f32.mrf.mxu2  ;;  %v586_v23 = vpop.f32.mrf.mxu3 }
  0xba   : > { %v322_v24 = vld [vmem:[#allocation2 + $0x10] sm:$0xf] }
  0xbb   : > { %v325_v27 = vadd.f32 %v322_v24, %v316_v8 }
  0xbd   : > { %328 = vst [vmem:[#allocation2 + $0x10] sm:$0xf] %v325_v27 }
  0xc0   : > { %v476_v31 = vpop.f32.mrf.mxu1  ;;  %v641_v32 = vpop.f32.mrf.mxu0 }
  0xc1   : > { %v533_v30 = vpop.f32.mrf.mxu2  ;;  %v488_v33 = vadd.f32 %v476_v31, %v433_v29  ;;  %v588_v34 = vpop.f32.mrf.mxu3 }
  0xc3   : > { %v543_v36 = vadd.f32 %v531_v20, %v488_v33 }
  0xc4   : > { %v377_v37 = vld [vmem:[#allocation2 + $0x10] sm:$0xf] }
  0xc5   : > { %v380_v38 = vadd.f32 %v377_v37, %v371_v11  ;;  %v598_v39 = vadd.f32 %v586_v23, %v543_v36 }
  0xc7   : > { %383 = vst [vmem:[#allocation2 + $0x10] sm:$0xf] %v380_v38  ;;  %v653_v43 = vadd.f32 %v641_v32, %v598_v39 }
  0xc8   : > { %v478_v44 = vpop.f32.mrf.mxu1  ;;  %v643_v45 = vpop.f32.mrf.mxu0 }
  0xc9   : > { %v536_v42 = vpop.f32.mrf.mxu2  ;;  %v489_v46 = vadd.f32 %v478_v44, %v434_v41  ;;  %v666_v47 = vadd.f32 %v906_v40, %v653_v43  ;;  %v591_v48 = vpop.f32.mrf.mxu3 }
  0xcb   : > { %v544_v49 = vadd.f32 %v533_v30, %v489_v46  ;;  %v669_v50 = vmax.f32 %v666_v47, 0.0 }
  0xcd   : > { %v599_v51 = vadd.f32 %v588_v34, %v544_v49  ;;  %672 = vst [vmem:[#allocation2] sm:$0xff] %v669_v50 }
  0xce   : > { %v432_v52 = vld [vmem:[#allocation2 + $0x10] sm:$0xf] }
  0xcf   : > { %v435_v53 = vadd.f32 %v432_v52, %v426_v15  ;;  %v654_v55 = vadd.f32 %v643_v45, %v599_v51 }
  0xd0   : > { %v481_v56 = vpop.f32.mrf.mxu1  ;;  %v646_v57 = vpop.f32.mrf.mxu0 }
  0xd1   : > { %v538_v54 = vpop.f32.mrf.mxu2  ;;  %438 = vst [vmem:[#allocation2 + $0x10] sm:$0xf] %v435_v53  ;;  %v667_v58 = vadd.f32 %v906_v40, %v654_v55  ;;  %v593_v59 = vpop.f32.mrf.mxu3 }
  0xd3   : > { %v670_v60 = vmax.f32 %v667_v58, 0.0 }
  0xd4   : > { %v675_v5 = vld [vmem:[#allocation2] sm:$0x1f] }
  0xd5   : > { %673 = vst [vmem:[#allocation2 + $0x8] sm:$0xff] %v670_v60  ;;  %v676_v6 = vld [vmem:[#allocation2 + $0x1] sm:$0x1f] }
  0xd6   : > { %v677_v7 = vmax.f32 %v675_v5, %v676_v6  ;;  %v678_v10 = vld [vmem:[#allocation2 + $0x2] sm:$0x1f] }
  0xd8   : > { %v487_v61 = vld [vmem:[#allocation2 + $0x10] sm:$0xf]  ;;  %v483_v62 = vpop.f32.mrf.mxu1  ;;  %v648_v63 = vpop.f32.mrf.mxu0  ;;  %v679_v12 = vmax.f32 %v677_v7, %v678_v10 }
  0xd9   : > { %v490_v0 = vadd.f32 %v487_v61, %v481_v56 }
  0xdb   : > { %493 = vst [vmem:[#allocation2 + $0x10] sm:$0xf] %v490_v0 }
  0xdc   : > { %v680_v11 = vld [vmem:[#allocation2 + $0x5] sm:$0x1f]  ;;  %v686_v21 = vld [vmem:[#allocation2 + $0xa] sm:$0x1f] }
  0xdd   : > { %v681_v13 = vmax.f32 %v679_v12, %v680_v11  ;;  %v682_v14 = vld [vmem:[#allocation2 + $0x6] sm:$0x1f]  ;;  %v688_v23 = vld [vmem:[#allocation2 + $0xb] sm:$0x1f] }
  0xde   : > { %v684_v18 = vld [vmem:[#allocation2 + $0x7] sm:$0x1f] }
  0xdf   : > { %v683_v15 = vmax.f32 %v681_v13, %v682_v14 }
  0xe1   : > { %v685_v19 = vmax.f32 %v683_v15, %v684_v18 }
  0xe2   : > { %v542_v1 = vld [vmem:[#allocation2 + $0x10] sm:$0xf] }
  0xe3   : > { %v545_v2 = vadd.f32 %v542_v1, %v536_v42  ;;  %v687_v22 = vmax.f32 %v685_v19, %v686_v21 }
  0xe5   : > { %548 = vst [vmem:[#allocation2 + $0x10] sm:$0xf] %v545_v2  ;;  %v689_v24 = vmax.f32 %v687_v22, %v688_v23 }
  0xec   : > { %v597_v3 = vld [vmem:[#allocation2 + $0x10] sm:$0xf] }
  0xed   : > { %v600_v4 = vadd.f32 %v597_v3, %v591_v48 }
  0xef   : > { %603 = vst [vmem:[#allocation2 + $0x10] sm:$0xf] %v600_v4 }
  0xf6   : > { %v652_v8 = vld [vmem:[#allocation2 + $0x10] sm:$0xf] }
  0xf7   : > { %v655_v9 = vadd.f32 %v652_v8, %v646_v57 }
  0xf9   : > { %658 = vst [vmem:[#allocation2 + $0x10] sm:$0xf] %v655_v9 }
 0x100   : > { %v661_v16 = vld [vmem:[#allocation2 + $0x10] sm:$0xf] }
 0x101   : > { %v668_v17 = vadd.f32 %v906_v40, %v661_v16 }
 0x103   : > { %v671_v20 = vmax.f32 %v668_v17, 0.0 }
 0x105   : > { %674 = vst [vmem:[#allocation2 + $0x10] sm:$0xf] %v671_v20 }
 0x10c   : > { %v690_v25 = vld [vmem:[#allocation2 + $0xc] sm:$0x1f] }
 0x10d   : > { %v691_v26 = vmax.f32 %v689_v24, %v690_v25 }
 0x10f   : > { %692 = vst [vmem:[%s168_s7] sm:$0x1f] %v691_v26 }
 0x110 PF: > { %s13_s12 = sadd.s32 1, %s913_s12  }
 0x111   : > { %p10_p4 = scmp.ge.s32.totalorder %s13_s12, 4  }
 0x113   :  { %12 = sbr.rel (!%p10_p4) target bundleno = 1 (0x1), region = 70 }

// kernel: image_features_forward.11
= control target key start
LH: loop header
LB: loop body
LE: loop exit
PB: predicated region body
PF: predicated region fallthrough
CT: control target
= control target key end

     0   :  { %s384_s0 = inlined_call_operand.vmem [shape: f32[2,32], index: 0, kind: input, shape index: {}]   ;;  %s385_s1 = inlined_call_operand.vmem [shape: bf16[32,128], index: 1, kind: input, shape index: {}]   ;;  %s386_s2 = inlined_call_operand.vmem [shape: f32[1,128], index: 2, kind: input, shape index: {}]   ;;  %s387_s3 = inlined_call_operand.vmem [shape: f32[1,128], index: 3, kind: input, shape index: {}]   ;;  %s388_s4 = inlined_call_operand.vmem [shape: f32[1,128], index: 4, kind: input, shape index: {}]   ;;  %s389_s5 = inlined_call_operand.vmem [shape: bf16[128,128], index: 5, kind: input, shape index: {}]   ;;  %s390_s6 = inlined_call_operand.vmem [shape: f32[1,128], index: 6, kind: input, shape index: {}]   ;;  %s391_s7 = inlined_call_operand.hbm [shape: f32[2,128], index: 7, kind: output, shape index: {}]  }
   0x1   :  { %v253_v0 = vld [vmem:[%s385_s1 + $0x8] sm:$0xff]  ;;  %v252_v1 = vld [vmem:[%s385_s1] sm:$0xff] }
   0x2   :  { %v28_v2 = vld [vmem:[%s384_s0] sm:$0x3]  ;;  %60 = vmatpush.bf16.msra.mxu0 %v253_v0 }
   0x3   :  { %12 = vsyncpa [#allocation3], 0  ;;  %v29_v3 = vpack.c.bf16 %v28_v2, %v28_v2  ;;  %vm50_vm0 = vcmask 261120   ;;  %v261_v4 = vld [vmem:[%s389_s5 + $0x38] sm:$0xff]  ;;  %v260_v5 = vld [vmem:[%s389_s5 + $0x30] sm:$0xff]  ;;  %vm68_vm1 = vcmask 1041408  }
   0x4   :  { %181 = vmatpush.bf16.msra.mxu1 %v261_v4  ;;  %v259_v6 = vld [vmem:[%s389_s5 + $0x28] sm:$0xff]  ;;  %v263_v7 = vld [vmem:[%s386_s2] ss:$0 sm:$0xff]  ;;  %v257_v12 = vld [vmem:[%s389_s5 + $0x18] sm:$0xff]  ;;  %s295_s27 = smov [#allocation2]  }
   0x5   :  { %v258_v8 = vld [vmem:[%s389_s5 + $0x20] sm:$0xff]  ;;  %v256_v17 = vld [vmem:[%s389_s5 + $0x10] sm:$0xff]  ;;  %v255_v23 = vld [vmem:[%s389_s5 + $0x8] sm:$0xff]  ;;  %s200_s28 = sshll.u32 %s295_s27, 4  ;;  %s201_s28 = int_to_ptr.vmem [resolvable:$true] %s200_s28 }
   0x6   :  { %61 = vmatpush.bf16.msra.mxu0 %v252_v1  ;;  %v254_v28 = vld [vmem:[%s389_s5] sm:$0xff] }
   0x7   :  { %v264_v45 = vld [vmem:[%s387_s3] ss:$0 sm:$0xff]  ;;  %s202_s3 = sshll.u32 %s391_s7, 4  ;;  %s203_s3 = int_to_ptr.hbm [resolvable:$true] %s202_s3 }
   0x8   :  { %182 = vmatpush.bf16.msra.mxu1 %v260_v5  ;;  %v265_v48 = vld [vmem:[%s388_s4] ss:$0 sm:$0xff] }
   0x9   :  { %219 = vmatmul.msk.bf16.vlgmr.msra.gmra.mxu0 %vm50_vm0, %v29_v3  ;;  %v266_v52 = vld [vmem:[%s390_s6] ss:$0 sm:$0xff] }
   0xc   :  { %183 = vmatpush.bf16.msra.mxu1 %v259_v6 }
  0x10   :  { %184 = vmatpush.bf16.msra.mxu1 %v258_v8 }
  0x14   :  { %185 = vmatpush.bf16.msra.mxu1 %v257_v12 }
  0x18   :  { %186 = vmatpush.bf16.msra.mxu1 %v256_v17 }
  0x1c   :  { %187 = vmatpush.bf16.msra.mxu1 %v255_v23 }
  0x20   :  { %188 = vmatpush.bf16.msra.mxu1 %v254_v28 }
  0x86   :  { %v63_v9 = vpop.f32.mrf.mxu0 }
  0x87   :  { %v64_v10 = vadd.f32 %v263_v7, %v63_v9 }
  0x89   :  { %v67_v11 = vmax.f32 %v64_v10, 0.0 }
  0x8b   :  { %v69_v13 = vsel %vm68_vm1, %v67_v11, 0.0  ;;  %v77_v14 = vmul.f32 %v67_v11, %v67_v11 }
  0x8c   :  { %v70_v15 = vrot.slane %v69_v13, 4 }
  0x8d   :  { %v78_v16 = vsel %vm68_vm1, %v77_v14, 0.0 }
  0x8e   :  { %v71_v18 = vadd.f32 %v70_v15, %v69_v13  ;;  %v79_v19 = vrot.slane %v78_v16, 4  ;;  %v65_v20 = vpop.f32.mrf.mxu0 }
  0x90   :  { %v72_v21 = vrot.slane %v71_v18, 2  ;;  %v80_v22 = vadd.f32 %v79_v19, %v78_v16 }
  0x92   :  { %v73_v24 = vadd.f32 %v72_v21, %v71_v18  ;;  %v81_v25 = vrot.slane %v80_v22, 2 }
  0x94   :  { %v74_v26 = vrot.slane %v73_v24, 1  ;;  %v82_v27 = vadd.f32 %v81_v25, %v80_v22 }
  0x96   :  { %v75_v29 = vadd.f32 %v74_v26, %v73_v24  ;;  %v83_v30 = vrot.slane %v82_v27, 1 }
  0x98   :  { %v76_v31 = vmul.f32 0.5, %v75_v29  ;;  %v84_v32 = vadd.f32 %v83_v30, %v82_v27 }
  0x9a   :  { %v85_v33 = vmul.f32 0.5, %v84_v32  ;;  %v86_v34 = vmul.f32 %v76_v31, %v76_v31  ;;  %v89_v44 = vsub.f32 %v67_v11, %v76_v31 }
  0x9c   :  { %v87_v35 = vsub.f32 %v85_v33, %v86_v34 }
  0x9e   :  { %v88_v36 = vmax.f32 %v87_v35, 0.0 }
  0xa0   :  { %v90_v37 = vadd.f32 1e-05, %v88_v36 }
  0xa2   :  { %267 = vrsqrt.f32 %v90_v37  ;;  %vm97_vm3 = vweird.f32 %v90_v37 }
  0xa8   :  { %v268_v38 = vpop.eup %267 }
  0xa9   :  { %v92_v39 = vmul.f32 %v268_v38, %v90_v37  ;;  %vm98_vm2 = vweird.f32 %v268_v38 }
  0xaa   :  { %vm99_vm4 = vmor %vm97_vm3, %vm98_vm2 }
  0xab   :  { %v93_v40 = vmul.f32 %v268_v38, %v92_v39 }
  0xad   :  { %v94_v41 = vmul.f32 0.5, %v93_v40 }
  0xaf   :  { %v95_v42 = vsub.f32 1.5, %v94_v41 }
  0xb1   :  { %v96_v43 = vmul.f32 %v268_v38, %v95_v42 }
  0xb3   :  { %v100_v46 = vsel %vm99_vm4, %v268_v38, %v96_v43 }
  0xb4   :  { %v101_v47 = vmul.f32 %v100_v46, %v89_v44 }
  0xb6   :  { %v106_v49 = vmul.f32 %v264_v45, %v101_v47 }
  0xb8   :  { %v111_v50 = vadd.f32 %v265_v48, %v106_v49 }
  0xba   :  { %v112_v51 = vpack.c.bf16 %v111_v50, %v111_v50 }
  0xbc   :  { %189 = vmatmul.bf16.vlgmr.msra.gmra.mxu1 %v112_v51 }
 0x139   :  { %v190_v53 = vpop.f32.mrf.mxu1 }
 0x13a   :  { %v191_v54 = vadd.f32 %v266_v52, %v190_v53 }
 0x13c   :  { %194 = vst [vmem:[#allocation2] sm:$0x3] %v191_v54 }
 0x13d   :  { %205 = dma.vmem_to_hbm [thread:$0]  %s201_s28, 32, %s203_s3, [#allocation3]  }
 0x141   :  { %v192_v55 = vpop.f32.mrf.mxu1 }
 0x142   :  { %293 = dma.done.wait [#allocation3], 32  }
 0x143   :  { %294 = vsyncadd [#allocation3], 4294967264 }
 0x144   :  { %210 = vsyncpa [#allocation3], 1 }

</bundles_post_ra>
